<compile_context>
chip_gen: v6e
topology: v6e:2x2x1
jax: 0.10.0
libtpu: 0.0.40
codegen_flags: <defaults>
</compile_context>

<pallas_src>
import functools

import jax
import jax.numpy as jnp
from jax import lax
from jax.experimental import pallas as pl
from jax.experimental.pallas import tpu as pltpu


def _layernorm_f32(x, gamma, beta, eps=1e-5):
    xf = x.astype(jnp.float32)
    mu = jnp.mean(xf, axis=-1, keepdims=True)
    var = jnp.mean(jnp.square(xf - mu), axis=-1, keepdims=True)
    return ((xf - mu) * lax.rsqrt(var + eps) * gamma.astype(jnp.float32)
            + beta.astype(jnp.float32))


def _erf_poly(x):
    # Abramowitz & Stegun 7.1.26, |err| < 1.5e-7.  Keeps nn.GELU (erf) parity
    # using only mul/add/exp/where (VALU + EUP) - no reliance on an erf lowering.
    ax = jnp.abs(x)
    t = 1.0 / (1.0 + 0.3275911 * ax)
    poly = t * (0.254829592 + t * (-0.284496736 + t * (1.421413741
                + t * (-1.453152027 + t * 1.061405429))))
    y = 1.0 - poly * jnp.exp(-ax * ax)
    return jnp.where(x < 0, -y, y)


def _gelu_erf(x):
    # nn.GELU default (erf).  If the MLP region shows VALU saturation, use
    # jax.nn.gelu(x, approximate=True) instead (tanh runs on the EUP slot).
    return 0.5 * x * (1.0 + _erf_poly(x * 0.7071067811865476))


def block_kernel(x_ref, y_ref,
                 g1_ref, be1_ref,
                 wq_ref, wkv_ref, wp_ref, bp_ref,
                 g2_ref, be2_ref,
                 w1_ref, b1_ref, w2_ref, b2_ref,
                 out_ref,
                 attn_scr,
                 *, num_heads, scale):
    TB, N, C = x_ref.shape
    hd = C // num_heads
    rows = TB * N

    # Flatten (TB, N, C) -> (TB*N, C): all linear layers see a tall MXU slab.
    x2 = x_ref[...].reshape(rows, C)
    y2 = y_ref[...].reshape(rows, C)

    g1 = g1_ref[...]
    be1 = be1_ref[...]
    xn = _layernorm_f32(x2, g1, be1)                 # f32 (rows, C)
    yn = _layernorm_f32(y2, g1, be1)

    wq = wq_ref[...]
    wkv = wkv_ref[...]
    mm_dt = wq.dtype                                 # matmul input dtype (bf16/f32)

    # Q projection + fused K/V projection, f32 accumulation on the MXU.
    q = jnp.dot(xn.astype(mm_dt), wq, preferred_element_type=jnp.float32)
    kv = jnp.dot(yn.astype(mm_dt), wkv, preferred_element_type=jnp.float32)

    # Fold the softmax scale into q (rows*C mults, not per-head rows*N*N).
    q_mm = (q * scale).astype(mm_dt).reshape(TB, N, C)
    k_mm = kv[:, :C].astype(mm_dt).reshape(TB, N, C)     # lane-aligned split
    v_mm = kv[:, C:].astype(mm_dt).reshape(TB, N, C)

    # Multi-head cross-attention.  Static head loop; both matmuls run in mm_dt
    # (bf16) with f32 accumulation, batched over the TB dim (single leading
    # batch dim -> validated Mosaic pattern).  Softmax stats stay f32.
    for h in range(num_heads):
        sl = slice(h * hd, (h + 1) * hd)
        qh = q_mm[:, :, sl]                          # (TB, N, hd)
        kh = k_mm[:, :, sl]
        vh = v_mm[:, :, sl]
        s = lax.dot_general(qh, kh, (((2,), (2,)), ((0,), (0,))),
                            preferred_element_type=jnp.float32)   # (TB, N, N)
        s = s - jnp.max(s, axis=-1, keepdims=True)
        p = jnp.exp(s)
        denom = jnp.sum(p, axis=-1, keepdims=True)
        p = (p * pl.reciprocal(denom, approx=True)).astype(mm_dt)
        oh = lax.dot_general(p, vh, (((2,), (1,)), ((0,), (0,))),
                             preferred_element_type=jnp.float32)  # (TB, N, hd)
        attn_scr[:, :, sl] = oh.astype(attn_scr.dtype)

    # Output projection (with bias) + first residual.
    a2 = attn_scr[...].reshape(rows, C)              # already mm_dt
    proj = jnp.dot(a2, wp_ref[...], preferred_element_type=jnp.float32) \
        + bp_ref[...].astype(jnp.float32)
    x1 = x2.astype(jnp.float32) + proj

    # norm2 + MLP (fc1 -> exact erf GELU -> fc2) + second residual.
    # TODO(synk): for ViT-L scale C on v7x, keep w1/w2 in HBM and pipeline
    # the MLP over Hm chunks (pltpu.emit_pipeline) instead of VMEM-resident.
    x1n = _layernorm_f32(x1, g2_ref[...], be2_ref[...])
    h1 = jnp.dot(x1n.astype(w1_ref.dtype), w1_ref[...],
                 preferred_element_type=jnp.float32) \
        + b1_ref[...].astype(jnp.float32)
    h1 = _gelu_erf(h1)
    mlp = jnp.dot(h1.astype(w2_ref.dtype), w2_ref[...],
                  preferred_element_type=jnp.float32) \
        + b2_ref[...].astype(jnp.float32)

    out_ref[...] = (x1 + mlp).reshape(TB, N, C).astype(out_ref.dtype)


def _pick_batch_tile(B, N, row_target, min_grid=2):
    """Largest TB dividing B with TB*N ~ row_target MXU rows, keeping the grid
    >= min_grid steps so both v7x TensorCores get work."""
    tb_cap = max(1, B // min_grid)
    tb = max(1, min(tb_cap, row_target // max(N, 1)))
    while B % tb != 0:
        tb -= 1
    return tb


def _vmem_limit_bytes(TB, N, C, Hm, act_itemsize, w_itemsize, out_itemsize,
                      single_buffer_weights):
    nbuf_w = 1 if single_buffer_weights else 2
    rows = TB * N
    est = 0
    est += 2 * 2 * rows * C * act_itemsize                    # x, y (double-buffered)
    est += 2 * rows * C * out_itemsize                        # out (double-buffered)
    est += nbuf_w * w_itemsize * (4 * C * C + 2 * C * Hm)     # wq + wkv + wp + w1 + w2
    est += nbuf_w * 4 * (6 * C + Hm)                          # LN / bias vectors (f32)
    est += rows * C * w_itemsize                              # attention scratch
    est += 4 * (7 * rows * C + TB * N * N + rows * Hm)        # f32 temporaries (rough)
    limit = int(est * 1.5) + (16 << 20)                       # generous headroom
    try:
        phys = pltpu.get_tpu_info().vmem_capacity_bytes       # 128 MiB v5e/v6e, 64 MiB v7x
    except Exception:
        phys = 128 << 20
    return int(max(32 << 20, min(limit, phys * 3 // 4)))


def block_forward(x, y, params, *, num_heads, batch_tile=None, row_target=256,
                  min_grid=2, single_buffer_weights=False):
    B, N, C = x.shape
    assert y.shape == (B, N, C)
    assert C % num_heads == 0
    # Lane-dense writeback: avoid masked vst.msk partial stores.
    assert C % 128 == 0, "C must be a multiple of 128 for lane-dense stores"
    Hm = params["w1"].shape[1]                 # MLP hidden dim
    hd = C // num_heads
    scale = hd ** (-0.5)
    w_dtype = params["wq"].dtype

    TB = batch_tile if batch_tile is not None else _pick_batch_tile(
        B, N, row_target, min_grid)
    assert B % TB == 0
    grid = (B // TB,)

    kern = functools.partial(block_kernel, num_heads=num_heads, scale=scale)

    def const_spec(shape):
        zeros = (0,) * len(shape)
        if single_buffer_weights:
            # v7x: constant-index weights only need one VMEM buffer.
            return pl.BlockSpec(shape, lambda b: zeros, pipeline_mode=pl.Buffered(1))
        return pl.BlockSpec(shape, lambda b: zeros)

    act_spec = pl.BlockSpec((TB, N, C), lambda b: (b, 0, 0))

    in_specs = [
        act_spec,                                   # x
        act_spec,                                   # y
        const_spec((1, C)), const_spec((1, C)),     # norm1 gamma / beta
        const_spec((C, C)),                         # Wq
        const_spec((C, 2 * C)),                     # Wkv (fused K/V)
        const_spec((C, C)), const_spec((1, C)),     # Wproj, bproj
        const_spec((1, C)), const_spec((1, C)),     # norm2 gamma / beta
        const_spec((C, Hm)), const_spec((1, Hm)),   # W1, b1
        const_spec((Hm, C)), const_spec((1, C)),    # W2, b2
    ]

    act_b = jnp.dtype(x.dtype).itemsize
    w_b = jnp.dtype(w_dtype).itemsize
    out_b = act_b

    # Advisory cost estimate so XLA can schedule around the kernel.
    flops = B * N * (8 * C * C + 4 * N * C + 4 * C * Hm)
    transcendentals = B * N * (num_heads * N + Hm + num_heads)
    bytes_accessed = (act_b * 3 * B * N * C
                      + w_b * (4 * C * C + 2 * C * Hm)
                      + 4 * (6 * C + Hm))

    vmem_limit = _vmem_limit_bytes(TB, N, C, Hm, act_b, w_b, out_b,
                                   single_buffer_weights)

    return pl.pallas_call(
        kern,
        out_shape=jax.ShapeDtypeStruct((B, N, C), x.dtype),
        grid=grid,
        in_specs=in_specs,
        out_specs=act_spec,
        scratch_shapes=[pltpu.VMEM((TB, N, C), w_dtype)],
        compiler_params=pltpu.CompilerParams(
            dimension_semantics=("parallel",),
            vmem_limit_bytes=vmem_limit),
        cost_estimate=pl.CostEstimate(
            flops=int(flops),
            transcendentals=int(transcendentals),
            bytes_accessed=int(bytes_accessed)),
    )(x, y,
      params["g1"], params["be1"],
      params["wq"], params["wkv"], params["wp"], params["bp"],
      params["g2"], params["be2"],
      params["w1"], params["b1"], params["w2"], params["b2"])


def init_params(key, dim, mlp_ratio=4.0, weight_dtype=jnp.bfloat16):
    hidden = int(dim * mlp_ratio)
    ks = jax.random.split(key, 11)
    s = 0.02

    def w(k, shape):
        # bf16 weights: halves HBM/VMEM traffic, native MXU input dtype.
        return (s * jax.random.normal(k, shape, jnp.float32)).astype(weight_dtype)

    return {
        "g1": 1.0 + s * jax.random.normal(ks[0], (1, dim), jnp.float32),
        "be1": s * jax.random.normal(ks[1], (1, dim), jnp.float32),
        "g2": 1.0 + s * jax.random.normal(ks[2], (1, dim), jnp.float32),
        "be2": s * jax.random.normal(ks[3], (1, dim), jnp.float32),
        # All linear weights pre-transposed to (in, out); kv fused to (in, 2*out).
        "wq": w(ks[4], (dim, dim)),
        "wkv": w(ks[5], (dim, 2 * dim)),
        "wp": w(ks[6], (dim, dim)),
        "bp": s * jax.random.normal(ks[7], (1, dim), jnp.float32),
        "w1": w(ks[8], (dim, hidden)),
        "b1": s * jax.random.normal(ks[9], (1, hidden), jnp.float32),
        "w2": w(ks[10], (hidden, dim)),
        "b2": jnp.zeros((1, dim), jnp.float32),
    }


def block_reference(x, y, p, *, num_heads):
    """Pure-JAX f32 reference mirroring the PyTorch Block forward."""
    def ln(t, g, b):
        mu = jnp.mean(t, -1, keepdims=True)
        var = jnp.mean((t - mu) ** 2, -1, keepdims=True)
        return (t - mu) * lax.rsqrt(var + 1e-5) * g + b

    f32 = lambda a: a.astype(jnp.float32)
    B, N, C = x.shape
    hd = C // num_heads
    xn = ln(x, p["g1"], p["be1"])
    yn = ln(y, p["g1"], p["be1"])
    q = (xn @ f32(p["wq"])).reshape(B, N, num_heads, hd).transpose(0, 2, 1, 3)
    kv = yn @ f32(p["wkv"])
    k = kv[..., :C].reshape(B, N, num_heads, hd).transpose(0, 2, 1, 3)
    v = kv[..., C:].reshape(B, N, num_heads, hd).transpose(0, 2, 1, 3)
    a = jnp.einsum("bhnd,bhmd->bhnm", q, k) * (hd ** -0.5)
    a = jax.nn.softmax(a, axis=-1)
    o = jnp.einsum("bhnm,bhmd->bhnd", a, v).transpose(0, 2, 1, 3).reshape(B, N, C)
    x1 = x + (o @ f32(p["wp"]) + p["bp"])
    x1n = ln(x1, p["g2"], p["be2"])
    m = jax.nn.gelu(x1n @ f32(p["w1"]) + p["b1"], approximate=False) @ f32(p["w2"]) \
        + p["b2"]
    return x1 + m


if __name__ == "__main__":
    B, N, C = 4, 64, 128        # C multiple of 128 -> lane-dense output stores
    num_heads = 4

    key = jax.random.PRNGKey(0)
    kx, ky, kp = jax.random.split(key, 3)
    x = jax.random.normal(kx, (B, N, C), jnp.float32)
    y = jax.random.normal(ky, (B, N, C), jnp.float32)
    params = init_params(kp, C, mlp_ratio=4.0, weight_dtype=jnp.bfloat16)

    out = block_forward(x, y, params, num_heads=num_heads)
    jax.block_until_ready(out)
    assert out.shape == (B, N, C)

    ref = block_reference(x, y, params, num_heads=num_heads)
    max_err = float(jnp.max(jnp.abs(out - ref)))
    assert jnp.allclose(out, ref, rtol=2e-2, atol=2e-2), max_err
    print("KERNEL_OK")
</pallas_src>

<mosaic_0001>
module attributes {stable_mosaic.version = 11 : i64} {
  func.func @block_kernel(%arg0: i32, %arg1: memref<2x64x128xf32, #tpu.memory_space<vmem>>, %arg2: memref<2x64x128xf32, #tpu.memory_space<vmem>>, %arg3: memref<1x128xf32, #tpu.memory_space<vmem>>, %arg4: memref<1x128xf32, #tpu.memory_space<vmem>>, %arg5: memref<128x128xbf16, #tpu.memory_space<vmem>>, %arg6: memref<128x256xbf16, #tpu.memory_space<vmem>>, %arg7: memref<128x128xbf16, #tpu.memory_space<vmem>>, %arg8: memref<1x128xf32, #tpu.memory_space<vmem>>, %arg9: memref<1x128xf32, #tpu.memory_space<vmem>>, %arg10: memref<1x128xf32, #tpu.memory_space<vmem>>, %arg11: memref<128x512xbf16, #tpu.memory_space<vmem>>, %arg12: memref<1x512xf32, #tpu.memory_space<vmem>>, %arg13: memref<512x128xbf16, #tpu.memory_space<vmem>>, %arg14: memref<1x128xf32, #tpu.memory_space<vmem>>, %arg15: memref<2x64x128xf32, #tpu.memory_space<vmem>>, %arg16: memref<2x64x128xbf16, #tpu.memory_space<vmem>>) attributes {dimension_semantics = [#tpu.dimension_semantics<parallel>], iteration_bounds = array<i64: 2>, scalar_prefetch = 0 : i64, scratch_operands = 1 : i64, tpu.core_type = #tpu.core_type<tc>, window_params = [{transform_indices = @transform_0, window_bounds = array<i64: 2, 64, 128>}, {transform_indices = @transform_1, window_bounds = array<i64: 2, 64, 128>}, {pipeline_mode = #tpu.pipeline_mode<synchronous>, transform_indices = @transform_2, window_bounds = array<i64: 1, 128>}, {pipeline_mode = #tpu.pipeline_mode<synchronous>, transform_indices = @transform_3, window_bounds = array<i64: 1, 128>}, {pipeline_mode = #tpu.pipeline_mode<synchronous>, transform_indices = @transform_4, window_bounds = array<i64: 128, 128>}, {pipeline_mode = #tpu.pipeline_mode<synchronous>, transform_indices = @transform_5, window_bounds = array<i64: 128, 256>}, {pipeline_mode = #tpu.pipeline_mode<synchronous>, transform_indices = @transform_6, window_bounds = array<i64: 128, 128>}, {pipeline_mode = #tpu.pipeline_mode<synchronous>, transform_indices = @transform_7, window_bounds = array<i64: 1, 128>}, {pipeline_mode = #tpu.pipeline_mode<synchronous>, transform_indices = @transform_8, window_bounds = array<i64: 1, 128>}, {pipeline_mode = #tpu.pipeline_mode<synchronous>, transform_indices = @transform_9, window_bounds = array<i64: 1, 128>}, {pipeline_mode = #tpu.pipeline_mode<synchronous>, transform_indices = @transform_10, window_bounds = array<i64: 128, 512>}, {pipeline_mode = #tpu.pipeline_mode<synchronous>, transform_indices = @transform_11, window_bounds = array<i64: 1, 512>}, {pipeline_mode = #tpu.pipeline_mode<synchronous>, transform_indices = @transform_12, window_bounds = array<i64: 512, 128>}, {pipeline_mode = #tpu.pipeline_mode<synchronous>, transform_indices = @transform_13, window_bounds = array<i64: 1, 128>}, {transform_indices = @transform_14, window_bounds = array<i64: 2, 64, 128>}]} {
    %c0 = arith.constant 0 : index
    %c0_0 = arith.constant 0 : index
    %c0_1 = arith.constant 0 : index
    %0 = vector.load %arg1[%c0, %c0_0, %c0_1] : memref<2x64x128xf32, #tpu.memory_space<vmem>>, vector<2x64x128xf32>
    %1 = vector.shape_cast %0 : vector<2x64x128xf32> to vector<128x128xf32>
    %c0_2 = arith.constant 0 : index
    %c0_3 = arith.constant 0 : index
    %c0_4 = arith.constant 0 : index
    %2 = vector.load %arg2[%c0_2, %c0_3, %c0_4] : memref<2x64x128xf32, #tpu.memory_space<vmem>>, vector<2x64x128xf32>
    %3 = vector.shape_cast %2 : vector<2x64x128xf32> to vector<128x128xf32>
    %c0_5 = arith.constant 0 : index
    %c0_6 = arith.constant 0 : index
    %4 = vector.load %arg3[%c0_5, %c0_6] : memref<1x128xf32, #tpu.memory_space<vmem>>, vector<1x128xf32>
    %c0_7 = arith.constant 0 : index
    %c0_8 = arith.constant 0 : index
    %5 = vector.load %arg4[%c0_7, %c0_8] : memref<1x128xf32, #tpu.memory_space<vmem>>, vector<1x128xf32>
    %cst = arith.constant dense<0.000000e+00> : vector<128xf32>
    %6 = vector.multi_reduction <add>, %1, %cst [1] : vector<128x128xf32> to vector<128xf32>
    %7 = vector.shape_cast %6 : vector<128xf32> to vector<128x1xf32>
    %cst_9 = arith.constant 1.280000e+02 : f32
    %8 = vector.broadcast %cst_9 : f32 to vector<128x1xf32>
    %9 = arith.divf %7, %8 : vector<128x1xf32>
    %10 = vector.broadcast %9 : vector<128x1xf32> to vector<128x128xf32>
    %11 = arith.subf %1, %10 : vector<128x128xf32>
    %12 = arith.mulf %11, %11 : vector<128x128xf32>
    %cst_10 = arith.constant dense<0.000000e+00> : vector<128xf32>
    %13 = vector.multi_reduction <add>, %12, %cst_10 [1] : vector<128x128xf32> to vector<128xf32>
    %14 = vector.shape_cast %13 : vector<128xf32> to vector<128x1xf32>
    %cst_11 = arith.constant 1.280000e+02 : f32
    %15 = vector.broadcast %cst_11 : f32 to vector<128x1xf32>
    %16 = arith.divf %14, %15 : vector<128x1xf32>
    %17 = vector.broadcast %9 : vector<128x1xf32> to vector<128x128xf32>
    %18 = arith.subf %1, %17 : vector<128x128xf32>
    %cst_12 = arith.constant 9.99999974E-6 : f32
    %19 = vector.broadcast %cst_12 : f32 to vector<128x1xf32>
    %20 = arith.addf %16, %19 : vector<128x1xf32>
    %21 = math.rsqrt %20 : vector<128x1xf32>
    %22 = vector.broadcast %21 : vector<128x1xf32> to vector<128x128xf32>
    %23 = arith.mulf %18, %22 : vector<128x128xf32>
    %24 = vector.broadcast %4 : vector<1x128xf32> to vector<128x128xf32>
    %25 = arith.mulf %23, %24 : vector<128x128xf32>
    %26 = vector.broadcast %5 : vector<1x128xf32> to vector<128x128xf32>
    %27 = arith.addf %25, %26 : vector<128x128xf32>
    %cst_13 = arith.constant dense<0.000000e+00> : vector<128xf32>
    %28 = vector.multi_reduction <add>, %3, %cst_13 [1] : vector<128x128xf32> to vector<128xf32>
    %29 = vector.shape_cast %28 : vector<128xf32> to vector<128x1xf32>
    %cst_14 = arith.constant 1.280000e+02 : f32
    %30 = vector.broadcast %cst_14 : f32 to vector<128x1xf32>
    %31 = arith.divf %29, %30 : vector<128x1xf32>
    %32 = vector.broadcast %31 : vector<128x1xf32> to vector<128x128xf32>
    %33 = arith.subf %3, %32 : vector<128x128xf32>
    %34 = arith.mulf %33, %33 : vector<128x128xf32>
    %cst_15 = arith.constant dense<0.000000e+00> : vector<128xf32>
    %35 = vector.multi_reduction <add>, %34, %cst_15 [1] : vector<128x128xf32> to vector<128xf32>
    %36 = vector.shape_cast %35 : vector<128xf32> to vector<128x1xf32>
    %cst_16 = arith.constant 1.280000e+02 : f32
    %37 = vector.broadcast %cst_16 : f32 to vector<128x1xf32>
    %38 = arith.divf %36, %37 : vector<128x1xf32>
    %39 = vector.broadcast %31 : vector<128x1xf32> to vector<128x128xf32>
    %40 = arith.subf %3, %39 : vector<128x128xf32>
    %cst_17 = arith.constant 9.99999974E-6 : f32
    %41 = vector.broadcast %cst_17 : f32 to vector<128x1xf32>
    %42 = arith.addf %38, %41 : vector<128x1xf32>
    %43 = math.rsqrt %42 : vector<128x1xf32>
    %44 = vector.broadcast %43 : vector<128x1xf32> to vector<128x128xf32>
    %45 = arith.mulf %40, %44 : vector<128x128xf32>
    %46 = vector.broadcast %4 : vector<1x128xf32> to vector<128x128xf32>
    %47 = arith.mulf %45, %46 : vector<128x128xf32>
    %48 = vector.broadcast %5 : vector<1x128xf32> to vector<128x128xf32>
    %49 = arith.addf %47, %48 : vector<128x128xf32>
    %c0_18 = arith.constant 0 : index
    %c0_19 = arith.constant 0 : index
    %50 = vector.load %arg5[%c0_18, %c0_19] : memref<128x128xbf16, #tpu.memory_space<vmem>>, vector<128x128xbf16>
    %c0_20 = arith.constant 0 : index
    %c0_21 = arith.constant 0 : index
    %51 = vector.load %arg6[%c0_20, %c0_21] : memref<128x256xbf16, #tpu.memory_space<vmem>>, vector<128x256xbf16>
    %52 = arith.truncf %27 : vector<128x128xf32> to vector<128x128xbf16>
    %cst_22 = arith.constant dense<0.000000e+00> : vector<128x128xf32>
    %53 = tpu.matmul %52, %50, %cst_22 {dimension_numbers = #tpu.dot_dimension_numbers<[1], [0], [0], [1], [0, 0, 1, 1], [], []>} : vector<128x128xbf16>, vector<128x128xbf16>, vector<128x128xf32> -> vector<128x128xf32>
    %54 = arith.truncf %49 : vector<128x128xf32> to vector<128x128xbf16>
    %cst_23 = arith.constant dense<0.000000e+00> : vector<128x256xf32>
    %55 = tpu.matmul %54, %51, %cst_23 {dimension_numbers = #tpu.dot_dimension_numbers<[1], [0], [0], [1], [0, 0, 1, 1], [], []>} : vector<128x128xbf16>, vector<128x256xbf16>, vector<128x256xf32> -> vector<128x256xf32>
    %cst_24 = arith.constant 0.176776692 : f32
    %56 = vector.broadcast %cst_24 : f32 to vector<128x128xf32>
    %57 = arith.mulf %53, %56 : vector<128x128xf32>
    %58 = arith.truncf %57 : vector<128x128xf32> to vector<128x128xbf16>
    %59 = vector.shape_cast %58 : vector<128x128xbf16> to vector<2x64x128xbf16>
    %60 = vector.extract_strided_slice %55 {offsets = [0, 0], sizes = [128, 128], strides = [1, 1]} : vector<128x256xf32> to vector<128x128xf32>
    %61 = arith.truncf %60 : vector<128x128xf32> to vector<128x128xbf16>
    %62 = vector.shape_cast %61 : vector<128x128xbf16> to vector<2x64x128xbf16>
    %63 = vector.extract_strided_slice %55 {offsets = [0, 128], sizes = [128, 128], strides = [1, 1]} : vector<128x256xf32> to vector<128x128xf32>
    %64 = arith.truncf %63 : vector<128x128xf32> to vector<128x128xbf16>
    %65 = vector.shape_cast %64 : vector<128x128xbf16> to vector<2x64x128xbf16>
    %66 = vector.extract_strided_slice %59 {offsets = [0, 0, 0], sizes = [2, 64, 32], strides = [1, 1, 1]} : vector<2x64x128xbf16> to vector<2x64x32xbf16>
    %67 = vector.extract_strided_slice %62 {offsets = [0, 0, 0], sizes = [2, 64, 32], strides = [1, 1, 1]} : vector<2x64x128xbf16> to vector<2x64x32xbf16>
    %68 = vector.extract_strided_slice %65 {offsets = [0, 0, 0], sizes = [2, 64, 32], strides = [1, 1, 1]} : vector<2x64x128xbf16> to vector<2x64x32xbf16>
    %cst_25 = arith.constant dense<0.000000e+00> : vector<2x64x64xf32>
    %69 = tpu.matmul %66, %67, %cst_25 {dimension_numbers = #tpu.dot_dimension_numbers<[2], [2], [1], [1], [0, 0, 0, 1, 1, 1], [0], [0]>} : vector<2x64x32xbf16>, vector<2x64x32xbf16>, vector<2x64x64xf32> -> vector<2x64x64xf32>
    %cst_26 = arith.constant dense<0xFF800000> : vector<2x64xf32>
    %70 = vector.multi_reduction <maximumf>, %69, %cst_26 [2] : vector<2x64x64xf32> to vector<2x64xf32>
    %71 = vector.shape_cast %70 : vector<2x64xf32> to vector<2x64x1xf32>
    %72 = vector.broadcast %71 : vector<2x64x1xf32> to vector<2x64x64xf32>
    %73 = arith.subf %69, %72 : vector<2x64x64xf32>
    %74 = math.exp %73 : vector<2x64x64xf32>
    %cst_27 = arith.constant dense<0.000000e+00> : vector<2x64xf32>
    %75 = vector.multi_reduction <add>, %74, %cst_27 [2] : vector<2x64x64xf32> to vector<2x64xf32>
    %76 = vector.shape_cast %75 : vector<2x64xf32> to vector<2x64x1xf32>
    %77 = tpu.reciprocal %76 {approx = true} : vector<2x64x1xf32> -> vector<2x64x1xf32>
    %78 = vector.broadcast %77 : vector<2x64x1xf32> to vector<2x64x64xf32>
    %79 = arith.mulf %74, %78 : vector<2x64x64xf32>
    %80 = arith.truncf %79 : vector<2x64x64xf32> to vector<2x64x64xbf16>
    %cst_28 = arith.constant dense<0.000000e+00> : vector<2x64x32xf32>
    %81 = tpu.matmul %80, %68, %cst_28 {dimension_numbers = #tpu.dot_dimension_numbers<[2], [1], [1], [2], [0, 0, 0, 1, 1, 2], [0], [0]>} : vector<2x64x64xbf16>, vector<2x64x32xbf16>, vector<2x64x32xf32> -> vector<2x64x32xf32>
    %82 = arith.truncf %81 : vector<2x64x32xf32> to vector<2x64x32xbf16>
    %c0_29 = arith.constant 0 : index
    %c0_30 = arith.constant 0 : index
    %c0_31 = arith.constant 0 : index
    %83 = vector.load %arg16[%c0_29, %c0_30, %c0_31] : memref<2x64x128xbf16, #tpu.memory_space<vmem>>, vector<2x64x32xbf16>
    tpu.vector_store %arg16[%c0_29, %c0_30, %c0_31], %82 {strides = array<i32>} : memref<2x64x128xbf16, #tpu.memory_space<vmem>>, vector<2x64x32xbf16>,
    %84 = vector.extract_strided_slice %59 {offsets = [0, 0, 32], sizes = [2, 64, 32], strides = [1, 1, 1]} : vector<2x64x128xbf16> to vector<2x64x32xbf16>
    %85 = vector.extract_strided_slice %62 {offsets = [0, 0, 32], sizes = [2, 64, 32], strides = [1, 1, 1]} : vector<2x64x128xbf16> to vector<2x64x32xbf16>
    %86 = vector.extract_strided_slice %65 {offsets = [0, 0, 32], sizes = [2, 64, 32], strides = [1, 1, 1]} : vector<2x64x128xbf16> to vector<2x64x32xbf16>
    %cst_32 = arith.constant dense<0.000000e+00> : vector<2x64x64xf32>
    %87 = tpu.matmul %84, %85, %cst_32 {dimension_numbers = #tpu.dot_dimension_numbers<[2], [2], [1], [1], [0, 0, 0, 1, 1, 1], [0], [0]>} : vector<2x64x32xbf16>, vector<2x64x32xbf16>, vector<2x64x64xf32> -> vector<2x64x64xf32>
    %cst_33 = arith.constant dense<0xFF800000> : vector<2x64xf32>
    %88 = vector.multi_reduction <maximumf>, %87, %cst_33 [2] : vector<2x64x64xf32> to vector<2x64xf32>
    %89 = vector.shape_cast %88 : vector<2x64xf32> to vector<2x64x1xf32>
    %90 = vector.broadcast %89 : vector<2x64x1xf32> to vector<2x64x64xf32>
    %91 = arith.subf %87, %90 : vector<2x64x64xf32>
    %92 = math.exp %91 : vector<2x64x64xf32>
    %cst_34 = arith.constant dense<0.000000e+00> : vector<2x64xf32>
    %93 = vector.multi_reduction <add>, %92, %cst_34 [2] : vector<2x64x64xf32> to vector<2x64xf32>
    %94 = vector.shape_cast %93 : vector<2x64xf32> to vector<2x64x1xf32>
    %95 = tpu.reciprocal %94 {approx = true} : vector<2x64x1xf32> -> vector<2x64x1xf32>
    %96 = vector.broadcast %95 : vector<2x64x1xf32> to vector<2x64x64xf32>
    %97 = arith.mulf %92, %96 : vector<2x64x64xf32>
    %98 = arith.truncf %97 : vector<2x64x64xf32> to vector<2x64x64xbf16>
    %cst_35 = arith.constant dense<0.000000e+00> : vector<2x64x32xf32>
    %99 = tpu.matmul %98, %86, %cst_35 {dimension_numbers = #tpu.dot_dimension_numbers<[2], [1], [1], [2], [0, 0, 0, 1, 1, 2], [0], [0]>} : vector<2x64x64xbf16>, vector<2x64x32xbf16>, vector<2x64x32xf32> -> vector<2x64x32xf32>
    %100 = arith.truncf %99 : vector<2x64x32xf32> to vector<2x64x32xbf16>
    %c0_36 = arith.constant 0 : index
    %c0_37 = arith.constant 0 : index
    %c32 = arith.constant 32 : index
    %101 = vector.load %arg16[%c0_36, %c0_37, %c32] : memref<2x64x128xbf16, #tpu.memory_space<vmem>>, vector<2x64x32xbf16>
    tpu.vector_store %arg16[%c0_36, %c0_37, %c32], %100 {strides = array<i32>} : memref<2x64x128xbf16, #tpu.memory_space<vmem>>, vector<2x64x32xbf16>,
    %102 = vector.extract_strided_slice %59 {offsets = [0, 0, 64], sizes = [2, 64, 32], strides = [1, 1, 1]} : vector<2x64x128xbf16> to vector<2x64x32xbf16>
    %103 = vector.extract_strided_slice %62 {offsets = [0, 0, 64], sizes = [2, 64, 32], strides = [1, 1, 1]} : vector<2x64x128xbf16> to vector<2x64x32xbf16>
    %104 = vector.extract_strided_slice %65 {offsets = [0, 0, 64], sizes = [2, 64, 32], strides = [1, 1, 1]} : vector<2x64x128xbf16> to vector<2x64x32xbf16>
    %cst_38 = arith.constant dense<0.000000e+00> : vector<2x64x64xf32>
    %105 = tpu.matmul %102, %103, %cst_38 {dimension_numbers = #tpu.dot_dimension_numbers<[2], [2], [1], [1], [0, 0, 0, 1, 1, 1], [0], [0]>} : vector<2x64x32xbf16>, vector<2x64x32xbf16>, vector<2x64x64xf32> -> vector<2x64x64xf32>
    %cst_39 = arith.constant dense<0xFF800000> : vector<2x64xf32>
    %106 = vector.multi_reduction <maximumf>, %105, %cst_39 [2] : vector<2x64x64xf32> to vector<2x64xf32>
    %107 = vector.shape_cast %106 : vector<2x64xf32> to vector<2x64x1xf32>
    %108 = vector.broadcast %107 : vector<2x64x1xf32> to vector<2x64x64xf32>
    %109 = arith.subf %105, %108 : vector<2x64x64xf32>
    %110 = math.exp %109 : vector<2x64x64xf32>
    %cst_40 = arith.constant dense<0.000000e+00> : vector<2x64xf32>
    %111 = vector.multi_reduction <add>, %110, %cst_40 [2] : vector<2x64x64xf32> to vector<2x64xf32>
    %112 = vector.shape_cast %111 : vector<2x64xf32> to vector<2x64x1xf32>
    %113 = tpu.reciprocal %112 {approx = true} : vector<2x64x1xf32> -> vector<2x64x1xf32>
    %114 = vector.broadcast %113 : vector<2x64x1xf32> to vector<2x64x64xf32>
    %115 = arith.mulf %110, %114 : vector<2x64x64xf32>
    %116 = arith.truncf %115 : vector<2x64x64xf32> to vector<2x64x64xbf16>
    %cst_41 = arith.constant dense<0.000000e+00> : vector<2x64x32xf32>
    %117 = tpu.matmul %116, %104, %cst_41 {dimension_numbers = #tpu.dot_dimension_numbers<[2], [1], [1], [2], [0, 0, 0, 1, 1, 2], [0], [0]>} : vector<2x64x64xbf16>, vector<2x64x32xbf16>, vector<2x64x32xf32> -> vector<2x64x32xf32>
    %118 = arith.truncf %117 : vector<2x64x32xf32> to vector<2x64x32xbf16>
    %c0_42 = arith.constant 0 : index
    %c0_43 = arith.constant 0 : index
    %c64 = arith.constant 64 : index
    %119 = vector.load %arg16[%c0_42, %c0_43, %c64] : memref<2x64x128xbf16, #tpu.memory_space<vmem>>, vector<2x64x32xbf16>
    tpu.vector_store %arg16[%c0_42, %c0_43, %c64], %118 {strides = array<i32>} : memref<2x64x128xbf16, #tpu.memory_space<vmem>>, vector<2x64x32xbf16>,
    %120 = vector.extract_strided_slice %59 {offsets = [0, 0, 96], sizes = [2, 64, 32], strides = [1, 1, 1]} : vector<2x64x128xbf16> to vector<2x64x32xbf16>
    %121 = vector.extract_strided_slice %62 {offsets = [0, 0, 96], sizes = [2, 64, 32], strides = [1, 1, 1]} : vector<2x64x128xbf16> to vector<2x64x32xbf16>
    %122 = vector.extract_strided_slice %65 {offsets = [0, 0, 96], sizes = [2, 64, 32], strides = [1, 1, 1]} : vector<2x64x128xbf16> to vector<2x64x32xbf16>
    %cst_44 = arith.constant dense<0.000000e+00> : vector<2x64x64xf32>
    %123 = tpu.matmul %120, %121, %cst_44 {dimension_numbers = #tpu.dot_dimension_numbers<[2], [2], [1], [1], [0, 0, 0, 1, 1, 1], [0], [0]>} : vector<2x64x32xbf16>, vector<2x64x32xbf16>, vector<2x64x64xf32> -> vector<2x64x64xf32>
    %cst_45 = arith.constant dense<0xFF800000> : vector<2x64xf32>
    %124 = vector.multi_reduction <maximumf>, %123, %cst_45 [2] : vector<2x64x64xf32> to vector<2x64xf32>
    %125 = vector.shape_cast %124 : vector<2x64xf32> to vector<2x64x1xf32>
    %126 = vector.broadcast %125 : vector<2x64x1xf32> to vector<2x64x64xf32>
    %127 = arith.subf %123, %126 : vector<2x64x64xf32>
    %128 = math.exp %127 : vector<2x64x64xf32>
    %cst_46 = arith.constant dense<0.000000e+00> : vector<2x64xf32>
    %129 = vector.multi_reduction <add>, %128, %cst_46 [2] : vector<2x64x64xf32> to vector<2x64xf32>
    %130 = vector.shape_cast %129 : vector<2x64xf32> to vector<2x64x1xf32>
    %131 = tpu.reciprocal %130 {approx = true} : vector<2x64x1xf32> -> vector<2x64x1xf32>
    %132 = vector.broadcast %131 : vector<2x64x1xf32> to vector<2x64x64xf32>
    %133 = arith.mulf %128, %132 : vector<2x64x64xf32>
    %134 = arith.truncf %133 : vector<2x64x64xf32> to vector<2x64x64xbf16>
    %cst_47 = arith.constant dense<0.000000e+00> : vector<2x64x32xf32>
    %135 = tpu.matmul %134, %122, %cst_47 {dimension_numbers = #tpu.dot_dimension_numbers<[2], [1], [1], [2], [0, 0, 0, 1, 1, 2], [0], [0]>} : vector<2x64x64xbf16>, vector<2x64x32xbf16>, vector<2x64x32xf32> -> vector<2x64x32xf32>
    %136 = arith.truncf %135 : vector<2x64x32xf32> to vector<2x64x32xbf16>
    %c0_48 = arith.constant 0 : index
    %c0_49 = arith.constant 0 : index
    %c96 = arith.constant 96 : index
    %137 = vector.load %arg16[%c0_48, %c0_49, %c96] : memref<2x64x128xbf16, #tpu.memory_space<vmem>>, vector<2x64x32xbf16>
    tpu.vector_store %arg16[%c0_48, %c0_49, %c96], %136 {strides = array<i32>} : memref<2x64x128xbf16, #tpu.memory_space<vmem>>, vector<2x64x32xbf16>,
    %c0_50 = arith.constant 0 : index
    %c0_51 = arith.constant 0 : index
    %c0_52 = arith.constant 0 : index
    %138 = vector.load %arg16[%c0_50, %c0_51, %c0_52] : memref<2x64x128xbf16, #tpu.memory_space<vmem>>, vector<2x64x128xbf16>
    %139 = vector.shape_cast %138 : vector<2x64x128xbf16> to vector<128x128xbf16>
    %c0_53 = arith.constant 0 : index
    %c0_54 = arith.constant 0 : index
    %140 = vector.load %arg7[%c0_53, %c0_54] : memref<128x128xbf16, #tpu.memory_space<vmem>>, vector<128x128xbf16>
    %cst_55 = arith.constant dense<0.000000e+00> : vector<128x128xf32>
    %141 = tpu.matmul %139, %140, %cst_55 {dimension_numbers = #tpu.dot_dimension_numbers<[1], [0], [0], [1], [0, 0, 1, 1], [], []>} : vector<128x128xbf16>, vector<128x128xbf16>, vector<128x128xf32> -> vector<128x128xf32>
    %c0_56 = arith.constant 0 : index
    %c0_57 = arith.constant 0 : index
    %142 = vector.load %arg8[%c0_56, %c0_57] : memref<1x128xf32, #tpu.memory_space<vmem>>, vector<1x128xf32>
    %143 = vector.broadcast %142 : vector<1x128xf32> to vector<128x128xf32>
    %144 = arith.addf %141, %143 : vector<128x128xf32>
    %145 = arith.addf %1, %144 : vector<128x128xf32>
    %c0_58 = arith.constant 0 : index
    %c0_59 = arith.constant 0 : index
    %146 = vector.load %arg9[%c0_58, %c0_59] : memref<1x128xf32, #tpu.memory_space<vmem>>, vector<1x128xf32>
    %c0_60 = arith.constant 0 : index
    %c0_61 = arith.constant 0 : index
    %147 = vector.load %arg10[%c0_60, %c0_61] : memref<1x128xf32, #tpu.memory_space<vmem>>, vector<1x128xf32>
    %cst_62 = arith.constant dense<0.000000e+00> : vector<128xf32>
    %148 = vector.multi_reduction <add>, %145, %cst_62 [1] : vector<128x128xf32> to vector<128xf32>
    %149 = vector.shape_cast %148 : vector<128xf32> to vector<128x1xf32>
    %cst_63 = arith.constant 1.280000e+02 : f32
    %150 = vector.broadcast %cst_63 : f32 to vector<128x1xf32>
    %151 = arith.divf %149, %150 : vector<128x1xf32>
    %152 = vector.broadcast %151 : vector<128x1xf32> to vector<128x128xf32>
    %153 = arith.subf %145, %152 : vector<128x128xf32>
    %154 = arith.mulf %153, %153 : vector<128x128xf32>
    %cst_64 = arith.constant dense<0.000000e+00> : vector<128xf32>
    %155 = vector.multi_reduction <add>, %154, %cst_64 [1] : vector<128x128xf32> to vector<128xf32>
    %156 = vector.shape_cast %155 : vector<128xf32> to vector<128x1xf32>
    %cst_65 = arith.constant 1.280000e+02 : f32
    %157 = vector.broadcast %cst_65 : f32 to vector<128x1xf32>
    %158 = arith.divf %156, %157 : vector<128x1xf32>
    %159 = vector.broadcast %151 : vector<128x1xf32> to vector<128x128xf32>
    %160 = arith.subf %145, %159 : vector<128x128xf32>
    %cst_66 = arith.constant 9.99999974E-6 : f32
    %161 = vector.broadcast %cst_66 : f32 to vector<128x1xf32>
    %162 = arith.addf %158, %161 : vector<128x1xf32>
    %163 = math.rsqrt %162 : vector<128x1xf32>
    %164 = vector.broadcast %163 : vector<128x1xf32> to vector<128x128xf32>
    %165 = arith.mulf %160, %164 : vector<128x128xf32>
    %166 = vector.broadcast %146 : vector<1x128xf32> to vector<128x128xf32>
    %167 = arith.mulf %165, %166 : vector<128x128xf32>
    %168 = vector.broadcast %147 : vector<1x128xf32> to vector<128x128xf32>
    %169 = arith.addf %167, %168 : vector<128x128xf32>
    %170 = arith.truncf %169 : vector<128x128xf32> to vector<128x128xbf16>
    %c0_67 = arith.constant 0 : index
    %c0_68 = arith.constant 0 : index
    %171 = vector.load %arg11[%c0_67, %c0_68] : memref<128x512xbf16, #tpu.memory_space<vmem>>, vector<128x512xbf16>
    %cst_69 = arith.constant dense<0.000000e+00> : vector<128x512xf32>
    %172 = tpu.matmul %170, %171, %cst_69 {dimension_numbers = #tpu.dot_dimension_numbers<[1], [0], [0], [1], [0, 0, 1, 1], [], []>} : vector<128x128xbf16>, vector<128x512xbf16>, vector<128x512xf32> -> vector<128x512xf32>
    %c0_70 = arith.constant 0 : index
    %c0_71 = arith.constant 0 : index
    %173 = vector.load %arg12[%c0_70, %c0_71] : memref<1x512xf32, #tpu.memory_space<vmem>>, vector<1x512xf32>
    %174 = vector.broadcast %173 : vector<1x512xf32> to vector<128x512xf32>
    %175 = arith.addf %172, %174 : vector<128x512xf32>
    %cst_72 = arith.constant 5.000000e-01 : f32
    %176 = vector.broadcast %cst_72 : f32 to vector<128x512xf32>
    %177 = arith.mulf %176, %175 : vector<128x512xf32>
    %cst_73 = arith.constant 0.707106769 : f32
    %178 = vector.broadcast %cst_73 : f32 to vector<128x512xf32>
    %179 = arith.mulf %175, %178 : vector<128x512xf32>
    %180 = math.absf %179 : vector<128x512xf32>
    %cst_74 = arith.constant 0.327591091 : f32
    %181 = vector.broadcast %cst_74 : f32 to vector<128x512xf32>
    %182 = arith.mulf %181, %180 : vector<128x512xf32>
    %cst_75 = arith.constant 1.000000e+00 : f32
    %183 = vector.broadcast %cst_75 : f32 to vector<128x512xf32>
    %184 = arith.addf %183, %182 : vector<128x512xf32>
    %cst_76 = arith.constant 1.000000e+00 : f32
    %185 = vector.broadcast %cst_76 : f32 to vector<128x512xf32>
    %186 = arith.divf %185, %184 : vector<128x512xf32>
    %cst_77 = arith.constant 1.06140542 : f32
    %187 = vector.broadcast %cst_77 : f32 to vector<128x512xf32>
    %188 = arith.mulf %186, %187 : vector<128x512xf32>
    %cst_78 = arith.constant -1.45315206 : f32
    %189 = vector.broadcast %cst_78 : f32 to vector<128x512xf32>
    %190 = arith.addf %189, %188 : vector<128x512xf32>
    %191 = arith.mulf %186, %190 : vector<128x512xf32>
    %cst_79 = arith.constant 1.42141378 : f32
    %192 = vector.broadcast %cst_79 : f32 to vector<128x512xf32>
    %193 = arith.addf %192, %191 : vector<128x512xf32>
    %194 = arith.mulf %186, %193 : vector<128x512xf32>
    %cst_80 = arith.constant -0.284496725 : f32
    %195 = vector.broadcast %cst_80 : f32 to vector<128x512xf32>
    %196 = arith.addf %195, %194 : vector<128x512xf32>
    %197 = arith.mulf %186, %196 : vector<128x512xf32>
    %cst_81 = arith.constant 0.254829586 : f32
    %198 = vector.broadcast %cst_81 : f32 to vector<128x512xf32>
    %199 = arith.addf %198, %197 : vector<128x512xf32>
    %200 = arith.mulf %186, %199 : vector<128x512xf32>
    %cst_82 = arith.constant 0.000000e+00 : f32
    %201 = vector.broadcast %cst_82 : f32 to vector<128x512xf32>
    %202 = arith.subf %201, %180 : vector<128x512xf32>
    %203 = arith.mulf %202, %180 : vector<128x512xf32>
    %204 = math.exp %203 : vector<128x512xf32>
    %205 = arith.mulf %200, %204 : vector<128x512xf32>
    %cst_83 = arith.constant 1.000000e+00 : f32
    %206 = vector.broadcast %cst_83 : f32 to vector<128x512xf32>
    %207 = arith.subf %206, %205 : vector<128x512xf32>
    %cst_84 = arith.constant 0.000000e+00 : f32
    %208 = vector.broadcast %cst_84 : f32 to vector<128x512xf32>
    %209 = arith.cmpf olt, %179, %208 : vector<128x512xf32>
    %cst_85 = arith.constant 0.000000e+00 : f32
    %210 = vector.broadcast %cst_85 : f32 to vector<128x512xf32>
    %211 = arith.subf %210, %207 : vector<128x512xf32>
    %212 = arith.select %209, %211, %207 : vector<128x512xi1>, vector<128x512xf32>
    %cst_86 = arith.constant 1.000000e+00 : f32
    %213 = vector.broadcast %cst_86 : f32 to vector<128x512xf32>
    %214 = arith.addf %213, %212 : vector<128x512xf32>
    %215 = arith.mulf %177, %214 : vector<128x512xf32>
    %216 = arith.truncf %215 : vector<128x512xf32> to vector<128x512xbf16>
    %c0_87 = arith.constant 0 : index
    %c0_88 = arith.constant 0 : index
    %217 = vector.load %arg13[%c0_87, %c0_88] : memref<512x128xbf16, #tpu.memory_space<vmem>>, vector<512x128xbf16>
    %cst_89 = arith.constant dense<0.000000e+00> : vector<128x128xf32>
    %218 = tpu.matmul %216, %217, %cst_89 {dimension_numbers = #tpu.dot_dimension_numbers<[1], [0], [0], [1], [0, 0, 1, 1], [], []>} : vector<128x512xbf16>, vector<512x128xbf16>, vector<128x128xf32> -> vector<128x128xf32>
    %c0_90 = arith.constant 0 : index
    %c0_91 = arith.constant 0 : index
    %219 = vector.load %arg14[%c0_90, %c0_91] : memref<1x128xf32, #tpu.memory_space<vmem>>, vector<1x128xf32>
    %220 = vector.broadcast %219 : vector<1x128xf32> to vector<128x128xf32>
    %221 = arith.addf %218, %220 : vector<128x128xf32>
    %222 = arith.addf %145, %221 : vector<128x128xf32>
    %223 = vector.shape_cast %222 : vector<128x128xf32> to vector<2x64x128xf32>
    %c0_92 = arith.constant 0 : index
    %c0_93 = arith.constant 0 : index
    %c0_94 = arith.constant 0 : index
    %224 = vector.load %arg15[%c0_92, %c0_93, %c0_94] : memref<2x64x128xf32, #tpu.memory_space<vmem>>, vector<2x64x128xf32>
    tpu.vector_store %arg15[%c0_92, %c0_93, %c0_94], %223 {strides = array<i32>} : memref<2x64x128xf32, #tpu.memory_space<vmem>>, vector<2x64x128xf32>,
    return
  }
  func.func @transform_0(%arg0: i32) -> (i32, i32, i32) {
    %c0_i32 = arith.constant 0 : i32
    %c0_i32_0 = arith.constant 0 : i32
    %c0_i32_1 = arith.constant 0 : i32
    return %arg0, %c0_i32, %c0_i32_0 : i32, i32, i32
  }
  func.func @transform_1(%arg0: i32) -> (i32, i32, i32) {
    %c0_i32 = arith.constant 0 : i32
    %c0_i32_0 = arith.constant 0 : i32
    %c0_i32_1 = arith.constant 0 : i32
    return %arg0, %c0_i32, %c0_i32_0 : i32, i32, i32
  }
  func.func @transform_2(%arg0: i32) -> (i32, i32) {
    %c0_i32 = arith.constant 0 : i32
    %c0_i32_0 = arith.constant 0 : i32
    %c0_i32_1 = arith.constant 0 : i32
    return %c0_i32, %c0_i32_0 : i32, i32
  }
  func.func @transform_3(%arg0: i32) -> (i32, i32) {
    %c0_i32 = arith.constant 0 : i32
    %c0_i32_0 = arith.constant 0 : i32
    %c0_i32_1 = arith.constant 0 : i32
    return %c0_i32, %c0_i32_0 : i32, i32
  }
  func.func @transform_4(%arg0: i32) -> (i32, i32) {
    %c0_i32 = arith.constant 0 : i32
    %c0_i32_0 = arith.constant 0 : i32
    %c0_i32_1 = arith.constant 0 : i32
    return %c0_i32, %c0_i32_0 : i32, i32
  }
  func.func @transform_5(%arg0: i32) -> (i32, i32) {
    %c0_i32 = arith.constant 0 : i32
    %c0_i32_0 = arith.constant 0 : i32
    %c0_i32_1 = arith.constant 0 : i32
    return %c0_i32, %c0_i32_0 : i32, i32
  }
  func.func @transform_6(%arg0: i32) -> (i32, i32) {
    %c0_i32 = arith.constant 0 : i32
    %c0_i32_0 = arith.constant 0 : i32
    %c0_i32_1 = arith.constant 0 : i32
    return %c0_i32, %c0_i32_0 : i32, i32
  }
  func.func @transform_7(%arg0: i32) -> (i32, i32) {
    %c0_i32 = arith.constant 0 : i32
    %c0_i32_0 = arith.constant 0 : i32
    %c0_i32_1 = arith.constant 0 : i32
    return %c0_i32, %c0_i32_0 : i32, i32
  }
  func.func @transform_8(%arg0: i32) -> (i32, i32) {
    %c0_i32 = arith.constant 0 : i32
    %c0_i32_0 = arith.constant 0 : i32
    %c0_i32_1 = arith.constant 0 : i32
    return %c0_i32, %c0_i32_0 : i32, i32
  }
  func.func @transform_9(%arg0: i32) -> (i32, i32) {
    %c0_i32 = arith.constant 0 : i32
    %c0_i32_0 = arith.constant 0 : i32
    %c0_i32_1 = arith.constant 0 : i32
    return %c0_i32, %c0_i32_0 : i32, i32
  }
  func.func @transform_10(%arg0: i32) -> (i32, i32) {
    %c0_i32 = arith.constant 0 : i32
    %c0_i32_0 = arith.constant 0 : i32
    %c0_i32_1 = arith.constant 0 : i32
    return %c0_i32, %c0_i32_0 : i32, i32
  }
  func.func @transform_11(%arg0: i32) -> (i32, i32) {
    %c0_i32 = arith.constant 0 : i32
    %c0_i32_0 = arith.constant 0 : i32
    %c0_i32_1 = arith.constant 0 : i32
    return %c0_i32, %c0_i32_0 : i32, i32
  }
  func.func @transform_12(%arg0: i32) -> (i32, i32) {
    %c0_i32 = arith.constant 0 : i32
    %c0_i32_0 = arith.constant 0 : i32
    %c0_i32_1 = arith.constant 0 : i32
    return %c0_i32, %c0_i32_0 : i32, i32
  }
  func.func @transform_13(%arg0: i32) -> (i32, i32) {
    %c0_i32 = arith.constant 0 : i32
    %c0_i32_0 = arith.constant 0 : i32
    %c0_i32_1 = arith.constant 0 : i32
    return %c0_i32, %c0_i32_0 : i32, i32
  }
  func.func @transform_14(%arg0: i32) -> (i32, i32, i32) {
    %c0_i32 = arith.constant 0 : i32
    %c0_i32_0 = arith.constant 0 : i32
    %c0_i32_1 = arith.constant 0 : i32
    return %arg0, %c0_i32, %c0_i32_0 : i32, i32, i32
  }
}

</mosaic_0001>

<bundles_post_ra>
// kernel: tpu_custom_call.1
= control target key start
LH: loop header
LB: loop body
LE: loop exit
PB: predicated region body
PF: predicated region fallthrough
CT: control target
= control target key end

     0   :  { %s13987_s0 = inlined_call_operand.hbm [shape: f32[4,64,128], index: 0, kind: input, shape index: {}]   ;;  %s13988_s1 = inlined_call_operand.hbm [shape: f32[4,64,128], index: 1, kind: input, shape index: {}]   ;;  %s13989_s2 = inlined_call_operand.vmem [shape: f32[1,128], index: 2, kind: input, shape index: {}]   ;;  %s13990_s3 = inlined_call_operand.vmem [shape: f32[1,128], index: 3, kind: input, shape index: {}]   ;;  %s13991_s4 = inlined_call_operand.hbm [shape: bf16[128,128], index: 4, kind: input, shape index: {}]   ;;  %s13992_s5 = inlined_call_operand.hbm [shape: bf16[128,256], index: 5, kind: input, shape index: {}]   ;;  %s13993_s6 = inlined_call_operand.hbm [shape: bf16[128,128], index: 6, kind: input, shape index: {}]   ;;  %s13994_s7 = inlined_call_operand.vmem [shape: f32[1,128], index: 7, kind: input, shape index: {}]   ;;  %s13995_s8 = inlined_call_operand.vmem [shape: f32[1,128], index: 8, kind: input, shape index: {}]   ;;  %s13996_s9 = inlined_call_operand.vmem [shape: f32[1,128], index: 9, kind: input, shape index: {}]   ;;  %s13997_s10 = inlined_call_operand.hbm [shape: bf16[128,512], index: 10, kind: input, shape index: {}]   ;;  %s13998_s11 = inlined_call_operand.vmem [shape: f32[1,512], index: 11, kind: input, shape index: {}]   ;;  %s13999_s12 = inlined_call_operand.hbm [shape: bf16[512,128], index: 12, kind: input, shape index: {}]   ;;  %s14000_s13 = inlined_call_operand.vmem [shape: f32[1,128], index: 13, kind: input, shape index: {}]   ;;  %s14001_s14 = inlined_call_operand.hbm [shape: f32[4,64,128], index: 14, kind: output, shape index: {}]  }
   0x1   :  { %14100 = sst [smem:[#allocation67_spill]] %s13987_s0 }
   0x2   :  { %14101 = sst [smem:[#allocation68_spill]] %s13991_s4 }
   0x3   :  { %14102 = sst [smem:[#allocation69_spill]] %s13992_s5 }
   0x4   :  { %14103 = sst [smem:[#allocation70_spill]] %s13993_s6 }
   0x5   :  { %14104 = sst [smem:[#allocation71_spill]] %s13997_s10 }
   0x6   :  { %14105 = sst [smem:[#allocation72_spill]] %s13999_s12 }
   0x7   :  { %14106 = sst [smem:[#allocation73_spill]] %s14000_s13 }
   0x8   :  { %14107 = sst [smem:[#allocation74_spill]] %s14001_s14 }
   0x9   :  { %19 = vsyncpa [#allocation4], 0 }
   0xa   :  { %21 = vsyncpa [#allocation4 + $0x1], 0 }
   0xb   :  { %22 = vsyncpa [#allocation7], 0 }
   0xc   :  { %24 = vsyncpa [#allocation7 + $0x1], 0 }
   0xd   :  { %25 = vsyncpa [#allocation10], 0 }
   0xe   :  { %26 = vsyncpa [#allocation13], 0 }
   0xf   :  { %27 = vsyncpa [#allocation5], 0 }
  0x10   :  { %29 = vsyncpa [#allocation5 + $0x1], 0  ;;  %s9735_s29 = smov 0   ;;  %s9737_s30 = smov 0  }
  0x11   :  { %s9739_s15 = smov 0   ;;  %s9741_s16 = smov 0  }
  0x12 LB: > { %14108 = sst [smem:[#allocation22_spill]] %s9626_s29  ;;  %s9640_s17 = smov [#allocation8]   ;;  %s9638_s16 = sphi %s9741_s16, %s14301_s16   ;;  %s9634_s15 = sphi %s9739_s15, %s14303_s15   ;;  %s9630_s30 = sphi %s9737_s30, %s14305_s30   ;;  %s9626_s29 = sphi %s9735_s29, %s14304_s29  }
  0x13   : > { %14109 = sst [smem:[#allocation23_spill]] %s9634_s15  ;;  %s388_s18 = sshll.u32 %s9640_s17, 4  ;;  %s389_s18 = int_to_ptr.vmem [resolvable:$true] %s388_s18 }
  0x14   : > { %s9756_s19 = sadd.s32 4294967295, %s9638_s16   ;;  %p7497_p0 = scmp.ge.s32.totalorder %s9638_s16, 1 }
  0x15   : > { %p14015_p1 = scmp.eq.s32.totalorder %s9756_s19, 0  ;;  %p370_p2 = scmp.lt.s32.totalorder %s9638_s16, 3 }
  0x16   : > { %s9641_s21 = smov [#allocation9]   ;;  %s9642_s24 = smov [#allocation12]  }
  0x17   : > { %p9761_p3 = pnand %p7497_p0, %p370_p2  ;;  %s401_s22 = sshll.u32 %s9641_s21, 4  ;;  %s9774_s22 = int_to_ptr.vmem [resolvable:$true] %s401_s22 }
  0x18   : > { %s9776_s25 = sshll.u32 %s9642_s24, 4  ;;  %s9383_s27 = scalar_lea.vmem %s389_s18, 1024  ;;  %s437_s25 = int_to_ptr.vmem [resolvable:$true] %s9776_s25 }
  0x19   : > { %p8517_p5 = pneg %p9761_p3  ;;  %p9384_p8 = scmp.ne.s32.totalorder %s389_s18, %s9383_s27 }
  0x1a   : > { %p9391_p11 = scmp.lt.s32.totalorder %s389_s18, %s389_s18  ;;  %p9392_p12 = scmp.lt.s32.totalorder %s9383_s27, %s9383_s27 }
  0x1b   : > { %p9770_p6 = pnand %p8517_p5, %p14015_p1 }
  0x1c   : > { %p9393_p13 = por %p9392_p12, %p9391_p11 }
  0x1d   : > { %p9780_p7 = pneg %p9770_p6 }
  0x1f   : > { %p9386_p9 = pnand %p9384_p8, %p9780_p7 }
  0x21   : > { %p9387_p10 = pneg %p9386_p9 }
  0x23   : > { %p9394_p0 = pnand %p9393_p13, %p9387_p10 }
  0x25   : > { %9397 = shalt.err (!%p9394_p0)
}
  0x26   : > { %s14003_s28 = smov 64   ;;  %s14005_s17 = smov 4  }
  0x27   : > { %s14113_s4 = sld [smem:[#allocation68_spill]]  ;;  %s9409_s14 = scalar_lea.vmem %s9774_s22, 2048 }
  0x28   : > { %p9410_p2 = scmp.ne.s32.totalorder %s9774_s22, %s9409_s14  ;;  %p9417_p9 = scmp.lt.s32.totalorder %s9774_s22, %s9774_s22 }
  0x29   : > { %p9418_p10 = scmp.lt.s32.totalorder %s9409_s14, %s9409_s14 }
  0x2a   : > { %p9412_p5 = pnand %p9410_p2, %p9780_p7 }
  0x2b   : > { %p9419_p11 = por %p9418_p10, %p9417_p9 }
  0x2c   : > { %p9413_p8 = pneg %p9412_p5 }
  0x2d   : > { %8520 = dma.hbm_to_vmem [thread:$0]  (!%p9770_p6), %s14113_s4, 1024, %s389_s18, [#allocation7], %s14003_s28, %s14003_s28, %s14005_s17  }
  0x2e   : > { %p9420_p12 = pnand %p9419_p11, %p9413_p8 }
  0x30   : > { %9423 = shalt.err (!%p9420_p12)
}
  0x31   : > { %s14007_s27 = smov 128   ;;  %s14009_s13 = smov 8  }
  0x32   : > { %s14114_s5 = sld [smem:[#allocation69_spill]]  ;;  %s9435_s24 = scalar_lea.vmem %s437_s25, 4096 }
  0x33   : > { %p9436_p13 = scmp.ne.s32.totalorder %s437_s25, %s9435_s24  ;;  %p9443_p5 = scmp.lt.s32.totalorder %s437_s25, %s437_s25 }
  0x34   : > { %p9444_p8 = scmp.lt.s32.totalorder %s9435_s24, %s9435_s24 }
  0x35   : > { %p9438_p0 = pnand %p9436_p13, %p9780_p7 }
  0x36   : > { %p9445_p9 = por %p9444_p8, %p9443_p5 }
  0x37   : > { %p9439_p2 = pneg %p9438_p0 }
  0x38   : > { %8523 = dma.hbm_to_vmem [thread:$0]  (!%p9770_p6), %s14114_s5, 2048, %s9774_s22, [#allocation10], %s14007_s27, %s14007_s27, %s14009_s13  }
  0x39   : > { %p9446_p10 = pnand %p9445_p9, %p9439_p2 }
  0x3b   : > { %9449 = shalt.err (!%p9446_p10)
}
  0x3c   : > { %s9647_s14 = smov 256   ;;  %s9648_s28 = smov 16  }
  0x3d   : > { %s14115_s10 = sld [smem:[#allocation71_spill]]  ;;  %s9649_s22 = smov [#allocation11]  }
  0x3e   : > { %s414_s18 = sshll.u32 %s9649_s22, 4  ;;  %s9650_s21 = smov [#allocation14]   ;;  %s415_s18 = int_to_ptr.vmem [resolvable:$true] %s414_s18 }
  0x3f   : > { %s452_s27 = sshll.u32 %s9650_s21, 4  ;;  %s9461_s13 = scalar_lea.vmem %s415_s18, 1024  ;;  %s453_s27 = int_to_ptr.vmem [resolvable:$true] %s452_s27 }
  0x40   : > { %p9462_p11 = scmp.ne.s32.totalorder %s415_s18, %s9461_s13  ;;  %p9469_p0 = scmp.lt.s32.totalorder %s415_s18, %s415_s18 }
  0x41   : > { %p9470_p2 = scmp.lt.s32.totalorder %s9461_s13, %s9461_s13 }
  0x42   : > { %p9464_p12 = pnand %p9462_p11, %p9780_p7 }
  0x43   : > { %8529 = dma.hbm_to_vmem [thread:$0]  (!%p9770_p6), %s14115_s10, 4096, %s437_s25, [#allocation13], %s9647_s14, %s9647_s14, %s9648_s28  }
  0x44   : > { %p9465_p13 = pneg %p9464_p12  ;;  %p9471_p5 = por %p9470_p2, %p9469_p0 }
  0x46   : > { %p9472_p8 = pnand %p9471_p5, %p9465_p13 }
  0x48   : > { %9475 = shalt.err (!%p9472_p8)
}
  0x49   : > { %s14116_s24 = smov 4   ;;  %s14117_s4 = smov 64  }
  0x4a   : > { %s14118_s6 = sld [smem:[#allocation70_spill]]  ;;  %s9487_s17 = scalar_lea.vmem %s453_s27, 4096 }
  0x4b   : > { %p9488_p9 = scmp.ne.s32.totalorder %s453_s27, %s9487_s17  ;;  %p9495_p12 = scmp.lt.s32.totalorder %s453_s27, %s453_s27 }
  0x4c   : > { %p9496_p0 = scmp.lt.s32.totalorder %s9487_s17, %s9487_s17 }
  0x4d   : > { %p9490_p10 = pnand %p9488_p9, %p9780_p7 }
  0x4e   : > { %p9497_p13 = por %p9496_p0, %p9495_p12 }
  0x4f   : > { %p9491_p11 = pneg %p9490_p10 }
  0x50   : > { %8526 = dma.hbm_to_vmem [thread:$0]  (!%p9770_p6), %s14118_s6, 1024, %s415_s18, [#allocation10], %s14117_s4, %s14117_s4, %s14116_s24  }
  0x51   : > { %p9498_p2 = pnand %p9497_p13, %p9491_p11 }
  0x53   : > { %9501 = shalt.err (!%p9498_p2)
}
  0x54   : > { %s14119_s12 = sld [smem:[#allocation72_spill]]  ;;  %s7496_s23 = sadd.s32 4294967294, %s9638_s16  }
  0x55   : > { %s9839_s26 = sadd.s32 1, %s9638_s16   ;;  %s42_s22 = sadd.s32 1, %s9634_s15 }
  0x56   : > { %14120 = sst [smem:[#allocation24_spill]] %s9839_s26  ;;  %s39_s18 = ssub.s32 %s9638_s16, %s9839_s26 }
  0x57   : > { %p49_p7 = scmp.ne.s32.totalorder %s9634_s15, %s9630_s30  ;;  %p40_p5 = scmp.eq.s32.totalorder %s39_s18, 0 }
  0x58   : > { %p50_p8 = scmp.eq.s32.totalorder %s9638_s16, 0  ;;  %p55_p9 = scmp.ne.s32.totalorder %s9630_s30, %s9626_s29 }
  0x59   : > { %p357_p10 = scmp.eq.s32.totalorder %s9756_s19, 1  ;;  %p363_p0 = scmp.eq.s32.totalorder %s7496_s23, 1 }
  0x5a   : > { %8532 = dma.hbm_to_vmem [thread:$0]  (!%p9770_p6), %s14119_s12, 4096, %s453_s27, [#allocation13], %s14117_s4, %s14117_s4, %s14116_s24  }
  0x5b   : > { %s9851_s21 = scalar_select %p40_p5, %s9634_s15, %s42_s22  }
  0x5c   : > { %p51_p11 = por %p50_p8, %p49_p7  ;;  %p9855_p12 = por %p14015_p1, %p55_p9 }
  0x5d   : > { %14121 = sst [smem:[#allocation25_spill]] %s9851_s21  ;;  %p9859_p6 = por %p357_p10, %p49_p7 }
  0x5e   : > { %s14122_s25 = scalar_select %p9855_p12, 1, 0 }
  0x5f   : > { %s14123_s27 = scalar_select %p9859_p6, 1, 0 }
  0x60   : > { %p8549_p13 = scmp.lt.s32.totalorder %s9638_s16, 2  ;;  %s469_s24 = sand.u32 1, %s9634_s15  }
  0x61   : > { %p9865_p2 = por %p363_p0, %p55_p9  ;;  %s9869_s28 = sshll.u32 %s469_s24, 7 }
  0x62   : > { %s7766_s17 = sshll.u32 %s9638_s16, 11  ;;  %s14126_s0 = sld [smem:[#allocation67_spill]] }
  0x63   : > { %s14124_s4 = scalar_select %p9865_p2, 1, 0 }
  0x64   : > { %s473_s18 = scalar_lea.vmem [#allocation3], %s9869_s28  ;;  %p9878_p7 = pnand %p8549_p13, %p51_p11 }
  0x65   : > { %14125 = sst [smem:[#allocation26_spill]] %s14124_s4  ;;  %s481_s23 = sshll.u32 %s473_s18, 4  ;;  %s9882_s23 = int_to_ptr.vmem [resolvable:$true] %s481_s23 }
  0x66   : > { %s9887_s12 = scalar_lea.hbm %s13988_s1, %s7766_s17  ;;  %s9889_s13 = scalar_lea.sflag [#allocation4], %s469_s24 }
  0x67   : > { %p9504_p8 = pneg %p9878_p7 }
  0x68   : > { %s9875_s22 = scalar_lea.hbm %s14126_s0, %s7766_s17  ;;  %s9507_s15 = scalar_lea.hbm %s14126_s0, 4096 }
  0x69   : > { %s9502_s14 = scalar_lea.hbm %s9875_s22, 2048  ;;  %p9508_p11 = scmp.lt.s32.totalorder %s9875_s22, %s14126_s0 }
  0x6a   : > { %p9503_p5 = scmp.ne.s32.totalorder %s9875_s22, %s9502_s14  ;;  %p9509_p0 = scmp.lt.s32.totalorder %s9507_s15, %s9502_s14 }
  0x6c   : > { %p9505_p9 = pnand %p9504_p8, %p9503_p5  ;;  %p9510_p13 = por %p9509_p0, %p9508_p11 }
  0x6e   : > { %p9506_p10 = pneg %p9505_p9 }
  0x70   : > { %p9511_p4 = pnand %p9510_p13, %p9506_p10 }
  0x72   : > { %9514 = shalt.err (!%p9511_p4)
}
  0x73   : > { %s9515_s6 = scalar_lea.vmem %s9882_s23, 2048  ;;  %s9651_s10 = smov [#allocation3]  }
  0x74   : > { %p9516_p1 = scmp.ne.s32.totalorder %s9882_s23, %s9515_s6  ;;  %s9520_s21 = sshll.u32 %s9651_s10, 4  ;;  %s9521_s21 = int_to_ptr.vmem [resolvable:$false] %s9520_s21 }
  0x75   : > { %s9522_s24 = scalar_lea.vmem %s9521_s21, 4096  ;;  %p9523_p2 = scmp.lt.s32.totalorder %s9882_s23, %s9521_s21 }
  0x76   : > { %p9518_p5 = pnand %p9516_p1, %p9504_p8  ;;  %p9524_p6 = scmp.lt.s32.totalorder %s9522_s24, %s9515_s6 }
  0x78   : > { %p9519_p9 = pneg %p9518_p5  ;;  %p9525_p12 = por %p9524_p6, %p9523_p2 }
  0x7a   : > { %p9526_p11 = pnand %p9525_p12, %p9519_p9 }
  0x7c   : > { %9529 = shalt.err (!%p9526_p11)
}
  0x7d   : > { %s14128_s15 = smov 8   ;;  %s14129_s26 = smov 128  }
  0x7e   : > { %8536 = dma.hbm_to_vmem [thread:$0]  (!%p9878_p7), %s9875_s22, 2048, %s9882_s23, %s9889_s13, %s14129_s26, %s14129_s26, %s14128_s15  }
  0x7f   : > { %s495_s4 = scalar_lea.vmem [#allocation6], %s9869_s28  ;;  %s491_s14 = sand.u32 1, %s9638_s16  }
  0x80   : > { %s503_s17 = sshll.u32 %s495_s4, 4  ;;  %s492_s18 = scalar_lea.sflag [#allocation7], %s491_s14  ;;  %s9921_s17 = int_to_ptr.vmem [resolvable:$true] %s503_s17 }
  0x81   : > { %s9530_s6 = scalar_lea.hbm %s9887_s12, 2048  ;;  %s9535_s24 = scalar_lea.hbm %s13988_s1, 4096 }
  0x82   : > { %p9531_p1 = scmp.ne.s32.totalorder %s9887_s12, %s9530_s6  ;;  %p9536_p6 = scmp.lt.s32.totalorder %s9887_s12, %s13988_s1 }
  0x83   : > { %p9537_p2 = scmp.lt.s32.totalorder %s9535_s24, %s9530_s6 }
  0x84   : > { %p9533_p4 = pnand %p9531_p1, %p9504_p8 }
  0x85   : > { %p9538_p10 = por %p9537_p2, %p9536_p6 }
  0x86   : > { %p9534_p12 = pneg %p9533_p4 }
  0x88   : > { %p9539_p0 = pnand %p9538_p10, %p9534_p12 }
  0x8a   : > { %9542 = shalt.err (!%p9539_p0)
}
  0x8b   : > { %s9543_s28 = scalar_lea.vmem %s9921_s17, 2048  ;;  %s9652_s22 = smov [#allocation6]  }
  0x8c   : > { %p9544_p13 = scmp.ne.s32.totalorder %s9921_s17, %s9543_s28  ;;  %s9548_s23 = sshll.u32 %s9652_s22, 4  ;;  %s9549_s23 = int_to_ptr.vmem [resolvable:$false] %s9548_s23 }
  0x8d   : > { %s9550_s13 = scalar_lea.vmem %s9549_s23, 4096  ;;  %p9551_p11 = scmp.lt.s32.totalorder %s9921_s17, %s9549_s23 }
  0x8e   : > { %p9546_p5 = pnand %p9544_p13, %p9504_p8  ;;  %p9552_p1 = scmp.lt.s32.totalorder %s9550_s13, %s9543_s28 }
  0x90   : > { %p9547_p9 = pneg %p9546_p5  ;;  %p9553_p4 = por %p9552_p1, %p9551_p11 }
  0x92   : > { %p9554_p6 = pnand %p9553_p4, %p9547_p9 }
  0x94   : > { %9557 = shalt.err (!%p9554_p6)
}
  0x95   : > { %8539 = dma.hbm_to_vmem [thread:$0]  (!%p9878_p7), %s9887_s12, 2048, %s9921_s17, %s492_s18, %s14129_s26, %s14129_s26, %s14128_s15  }
  0x96   : > { %515 = sbr.rel (%p9761_p3) target bundleno = 4812 (0x12cc), region = 76 }
  0x9b   : > { %s9951_s0 = sand.u32 1, %s9630_s30   ;;  %p14130_p8 = scmp.ne.s32.totalorder %s14122_s25, 0 }
  0x9c   : > { %s9954_s29 = sshll.u32 %s9951_s0, 7  ;;  %s518_s4 = scalar_lea.sflag [#allocation4], %s9951_s0 }
  0x9d   : > { %s9958_s5 = scalar_lea.vmem [#allocation3], %s9954_s29 }
  0x9e   : > { %9601 = dma.done.wait (%p14130_p8), %s518_s4, 2048  }
  0x9f   : > { %9603 = vsyncadd (%p14130_p8), %s518_s4, 4294965248  ;;  %s526_s12 = sand.u32 1, %s9756_s19   ;;  %s9966_s15 = scalar_lea.vmem [#allocation6], %s9954_s29 }
  0xa0   : > { %s527_s20 = scalar_lea.sflag [#allocation7], %s526_s12 }
  0xa1   : > { %9605 = dma.done.wait (%p14130_p8), %s527_s20, 2048  }
  0xa2   : > { %9607 = vsyncadd (%p14130_p8), %s527_s20, 4294965248  ;;  %p14131_p3 = scmp.eq.s32.totalorder %s9756_s19, 0 }
  0xa4   : > { %9609 = dma.done.wait (%p14131_p3), [#allocation7], 1024   ;;  %p14132_p7 = pmov %p14131_p3 }
  0xa5   : > { %p14133_p12 = pmov %p14131_p3 }
  0xa6   : > { %9611 = vsyncadd (%p14132_p7), [#allocation7], 4294966272 }
  0xa7   : > { %9613 = dma.done.wait (%p14133_p12), [#allocation10], 3072   ;;  %p14134_p2 = pmov %p14131_p3 }
  0xa9   : > { %9615 = vsyncadd (%p14134_p2), [#allocation10], 4294964224  ;;  %p14135_p10 = pmov %p14134_p2 }
  0xaa   : > { %p14136_p0 = pmov %p14134_p2 }
  0xab   : > { %9617 = dma.done.wait (%p14135_p10), [#allocation13], 8192  }
  0xac   : > { %9619 = vsyncadd (%p14136_p0), [#allocation13], 4294959104  ;;  %v620_v0 = vld [vmem:[%s9966_s15] sm:$0xff]  ;;  %v9986_v1 = vld [vmem:[%s9966_s15 + $0x10] sm:$0xff]  ;;  %s9654_s18 = smov 96   ;;  %vm1493_vm0 = vcmask 261120  }
  0xad   : > { %859 = vadd.xlane.f32.xlu0 %v620_v0  ;;  %863 = vadd.xlane.f32.xlu1 %v9986_v1  ;;  %v621_v2 = vld [vmem:[%s9966_s15 + $0x8] sm:$0xff]  ;;  %v9991_v3 = vld [vmem:[%s9966_s15 + $0x18] sm:$0xff]  ;;  %v9995_v4 = vld [vmem:[%s9966_s15 + $0x20] sm:$0xff]  ;;  %vm1672_vm1 = vcmask 523264   ;;  %s9655_s6 = smov 64   ;;  %vm2075_vm2 = vcmask 257024  }
  0xae   : > { %v9998_v5 = vld [vmem:[%s9966_s15 + $0x28] sm:$0xff]  ;;  %v10001_v6 = vld [vmem:[%s9966_s15 + $0x30] sm:$0xff]  ;;  %v10004_v7 = vld [vmem:[%s9966_s15 + $0x38] sm:$0xff]  ;;  %s9656_s10 = smov 32   ;;  %vm2784_vm3 = vcmask 519424   ;;  %vm3469_vm4 = vcmask 781824  }
  0xaf   : > { %v10009_v8 = vld [vmem:[%s9966_s15 + $0x40] sm:$0xff]  ;;  %v10012_v9 = vld [vmem:[%s9966_s15 + $0x48] sm:$0xff]  ;;  %v10017_v10 = vld [vmem:[%s9966_s15 + $0x50] sm:$0xff]  ;;  %vm4154_vm5 = vcmask 1044224   ;;  %s13838_s25 = scalar_lea.vmem [#allocation15], %s9954_s29  ;;  %s7834_s29 = sshll.u32 %s9756_s19, 11 }
  0xb0   : > { %v10020_v11 = vld [vmem:[%s9966_s15 + $0x58] sm:$0xff]  ;;  %v10025_v12 = vld [vmem:[%s9966_s15 + $0x60] sm:$0xff]  ;;  %v10030_v13 = vld [vmem:[%s9966_s15 + $0x68] sm:$0xff]  ;;  %s7353_s26 = sshll.u32 %s13838_s25, 4  ;;  %p14296_p5 = scmp.ne.s32.totalorder %s14123_s27, 0  ;;  %s13942_s26 = int_to_ptr.vmem [resolvable:$true] %s7353_s26 }
  0xb1   : > { %861 = vadd.xlane.f32.xlu0 %v621_v2  ;;  %865 = vadd.xlane.f32.xlu1 %v9991_v3  ;;  %v10033_v14 = vld [vmem:[%s9958_s5] sm:$0xff]  ;;  %v10036_v15 = vld [vmem:[%s9958_s5 + $0x8] sm:$0xff]  ;;  %v10041_v16 = vld [vmem:[%s9958_s5 + $0x10] sm:$0xff]  ;;  %s9558_s21 = scalar_lea.vmem %s13942_s26, 2048  ;;  %s9657_s19 = smov [#allocation15]  }
  0xb2   : > { %v10044_v17 = vld [vmem:[%s9958_s5 + $0x18] sm:$0xff]  ;;  %v10049_v18 = vld [vmem:[%s9966_s15 + $0x70] sm:$0xff]  ;;  %v10057_v20 = vld [vmem:[%s9958_s5 + $0x20] sm:$0xff]  ;;  %p9559_p13 = scmp.ne.s32.totalorder %s13942_s26, %s9558_s21  ;;  %s9562_s24 = sshll.u32 %s9657_s19, 4  ;;  %s9563_s24 = int_to_ptr.vmem [resolvable:$false] %s9562_s24 }
  0xb3   : > { %v10054_v19 = vld [vmem:[%s9966_s15 + $0x78] sm:$0xff]  ;;  %v10060_v21 = vld [vmem:[%s9958_s5 + $0x28] sm:$0xff]  ;;  %v10065_v22 = vld [vmem:[%s9958_s5 + $0x30] sm:$0xff]  ;;  %s14269_s15 = sld [smem:[#allocation73_spill]]  ;;  %s9564_s28 = scalar_lea.vmem %s9563_s24, 4096 }
  0xb4   : > { %v10070_v23 = vld [vmem:[%s9958_s5 + $0x38] sm:$0xff]  ;;  %v10073_v24 = vld [vmem:[%s9958_s5 + $0x40] sm:$0xff]  ;;  %v10076_v25 = vld [vmem:[%s9958_s5 + $0x48] sm:$0xff]  ;;  %p9560_p9 = pnand %p9559_p13, %p14296_p5  ;;  %p9565_p1 = scmp.lt.s32.totalorder %s13942_s26, %s9563_s24 }
  0xb5   : > { %867 = vadd.xlane.f32.xlu0 %v9995_v4  ;;  %869 = vadd.xlane.f32.xlu1 %v9998_v5  ;;  %v8605_v26 = vld [vmem:[#allocation9 + $0x74] ss:$8 sps:$4 sm:$0xff]   ;;  %v8607_v27 = vld [vmem:[#allocation9 + $0x70] ss:$8 sps:$4 sm:$0xff]   ;;  %v8608_v58 = vld [vmem:[#allocation9 + $0x64] ss:$8 sps:$4 sm:$0xff]   ;;  %p9566_p4 = scmp.lt.s32.totalorder %s9564_s28, %s9558_s21 }
  0xb6   : > { %1340 = vmatprep.subr.bf16.mxu1 %v8605_v26  ;;  %v10092_v40 = vld [vmem:[%s9958_s5 + $0x50] sm:$0xff]  ;;  %v10106_v49 = vld [vmem:[%s9958_s5 + $0x58] sm:$0xff]  ;;  %v8610_v59 = vld [vmem:[#allocation9 + $0x60] ss:$8 sps:$4 sm:$0xff]   ;;  %p9561_p11 = pneg %p9560_p9 }
  0xb7   : > { %1341 = vmatpush1.bf16.msra.mxu1 %v8607_v27  ;;  %v10122_v63 = vld [vmem:[%s9958_s5 + $0x60] sm:$0xff]  ;;  %p9567_p6 = por %p9566_p4, %p9565_p1 }
  0xb8   : > { %1342 = vmatprep.subr.bf16.mxu1 %v8608_v58 }
  0xb9   : > { %871 = vadd.xlane.f32.xlu0 %v10001_v6  ;;  %873 = vadd.xlane.f32.xlu1 %v10004_v7  ;;  %p9568_p8 = pnand %p9567_p6, %p9561_p11 }
  0xbb   : > { %1343 = vmatpush1.bf16.msra.mxu1 %v8610_v59  ;;  %v8622_v59 = vld [vmem:[#allocation9 + $0x20] ss:$8 sps:$4 sm:$0xff]  }
  0xbd   : > { %875 = vadd.xlane.f32.xlu0 %v10009_v8  ;;  %877 = vadd.xlane.f32.xlu1 %v10012_v9 }
  0xc1   : > { %879 = vadd.xlane.f32.xlu0 %v10017_v10  ;;  %881 = vadd.xlane.f32.xlu1 %v10020_v11 }
  0xc5   : > { %883 = vadd.xlane.f32.xlu0 %v10025_v12  ;;  %885 = vadd.xlane.f32.xlu1 %v10030_v13 }
  0xc9   : > { %638 = vadd.xlane.f32.xlu0 %v10033_v14  ;;  %640 = vadd.xlane.f32.xlu1 %v10036_v15 }
  0xcd   : > { %642 = vadd.xlane.f32.xlu0 %v10041_v16  ;;  %644 = vadd.xlane.f32.xlu1 %v10044_v17 }
  0xd1   : > { %887 = vadd.xlane.f32.xlu0 %v10049_v18  ;;  %889 = vadd.xlane.f32.xlu1 %v10054_v19 }
  0xd5   : > { %646 = vadd.xlane.f32.xlu0 %v10057_v20  ;;  %648 = vadd.xlane.f32.xlu1 %v10060_v21 }
  0xd9   : > { %650 = vadd.xlane.f32.xlu0 %v10065_v22  ;;  %652 = vadd.xlane.f32.xlu1 %v10070_v23 }
  0xdd   : > { %654 = vadd.xlane.f32.xlu0 %v10073_v24  ;;  %656 = vadd.xlane.f32.xlu1 %v10076_v25 }
 0x136   : > { %v860_v28 = vpop.xlane.xlu0 %859  ;;  %v864_v29 = vpop.xlane.xlu1 %863 }
 0x137   : > { %v891_v30 = vmul.f32 0.0078125, %v860_v28  ;;  %v893_v32 = vmul.f32 0.0078125, %v864_v29  ;;  %v8614_v29 = vld [vmem:[#allocation9 + $0x44] ss:$8 sps:$4 sm:$0xff]  }
 0x139   : > { %v10082_v31 = vsub.f32 %v620_v0, %v891_v30  ;;  %v10089_v39 = vsub.f32 %v9986_v1, %v893_v32  ;;  %v8616_v32 = vld [vmem:[#allocation9 + $0x40] ss:$8 sps:$4 sm:$0xff]  }
 0x13a   : > { %v862_v33 = vpop.xlane.xlu0 %861  ;;  %v866_v34 = vpop.xlane.xlu1 %865 }
 0x13b   : > { %v892_v35 = vmul.f32 0.0078125, %v862_v33  ;;  %v923_v36 = vmul.f32 %v10082_v31, %v10082_v31  ;;  %v894_v38 = vmul.f32 0.0078125, %v866_v34  ;;  %v925_v45 = vmul.f32 %v10089_v39, %v10089_v39 }
 0x13d   : > { %939 = vadd.xlane.f32.xlu0 %v923_v36  ;;  %v10086_v37 = vsub.f32 %v621_v2, %v892_v35  ;;  %v10100_v47 = vsub.f32 %v9991_v3, %v894_v38  ;;  %v8611_v2 = vld [vmem:[#allocation9 + $0x54] ss:$8 sps:$4 sm:$0xff]   ;;  %v8613_v3 = vld [vmem:[#allocation9 + $0x50] ss:$8 sps:$4 sm:$0xff]  }
 0x13e   : > { %v868_v41 = vpop.xlane.xlu0 %867  ;;  %v870_v42 = vpop.xlane.xlu1 %869  ;;  %1344 = vmatprep.subr.bf16.mxu1 %v8611_v2  ;;  %v10140_v35 = vld [vmem:[%s9958_s5 + $0x70] sm:$0xff] }
 0x13f   : > { %v924_v43 = vmul.f32 %v10086_v37, %v10086_v37  ;;  %v895_v44 = vmul.f32 0.0078125, %v868_v41  ;;  %v896_v46 = vmul.f32 0.0078125, %v870_v42  ;;  %v926_v52 = vmul.f32 %v10100_v47, %v10100_v47  ;;  %1345 = vmatpush1.bf16.msra.mxu1 %v8613_v3  ;;  %v8617_v42 = vld [vmem:[#allocation9 + $0x34] ss:$8 sps:$4 sm:$0xff]  }
 0x140   : > { %1346 = vmatprep.subr.bf16.mxu1 %v8614_v29  ;;  %v8623_v2 = vld [vmem:[#allocation9 + $0x14] ss:$8 sps:$4 sm:$0xff]   ;;  %v8626_v29 = vld [vmem:[#allocation9 + $0x4] ss:$8 sps:$4 sm:$0xff]  }
 0x141   : > { %941 = vadd.xlane.f32.xlu1 %v924_v43  ;;  %658 = vadd.xlane.f32.xlu0 %v10092_v40  ;;  %v10103_v48 = vsub.f32 %v9995_v4, %v895_v44  ;;  %v10114_v55 = vsub.f32 %v9998_v5, %v896_v46  ;;  %v8619_v46 = vld [vmem:[#allocation9 + $0x30] ss:$8 sps:$4 sm:$0xff]  }
 0x142   : > { %v872_v50 = vpop.xlane.xlu0 %871  ;;  %v874_v51 = vpop.xlane.xlu1 %873 }
 0x143   : > { %v927_v53 = vmul.f32 %v10103_v48, %v10103_v48  ;;  %v897_v54 = vmul.f32 0.0078125, %v872_v50  ;;  %v928_v60 = vmul.f32 %v10114_v55, %v10114_v55  ;;  %v898_v61 = vmul.f32 0.0078125, %v874_v51  ;;  %1347 = vmatpush1.bf16.msra.mxu1 %v8616_v32  ;;  %v10152_v50 = vld [vmem:[%s9958_s5 + $0x78] sm:$0xff] }
 0x144   : > { %1348 = vmatprep.subr.bf16.mxu1 %v8617_v42 }
 0x145   : > { %660 = vadd.xlane.f32.xlu1 %v10106_v49  ;;  %943 = vadd.xlane.f32.xlu0 %v925_v45  ;;  %v10119_v62 = vsub.f32 %v10001_v6, %v897_v54  ;;  %v10128_v26 = vsub.f32 %v10004_v7, %v898_v61  ;;  %v10131_v6 = vld [vmem:[%s9958_s5 + $0x68] sm:$0xff] }
 0x146   : > { %v876_v56 = vpop.xlane.xlu0 %875  ;;  %v878_v57 = vpop.xlane.xlu1 %877  ;;  %v8620_v54 = vld [vmem:[#allocation9 + $0x24] ss:$8 sps:$4 sm:$0xff]  }
 0x147   : > { %v929_v4 = vmul.f32 %v10119_v62, %v10119_v62  ;;  %v899_v5 = vmul.f32 0.0078125, %v876_v56  ;;  %v900_v30 = vmul.f32 0.0078125, %v878_v57  ;;  %v930_v33 = vmul.f32 %v10128_v26, %v10128_v26  ;;  %1349 = vmatpush1.bf16.msra.mxu1 %v8619_v46 }
 0x148   : > { %1350 = vmatprep.subr.bf16.mxu1 %v8620_v54  ;;  %v14019_v46 = vmov 0  }
 0x149   : > { %945 = vadd.xlane.f32.xlu1 %v926_v52  ;;  %947 = vadd.xlane.f32.xlu0 %v927_v53  ;;  %v10137_v7 = vsub.f32 %v10009_v8, %v899_v5  ;;  %v10143_v41 = vsub.f32 %v10012_v9, %v900_v30  ;;  %v8625_v5 = vld [vmem:[#allocation9 + $0x10] ss:$8 sps:$4 sm:$0xff]  }
 0x14a   : > { %v880_v0 = vpop.xlane.xlu0 %879  ;;  %v882_v1 = vpop.xlane.xlu1 %881  ;;  %1372 = vmatprep.mubr.bf16.mxu1 %v14019_v46 }
 0x14b   : > { %v901_v34 = vmul.f32 0.0078125, %v880_v0  ;;  %v931_v43 = vmul.f32 %v10137_v7, %v10137_v7  ;;  %v902_v44 = vmul.f32 0.0078125, %v882_v1  ;;  %v932_v9 = vmul.f32 %v10143_v41, %v10143_v41  ;;  %1351 = vmatpush1.bf16.msra.mxu1 %v8622_v59 }
 0x14c   : > { %1352 = vmatprep.subr.bf16.mxu1 %v8623_v2 }
 0x14d   : > { %949 = vadd.xlane.f32.xlu1 %v928_v60  ;;  %662 = vadd.xlane.f32.xlu0 %v10122_v63  ;;  %v10149_v8 = vsub.f32 %v10017_v10, %v901_v34  ;;  %v10160_v57 = vsub.f32 %v10020_v11, %v902_v44  ;;  %v8628_v34 = vld [vmem:[#allocation9] ss:$8 sps:$4 sm:$0xff]  }
 0x14e   : > { %v884_v27 = vpop.xlane.xlu0 %883  ;;  %v886_v28 = vpop.xlane.xlu1 %885 }
 0x14f   : > { %v903_v45 = vmul.f32 0.0078125, %v884_v27  ;;  %v904_v53 = vmul.f32 0.0078125, %v886_v28  ;;  %v933_v56 = vmul.f32 %v10149_v8, %v10149_v8  ;;  %v934_v3 = vmul.f32 %v10160_v57, %v10160_v57  ;;  %1353 = vmatpush1.bf16.msra.mxu1 %v8625_v5 }
 0x150   : > { %1354 = vmatprep.subr.bf16.mxu1 %v8626_v29 }
 0x151   : > { %664 = vadd.xlane.f32.xlu1 %v10131_v6  ;;  %951 = vadd.xlane.f32.xlu0 %v929_v4  ;;  %v10163_v58 = vsub.f32 %v10025_v12, %v903_v45  ;;  %v10166_v0 = vsub.f32 %v10030_v13, %v904_v53 }
 0x152   : > { %v639_v36 = vpop.xlane.xlu0 %638  ;;  %v641_v38 = vpop.xlane.xlu1 %640 }
 0x153   : > { %v671_v10 = vmul.f32 0.0078125, %v639_v36  ;;  %v672_v61 = vmul.f32 0.0078125, %v641_v38  ;;  %v935_v11 = vmul.f32 %v10163_v58, %v10163_v58  ;;  %v936_v13 = vmul.f32 %v10166_v0, %v10166_v0  ;;  %1355 = vmatpush1.bf16.msra.mxu1 %v8628_v34  ;;  %v8636_v34 = vld [vmem:[#allocation8] sm:$0xff]  }
 0x155   : > { %953 = vadd.xlane.f32.xlu1 %v930_v33  ;;  %666 = vadd.xlane.f32.xlu0 %v10140_v35  ;;  %v10173_v4 = vsub.f32 %v10033_v14, %v671_v10  ;;  %v10178_v28 = vsub.f32 %v10036_v15, %v672_v61 }
 0x156   : > { %v643_v51 = vpop.xlane.xlu0 %642  ;;  %v645_v52 = vpop.xlane.xlu1 %644 }
 0x157   : > { %v673_v12 = vmul.f32 0.0078125, %v643_v51  ;;  %v703_v30 = vmul.f32 %v10173_v4, %v10173_v4  ;;  %v674_v32 = vmul.f32 0.0078125, %v645_v52  ;;  %v704_v38 = vmul.f32 %v10178_v28, %v10178_v28 }
 0x159   : > { %668 = vadd.xlane.f32.xlu1 %v10152_v50  ;;  %955 = vadd.xlane.f32.xlu0 %v931_v43  ;;  %v10183_v14 = vsub.f32 %v10041_v16, %v673_v12  ;;  %v10190_v45 = vsub.f32 %v10044_v17, %v674_v32  ;;  %v8633_v32 = vld [vmem:[#allocation8 + $0x18] sm:$0xff]  }
 0x15a   : > { %v888_v60 = vpop.xlane.xlu0 %887  ;;  %v890_v1 = vpop.xlane.xlu1 %889 }
 0x15b   : > { %v905_v33 = vmul.f32 0.0078125, %v888_v60  ;;  %v906_v15 = vmul.f32 0.0078125, %v890_v1  ;;  %v705_v43 = vmul.f32 %v10183_v14, %v10183_v14  ;;  %v706_v53 = vmul.f32 %v10190_v45, %v10190_v45 }
 0x15d   : > { %957 = vadd.xlane.f32.xlu1 %v932_v9  ;;  %959 = vadd.xlane.f32.xlu0 %v933_v56  ;;  %v10193_v16 = vsub.f32 %v10049_v18, %v905_v33  ;;  %v10197_v52 = vsub.f32 %v10054_v19, %v906_v15  ;;  %v8634_v33 = vld [vmem:[#allocation8 + $0x10] sm:$0xff]  }
 0x15e   : > { %v647_v27 = vpop.xlane.xlu0 %646  ;;  %v649_v36 = vpop.xlane.xlu1 %648 }
 0x15f   : > { %v675_v44 = vmul.f32 0.0078125, %v647_v27  ;;  %v676_v51 = vmul.f32 0.0078125, %v649_v36  ;;  %v937_v17 = vmul.f32 %v10193_v16, %v10193_v16  ;;  %v938_v10 = vmul.f32 %v10197_v52, %v10197_v52 }
 0x161   : > { %961 = vadd.xlane.f32.xlu1 %v934_v3  ;;  %963 = vadd.xlane.f32.xlu0 %v935_v11  ;;  %v10204_v18 = vsub.f32 %v10057_v20, %v675_v44  ;;  %v10209_v19 = vsub.f32 %v10060_v21, %v676_v51  ;;  %v8629_v3 = vld [vmem:[#allocation8 + $0x38] sm:$0xff]  }
 0x162   : > { %v651_v42 = vpop.xlane.xlu0 %650  ;;  %v653_v9 = vpop.xlane.xlu1 %652  ;;  %8123 = vmatprep.subr.bf16.mxu0 %v8629_v3 }
 0x163   : > { %v677_v54 = vmul.f32 0.0078125, %v651_v42  ;;  %v707_v59 = vmul.f32 %v10204_v18, %v10204_v18  ;;  %v678_v60 = vmul.f32 0.0078125, %v653_v9  ;;  %v708_v20 = vmul.f32 %v10209_v19, %v10209_v19  ;;  %8124 = vmatpush3.bf16.msra.mxu0 %v8629_v3 }
 0x165   : > { %965 = vadd.xlane.f32.xlu1 %v936_v13  ;;  %719 = vadd.xlane.f32.xlu0 %v703_v30  ;;  %v10214_v1 = vsub.f32 %v10065_v22, %v677_v54  ;;  %v10221_v12 = vsub.f32 %v10070_v23, %v678_v60  ;;  %v8630_v22 = vld [vmem:[#allocation8 + $0x30] sm:$0xff]   ;;  %v8631_v23 = vld [vmem:[#allocation8 + $0x28] sm:$0xff]   ;;  %v8632_v30 = vld [vmem:[#allocation8 + $0x20] sm:$0xff]  }
 0x166   : > { %v655_v56 = vpop.xlane.xlu0 %654  ;;  %v657_v2 = vpop.xlane.xlu1 %656  ;;  %8125 = vmatprep.subr.bf16.mxu0 %v8630_v22 }
 0x167   : > { %v679_v61 = vmul.f32 0.0078125, %v655_v56  ;;  %v709_v21 = vmul.f32 %v10214_v1, %v10214_v1  ;;  %v680_v11 = vmul.f32 0.0078125, %v657_v2  ;;  %v710_v27 = vmul.f32 %v10221_v12, %v10221_v12  ;;  %8126 = vmatpush3.bf16.msra.mxu0 %v8630_v22 }
 0x168   : > { %8127 = vmatprep.subr.bf16.mxu0 %v8631_v23 }
 0x169   : > { %721 = vadd.xlane.f32.xlu1 %v704_v38  ;;  %723 = vadd.xlane.f32.xlu0 %v705_v43  ;;  %v10224_v5 = vsub.f32 %v10073_v24, %v679_v61  ;;  %v10231_v29 = vsub.f32 %v10076_v25, %v680_v11  ;;  %v8635_v25 = vld [vmem:[#allocation8 + $0x8] sm:$0xff]  }
 0x16b   : > { %v711_v13 = vmul.f32 %v10224_v5, %v10224_v5  ;;  %v712_v24 = vmul.f32 %v10231_v29, %v10231_v29  ;;  %8128 = vmatpush3.bf16.msra.mxu0 %v8631_v23 }
 0x16c   : > { %8129 = vmatprep.subr.bf16.mxu0 %v8632_v30 }
 0x16d   : > { %725 = vadd.xlane.f32.xlu1 %v706_v53  ;;  %967 = vadd.xlane.f32.xlu0 %v937_v17 }
 0x16f   : > { %8130 = vmatpush3.bf16.msra.mxu0 %v8632_v30 }
 0x170   : > { %8131 = vmatprep.subr.bf16.mxu0 %v8633_v32 }
 0x171   : > { %969 = vadd.xlane.f32.xlu1 %v938_v10  ;;  %727 = vadd.xlane.f32.xlu0 %v707_v59 }
 0x173   : > { %8132 = vmatpush3.bf16.msra.mxu0 %v8633_v32 }
 0x174   : > { %8133 = vmatprep.subr.bf16.mxu0 %v8634_v33 }
 0x175   : > { %729 = vadd.xlane.f32.xlu1 %v708_v20  ;;  %731 = vadd.xlane.f32.xlu0 %v709_v21 }
 0x177   : > { %8134 = vmatpush3.bf16.msra.mxu0 %v8634_v33 }
 0x178   : > { %8135 = vmatprep.subr.bf16.mxu0 %v8635_v25 }
 0x179   : > { %733 = vadd.xlane.f32.xlu1 %v710_v27  ;;  %735 = vadd.xlane.f32.xlu0 %v711_v13 }
 0x17b   : > { %8136 = vmatpush3.bf16.msra.mxu0 %v8635_v25 }
 0x17c   : > { %8137 = vmatprep.subr.bf16.mxu0 %v8636_v34 }
 0x17d   : > { %737 = vadd.xlane.f32.xlu1 %v712_v24 }
 0x17f   : > { %8138 = vmatpush3.bf16.msra.mxu0 %v8636_v34 }
 0x1c6   : > { %v940_v36 = vpop.xlane.xlu0 %939 }
 0x1c7   : > { %v971_v38 = vmul.f32 0.0078125, %v940_v36 }
 0x1c9   : > { %v987_v15 = vadd.f32 1e-05, %v971_v38 }
 0x1ca   : > { %v942_v42 = vpop.xlane.xlu1 %941  ;;  %v659_v43 = vpop.xlane.xlu0 %658 }
 0x1cb   : > { %8733 = vrsqrt.f32 %v987_v15  ;;  %v972_v44 = vmul.f32 0.0078125, %v942_v42  ;;  %v681_v51 = vmul.f32 0.0078125, %v659_v43  ;;  %v10254_v42 = vld [vmem:[%s13989_s2] ss:$0 sm:$0xff] }
 0x1cd   : > { %v988_v9 = vadd.f32 1e-05, %v972_v44  ;;  %v10236_v53 = vsub.f32 %v10092_v40, %v681_v51 }
 0x1ce   : > { %v661_v17 = vpop.xlane.xlu1 %660  ;;  %v944_v54 = vpop.xlane.xlu0 %943 }
 0x1cf   : > { %8735 = vrsqrt.f32 %v988_v9  ;;  %v682_v56 = vmul.f32 0.0078125, %v661_v17  ;;  %v973_v10 = vmul.f32 0.0078125, %v944_v54  ;;  %v713_v59 = vmul.f32 %v10236_v53, %v10236_v53 }
 0x1d1   : > { %v989_v60 = vadd.f32 1e-05, %v973_v10  ;;  %739 = vadd.xlane.f32.xlu0 %v713_v59  ;;  %v10241_v61 = vsub.f32 %v10106_v49, %v682_v56  ;;  %v10266_v59 = vld [vmem:[%s13990_s3] ss:$0 sm:$0xff] }
 0x1d2   : > { %v946_v2 = vpop.xlane.xlu1 %945  ;;  %v948_v20 = vpop.xlane.xlu0 %947 }
 0x1d3   : > { %8737 = vrsqrt.f32 %v989_v60  ;;  %v974_v3 = vmul.f32 0.0078125, %v946_v2  ;;  %v975_v21 = vmul.f32 0.0078125, %v948_v20  ;;  %v714_v40 = vmul.f32 %v10241_v61, %v10241_v61 }
 0x1d5   : > { %v990_v11 = vadd.f32 1e-05, %v974_v3  ;;  %v991_v22 = vadd.f32 1e-05, %v975_v21  ;;  %741 = vadd.xlane.f32.xlu1 %v714_v40 }
 0x1d6   : > { %v950_v27 = vpop.xlane.xlu1 %949  ;;  %v663_v13 = vpop.xlane.xlu0 %662 }
 0x1d7   : > { %8739 = vrsqrt.f32 %v990_v11  ;;  %v976_v23 = vmul.f32 0.0078125, %v950_v27  ;;  %v683_v24 = vmul.f32 0.0078125, %v663_v13 }
 0x1d8   : > { %v8734_v30 = vpop.eup %8733  ;;  %8741 = vrsqrt.f32 %v991_v22 }
 0x1d9   : > { %v992_v49 = vadd.f32 1e-05, %v976_v23  ;;  %v10246_v32 = vsub.f32 %v10122_v63, %v683_v24  ;;  %v1019_v34 = vmul.f32 %v8734_v30, %v10082_v31 }
 0x1da   : > { %v665_v33 = vpop.xlane.xlu1 %664  ;;  %v952_v25 = vpop.xlane.xlu0 %951 }
 0x1db   : > { %8743 = vrsqrt.f32 %v992_v49  ;;  %v684_v36 = vmul.f32 0.0078125, %v665_v33  ;;  %v977_v38 = vmul.f32 0.0078125, %v952_v25  ;;  %v715_v15 = vmul.f32 %v10246_v32, %v10246_v32 }
 0x1dc   : > { %v8736_v43 = vpop.eup %8735  ;;  %v1035_v17 = vmul.f32 %v10254_v42, %v1019_v34 }
 0x1dd   : > { %743 = vadd.xlane.f32.xlu0 %v715_v15  ;;  %v10257_v63 = vsub.f32 %v10131_v6, %v684_v36  ;;  %v1020_v44 = vmul.f32 %v8736_v43, %v10086_v37  ;;  %v993_v51 = vadd.f32 1e-05, %v977_v38 }
 0x1de   : > { %v954_v31 = vpop.xlane.xlu1 %953  ;;  %v667_v9 = vpop.xlane.xlu0 %666  ;;  %v1051_v21 = vadd.f32 %v10266_v59, %v1035_v17 }
 0x1df   : > { %v978_v54 = vmul.f32 0.0078125, %v954_v31  ;;  %v685_v56 = vmul.f32 0.0078125, %v667_v9  ;;  %v716_v10 = vmul.f32 %v10257_v63, %v10257_v63  ;;  %v1036_v6 = vmul.f32 %v10254_v42, %v1020_v44 }
 0x1e0   : > { %v8738_v60 = vpop.eup %8737  ;;  %8745 = vrsqrt.f32 %v993_v51 }
 0x1e1   : > { %v994_v2 = vadd.f32 1e-05, %v978_v54  ;;  %745 = vadd.xlane.f32.xlu1 %v716_v10  ;;  %v10270_v37 = vsub.f32 %v10140_v35, %v685_v56  ;;  %v1052_v40 = vadd.f32 %v10266_v59, %v1036_v6  ;;  %v1021_v11 = vmul.f32 %v8738_v60, %v10089_v39 }
 0x1e2   : > { %v669_v20 = vpop.xlane.xlu1 %668  ;;  %v956_v3 = vpop.xlane.xlu0 %955 }
 0x1e3   : > { %8747 = vrsqrt.f32 %v994_v2  ;;  %v686_v22 = vmul.f32 0.0078125, %v669_v20  ;;  %v979_v27 = vmul.f32 0.0078125, %v956_v3  ;;  %v717_v13 = vmul.f32 %v10270_v37, %v10270_v37 }
 0x1e4   : > { %v8740_v23 = vpop.eup %8739  ;;  %v1252_v24 = vpack.c.bf16 %v1052_v40, %v1051_v21  ;;  %v1037_v39 = vmul.f32 %v10254_v42, %v1021_v11 }
 0x1e5   : > { %747 = vadd.xlane.f32.xlu0 %v717_v13  ;;  %v10278_v35 = vsub.f32 %v10152_v50, %v686_v22  ;;  %v1022_v30 = vmul.f32 %v8740_v23, %v10100_v47  ;;  %v8742_v49 = vpop.eup %8741  ;;  %v995_v33 = vadd.f32 1e-05, %v979_v27 }
 0x1e6   : > { %1373 = vmatmul.mubr.bf16.vlgmr.msra.gmra.mxu1 %v1252_v24  ;;  %v958_v25 = vpop.xlane.xlu1 %957  ;;  %v960_v34 = vpop.xlane.xlu0 %959  ;;  %v1023_v47 = vmul.f32 %v8742_v49, %v10103_v48  ;;  %v1053_v17 = vadd.f32 %v10266_v59, %v1037_v39 }
 0x1e7   : > { %v980_v36 = vmul.f32 0.0078125, %v958_v25  ;;  %v718_v38 = vmul.f32 %v10278_v35, %v10278_v35  ;;  %1382 = vmatprep.mubr.bf16.mxu1 %v14019_v46  ;;  %v1038_v43 = vmul.f32 %v10254_v42, %v1022_v30  ;;  %8749 = vrsqrt.f32 %v995_v33 }
 0x1e8   : > { %v8744_v15 = vpop.eup %8743  ;;  %v981_v51 = vmul.f32 0.0078125, %v960_v34  ;;  %v1039_v2 = vmul.f32 %v10254_v42, %v1023_v47 }
 0x1e9   : > { %v996_v50 = vadd.f32 1e-05, %v980_v36  ;;  %749 = vadd.xlane.f32.xlu1 %v718_v38  ;;  %v1024_v44 = vmul.f32 %v8744_v15, %v10114_v55  ;;  %v1054_v54 = vadd.f32 %v10266_v59, %v1038_v43 }
 0x1ea   : > { %v962_v31 = vpop.xlane.xlu1 %961  ;;  %v964_v9 = vpop.xlane.xlu0 %963  ;;  %v997_v20 = vadd.f32 1e-05, %v981_v51  ;;  %v1055_v13 = vadd.f32 %v10266_v59, %v1039_v2 }
 0x1eb   : > { %8751 = vrsqrt.f32 %v996_v50  ;;  %v982_v56 = vmul.f32 0.0078125, %v962_v31  ;;  %v1253_v10 = vpack.c.bf16 %v1054_v54, %v1053_v17  ;;  %v1040_v60 = vmul.f32 %v10254_v42, %v1024_v44 }
 0x1ec   : > { %v983_v24 = vmul.f32 0.0078125, %v964_v9 }
 0x1ed   : > { %v998_v6 = vadd.f32 1e-05, %v982_v56  ;;  %v8746_v3 = vpop.eup %8745  ;;  %v1056_v22 = vadd.f32 %v10266_v59, %v1040_v60 }
 0x1ee   : > { %1383 = vmatmul.mubr.bf16.gmra.mxu1 %v1253_v10  ;;  %v966_v48 = vpop.xlane.xlu1 %965  ;;  %v720_v55 = vpop.xlane.xlu0 %719  ;;  %v1025_v25 = vmul.f32 %v8746_v3, %v10119_v62  ;;  %v999_v50 = vadd.f32 1e-05, %v983_v24 }
 0x1ef   : > { %v984_v21 = vmul.f32 0.0078125, %v966_v48  ;;  %v751_v40 = vmul.f32 0.0078125, %v720_v55  ;;  %1392 = vmatprep.mubr.bf16.mxu1 %v14019_v46  ;;  %8753 = vrsqrt.f32 %v998_v6  ;;  %v1254_v36 = vpack.c.bf16 %v1056_v22, %v1055_v13 }
 0x1f0   : > { %v8748_v11 = vpop.eup %8747  ;;  %8755 = vrsqrt.f32 %v997_v20  ;;  %v1041_v44 = vmul.f32 %v10254_v42, %v1025_v25 }
 0x1f1   : > { %v767_v27 = vadd.f32 1e-05, %v751_v40  ;;  %v1026_v23 = vmul.f32 %v8748_v11, %v10128_v26  ;;  %v1000_v30 = vadd.f32 1e-05, %v984_v21 }
 0x1f2   : > { %v722_v49 = vpop.xlane.xlu1 %721  ;;  %v724_v33 = vpop.xlane.xlu0 %723  ;;  %v1057_v6 = vadd.f32 %v10266_v59, %v1041_v44 }
 0x1f3   : > { %v752_v34 = vmul.f32 0.0078125, %v722_v49  ;;  %v753_v39 = vmul.f32 0.0078125, %v724_v33  ;;  %8757 = vrsqrt.f32 %v767_v27  ;;  %v1042_v38 = vmul.f32 %v10254_v42, %v1026_v23 }
 0x1f4   : > { %8759 = vrsqrt.f32 %v1000_v30  ;;  %v8750_v51 = vpop.eup %8749 }
 0x1f5   : > { %v768_v15 = vadd.f32 1e-05, %v752_v34  ;;  %v769_v43 = vadd.f32 1e-05, %v753_v39  ;;  %v1058_v9 = vadd.f32 %v10266_v59, %v1042_v38  ;;  %v1027_v2 = vmul.f32 %v8750_v51, %v10137_v7 }
 0x1f6   : > { %1393 = vmatmul.mubr.bf16.gmra.mxu1 %v1254_v36  ;;  %v726_v47 = vpop.xlane.xlu1 %725  ;;  %v968_v26 = vpop.xlane.xlu0 %967 }
 0x1f7   : > { %8761 = vrsqrt.f32 %v768_v15  ;;  %v754_v31 = vmul.f32 0.0078125, %v726_v47  ;;  %1402 = vmatprep.mubr.bf16.mxu1 %v14019_v46  ;;  %v985_v56 = vmul.f32 0.0078125, %v968_v26  ;;  %v1255_v55 = vpack.c.bf16 %v1058_v9, %v1057_v6 }
 0x1f8   : > { %v8752_v62 = vpop.eup %8751  ;;  %8763 = vrsqrt.f32 %v769_v43  ;;  %v1043_v13 = vmul.f32 %v10254_v42, %v1027_v2 }
 0x1f9   : > { %v770_v17 = vadd.f32 1e-05, %v754_v31  ;;  %v1028_v54 = vmul.f32 %v8752_v62, %v10143_v41  ;;  %8765 = vrsqrt.f32 %v999_v50  ;;  %v1001_v22 = vadd.f32 1e-05, %v985_v56 }
 0x1fa   : > { %v970_v10 = vpop.xlane.xlu1 %969  ;;  %v728_v60 = vpop.xlane.xlu0 %727  ;;  %v1059_v38 = vadd.f32 %v10266_v59, %v1043_v13 }
 0x1fb   : > { %8767 = vrsqrt.f32 %v770_v17  ;;  %v986_v20 = vmul.f32 0.0078125, %v970_v10  ;;  %v755_v48 = vmul.f32 0.0078125, %v728_v60  ;;  %v1044_v3 = vmul.f32 %v10254_v42, %v1028_v54 }
 0x1fc   : > { %v8754_v21 = vpop.eup %8753 }
 0x1fd   : > { %v1002_v40 = vadd.f32 1e-05, %v986_v20  ;;  %v771_v11 = vadd.f32 1e-05, %v755_v48  ;;  %v8756_v23 = vpop.eup %8755  ;;  %v1060_v7 = vadd.f32 %v10266_v59, %v1044_v3  ;;  %v1030_v49 = vmul.f32 %v8754_v21, %v10160_v57 }
 0x1fe   : > { %1403 = vmatmul.mubr.bf16.gmra.mxu1 %v1255_v55  ;;  %v730_v41 = vpop.xlane.xlu1 %729  ;;  %v732_v27 = vpop.xlane.xlu0 %731  ;;  %v1029_v43 = vmul.f32 %v8756_v23, %v10149_v8 }
 0x1ff   : > { %8769 = vrsqrt.f32 %v1002_v40  ;;  %v756_v24 = vmul.f32 0.0078125, %v730_v41  ;;  %v757_v30 = vmul.f32 0.0078125, %v732_v27  ;;  %1412 = vmatprep.mubr.bf16.mxu1 %v14019_v46  ;;  %v1256_v51 = vpack.c.bf16 %v1060_v7, %v1059_v38 }
 0x200   : > { %8771 = vrsqrt.f32 %v771_v11  ;;  %v8758_v33 = vpop.eup %8757  ;;  %v1046_v31 = vmul.f32 %v10254_v42, %v1030_v49  ;;  %v1045_v8 = vmul.f32 %v10254_v42, %v1029_v43 }
 0x201   : > { %v772_v25 = vadd.f32 1e-05, %v756_v24  ;;  %v773_v34 = vadd.f32 1e-05, %v757_v30  ;;  %8773 = vrsqrt.f32 %v1001_v22  ;;  %v799_v15 = vmul.f32 %v8758_v33, %v10173_v4  ;;  %v8760_v50 = vpop.eup %8759 }
 0x202   : > { %v734_v39 = vpop.xlane.xlu1 %733  ;;  %v736_v36 = vpop.xlane.xlu0 %735  ;;  %v1062_v48 = vadd.f32 %v10266_v59, %v1046_v31  ;;  %v1061_v40 = vadd.f32 %v10266_v59, %v1045_v8 }
 0x203   : > { %8775 = vrsqrt.f32 %v772_v25  ;;  %v758_v47 = vmul.f32 0.0078125, %v734_v39  ;;  %v759_v26 = vmul.f32 0.0078125, %v736_v36  ;;  %v821_v57 = vmul.f32 %v10254_v42, %v799_v15 }
 0x204   : > { %v8762_v44 = vpop.eup %8761  ;;  %8777 = vrsqrt.f32 %v773_v34  ;;  %v1257_v13 = vpack.c.bf16 %v1062_v48, %v1061_v40 }
 0x205   : > { %v8764_v62 = vpop.eup %8763  ;;  %v774_v9 = vadd.f32 1e-05, %v758_v47  ;;  %v775_v17 = vadd.f32 1e-05, %v759_v26  ;;  %v800_v54 = vmul.f32 %v8762_v44, %v10178_v28  ;;  %v843_v20 = vadd.f32 %v10266_v59, %v821_v57 }
 0x206   : > { %1413 = vmatmul.mubr.bf16.gmra.mxu1 %v1256_v51  ;;  %v738_v4 = vpop.xlane.xlu1 %737  ;;  %v801_v56 = vmul.f32 %v8764_v62, %v10183_v14  ;;  %v8766_v10 = vpop.eup %8765  ;;  %v1032_v28 = vmul.f32 %v8760_v50, %v10166_v0 }
 0x207   : > { %8779 = vrsqrt.f32 %v774_v9  ;;  %v760_v60 = vmul.f32 0.0078125, %v738_v4  ;;  %1422 = vmatprep.mubr.bf16.mxu1 %v14019_v46  ;;  %v822_v6 = vmul.f32 %v10254_v42, %v800_v54  ;;  %v1031_v11 = vmul.f32 %v8766_v10, %v10163_v58 }
 0x208   : > { %v8768_v2 = vpop.eup %8767  ;;  %8781 = vrsqrt.f32 %v775_v17  ;;  %v823_v21 = vmul.f32 %v10254_v42, %v801_v56  ;;  %v1048_v23 = vmul.f32 %v10254_v42, %v1032_v28 }
 0x209   : > { %v776_v55 = vadd.f32 1e-05, %v760_v60  ;;  %v844_v3 = vadd.f32 %v10266_v59, %v822_v6  ;;  %v802_v14 = vmul.f32 %v8768_v2, %v10190_v45  ;;  %v1047_v30 = vmul.f32 %v10254_v42, %v1031_v11 }
 0x20a   : > { %v845_v24 = vadd.f32 %v10266_v59, %v823_v21  ;;  %v1064_v25 = vadd.f32 %v10266_v59, %v1048_v23 }
 0x20b   : > { %8783 = vrsqrt.f32 %v776_v55  ;;  %v1099_v22 = vpack.c.bf16 %v844_v3, %v843_v20  ;;  %v824_v41 = vmul.f32 %v10254_v42, %v802_v14  ;;  %v1063_v15 = vadd.f32 %v10266_v59, %v1047_v30 }
 0x20c   : > { %v8770_v27 = vpop.eup %8769 }
 0x20d   : > { %v8772_v0 = vpop.eup %8771  ;;  %8139 = vmatprep.mubr.bf16.mxu0 %v1099_v22  ;;  %v846_v45 = vadd.f32 %v10266_v59, %v824_v41  ;;  %v1034_v34 = vmul.f32 %v8770_v27, %v10197_v52  ;;  %v1258_v26 = vpack.c.bf16 %v1064_v25, %v1063_v15 }
 0x20e   : > { %1423 = vmatmul.mubr.bf16.gmra.mxu1 %v1257_v13  ;;  %v803_v7 = vmul.f32 %v8772_v0, %v10204_v18  ;;  %v8774_v58 = vpop.eup %8773 }
 0x20f   : > { %v1100_v49 = vpack.c.bf16 %v846_v45, %v845_v24  ;;  %1432 = vmatprep.mubr.bf16.mxu1 %v14019_v46  ;;  %v1033_v18 = vmul.f32 %v8774_v58, %v10193_v16  ;;  %v1050_v44 = vmul.f32 %v10254_v42, %v1034_v34 }
 0x210   : > { %v8776_v33 = vpop.eup %8775  ;;  %v825_v38 = vmul.f32 %v10254_v42, %v803_v7 }
 0x211   : > { %v8778_v39 = vpop.eup %8777  ;;  %8140 = vmatmul.mubr.bf16.vlgmr.msra.gmra.mxu0 %v1100_v49  ;;  %v804_v36 = vmul.f32 %v8776_v33, %v10209_v19  ;;  %v1066_v54 = vadd.f32 %v10266_v59, %v1050_v44 }
 0x212   : > { %v805_v43 = vmul.f32 %v8778_v39, %v10214_v1  ;;  %v847_v52 = vadd.f32 %v10266_v59, %v825_v38  ;;  %v1049_v1 = vmul.f32 %v10254_v42, %v1033_v18 }
 0x213   : > { %v826_v50 = vmul.f32 %v10254_v42, %v804_v36 }
 0x214   : > { %v8780_v47 = vpop.eup %8779  ;;  %v827_v31 = vmul.f32 %v10254_v42, %v805_v43  ;;  %v1065_v10 = vadd.f32 %v10266_v59, %v1049_v1 }
 0x215   : > { %v8782_v51 = vpop.eup %8781  ;;  %v848_v57 = vadd.f32 %v10266_v59, %v826_v50  ;;  %v806_v19 = vmul.f32 %v8780_v47, %v10221_v12 }
 0x216   : > { %1433 = vmatmul.mubr.bf16.gmra.mxu1 %v1258_v26  ;;  %v807_v16 = vmul.f32 %v8782_v51, %v10224_v5  ;;  %v849_v4 = vadd.f32 %v10266_v59, %v827_v31  ;;  %v1259_v6 = vpack.c.bf16 %v1066_v54, %v1065_v10 }
 0x217   : > { %v1101_v62 = vpack.c.bf16 %v848_v57, %v847_v52  ;;  %1442 = vmatprep.mubr.bf16.mxu1 %v14019_v46  ;;  %v828_v9 = vmul.f32 %v10254_v42, %v806_v19 }
 0x218   : > { %v8784_v17 = vpop.eup %8783  ;;  %v829_v56 = vmul.f32 %v10254_v42, %v807_v16 }
 0x219   : > { %8143 = vmatprep.mubr.bf16.mxu0 %v1101_v62  ;;  %v850_v12 = vadd.f32 %v10266_v59, %v828_v9  ;;  %v808_v8 = vmul.f32 %v8784_v17, %v10231_v29 }
 0x21a   : > { %v851_v2 = vadd.f32 %v10266_v59, %v829_v56 }
 0x21b   : > { %v1102_v5 = vpack.c.bf16 %v850_v12, %v849_v4  ;;  %v830_v60 = vmul.f32 %v10254_v42, %v808_v8 }
 0x21d   : > { %8144 = vmatmul.mubr.bf16.gmra.mxu0 %v1102_v5  ;;  %v852_v20 = vadd.f32 %v10266_v59, %v830_v60 }
 0x21e   : > { %1443 = vmatmul.mubr.bf16.gmra.mxu1 %v1259_v6 }
 0x21f   : > { %v1103_v48 = vpack.c.bf16 %v852_v20, %v851_v2 }
 0x221   : > { %8147 = vmatprep.mubr.bf16.mxu0 %v1103_v48 }
 0x25a   : > { %v740_v28 = vpop.xlane.xlu0 %739 }
 0x25b   : > { %v761_v55 = vmul.f32 0.0078125, %v740_v28 }
 0x25d   : > { %v777_v3 = vadd.f32 1e-05, %v761_v55 }
 0x25e   : > { %v742_v29 = vpop.xlane.xlu1 %741 }
 0x25f   : > { %8785 = vrsqrt.f32 %v777_v3  ;;  %v762_v14 = vmul.f32 0.0078125, %v742_v29 }
 0x261   : > { %v778_v21 = vadd.f32 1e-05, %v762_v14 }
 0x263   : > { %8787 = vrsqrt.f32 %v778_v21 }
 0x266   : > { %v744_v40 = vpop.xlane.xlu0 %743 }
 0x267   : > { %v763_v11 = vmul.f32 0.0078125, %v744_v40 }
 0x269   : > { %v779_v22 = vadd.f32 1e-05, %v763_v11 }
 0x26a   : > { %v746_v41 = vpop.xlane.xlu1 %745 }
 0x26b   : > { %8789 = vrsqrt.f32 %v779_v22  ;;  %v764_v27 = vmul.f32 0.0078125, %v746_v41 }
 0x26c   : > { %v8786_v13 = vpop.eup %8785 }
 0x26d   : > { %v780_v23 = vadd.f32 1e-05, %v764_v27  ;;  %v809_v0 = vmul.f32 %v8786_v13, %v10236_v53 }
 0x26e   : > { %v748_v24 = vpop.xlane.xlu0 %747 }
 0x26f   : > { %8791 = vrsqrt.f32 %v780_v23  ;;  %v765_v45 = vmul.f32 0.0078125, %v748_v24  ;;  %v831_v49 = vmul.f32 %v10254_v42, %v809_v0 }
 0x270   : > { %v8788_v30 = vpop.eup %8787 }
 0x271   : > { %v781_v7 = vadd.f32 1e-05, %v765_v45  ;;  %v810_v58 = vmul.f32 %v8788_v30, %v10241_v61  ;;  %v853_v36 = vadd.f32 %v10266_v59, %v831_v49 }
 0x272   : > { %v750_v33 = vpop.xlane.xlu1 %749 }
 0x273   : > { %8793 = vrsqrt.f32 %v781_v7  ;;  %v766_v25 = vmul.f32 0.0078125, %v750_v33  ;;  %v832_v34 = vmul.f32 %v10254_v42, %v810_v58 }
 0x275   : > { %v782_v39 = vadd.f32 1e-05, %v766_v25  ;;  %v854_v38 = vadd.f32 %v10266_v59, %v832_v34 }
 0x277   : > { %8795 = vrsqrt.f32 %v782_v39  ;;  %v1104_v53 = vpack.c.bf16 %v854_v38, %v853_v36 }
 0x278   : > { %v8790_v15 = vpop.eup %8789 }
 0x279   : > { %8148 = vmatmul.mubr.bf16.gmra.mxu0 %v1104_v53  ;;  %v811_v43 = vmul.f32 %v8790_v15, %v10246_v32 }
 0x27b   : > { %v833_v50 = vmul.f32 %v10254_v42, %v811_v43 }
 0x27c   : > { %v8792_v18 = vpop.eup %8791 }
 0x27d   : > { %v812_v61 = vmul.f32 %v8792_v18, %v10257_v63  ;;  %v855_v44 = vadd.f32 %v10266_v59, %v833_v50 }
 0x27f   : > { %v834_v47 = vmul.f32 %v10254_v42, %v812_v61 }
 0x280   : > { %v8794_v26 = vpop.eup %8793 }
 0x281   : > { %v856_v51 = vadd.f32 %v10266_v59, %v834_v47  ;;  %v813_v52 = vmul.f32 %v8794_v26, %v10270_v37 }
 0x283   : > { %v1105_v57 = vpack.c.bf16 %v856_v51, %v855_v44  ;;  %v835_v32 = vmul.f32 %v10254_v42, %v813_v52 }
 0x284   : > { %v8796_v19 = vpop.eup %8795 }
 0x285   : > { %8151 = vmatprep.mubr.bf16.mxu0 %v1105_v57  ;;  %v814_v31 = vmul.f32 %v8796_v19, %v10278_v35  ;;  %v857_v1 = vadd.f32 %v10266_v59, %v835_v32 }
 0x287   : > { %v836_v63 = vmul.f32 %v10254_v42, %v814_v31 }
 0x289   : > { %v858_v16 = vadd.f32 %v10266_v59, %v836_v63 }
 0x28b   : > { %v1106_v62 = vpack.c.bf16 %v858_v16, %v857_v1 }
 0x28d   : > { %8152 = vmatmul.mubr.bf16.gmra.mxu0 %v1106_v62 }
 0x2a6   : > { %v1374_v9 = vpop.f32.mrf.mxu1 }
 0x2a8   : > { %v1376_v17 = vpop.f32.mrf.mxu1 }
 0x2aa   : > { %v1378_v54 = vpop.f32.mrf.mxu1 }
 0x2ab   : > { %v10378_v4 = vpack.c.bf16 %v1378_v54, %v1374_v9 }
 0x2ac   : > { %v1380_v37 = vpop.f32.mrf.mxu1 }
 0x2ad   : > { %2108 = vrot.lane.b32.xlu0 %v10378_v4, %s9654_s18  ;;  %v10419_v23 = vpack.c.bf16 %v1380_v37, %v1376_v17  ;;  %v1507_v18 = vsel %vm1493_vm0, %v10378_v4, 0 }
 0x2ae   : > { %v1384_v35 = vpop.f32.mrf.mxu1 }
 0x2b0   : > { %v1386_v12 = vpop.f32.mrf.mxu1 }
 0x2b2   : > { %v1388_v8 = vpop.f32.mrf.mxu1 }
 0x2b3   : > { %v10382_v42 = vpack.c.bf16 %v1388_v8, %v1384_v35 }
 0x2b4   : > { %v1390_v56 = vpop.f32.mrf.mxu1 }
 0x2b5   : > { %2110 = vrot.lane.b32.xlu0 %v10382_v42, %s9654_s18  ;;  %v10411_v22 = vpack.c.bf16 %v1390_v56, %v1386_v12  ;;  %v1510_v49 = vsel %vm1493_vm0, %v10382_v42, 0 }
 0x2b6   : > { %v1394_v59 = vpop.f32.mrf.mxu1 }
 0x2b8   : > { %v1396_v10 = vpop.f32.mrf.mxu1 }
 0x2ba   : > { %v1398_v5 = vpop.f32.mrf.mxu1 }
 0x2bb   : > { %v10386_v60 = vpack.c.bf16 %v1398_v5, %v1394_v59 }
 0x2bc   : > { %v1400_v6 = vpop.f32.mrf.mxu1 }
 0x2bd   : > { %2112 = vrot.lane.b32.xlu1 %v10386_v60, %s9654_s18  ;;  %v10402_v21 = vpack.c.bf16 %v1400_v6, %v1396_v10  ;;  %v1513_v27 = vsel %vm1493_vm0, %v10386_v60, 0 }
 0x2be   : > { %v1404_v2 = vpop.f32.mrf.mxu1 }
 0x2c0   : > { %v1406_v20 = vpop.f32.mrf.mxu1 }
 0x2c2   : > { %v1408_v48 = vpop.f32.mrf.mxu1 }
 0x2c3   : > { %v10390_v28 = vpack.c.bf16 %v1408_v48, %v1404_v2 }
 0x2c4   : > { %v1410_v55 = vpop.f32.mrf.mxu1 }
 0x2c5   : > { %v10392_v3 = vpack.c.bf16 %v1410_v55, %v1406_v20  ;;  %8459 = vmatprep.subr.msk.bf16.mxu0 %vm1493_vm0, %v10390_v28  ;;  %2114 = vrot.lane.b32.xlu0 %v10390_v28, %s9654_s18  ;;  %v1516_v29 = vsel %vm1493_vm0, %v10390_v28, 0 }
 0x2c6   : > { %v10400_v14 = vpop.f32.mrf.mxu1  ;;  %8156 = vmatpush3.bf16.xpose.msra.mxu0 %v1516_v29 }
 0x2c7   : > { %8460 = vmatprep.subr.msk.bf16.mxu0 %vm1493_vm0, %v10386_v60  ;;  %8187 = vmatprep.subr.bf16.mxu1 %v10392_v3 }
 0x2c8   : > { %v10407_v40 = vpop.f32.mrf.mxu1  ;;  %8188 = vmatpush3.bf16.msra.mxu1 %v10392_v3 }
 0x2c9   : > { %8189 = vmatprep.subr.bf16.mxu1 %v10402_v21 }
 0x2ca   : > { %v1418_v11 = vpop.f32.mrf.mxu1 }
 0x2cb   : > { %v10469_v12 = vpack.c.bf16 %v1418_v11, %v10400_v14 }
 0x2cc   : > { %v10413_v41 = vpop.f32.mrf.mxu1  ;;  %8190 = vmatpush3.bf16.msra.mxu1 %v10402_v21 }
 0x2cd   : > { %8191 = vmatprep.subr.bf16.mxu1 %v10411_v22  ;;  %v1596_v10 = vsel %vm1493_vm0, %v10469_v12, 0 }
 0x2ce   : > { %v1424_v13 = vpop.f32.mrf.mxu1  ;;  %8158 = vmatpush3.bf16.xpose.msra.mxu0 %v1513_v27 }
 0x2cf   : > { %8461 = vmatprep.subr.msk.bf16.mxu0 %vm1493_vm0, %v10382_v42 }
 0x2d0   : > { %v10423_v0 = vpop.f32.mrf.mxu1  ;;  %8192 = vmatpush3.bf16.msra.mxu1 %v10411_v22 }
 0x2d1   : > { %8193 = vmatprep.subr.bf16.mxu1 %v10419_v23  ;;  %v8141_v24 = vpop.f32.mrf.mxu0 }
 0x2d2   : > { %v1428_v45 = vpop.f32.mrf.mxu1  ;;  %v1455_v44 = vmul.f32 0.17677669, %v8141_v24 }
 0x2d3   : > { %v1189_v30 = vpop.f32.mrf.mxu0  ;;  %v10460_v37 = vpack.c.bf16 %v1428_v45, %v1424_v13 }
 0x2d4   : > { %v10427_v7 = vpop.f32.mrf.mxu1  ;;  %8194 = vmatpush3.bf16.msra.mxu1 %v10419_v23  ;;  %v1453_v34 = vmul.f32 0.17677669, %v1189_v30 }
 0x2d5   : > { %v8142_v58 = vpop.f32.mrf.mxu0  ;;  %v1599_v8 = vsel %vm1493_vm0, %v10460_v37, 0 }
 0x2d6   : > { %v1434_v33 = vpop.f32.mrf.mxu1  ;;  %8160 = vmatpush3.bf16.xpose.msra.mxu0 %v1510_v49  ;;  %v1456_v50 = vmul.f32 0.17677669, %v8142_v58  ;;  %v10502_v58 = vpack.c.bf16 %v10427_v7, %v10423_v0  ;;  %v10508_v49 = vpack.c.bf16 %v10413_v41, %v10407_v40 }
 0x2d7   : > { %8462 = vmatprep.subr.msk.bf16.mxu0 %vm1493_vm0, %v10378_v4  ;;  %v1192_v25 = vpop.f32.mrf.mxu0 }
 0x2d8   : > { %v1454_v39 = vmul.f32 0.17677669, %v1192_v25  ;;  %v1436_v36 = vpop.f32.mrf.mxu1  ;;  %v10440_v57 = vpack.c.bf16 %v1456_v50, %v1455_v44 }
 0x2da   : > { %v10434_v38 = vpack.c.bf16 %v1454_v39, %v1453_v34  ;;  %v1438_v53 = vpop.f32.mrf.mxu1 }
 0x2db   : > { %v10444_v1 = vpack.c.bf16 %v1438_v53, %v1434_v33 }
 0x2dc   : > { %v1440_v15 = vpop.f32.mrf.mxu1  ;;  %8163 = vmatprep.mubr.msk.bf16.mxu0 %vm1493_vm0, %v10434_v38 }
 0x2dd   : > { %v8145_v43 = vpop.f32.mrf.mxu0  ;;  %v1602_v35 = vsel %vm1493_vm0, %v10444_v1, 0  ;;  %v10494_v30 = vpack.c.bf16 %v1440_v15, %v1436_v36 }
 0x2de   : > { %v1444_v61 = vpop.f32.mrf.mxu1  ;;  %8162 = vmatpush3.bf16.xpose.msra.mxu0 %v1507_v18  ;;  %v1459_v17 = vmul.f32 0.17677669, %v8145_v43 }
 0x2df   : > { %v1205_v47 = vpop.f32.mrf.mxu0 }
 0x2e0   : > { %v1446_v26 = vpop.f32.mrf.mxu1  ;;  %v1457_v32 = vmul.f32 0.17677669, %v1205_v47 }
 0x2e1   : > { %v8146_v51 = vpop.f32.mrf.mxu0 }
 0x2e2   : > { %v1448_v52 = vpop.f32.mrf.mxu1  ;;  %v1460_v9 = vmul.f32 0.17677669, %v8146_v51 }
 0x2e3   : > { %v10442_v19 = vpack.c.bf16 %v1448_v52, %v1444_v61  ;;  %v1208_v31 = vpop.f32.mrf.mxu0 }
 0x2e4   : > { %v1458_v63 = vmul.f32 0.17677669, %v1208_v31  ;;  %v10458_v54 = vpack.c.bf16 %v1460_v9, %v1459_v17  ;;  %v1450_v56 = vpop.f32.mrf.mxu1 }
 0x2e5   : > { %8164 = vmatmul.mubr.msk.bf16.vlgmr.msra.gmra.mxu0 %vm1493_vm0, %v10440_v57  ;;  %8463 = vmatprep.subr.msk.bf16.mxu0 %vm1493_vm0, %v10442_v19  ;;  %v1605_v16 = vsel %vm1493_vm0, %v10442_v19, 0  ;;  %v10475_v59 = vpack.c.bf16 %v1450_v56, %v1446_v26 }
 0x2e6   : > { %v10452_v62 = vpack.c.bf16 %v1458_v63, %v1457_v32  ;;  %8172 = vmatpush3.bf16.xpose.msra.mxu0 %v1605_v16 }
 0x2e7   : > { %8464 = vmatprep.subr.msk.bf16.mxu0 %vm1493_vm0, %v10444_v1 }
 0x2e8   : > { %8167 = vmatprep.mubr.msk.bf16.mxu0 %vm1493_vm0, %v10452_v62 }
 0x2ed   : > { %8168 = vmatmul.mubr.msk.bf16.gmra.mxu0 %vm1493_vm0, %v10458_v54 }
 0x2ee   : > { %8174 = vmatpush3.bf16.xpose.msra.mxu0 %v1602_v35 }
 0x2ef   : > { %8465 = vmatprep.subr.msk.bf16.mxu0 %vm1493_vm0, %v10460_v37 }
 0x2f6   : > { %8176 = vmatpush3.bf16.xpose.msra.mxu0 %v1599_v8 }
 0x2f7   : > { %8466 = vmatprep.subr.msk.bf16.mxu0 %vm1493_vm0, %v10469_v12 }
 0x2fe   : > { %8178 = vmatpush3.bf16.xpose.msra.mxu0 %v1596_v10 }
 0x2ff   : > { %8203 = vmatprep.subr.bf16.mxu0 %v10475_v59 }
 0x31f   : > { %v10480_v5 = vpop.permute.xlu0 %2108 }
 0x327   : > { %v10482_v6 = vpop.permute.xlu0 %2110 }
 0x337   : > { %v10484_v2 = vpop.permute.xlu0 %2114 }
 0x338   : > { %8467 = vmatprep.subr.msk.bf16.mxu1 %vm1493_vm0, %v10484_v2 }
 0x339   : > { %v8149_v20 = vpop.f32.mrf.mxu0 }
 0x33a   : > { %v1463_v13 = vmul.f32 0.17677669, %v8149_v20 }
 0x33b   : > { %v1221_v48 = vpop.f32.mrf.mxu0 }
 0x33c   : > { %v1461_v11 = vmul.f32 0.17677669, %v1221_v48 }
 0x33d   : > { %v8150_v55 = vpop.f32.mrf.mxu0 }
 0x33e   : > { %v1464_v29 = vmul.f32 0.17677669, %v8150_v55 }
 0x33f   : > { %v1224_v14 = vpop.f32.mrf.mxu0 }
 0x340   : > { %v1462_v27 = vmul.f32 0.17677669, %v1224_v14  ;;  %v10490_v45 = vpack.c.bf16 %v1464_v29, %v1463_v13 }
 0x342   : > { %v10488_v24 = vpack.c.bf16 %v1462_v27, %v1461_v11 }
 0x344   : > { %8179 = vmatprep.mubr.msk.bf16.mxu0 %vm1493_vm0, %v10488_v24 }
 0x345   : > { %8180 = vmatmul.mubr.msk.bf16.vlgmr.msra.gmra.mxu0 %vm1493_vm0, %v10490_v45 }
 0x346   : > { %8204 = vmatpush3.bf16.msra.mxu0 %v10475_v59 }
 0x347   : > { %8205 = vmatprep.subr.bf16.mxu0 %v10494_v30 }
 0x34a   : > { %8206 = vmatpush3.bf16.msra.mxu0 %v10494_v30 }
 0x34b   : > { %8207 = vmatprep.subr.bf16.mxu0 %v10502_v58 }
 0x34d   : > { %v8153_v33 = vpop.f32.mrf.mxu0 }
 0x34e   : > { %8208 = vmatpush3.bf16.msra.mxu0 %v10502_v58  ;;  %v1467_v53 = vmul.f32 0.17677669, %v8153_v33  ;;  %v10559_v33 = vpop.permute.xlu1 %2112 }
 0x34f   : > { %8209 = vmatprep.subr.bf16.mxu0 %v10508_v49  ;;  %v1237_v25 = vpop.f32.mrf.mxu0 }
 0x350   : > { %v1465_v7 = vmul.f32 0.17677669, %v1237_v25 }
 0x351   : > { %v8154_v34 = vpop.f32.mrf.mxu0 }
 0x352   : > { %8210 = vmatpush3.bf16.msra.mxu0 %v10508_v49  ;;  %v1468_v39 = vmul.f32 0.17677669, %v8154_v34 }
 0x353   : > { %v1240_v0 = vpop.f32.mrf.mxu0 }
 0x354   : > { %v1466_v36 = vmul.f32 0.17677669, %v1240_v0  ;;  %v10515_v43 = vpack.c.bf16 %v1468_v39, %v1467_v53 }
 0x356   : > { %v10513_v15 = vpack.c.bf16 %v1466_v36, %v1465_v7 }
 0x358   : > { %8183 = vmatprep.mubr.msk.bf16.mxu0 %vm1493_vm0, %v10513_v15 }
 0x359   : > { %8184 = vmatmul.mubr.msk.bf16.gmra.mxu0 %vm1493_vm0, %v10515_v43 }
 0x3a5   : > { %v8165_v40 = vpop.f32.mrf.mxu0 }
 0x3a6   : > { %v1679_v41 = vsel %vm1672_vm1, %v8165_v40, -inf }
 0x3a7   : > { %1680 = vmax.xlane.f32.xlu0 %v1679_v41  ;;  %v1552_v18 = vpop.f32.mrf.mxu0 }
 0x3a8   : > { %v1673_v50 = vsel %vm1672_vm1, %v1552_v18, -inf }
 0x3a9   : > { %v8166_v61 = vpop.f32.mrf.mxu0 }
 0x3aa   : > { %v1682_v47 = vsel %vm1672_vm1, %v8166_v61, -inf }
 0x3ab   : > { %1674 = vmax.xlane.f32.xlu0 %v1673_v50  ;;  %1683 = vmax.xlane.f32.xlu1 %v1682_v47  ;;  %v1555_v26 = vpop.f32.mrf.mxu0 }
 0x3ac   : > { %v1676_v51 = vsel %vm1672_vm1, %v1555_v26, -inf }
 0x3ad   : > { %v8169_v44 = vpop.f32.mrf.mxu0 }
 0x3ae   : > { %v1691_v52 = vsel %vm1672_vm1, %v8169_v44, -inf }
 0x3af   : > { %1677 = vmax.xlane.f32.xlu1 %v1676_v51  ;;  %1692 = vmax.xlane.f32.xlu0 %v1691_v52  ;;  %v1568_v31 = vpop.f32.mrf.mxu0 }
 0x3b0   : > { %v1685_v63 = vsel %vm1672_vm1, %v1568_v31, -inf }
 0x3b1   : > { %v8170_v32 = vpop.f32.mrf.mxu0 }
 0x3b2   : > { %v1694_v16 = vsel %vm1672_vm1, %v8170_v32, -inf }
 0x3b3   : > { %1686 = vmax.xlane.f32.xlu0 %v1685_v63  ;;  %1695 = vmax.xlane.f32.xlu1 %v1694_v16  ;;  %v1571_v9 = vpop.f32.mrf.mxu0 }
 0x3b4   : > { %v1688_v17 = vsel %vm1672_vm1, %v1571_v9, -inf }
 0x3b7   : > { %1689 = vmax.xlane.f32.xlu1 %v1688_v17 }
 0x405   : > { %v10529_v35 = vpop.f32.mrf.mxu0 }
 0x406   : > { %v1703_v8 = vsel %vm1672_vm1, %v10529_v35, -inf }
 0x407   : > { %1704 = vmax.xlane.f32.xlu0 %v1703_v8  ;;  %v10533_v56 = vpop.f32.mrf.mxu0 }
 0x408   : > { %v1697_v20 = vsel %vm1672_vm1, %v10533_v56, -inf }
 0x409   : > { %v10535_v10 = vpop.f32.mrf.mxu0 }
 0x40a   : > { %v1706_v48 = vsel %vm1672_vm1, %v10535_v10, -inf }
 0x40b   : > { %1698 = vmax.xlane.f32.xlu0 %v1697_v20  ;;  %1707 = vmax.xlane.f32.xlu1 %v1706_v48  ;;  %v10541_v55 = vpop.f32.mrf.mxu0 }
 0x40c   : > { %v1700_v29 = vsel %vm1672_vm1, %v10541_v55, -inf }
 0x40f   : > { %1701 = vmax.xlane.f32.xlu1 %v1700_v29 }
 0x419   : > { %v10545_v14 = vpop.f32.mrf.mxu0 }
 0x41a   : > { %v1715_v11 = vsel %vm1672_vm1, %v10545_v14, -inf }
 0x41b   : > { %1716 = vmax.xlane.f32.xlu0 %v1715_v11  ;;  %v10549_v27 = vpop.f32.mrf.mxu0 }
 0x41c   : > { %v1709_v13 = vsel %vm1672_vm1, %v10549_v27, -inf }
 0x41f   : > { %1710 = vmax.xlane.f32.xlu0 %v1709_v13  ;;  %v10563_v13 = vpop.f32.mrf.mxu0 }
 0x420   : > { %2098 = vrot.lane.b32.xlu1 %v10440_v57, %s9654_s18 }
 0x424   : > { %2227 = vrot.lane.b32.xlu1 %v10442_v19, %s9654_s18 }
 0x428   : > { %2225 = vrot.lane.b32.xlu1 %v10444_v1, %s9654_s18 }
 0x430   : > { %v1681_v25 = vpop.xlane.xlu0 %1680 }
 0x431   : > { %v1723_v7 = vsub.f32 %v8165_v40, %v1681_v25  ;;  %v10567_v25 = vpop.f32.mrf.mxu0 }
 0x433   : > { %v1741_v41 = vmul.f32 1.442695, %v1723_v7 }
 0x434   : > { %v1684_v34 = vpop.xlane.xlu1 %1683  ;;  %v1675_v39 = vpop.xlane.xlu0 %1674 }
 0x435   : > { %2096 = vrot.lane.b32.xlu0 %v10434_v38, %s9654_s18  ;;  %v1724_v36 = vsub.f32 %v8166_v61, %v1684_v34  ;;  %v1721_v50 = vsub.f32 %v1552_v18, %v1675_v39  ;;  %8797 = vpow2.f32 %v1741_v41 }
 0x437   : > { %v1743_v51 = vmul.f32 1.442695, %v1724_v36  ;;  %v1737_v63 = vmul.f32 1.442695, %v1721_v50 }
 0x438   : > { %v1678_v0 = vpop.xlane.xlu1 %1677  ;;  %v1693_v53 = vpop.xlane.xlu0 %1692 }
 0x439   : > { %v1722_v52 = vsub.f32 %v1555_v26, %v1678_v0  ;;  %v1727_v16 = vsub.f32 %v8169_v44, %v1693_v53  ;;  %8799 = vpow2.f32 %v1743_v51  ;;  %v1718_v44 = vsel %vm1672_vm1, %v10563_v13, -inf }
 0x43a   : > { %8801 = vpow2.f32 %v1737_v63 }
 0x43b   : > { %v1739_v17 = vmul.f32 1.442695, %v1722_v52  ;;  %v1749_v29 = vmul.f32 1.442695, %v1727_v16 }
 0x43c   : > { %v1696_v47 = vpop.xlane.xlu1 %1695  ;;  %v1687_v20 = vpop.xlane.xlu0 %1686 }
 0x43d   : > { %v1728_v8 = vsub.f32 %v8170_v32, %v1696_v47  ;;  %v1725_v11 = vsub.f32 %v1568_v31, %v1687_v20  ;;  %8803 = vpow2.f32 %v1739_v17  ;;  %v1712_v31 = vsel %vm1672_vm1, %v10567_v25, -inf }
 0x43e   : > { %8805 = vpow2.f32 %v1749_v29 }
 0x43f   : > { %v1751_v40 = vmul.f32 1.442695, %v1728_v8  ;;  %v1745_v18 = vmul.f32 1.442695, %v1725_v11 }
 0x440   : > { %v1690_v48 = vpop.xlane.xlu1 %1689 }
 0x441   : > { %v1726_v61 = vsub.f32 %v1571_v9, %v1690_v48  ;;  %8807 = vpow2.f32 %v1751_v40 }
 0x442   : > { %8809 = vpow2.f32 %v1745_v18  ;;  %v10569_v32 = vpop.eup %8797 }
 0x443   : > { %v1747_v26 = vmul.f32 1.442695, %v1726_v61  ;;  %v1775_v0 = vsel %vm1672_vm1, %v10569_v32, 0.0 }
 0x445   : > { %8811 = vpow2.f32 %v1747_v26 }
 0x446   : > { %v10573_v9 = vpop.eup %8799 }
 0x447   : > { %v10575_v34 = vpop.eup %8801  ;;  %v1778_v39 = vsel %vm1672_vm1, %v10573_v9, 0.0 }
 0x448   : > { %v1769_v41 = vsel %vm1672_vm1, %v10575_v34, 0.0 }
 0x44a   : > { %v10581_v7 = vpop.eup %8803 }
 0x44b   : > { %v10583_v36 = vpop.eup %8805  ;;  %v1772_v53 = vsel %vm1672_vm1, %v10581_v7, 0.0 }
 0x44c   : > { %1719 = vmax.xlane.f32.xlu1 %v1718_v44  ;;  %v1787_v52 = vsel %vm1672_vm1, %v10583_v36, 0.0 }
 0x44e   : > { %v10589_v50 = vpop.eup %8807 }
 0x44f   : > { %v10591_v47 = vpop.eup %8809  ;;  %v1790_v51 = vsel %vm1672_vm1, %v10589_v50, 0.0 }
 0x450   : > { %1713 = vmax.xlane.f32.xlu1 %v1712_v31  ;;  %v1781_v17 = vsel %vm1672_vm1, %v10591_v47, 0.0 }
 0x452   : > { %v10597_v63 = vpop.eup %8811 }
 0x453   : > { %v1784_v16 = vsel %vm1672_vm1, %v10597_v63, 0.0 }
 0x454   : > { %1779 = vadd.xlane.f32.xlu1 %v1778_v39  ;;  %1776 = vadd.xlane.f32.xlu0 %v1775_v0 }
 0x458   : > { %1773 = vadd.xlane.f32.xlu1 %v1772_v53  ;;  %1770 = vadd.xlane.f32.xlu0 %v1769_v41 }
 0x45c   : > { %1791 = vadd.xlane.f32.xlu1 %v1790_v51  ;;  %1788 = vadd.xlane.f32.xlu0 %v1787_v52 }
 0x460   : > { %1785 = vadd.xlane.f32.xlu1 %v1784_v16  ;;  %1782 = vadd.xlane.f32.xlu0 %v1781_v17 }
 0x476   : > { %2223 = vrot.lane.b32.xlu0 %v10460_v37, %s9654_s18 }
 0x490   : > { %v1705_v8 = vpop.xlane.xlu0 %1704 }
 0x491   : > { %v1731_v20 = vsub.f32 %v10529_v35, %v1705_v8 }
 0x493   : > { %v1757_v48 = vmul.f32 1.442695, %v1731_v20 }
 0x494   : > { %v1708_v29 = vpop.xlane.xlu1 %1707  ;;  %v1699_v11 = vpop.xlane.xlu0 %1698 }
 0x495   : > { %8813 = vpow2.f32 %v1757_v48  ;;  %v1732_v40 = vsub.f32 %v10535_v10, %v1708_v29  ;;  %v1729_v61 = vsub.f32 %v10533_v56, %v1699_v11 }
 0x497   : > { %v1753_v18 = vmul.f32 1.442695, %v1729_v61  ;;  %v1759_v26 = vmul.f32 1.442695, %v1732_v40 }
 0x498   : > { %v1702_v44 = vpop.xlane.xlu1 %1701 }
 0x499   : > { %v1730_v31 = vsub.f32 %v10541_v55, %v1702_v44  ;;  %8815 = vpow2.f32 %v1753_v18 }
 0x49a   : > { %8817 = vpow2.f32 %v1759_v26 }
 0x49b   : > { %v1755_v39 = vmul.f32 1.442695, %v1730_v31 }
 0x49c   : > { %v10609_v0 = vpop.permute.xlu1 %2098 }
 0x49d   : > { %8819 = vpow2.f32 %v1755_v39 }
 0x4a0   : > { %v10611_v35 = vpop.permute.xlu1 %2227 }
 0x4a1   : > { %8471 = vmatprep.subr.msk.bf16.mxu0 %vm1493_vm0, %v10611_v35 }
 0x4a2   : > { %v10615_v53 = vpop.eup %8813 }
 0x4a3   : > { %v1799_v56 = vsel %vm1672_vm1, %v10615_v53, 0.0 }
 0x4a4   : > { %1800 = vadd.xlane.f32.xlu1 %v1799_v56  ;;  %v1717_v10 = vpop.xlane.xlu0 %1716  ;;  %v10643_v18 = vpop.permute.xlu1 %2225 }
 0x4a5   : > { %v1735_v55 = vsub.f32 %v10545_v14, %v1717_v10 }
 0x4a6   : > { %v10620_v41 = vpop.eup %8815 }
 0x4a7   : > { %v1765_v51 = vmul.f32 1.442695, %v1735_v55  ;;  %v1793_v52 = vsel %vm1672_vm1, %v10620_v41, 0.0  ;;  %v10624_v17 = vpop.eup %8817 }
 0x4a8   : > { %v1711_v16 = vpop.xlane.xlu0 %1710  ;;  %1794 = vadd.xlane.f32.xlu1 %v1793_v52  ;;  %v1802_v48 = vsel %vm1672_vm1, %v10624_v17, 0.0 }
 0x4a9   : > { %8821 = vpow2.f32 %v1765_v51  ;;  %v1733_v8 = vsub.f32 %v10549_v27, %v1711_v16 }
 0x4aa   : > { %v10629_v29 = vpop.eup %8819 }
 0x4ab   : > { %v1761_v20 = vmul.f32 1.442695, %v1733_v8  ;;  %v1796_v14 = vsel %vm1672_vm1, %v10629_v29, 0.0 }
 0x4ac   : > { %1803 = vadd.xlane.f32.xlu1 %v1802_v48  ;;  %v2097_v39 = vpop.permute.xlu0 %2096 }
 0x4ad   : > { %8823 = vpow2.f32 %v1761_v20 }
 0x4b0   : > { %1797 = vadd.xlane.f32.xlu1 %v1796_v14 }
 0x4b6   : > { %v10633_v11 = vpop.eup %8821 }
 0x4b7   : > { %v1811_v40 = vsel %vm1672_vm1, %v10633_v11, 0.0 }
 0x4b8   : > { %1812 = vadd.xlane.f32.xlu0 %v1811_v40 }
 0x4ba   : > { %v10637_v61 = vpop.eup %8823 }
 0x4bb   : > { %v1805_v27 = vsel %vm1672_vm1, %v10637_v61, 0.0 }
 0x4bc   : > { %1806 = vadd.xlane.f32.xlu0 %v1805_v27 }
 0x4c1   : > { %2100 = vrot.lane.b32.xlu1 %v10452_v62, %s9654_s18 }
 0x4d5   : > { %v1720_v26 = vpop.xlane.xlu1 %1719 }
 0x4d6   : > { %v1736_v44 = vsub.f32 %v10563_v13, %v1720_v26 }
 0x4d8   : > { %v1767_v31 = vmul.f32 1.442695, %v1736_v44 }
 0x4d9   : > { %v1714_v56 = vpop.xlane.xlu1 %1713 }
 0x4da   : > { %8825 = vpow2.f32 %v1767_v31  ;;  %v1734_v10 = vsub.f32 %v10567_v25, %v1714_v56 }
 0x4dc   : > { %v1763_v55 = vmul.f32 1.442695, %v1734_v10 }
 0x4dd   : > { %v1780_v51 = vpop.xlane.xlu1 %1779  ;;  %v1777_v52 = vpop.xlane.xlu0 %1776 }
 0x4de   : > { %8827 = vpow2.f32 %v1763_v55 }
 0x4df   : > { %8829 = vrcp.f32 %v1780_v51 }
 0x4e0   : > { %8831 = vrcp.f32 %v1777_v52 }
 0x4e1   : > { %v1774_v16 = vpop.xlane.xlu1 %1773  ;;  %v1771_v8 = vpop.xlane.xlu0 %1770 }
 0x4e2   : > { %8833 = vrcp.f32 %v1774_v16 }
 0x4e3   : > { %8835 = vrcp.f32 %v1771_v8 }
 0x4e5   : > { %v1792_v20 = vpop.xlane.xlu1 %1791  ;;  %v1789_v48 = vpop.xlane.xlu0 %1788 }
 0x4e6   : > { %8837 = vrcp.f32 %v1792_v20 }
 0x4e7   : > { %v10647_v14 = vpop.eup %8825  ;;  %8839 = vrcp.f32 %v1789_v48 }
 0x4e8   : > { %v1814_v13 = vsel %vm1672_vm1, %v10647_v14, 0.0 }
 0x4e9   : > { %v1786_v25 = vpop.xlane.xlu1 %1785  ;;  %1815 = vadd.xlane.f32.xlu0 %v1814_v13  ;;  %v1783_v40 = vpop.xlane.xlu0 %1782 }
 0x4ea   : > { %8841 = vrcp.f32 %v1786_v25  ;;  %v2138_v25 = vsel %vm1493_vm0, %v10484_v2, 0  ;;  %v2135_v2 = vsel %vm1493_vm0, %v10559_v33, 0 }
 0x4eb   : > { %v10651_v27 = vpop.eup %8827  ;;  %8843 = vrcp.f32 %v1783_v40 }
 0x4ec   : > { %v8830_v26 = vpop.eup %8829  ;;  %v1808_v44 = vsel %vm1672_vm1, %v10651_v27, 0.0 }
 0x4ed   : > { %v8832_v31 = vpop.eup %8831  ;;  %1809 = vadd.xlane.f32.xlu1 %v1808_v44  ;;  %v1836_v55 = vmul.f32 %v8830_v26, %v10573_v9 }
 0x4ee   : > { %v1835_v51 = vmul.f32 %v8832_v31, %v10569_v32 }
 0x4ef   : > { %v8834_v56 = vpop.eup %8833 }
 0x4f0   : > { %v8836_v10 = vpop.eup %8835  ;;  %v1834_v52 = vmul.f32 %v8834_v56, %v10581_v7  ;;  %v1850_v48 = vpack.c.bf16 %v1836_v55, %v1835_v51 }
 0x4f1   : > { %v1833_v16 = vmul.f32 %v8836_v10, %v10575_v34 }
 0x4f3   : > { %v1849_v8 = vpack.c.bf16 %v1834_v52, %v1833_v16  ;;  %v8838_v20 = vpop.eup %8837 }
 0x4f4   : > { %v8840_v13 = vpop.eup %8839  ;;  %v1840_v7 = vmul.f32 %v8838_v20, %v10589_v50 }
 0x4f5   : > { %8195 = vmatprep.mubr.msk.bf16.mxu1 %vm1672_vm1, %v1849_v8  ;;  %v1839_v34 = vmul.f32 %v8840_v13, %v10583_v36  ;;  %v2129_v36 = vsel %vm1493_vm0, %v10480_v5, 0 }
 0x4f6   : > { %8196 = vmatmul.mubr.msk.bf16.vlgmr.msra.gmra.mxu1 %vm1672_vm1, %v1850_v48  ;;  %v2251_v48 = vsel %vm1493_vm0, %v10611_v35, 0 }
 0x4f7   : > { %v8842_v40 = vpop.eup %8841  ;;  %8220 = vmatpush3.bf16.xpose.msra.mxu1 %v2138_v25  ;;  %v1852_v31 = vpack.c.bf16 %v1840_v7, %v1839_v34 }
 0x4f8   : > { %v8844_v9 = vpop.eup %8843  ;;  %8468 = vmatprep.subr.msk.bf16.mxu1 %vm1493_vm0, %v10559_v33  ;;  %v1838_v32 = vmul.f32 %v8842_v40, %v10597_v63  ;;  %v2132_v33 = vsel %vm1493_vm0, %v10482_v6, 0 }
 0x4f9   : > { %v1837_v26 = vmul.f32 %v8844_v9, %v10591_v47 }
 0x4fb   : > { %v1851_v44 = vpack.c.bf16 %v1838_v32, %v1837_v26 }
 0x4fd   : > { %8199 = vmatprep.mubr.msk.bf16.mxu1 %vm1672_vm1, %v1851_v44 }
 0x4fe   : > { %8200 = vmatmul.mubr.msk.bf16.gmra.mxu1 %vm1672_vm1, %v1852_v31  ;;  %2221 = vrot.lane.b32.xlu1 %v10469_v12, %s9654_s18 }
 0x4ff   : > { %8222 = vmatpush3.bf16.xpose.msra.mxu1 %v2135_v2  ;;  %8227 = vmatprep.mubr.msk.bf16.mxu1 %vm1493_vm0, %v2097_v39 }
 0x500   : > { %8469 = vmatprep.subr.msk.bf16.mxu1 %vm1493_vm0, %v10482_v6  ;;  %2102 = vrot.lane.b32.xlu0 %v10458_v54, %s9654_s18 }
 0x502   : > { %2211 = vrot.lane.b32.xlu1 %v10490_v45, %s9654_s18 }
 0x504   : > { %2209 = vrot.lane.b32.xlu0 %v10488_v24, %s9654_s18 }
 0x506   : > { %2215 = vrot.lane.b32.xlu1 %v10515_v43, %s9654_s18 }
 0x507   : > { %8224 = vmatpush3.bf16.xpose.msra.mxu1 %v2132_v33 }
 0x508   : > { %8470 = vmatprep.subr.msk.bf16.mxu1 %vm1493_vm0, %v10480_v5  ;;  %2213 = vrot.lane.b32.xlu0 %v10513_v15, %s9654_s18 }
 0x50a   : > { %2510 = vrot.lane.b32.xlu1 %v10402_v21, %s9654_s18 }
 0x50c   : > { %2512 = vrot.lane.b32.xlu0 %v10392_v3, %s9654_s18 }
 0x50e   : > { %2508 = vrot.lane.b32.xlu1 %v10411_v22, %s9654_s18 }
 0x50f   : > { %8226 = vmatpush3.bf16.xpose.msra.mxu1 %v2129_v36 }
 0x510   : > { %2815 = vrot.lane.b32.xlu0 %v10390_v28, %s9655_s6 }
 0x512   : > { %2506 = vrot.lane.b32.xlu1 %v10419_v23, %s9654_s18 }
 0x514   : > { %2605 = vrot.lane.b32.xlu0 %v10475_v59, %s9654_s18 }
 0x516   : > { %8228 = vmatmul.mubr.msk.bf16.vlgmr.msra.gmra.mxu1 %vm1493_vm0, %v10609_v0  ;;  %2813 = vrot.lane.b32.xlu1 %v10386_v60, %s9655_s6 }
 0x518   : > { %2809 = vrot.lane.b32.xlu0 %v10378_v4, %s9655_s6 }
 0x51a   : > { %2811 = vrot.lane.b32.xlu1 %v10382_v42, %s9655_s6 }
 0x51e   : > { %2603 = vrot.lane.b32.xlu1 %v10494_v30, %s9654_s18 }
 0x522   : > { %2601 = vrot.lane.b32.xlu1 %v10502_v58, %s9654_s18 }
 0x526   : > { %2599 = vrot.lane.b32.xlu1 %v10508_v49, %s9654_s18 }
 0x52d   : > { %v1801_v5 = vpop.xlane.xlu1 %1800 }
 0x531   : > { %v1795_v6 = vpop.xlane.xlu1 %1794 }
 0x535   : > { %v1804_v50 = vpop.xlane.xlu1 %1803 }
 0x536   : > { %8845 = vrcp.f32 %v1804_v50 }
 0x537   : > { %8847 = vrcp.f32 %v1795_v6 }
 0x538   : > { %8849 = vrcp.f32 %v1801_v5 }
 0x539   : > { %v1798_v47 = vpop.xlane.xlu1 %1797 }
 0x53a   : > { %8851 = vrcp.f32 %v1798_v47 }
 0x53d   : > { %v2101_v63 = vpop.permute.xlu1 %2100 }
 0x53e   : > { %8231 = vmatprep.mubr.msk.bf16.mxu1 %vm1493_vm0, %v2101_v63 }
 0x543   : > { %v8846_v0 = vpop.eup %8845 }
 0x544   : > { %v8848_v39 = vpop.eup %8847  ;;  %v1844_v55 = vmul.f32 %v8846_v0, %v10624_v17  ;;  %v2224_v17 = vpop.permute.xlu0 %2223 }
 0x545   : > { %v8850_v56 = vpop.eup %8849  ;;  %v1841_v51 = vmul.f32 %v8848_v39, %v10620_v41  ;;  %v2248_v41 = vsel %vm1493_vm0, %v10643_v18, 0 }
 0x546   : > { %v1843_v16 = vmul.f32 %v8850_v56, %v10615_v53  ;;  %v2245_v53 = vsel %vm1493_vm0, %v2224_v17, 0 }
 0x547   : > { %v8852_v10 = vpop.eup %8851 }
 0x548   : > { %v1842_v52 = vmul.f32 %v8852_v10, %v10629_v29  ;;  %v1854_v20 = vpack.c.bf16 %v1844_v55, %v1843_v16  ;;  %v1813_v29 = vpop.xlane.xlu0 %1812 }
 0x54a   : > { %v1853_v8 = vpack.c.bf16 %v1842_v52, %v1841_v51 }
 0x54c   : > { %8211 = vmatprep.mubr.msk.bf16.mxu0 %vm1672_vm1, %v1853_v8  ;;  %v1807_v13 = vpop.xlane.xlu0 %1806 }
 0x54d   : > { %8212 = vmatmul.mubr.msk.bf16.vlgmr.msra.gmra.mxu0 %vm1672_vm1, %v1854_v20 }
 0x54e   : > { %8236 = vmatpush3.bf16.xpose.msra.mxu0 %v2251_v48 }
 0x54f   : > { %8472 = vmatprep.subr.msk.bf16.mxu0 %vm1493_vm0, %v10643_v18 }
 0x556   : > { %8238 = vmatpush3.bf16.xpose.msra.mxu0 %v2248_v41 }
 0x557   : > { %8473 = vmatprep.subr.msk.bf16.mxu0 %vm1493_vm0, %v2224_v17 }
 0x55e   : > { %8240 = vmatpush3.bf16.xpose.msra.mxu0 %v2245_v53 }
 0x572   : > { %v1816_v25 = vpop.xlane.xlu0 %1815 }
 0x573   : > { %8853 = vrcp.f32 %v1816_v25 }
 0x574   : > { %8855 = vrcp.f32 %v1807_v13 }
 0x575   : > { %8857 = vrcp.f32 %v1813_v29 }
 0x576   : > { %v1810_v35 = vpop.xlane.xlu1 %1809  ;;  %v2103_v40 = vpop.permute.xlu0 %2102 }
 0x577   : > { %8859 = vrcp.f32 %v1810_v35  ;;  %8232 = vmatmul.mubr.msk.bf16.gmra.mxu1 %vm1493_vm0, %v2103_v40 }
 0x57a   : > { %v2222_v9 = vpop.permute.xlu1 %2221  ;;  %v2210_v18 = vpop.permute.xlu0 %2209 }
 0x57b   : > { %8474 = vmatprep.subr.msk.bf16.mxu0 %vm1493_vm0, %v2222_v9  ;;  %v2242_v32 = vsel %vm1493_vm0, %v2222_v9, 0 }
 0x57c   : > { %8242 = vmatpush3.bf16.xpose.msra.mxu0 %v2242_v32 }
 0x57e   : > { %v2212_v34 = vpop.permute.xlu1 %2211  ;;  %v2214_v7 = vpop.permute.xlu0 %2213 }
 0x580   : > { %v8854_v26 = vpop.eup %8853 }
 0x581   : > { %v8856_v44 = vpop.eup %8855  ;;  %v1848_v5 = vmul.f32 %v8854_v26, %v10647_v14 }
 0x582   : > { %v2216_v31 = vpop.permute.xlu1 %2215  ;;  %v2513_v2 = vpop.permute.xlu0 %2512  ;;  %v1845_v6 = vmul.f32 %v8856_v44, %v10637_v61 }
 0x583   : > { %v8858_v33 = vpop.eup %8857  ;;  %8251 = vmatprep.subr.bf16.mxu1 %v2513_v2 }
 0x584   : > { %v8860_v36 = vpop.eup %8859  ;;  %8252 = vmatpush3.bf16.msra.mxu1 %v2513_v2  ;;  %v1847_v0 = vmul.f32 %v8858_v33, %v10633_v11 }
 0x585   : > { %v1846_v50 = vmul.f32 %v8860_v36, %v10651_v27 }
 0x586   : > { %v2511_v47 = vpop.permute.xlu1 %2510  ;;  %v10741_v63 = vpop.permute.xlu0 %2815  ;;  %v1856_v56 = vpack.c.bf16 %v1848_v5, %v1847_v0 }
 0x587   : > { %8253 = vmatprep.subr.bf16.mxu1 %v2511_v47  ;;  %v1855_v39 = vpack.c.bf16 %v1846_v50, %v1845_v6 }
 0x588   : > { %8254 = vmatpush3.bf16.msra.mxu1 %v2511_v47 }
 0x589   : > { %8215 = vmatprep.mubr.msk.bf16.mxu0 %vm1672_vm1, %v1855_v39 }
 0x58a   : > { %v2509_v10 = vpop.permute.xlu1 %2508  ;;  %8216 = vmatmul.mubr.msk.bf16.gmra.mxu0 %vm1672_vm1, %v1856_v56  ;;  %v2606_v55 = vpop.permute.xlu0 %2605 }
 0x58b   : > { %8243 = vmatprep.mubr.msk.bf16.mxu0 %vm1493_vm0, %v2210_v18  ;;  %8255 = vmatprep.subr.bf16.mxu1 %v2509_v10 }
 0x58c   : > { %8267 = vmatprep.subr.bf16.mxu0 %v2606_v55  ;;  %8256 = vmatpush3.bf16.msra.mxu1 %v2509_v10 }
 0x58e   : > { %v2507_v61 = vpop.permute.xlu1 %2506 }
 0x58f   : > { %8257 = vmatprep.subr.bf16.mxu1 %v2507_v61 }
 0x590   : > { %8258 = vmatpush3.bf16.msra.mxu1 %v2507_v61 }
 0x591   : > { %8475 = vmatprep.subr.msk.bf16.mxu1 %vm1493_vm0, %v10741_v63 }
 0x592   : > { %v10749_v11 = vpop.permute.xlu1 %2813  ;;  %8244 = vmatmul.mubr.msk.bf16.vlgmr.msra.gmra.mxu0 %vm1493_vm0, %v2212_v34 }
 0x593   : > { %8268 = vmatpush3.bf16.msra.mxu0 %v2606_v55  ;;  %8247 = vmatprep.mubr.msk.bf16.mxu0 %vm1493_vm0, %v2214_v7 }
 0x596   : > { %v10753_v14 = vpop.permute.xlu1 %2811 }
 0x59a   : > { %v2604_v27 = vpop.permute.xlu1 %2603  ;;  %8248 = vmatmul.mubr.msk.bf16.gmra.mxu0 %vm1493_vm0, %v2216_v31 }
 0x59b   : > { %8269 = vmatprep.subr.bf16.mxu0 %v2604_v27 }
 0x59c   : > { %8270 = vmatpush3.bf16.msra.mxu0 %v2604_v27 }
 0x59e   : > { %v2602_v51 = vpop.permute.xlu1 %2601 }
 0x59f   : > { %8271 = vmatprep.subr.bf16.mxu0 %v2602_v51 }
 0x5a0   : > { %8272 = vmatpush3.bf16.msra.mxu0 %v2602_v51 }
 0x5a2   : > { %v2600_v52 = vpop.permute.xlu1 %2599 }
 0x5a3   : > { %8273 = vmatprep.subr.bf16.mxu0 %v2600_v52 }
 0x5a4   : > { %8274 = vmatpush3.bf16.msra.mxu0 %v2600_v52 }
 0x5b6   : > { %v8197_v16 = vpop.f32.mrf.mxu1 }
 0x5b7   : > { %v7771_v8 = vpack.c.bf16 %v8197_v16, %v8197_v16 }
 0x5b8   : > { %v1903_v20 = vpop.f32.mrf.mxu1 }
 0x5b9   : > { %2078 = vst.msk [vmem:[#allocation2 + $0x8] sm:$0xf] %vm2075_vm2, %v7771_v8  ;;  %v7769_v48 = vpack.c.bf16 %v1903_v20, %v1903_v20 }
 0x5ba   : > { %v8198_v41 = vpop.f32.mrf.mxu1 }
 0x5bb   : > { %2076 = vst.msk [vmem:[#allocation2] sm:$0xf] %vm2075_vm2, %v7769_v48  ;;  %v7772_v17 = vpack.c.bf16 %v8198_v41, %v8198_v41 }
 0x5bc   : > { %v1906_v53 = vpop.f32.mrf.mxu1 }
 0x5bd   : > { %2079 = vst.msk [vmem:[#allocation2 + $0xc] sm:$0xf] %vm2075_vm2, %v7772_v17  ;;  %v7770_v29 = vpack.c.bf16 %v1906_v53, %v1906_v53 }
 0x5be   : > { %v8201_v13 = vpop.f32.mrf.mxu1 }
 0x5bf   : > { %2077 = vst.msk [vmem:[#allocation2 + $0x4] sm:$0xf] %vm2075_vm2, %v7770_v29  ;;  %v7775_v25 = vpack.c.bf16 %v8201_v13, %v8201_v13 }
 0x5c0   : > { %v1919_v35 = vpop.f32.mrf.mxu1 }
 0x5c1   : > { %2082 = vst.msk [vmem:[#allocation2 + $0x18] sm:$0xf] %vm2075_vm2, %v7775_v25  ;;  %v7773_v40 = vpack.c.bf16 %v1919_v35, %v1919_v35 }
 0x5c2   : > { %v8202_v9 = vpop.f32.mrf.mxu1 }
 0x5c3   : > { %2080 = vst.msk [vmem:[#allocation2 + $0x10] sm:$0xf] %vm2075_vm2, %v7773_v40  ;;  %v7776_v18 = vpack.c.bf16 %v8202_v9, %v8202_v9 }
 0x5c4   : > { %v1922_v32 = vpop.f32.mrf.mxu1 }
 0x5c5   : > { %2083 = vst.msk [vmem:[#allocation2 + $0x1c] sm:$0xf] %vm2075_vm2, %v7776_v18  ;;  %v7774_v34 = vpack.c.bf16 %v1922_v32, %v1922_v32 }
 0x5c7   : > { %2081 = vst.msk [vmem:[#allocation2 + $0x14] sm:$0xf] %vm2075_vm2, %v7774_v34 }
 0x5d6   : > { %v10764_v7 = vpop.f32.mrf.mxu1 }
 0x5d7   : > { %v2324_v26 = vsel %vm1672_vm1, %v10764_v7, -inf }
 0x5d8   : > { %2325 = vmax.xlane.f32.xlu0 %v2324_v26  ;;  %v10768_v44 = vpop.f32.mrf.mxu1 }
 0x5d9   : > { %v2318_v2 = vsel %vm1672_vm1, %v10768_v44, -inf }
 0x5da   : > { %v10770_v31 = vpop.f32.mrf.mxu1 }
 0x5db   : > { %v2327_v5 = vsel %vm1672_vm1, %v10770_v31, -inf }
 0x5dc   : > { %2319 = vmax.xlane.f32.xlu0 %v2318_v2  ;;  %v10774_v33 = vpop.f32.mrf.mxu1 }
 0x5dd   : > { %v2321_v36 = vsel %vm1672_vm1, %v10774_v33, -inf }
 0x5de   : > { %2322 = vmax.xlane.f32.xlu1 %v2321_v36  ;;  %v10822_v36 = vpop.permute.xlu0 %2809 }
 0x5e0   : > { %2328 = vmax.xlane.f32.xlu0 %v2327_v5 }
 0x60d   : > { %v8213_v6 = vpop.f32.mrf.mxu0 }
 0x60e   : > { %v7779_v50 = vpack.c.bf16 %v8213_v6, %v8213_v6 }
 0x60f   : > { %v1980_v47 = vpop.f32.mrf.mxu0 }
 0x610   : > { %2086 = vst.msk [vmem:[#allocation2 + $0x28] sm:$0xf] %vm2075_vm2, %v7779_v50  ;;  %v7777_v0 = vpack.c.bf16 %v1980_v47, %v1980_v47 }
 0x611   : > { %v8214_v39 = vpop.f32.mrf.mxu0 }
 0x612   : > { %2084 = vst.msk [vmem:[#allocation2 + $0x20] sm:$0xf] %vm2075_vm2, %v7777_v0  ;;  %v7780_v56 = vpack.c.bf16 %v8214_v39, %v8214_v39 }
 0x613   : > { %v1983_v10 = vpop.f32.mrf.mxu0 }
 0x614   : > { %2087 = vst.msk [vmem:[#allocation2 + $0x2c] sm:$0xf] %vm2075_vm2, %v7780_v56  ;;  %v7778_v55 = vpack.c.bf16 %v1983_v10, %v1983_v10 }
 0x616   : > { %2085 = vst.msk [vmem:[#allocation2 + $0x24] sm:$0xf] %vm2075_vm2, %v7778_v55 }
 0x637   : > { %v10784_v61 = vpop.f32.mrf.mxu1 }
 0x638   : > { %v2336_v27 = vsel %vm1672_vm1, %v10784_v61, -inf }
 0x639   : > { %2337 = vmax.xlane.f32.xlu0 %v2336_v27  ;;  %v10788_v51 = vpop.f32.mrf.mxu1 }
 0x63a   : > { %v2330_v16 = vsel %vm1672_vm1, %v10788_v51, -inf }
 0x63b   : > { %v10790_v52 = vpop.f32.mrf.mxu1 }
 0x63c   : > { %v2339_v8 = vsel %vm1672_vm1, %v10790_v52, -inf }
 0x63d   : > { %2331 = vmax.xlane.f32.xlu0 %v2330_v16  ;;  %2340 = vmax.xlane.f32.xlu1 %v2339_v8  ;;  %v10796_v20 = vpop.f32.mrf.mxu1 }
 0x63e   : > { %v2333_v48 = vsel %vm1672_vm1, %v10796_v20, -inf }
 0x641   : > { %2334 = vmax.xlane.f32.xlu1 %v2333_v48 }
 0x64a   : > { %v8217_v41 = vpop.f32.mrf.mxu0 }
 0x64b   : > { %v7783_v17 = vpack.c.bf16 %v8217_v41, %v8217_v41 }
 0x64c   : > { %v1996_v53 = vpop.f32.mrf.mxu0 }
 0x64d   : > { %2090 = vst.msk [vmem:[#allocation2 + $0x38] sm:$0xf] %vm2075_vm2, %v7783_v17  ;;  %v7781_v29 = vpack.c.bf16 %v1996_v53, %v1996_v53 }
 0x64e   : > { %v8218_v13 = vpop.f32.mrf.mxu0 }
 0x64f   : > { %2088 = vst.msk [vmem:[#allocation2 + $0x30] sm:$0xf] %vm2075_vm2, %v7781_v29  ;;  %v7784_v25 = vpack.c.bf16 %v8218_v13, %v8218_v13 }
 0x650   : > { %v1999_v35 = vpop.f32.mrf.mxu0 }
 0x651   : > { %2091 = vst.msk [vmem:[#allocation2 + $0x3c] sm:$0xf] %vm2075_vm2, %v7784_v25  ;;  %v7782_v40 = vpack.c.bf16 %v1999_v35, %v1999_v35 }
 0x652   : > { %2803 = vrot.lane.b32.xlu1 %v10440_v57, %s9655_s6  ;;  %v10805_v9 = vpop.f32.mrf.mxu0 }
 0x653   : > { %2089 = vst.msk [vmem:[#allocation2 + $0x34] sm:$0xf] %vm2075_vm2, %v7782_v40  ;;  %v2348_v18 = vsel %vm1672_vm1, %v10805_v9, -inf }
 0x654   : > { %2349 = vmax.xlane.f32.xlu0 %v2348_v18  ;;  %v10810_v32 = vpop.f32.mrf.mxu0 }
 0x655   : > { %v2342_v34 = vsel %vm1672_vm1, %v10810_v32, -inf }
 0x656   : > { %2920 = vrot.lane.b32.xlu1 %v10442_v19, %s9655_s6  ;;  %v10816_v26 = vpop.f32.mrf.mxu0 }
 0x657   : > { %v2351_v50 = vsel %vm1672_vm1, %v10816_v26, -inf }
 0x658   : > { %2343 = vmax.xlane.f32.xlu0 %v2342_v34  ;;  %v10820_v2 = vpop.f32.mrf.mxu0 }
 0x659   : > { %v2345_v56 = vsel %vm1672_vm1, %v10820_v2, -inf }
 0x65a   : > { %v10824_v5 = vpop.f32.mrf.mxu0 }
 0x65b   : > { %v2360_v41 = vsel %vm1672_vm1, %v10824_v5, -inf }
 0x65c   : > { %v10828_v47 = vpop.f32.mrf.mxu0 }
 0x65e   : > { %v10833_v10 = vpop.f32.mrf.mxu0 }
 0x65f   : > { %v2363_v16 = vsel %vm1672_vm1, %v10833_v10, -inf }
 0x660   : > { %v10838_v8 = vpop.f32.mrf.mxu0 }
 0x661   : > { %v2326_v6 = vpop.xlane.xlu0 %2325 }
 0x662   : > { %v2368_v0 = vsub.f32 %v10764_v7, %v2326_v6  ;;  %v2357_v7 = vsel %vm1672_vm1, %v10838_v8, -inf }
 0x664   : > { %v2386_v55 = vmul.f32 1.442695, %v2368_v0 }
 0x665   : > { %v2320_v39 = vpop.xlane.xlu0 %2319 }
 0x666   : > { %v2366_v27 = vsub.f32 %v10768_v44, %v2320_v39  ;;  %8861 = vpow2.f32 %v2386_v55  ;;  %v2354_v44 = vsel %vm1672_vm1, %v10828_v47, -inf }
 0x667   : > { %v2323_v40 = vpop.xlane.xlu1 %2322 }
 0x668   : > { %v2382_v48 = vmul.f32 1.442695, %v2366_v27  ;;  %v2367_v18 = vsub.f32 %v10774_v33, %v2323_v40 }
 0x669   : > { %v2329_v25 = vpop.xlane.xlu0 %2328 }
 0x66a   : > { %8863 = vpow2.f32 %v2382_v48  ;;  %v2369_v35 = vsub.f32 %v10770_v31, %v2329_v25  ;;  %v2384_v6 = vmul.f32 1.442695, %v2367_v18 }
 0x66c   : > { %v2388_v34 = vmul.f32 1.442695, %v2369_v35 }
 0x66e   : > { %2801 = vrot.lane.b32.xlu0 %v10434_v38, %s9655_s6  ;;  %8865 = vpow2.f32 %v2388_v34 }
 0x66f   : > { %8867 = vpow2.f32 %v2384_v6 }
 0x673   : > { %v10846_v17 = vpop.eup %8861 }
 0x674   : > { %v2420_v53 = vsel %vm1672_vm1, %v10846_v17, 0.0 }
 0x677   : > { %v10850_v29 = vpop.eup %8863 }
 0x678   : > { %v2414_v13 = vsel %vm1672_vm1, %v10850_v29, 0.0 }
 0x67a   : > { %2352 = vmax.xlane.f32.xlu1 %v2351_v50 }
 0x67b   : > { %v10858_v50 = vpop.eup %8865 }
 0x67c   : > { %v2423_v0 = vsel %vm1672_vm1, %v10858_v50, 0.0  ;;  %v10862_v39 = vpop.eup %8867 }
 0x67e   : > { %2346 = vmax.xlane.f32.xlu1 %v2345_v56  ;;  %v2417_v56 = vsel %vm1672_vm1, %v10862_v39, 0.0 }
 0x682   : > { %2364 = vmax.xlane.f32.xlu1 %v2363_v16 }
 0x686   : > { %2358 = vmax.xlane.f32.xlu1 %v2357_v7 }
 0x68d   : > { %2361 = vmax.xlane.f32.xlu0 %v2360_v41 }
 0x691   : > { %2355 = vmax.xlane.f32.xlu0 %v2354_v44 }
 0x695   : > { %2421 = vadd.xlane.f32.xlu0 %v2420_v53 }
 0x697   : > { %2918 = vrot.lane.b32.xlu1 %v10444_v1, %s9655_s6 }
 0x699   : > { %2415 = vadd.xlane.f32.xlu0 %v2414_v13 }
 0x6bb   : > { %2424 = vadd.xlane.f32.xlu1 %v2423_v0 }
 0x6bf   : > { %2418 = vadd.xlane.f32.xlu1 %v2417_v56 }
 0x6c2   : > { %v2338_v31 = vpop.xlane.xlu0 %2337 }
 0x6c3   : > { %v2372_v55 = vsub.f32 %v10784_v61, %v2338_v31 }
 0x6c5   : > { %v2394_v33 = vmul.f32 1.442695, %v2372_v55 }
 0x6c6   : > { %v2341_v27 = vpop.xlane.xlu1 %2340  ;;  %v2332_v16 = vpop.xlane.xlu0 %2331 }
 0x6c7   : > { %8869 = vpow2.f32 %v2394_v33  ;;  %v2373_v48 = vsub.f32 %v10790_v52, %v2341_v27  ;;  %v2370_v7 = vsub.f32 %v10788_v51, %v2332_v16 }
 0x6c9   : > { %v2396_v41 = vmul.f32 1.442695, %v2373_v48  ;;  %v2390_v44 = vmul.f32 1.442695, %v2370_v7 }
 0x6ca   : > { %v2335_v53 = vpop.xlane.xlu1 %2334 }
 0x6cb   : > { %8871 = vpow2.f32 %v2396_v41  ;;  %v2371_v13 = vsub.f32 %v10796_v20, %v2335_v53 }
 0x6cc   : > { %8873 = vpow2.f32 %v2390_v44 }
 0x6cd   : > { %v2392_v25 = vmul.f32 1.442695, %v2371_v13 }
 0x6ce   : > { %v10870_v35 = vpop.permute.xlu1 %2803 }
 0x6cf   : > { %8875 = vpow2.f32 %v2392_v25 }
 0x6d2   : > { %v10872_v61 = vpop.permute.xlu1 %2920 }
 0x6d3   : > { %8479 = vmatprep.subr.msk.bf16.mxu0 %vm1493_vm0, %v10872_v61 }
 0x6d4   : > { %v10876_v40 = vpop.eup %8869 }
 0x6d5   : > { %v2432_v51 = vsel %vm1672_vm1, %v10876_v40, 0.0 }
 0x6d6   : > { %2433 = vadd.xlane.f32.xlu0 %v2432_v51 }
 0x6d8   : > { %v10880_v52 = vpop.eup %8871 }
 0x6d9   : > { %v10882_v18 = vpop.eup %8873  ;;  %v2435_v20 = vsel %vm1672_vm1, %v10880_v52, 0.0 }
 0x6da   : > { %2436 = vadd.xlane.f32.xlu0 %v2435_v20  ;;  %v2426_v34 = vsel %vm1672_vm1, %v10882_v18, 0.0 }
 0x6db   : > { %2427 = vadd.xlane.f32.xlu1 %v2426_v34 }
 0x6dc   : > { %v10888_v6 = vpop.eup %8875 }
 0x6dd   : > { %v2350_v0 = vpop.xlane.xlu0 %2349  ;;  %v2429_v56 = vsel %vm1672_vm1, %v10888_v6, 0.0 }
 0x6de   : > { %v2376_v31 = vsub.f32 %v10805_v9, %v2350_v0  ;;  %2430 = vadd.xlane.f32.xlu0 %v2429_v56 }
 0x6e0   : > { %v2402_v55 = vmul.f32 1.442695, %v2376_v31 }
 0x6e1   : > { %v2344_v33 = vpop.xlane.xlu0 %2343 }
 0x6e2   : > { %8877 = vpow2.f32 %v2402_v55  ;;  %v2374_v27 = vsub.f32 %v10810_v32, %v2344_v33 }
 0x6e4   : > { %v2398_v16 = vmul.f32 1.442695, %v2374_v27 }
 0x6e5   : > { %v10906_v20 = vpop.permute.xlu0 %2801 }
 0x6e6   : > { %8879 = vpow2.f32 %v2398_v16 }
 0x6ef   : > { %v10894_v48 = vpop.eup %8877 }
 0x6f0   : > { %v2444_v7 = vsel %vm1672_vm1, %v10894_v48, 0.0 }
 0x6f1   : > { %2445 = vadd.xlane.f32.xlu1 %v2444_v7 }
 0x6f3   : > { %v10898_v41 = vpop.eup %8879 }
 0x6f4   : > { %v2438_v44 = vsel %vm1672_vm1, %v10898_v41, 0.0 }
 0x6f5   : > { %2439 = vadd.xlane.f32.xlu1 %v2438_v44 }
 0x703   : > { %v2353_v9 = vpop.xlane.xlu1 %2352 }
 0x704   : > { %v2377_v53 = vsub.f32 %v10816_v26, %v2353_v9 }
 0x706   : > { %v2404_v13 = vmul.f32 1.442695, %v2377_v53  ;;  %2805 = vrot.lane.b32.xlu1 %v10452_v62, %s9655_s6 }
 0x707   : > { %v2347_v32 = vpop.xlane.xlu1 %2346 }
 0x708   : > { %8881 = vpow2.f32 %v2404_v13  ;;  %v2375_v25 = vsub.f32 %v10820_v2, %v2347_v32 }
 0x70a   : > { %v2400_v51 = vmul.f32 1.442695, %v2375_v25 }
 0x70b   : > { %v2365_v7 = vpop.xlane.xlu1 %2364 }
 0x70c   : > { %8883 = vpow2.f32 %v2400_v51  ;;  %v2381_v53 = vsub.f32 %v10833_v10, %v2365_v7 }
 0x70e   : > { %v2412_v25 = vmul.f32 1.442695, %v2381_v53 }
 0x70f   : > { %v2359_v9 = vpop.xlane.xlu1 %2358 }
 0x713   : > { %v10928_v51 = vpop.permute.xlu1 %2918 }
 0x715   : > { %v10908_v34 = vpop.eup %8881 }
 0x716   : > { %v2362_v0 = vpop.xlane.xlu0 %2361  ;;  %v2447_v56 = vsel %vm1672_vm1, %v10908_v34, 0.0 }
 0x717   : > { %2448 = vadd.xlane.f32.xlu0 %v2447_v56  ;;  %v2380_v44 = vsub.f32 %v10824_v5, %v2362_v0 }
 0x719   : > { %v10912_v26 = vpop.eup %8883  ;;  %v2410_v13 = vmul.f32 1.442695, %v2380_v44 }
 0x71a   : > { %v2356_v31 = vpop.xlane.xlu0 %2355  ;;  %v2441_v55 = vsel %vm1672_vm1, %v10912_v26, 0.0 }
 0x71b   : > { %v2378_v33 = vsub.f32 %v10828_v47, %v2356_v31  ;;  %2442 = vadd.xlane.f32.xlu0 %v2441_v55  ;;  %v2379_v47 = vsub.f32 %v10838_v8, %v2359_v9 }
 0x71d   : > { %v2406_v2 = vmul.f32 1.442695, %v2378_v33  ;;  %v2408_v56 = vmul.f32 1.442695, %v2379_v47 }
 0x71e   : > { %v2422_v32 = vpop.xlane.xlu0 %2421 }
 0x71f   : > { %8885 = vpow2.f32 %v2406_v2 }
 0x720   : > { %8887 = vpow2.f32 %v2410_v13 }
 0x721   : > { %8889 = vpow2.f32 %v2412_v25 }
 0x722   : > { %v2416_v5 = vpop.xlane.xlu0 %2415  ;;  %8891 = vpow2.f32 %v2408_v56 }
 0x72c   : > { %v10917_v27 = vpop.eup %8885 }
 0x72d   : > { %v2450_v16 = vsel %vm1672_vm1, %v10917_v27, 0.0  ;;  %v10936_v8 = vpop.eup %8887 }
 0x72e   : > { %2451 = vadd.xlane.f32.xlu1 %v2450_v16  ;;  %v2456_v31 = vsel %vm1672_vm1, %v10936_v8, 0.0  ;;  %v10942_v55 = vpop.eup %8889 }
 0x72f   : > { %v10944_v33 = vpop.eup %8891  ;;  %v2459_v16 = vsel %vm1672_vm1, %v10942_v55, 0.0 }
 0x730   : > { %v2453_v13 = vsel %vm1672_vm1, %v10944_v33, 0.0 }
 0x731   : > { %2916 = vrot.lane.b32.xlu0 %v10460_v37, %s9655_s6 }
 0x73f   : > { %2914 = vrot.lane.b32.xlu1 %v10469_v12, %s9655_s6 }
 0x743   : > { %2908 = vrot.lane.b32.xlu1 %v10490_v45, %s9655_s6 }
 0x744   : > { %v2425_v0 = vpop.xlane.xlu1 %2424 }
 0x745   : > { %8893 = vrcp.f32 %v2425_v0 }
 0x746   : > { %8895 = vrcp.f32 %v2416_v5 }
 0x747   : > { %2912 = vrot.lane.b32.xlu1 %v10515_v43, %s9655_s6  ;;  %8897 = vrcp.f32 %v2422_v32 }
 0x748   : > { %v2419_v10 = vpop.xlane.xlu1 %2418 }
 0x749   : > { %8899 = vrcp.f32 %v2419_v10 }
 0x74b   : > { %3199 = vrot.lane.b32.xlu1 %v10402_v21, %s9655_s6 }
 0x74f   : > { %3197 = vrot.lane.b32.xlu1 %v10411_v22, %s9655_s6 }
 0x750   : > { %2457 = vadd.xlane.f32.xlu0 %v2456_v31  ;;  %v2830_v31 = vsel %vm1493_vm0, %v10822_v36, 0 }
 0x752   : > { %v8894_v2 = vpop.eup %8893 }
 0x753   : > { %3195 = vrot.lane.b32.xlu1 %v10419_v23, %s9655_s6  ;;  %v8896_v7 = vpop.eup %8895  ;;  %v2481_v53 = vmul.f32 %v8894_v2, %v10858_v50  ;;  %v2836_v50 = vsel %vm1493_vm0, %v10749_v11, 0 }
 0x754   : > { %2460 = vadd.xlane.f32.xlu0 %v2459_v16  ;;  %v8898_v44 = vpop.eup %8897  ;;  %v2478_v47 = vmul.f32 %v8896_v7, %v10850_v29 }
 0x755   : > { %v2480_v25 = vmul.f32 %v8898_v44, %v10846_v17 }
 0x756   : > { %v8900_v9 = vpop.eup %8899 }
 0x757   : > { %3498 = vrot.lane.b32.xlu1 %v10386_v60, %s9656_s10  ;;  %v2479_v32 = vmul.f32 %v8900_v9, %v10862_v39  ;;  %v2495_v5 = vpack.c.bf16 %v2481_v53, %v2480_v25  ;;  %v2839_v60 = vsel %vm1493_vm0, %v10741_v63, 0  ;;  %v2833_v39 = vsel %vm1493_vm0, %v10753_v14, 0 }
 0x758   : > { %2454 = vadd.xlane.f32.xlu0 %v2453_v13 }
 0x759   : > { %v2494_v56 = vpack.c.bf16 %v2479_v32, %v2478_v47 }
 0x75b   : > { %3496 = vrot.lane.b32.xlu1 %v10382_v42, %s9656_s10  ;;  %8259 = vmatprep.mubr.msk.bf16.mxu1 %vm1672_vm1, %v2494_v56 }
 0x75c   : > { %8260 = vmatmul.mubr.msk.bf16.vlgmr.msra.gmra.mxu1 %vm1672_vm1, %v2495_v5 }
 0x75d   : > { %8284 = vmatpush3.bf16.xpose.msra.mxu1 %v2839_v60  ;;  %v2944_v60 = vsel %vm1493_vm0, %v10872_v61, 0 }
 0x75e   : > { %8476 = vmatprep.subr.msk.bf16.mxu1 %vm1493_vm0, %v10749_v11 }
 0x75f   : > { %3288 = vrot.lane.b32.xlu1 %v10494_v30, %s9655_s6  ;;  %v2434_v17 = vpop.xlane.xlu0 %2433 }
 0x763   : > { %3286 = vrot.lane.b32.xlu1 %v10502_v58, %s9655_s6  ;;  %v2437_v29 = vpop.xlane.xlu0 %2436 }
 0x764   : > { %v2428_v42 = vpop.xlane.xlu1 %2427  ;;  %8901 = vrcp.f32 %v2437_v29 }
 0x765   : > { %8286 = vmatpush3.bf16.xpose.msra.mxu1 %v2836_v50  ;;  %8903 = vrcp.f32 %v2428_v42 }
 0x766   : > { %8477 = vmatprep.subr.msk.bf16.mxu1 %vm1493_vm0, %v10753_v14  ;;  %8905 = vrcp.f32 %v2434_v17 }
 0x767   : > { %3284 = vrot.lane.b32.xlu1 %v10508_v49, %s9655_s6  ;;  %v2431_v63 = vpop.xlane.xlu0 %2430 }
 0x768   : > { %8907 = vrcp.f32 %v2431_v63 }
 0x76d   : > { %8288 = vmatpush3.bf16.xpose.msra.mxu1 %v2833_v39 }
 0x76e   : > { %8478 = vmatprep.subr.msk.bf16.mxu1 %vm1493_vm0, %v10822_v36  ;;  %2807 = vrot.lane.b32.xlu0 %v10458_v54, %s9655_s6 }
 0x771   : > { %v8902_v11 = vpop.eup %8901 }
 0x772   : > { %2906 = vrot.lane.b32.xlu0 %v10488_v24, %s9655_s6  ;;  %v8904_v0 = vpop.eup %8903  ;;  %v2485_v14 = vmul.f32 %v8902_v11, %v10880_v52 }
 0x773   : > { %v8906_v10 = vpop.eup %8905  ;;  %v2482_v16 = vmul.f32 %v8904_v0, %v10882_v18 }
 0x774   : > { %v2484_v44 = vmul.f32 %v8906_v10, %v10876_v40 }
 0x775   : > { %v8908_v2 = vpop.eup %8907  ;;  %8290 = vmatpush3.bf16.xpose.msra.mxu1 %v2830_v31 }
 0x776   : > { %2910 = vrot.lane.b32.xlu0 %v10513_v15, %s9655_s6  ;;  %v2483_v7 = vmul.f32 %v8908_v2, %v10888_v6  ;;  %v2497_v53 = vpack.c.bf16 %v2485_v14, %v2484_v44 }
 0x778   : > { %v2496_v9 = vpack.c.bf16 %v2483_v7, %v2482_v16 }
 0x77a   : > { %v2446_v13 = vpop.xlane.xlu1 %2445  ;;  %3201 = vrot.lane.b32.xlu0 %v10392_v3, %s9655_s6  ;;  %8263 = vmatprep.mubr.msk.bf16.mxu1 %vm1672_vm1, %v2496_v9 }
 0x77b   : > { %8264 = vmatmul.mubr.msk.bf16.gmra.mxu1 %vm1672_vm1, %v2497_v53 }
 0x77c   : > { %8291 = vmatprep.mubr.msk.bf16.mxu1 %vm1493_vm0, %v10906_v20 }
 0x77e   : > { %v2440_v36 = vpop.xlane.xlu1 %2439  ;;  %3500 = vrot.lane.b32.xlu0 %v10390_v28, %s9656_s10 }
 0x782   : > { %v2806_v52 = vpop.permute.xlu1 %2805  ;;  %3290 = vrot.lane.b32.xlu0 %v10475_v59, %s9655_s6 }
 0x783   : > { %8292 = vmatmul.mubr.msk.bf16.vlgmr.msra.gmra.mxu1 %vm1493_vm0, %v10870_v35 }
 0x784   : > { %8295 = vmatprep.mubr.msk.bf16.mxu1 %vm1493_vm0, %v2806_v52 }
 0x786   : > { %3494 = vrot.lane.b32.xlu0 %v10378_v4, %s9656_s10 }
 0x7a0   : > { %v2449_v40 = vpop.xlane.xlu0 %2448 }
 0x7a1   : > { %8909 = vrcp.f32 %v2449_v40 }
 0x7a2   : > { %8911 = vrcp.f32 %v2440_v36 }
 0x7a3   : > { %8913 = vrcp.f32 %v2446_v13 }
 0x7a4   : > { %v2443_v18 = vpop.xlane.xlu0 %2442 }
 0x7a5   : > { %8915 = vrcp.f32 %v2443_v18 }
 0x7ae   : > { %v8910_v6 = vpop.eup %8909 }
 0x7af   : > { %v8912_v28 = vpop.eup %8911  ;;  %v2489_v32 = vmul.f32 %v8910_v6, %v10908_v34  ;;  %v2917_v34 = vpop.permute.xlu0 %2916 }
 0x7b0   : > { %v8914_v20 = vpop.eup %8913  ;;  %v2486_v25 = vmul.f32 %v8912_v28, %v10898_v41  ;;  %v2941_v41 = vsel %vm1493_vm0, %v10928_v51, 0 }
 0x7b1   : > { %v2488_v56 = vmul.f32 %v8914_v20, %v10894_v48 }
 0x7b2   : > { %v8916_v47 = vpop.eup %8915 }
 0x7b3   : > { %v2487_v35 = vmul.f32 %v8916_v47, %v10912_v26  ;;  %v2499_v4 = vpack.c.bf16 %v2489_v32, %v2488_v56  ;;  %v2938_v26 = vsel %vm1493_vm0, %v2917_v34, 0 }
 0x7b5   : > { %v2498_v5 = vpack.c.bf16 %v2487_v35, %v2486_v25 }
 0x7b7   : > { %8275 = vmatprep.mubr.msk.bf16.mxu0 %vm1672_vm1, %v2498_v5  ;;  %v2452_v48 = vpop.xlane.xlu1 %2451 }
 0x7b8   : > { %8276 = vmatmul.mubr.msk.bf16.vlgmr.msra.gmra.mxu0 %vm1672_vm1, %v2499_v4 }
 0x7b9   : > { %8300 = vmatpush3.bf16.xpose.msra.mxu0 %v2944_v60 }
 0x7ba   : > { %8480 = vmatprep.subr.msk.bf16.mxu0 %vm1493_vm0, %v10928_v51 }
 0x7bb   : > { %v2915_v17 = vpop.permute.xlu1 %2914 }
 0x7bc   : > { %v2935_v61 = vsel %vm1493_vm0, %v2915_v17, 0 }
 0x7bf   : > { %v2909_v29 = vpop.permute.xlu1 %2908 }
 0x7c1   : > { %8302 = vmatpush3.bf16.xpose.msra.mxu0 %v2941_v41 }
 0x7c2   : > { %8481 = vmatprep.subr.msk.bf16.mxu0 %vm1493_vm0, %v2917_v34 }
 0x7c3   : > { %v2913_v42 = vpop.permute.xlu1 %2912 }
 0x7c7   : > { %v3200_v63 = vpop.permute.xlu1 %3199 }
 0x7c9   : > { %8304 = vmatpush3.bf16.xpose.msra.mxu0 %v2938_v26 }
 0x7ca   : > { %8482 = vmatprep.subr.msk.bf16.mxu0 %vm1493_vm0, %v2915_v17 }
 0x7cb   : > { %v3198_v11 = vpop.permute.xlu1 %3197 }
 0x7cf   : > { %v3196_v10 = vpop.permute.xlu1 %3195 }
 0x7d1   : > { %8306 = vmatpush3.bf16.xpose.msra.mxu0 %v2935_v61 }
 0x7d3   : > { %v11024_v44 = vpop.permute.xlu1 %3498 }
 0x7d7   : > { %v11030_v28 = vpop.permute.xlu1 %3496 }
 0x7d9   : > { %v2458_v50 = vpop.xlane.xlu0 %2457 }
 0x7dd   : > { %v2461_v39 = vpop.xlane.xlu0 %2460 }
 0x7de   : > { %8917 = vrcp.f32 %v2461_v39 }
 0x7df   : > { %8919 = vrcp.f32 %v2452_v48 }
 0x7e0   : > { %8921 = vrcp.f32 %v2458_v50 }
 0x7e1   : > { %v2455_v51 = vpop.xlane.xlu0 %2454 }
 0x7e2   : > { %8923 = vrcp.f32 %v2455_v51 }
 0x7e5   : > { %v2808_v0 = vpop.permute.xlu0 %2807 }
 0x7e6   : > { %8296 = vmatmul.mubr.msk.bf16.gmra.mxu1 %vm1493_vm0, %v2808_v0 }
 0x7e9   : > { %v2907_v31 = vpop.permute.xlu0 %2906 }
 0x7eb   : > { %v8918_v2 = vpop.eup %8917 }
 0x7ec   : > { %v8920_v14 = vpop.eup %8919  ;;  %v2493_v53 = vmul.f32 %v8918_v2, %v10942_v55  ;;  %v3289_v55 = vpop.permute.xlu1 %3288 }
 0x7ed   : > { %v2911_v16 = vpop.permute.xlu0 %2910  ;;  %v8922_v7 = vpop.eup %8921  ;;  %v2490_v13 = vmul.f32 %v8920_v14, %v10917_v27 }
 0x7ee   : > { %v2492_v40 = vmul.f32 %v8922_v7, %v10936_v8 }
 0x7ef   : > { %v8924_v9 = vpop.eup %8923 }
 0x7f0   : > { %v2491_v36 = vmul.f32 %v8924_v9, %v10944_v33  ;;  %v2501_v6 = vpack.c.bf16 %v2493_v53, %v2492_v40  ;;  %v3287_v8 = vpop.permute.xlu1 %3286 }
 0x7f1   : > { %v3202_v52 = vpop.permute.xlu0 %3201 }
 0x7f2   : > { %8315 = vmatprep.subr.bf16.mxu1 %v3202_v52  ;;  %v2500_v18 = vpack.c.bf16 %v2491_v36, %v2490_v13 }
 0x7f3   : > { %8316 = vmatpush3.bf16.msra.mxu1 %v3202_v52 }
 0x7f4   : > { %8279 = vmatprep.mubr.msk.bf16.mxu0 %vm1672_vm1, %v2500_v18  ;;  %8317 = vmatprep.subr.bf16.mxu1 %v3200_v63  ;;  %v3285_v33 = vpop.permute.xlu1 %3284 }
 0x7f5   : > { %8280 = vmatmul.mubr.msk.bf16.gmra.mxu0 %vm1672_vm1, %v2501_v6  ;;  %v11034_v20 = vpop.permute.xlu0 %3500 }
 0x7f6   : > { %8307 = vmatprep.mubr.msk.bf16.mxu0 %vm1493_vm0, %v2907_v31 }
 0x7f7   : > { %8318 = vmatpush3.bf16.msra.mxu1 %v3200_v63 }
 0x7f8   : > { %8319 = vmatprep.subr.bf16.mxu1 %v3198_v11 }
 0x7f9   : > { %v3291_v27 = vpop.permute.xlu0 %3290 }
 0x7fa   : > { %8331 = vmatprep.subr.bf16.mxu0 %v3291_v27 }
 0x7fb   : > { %8320 = vmatpush3.bf16.msra.mxu1 %v3198_v11 }
 0x7fc   : > { %8321 = vmatprep.subr.bf16.mxu1 %v3196_v10 }
 0x7fd   : > { %8308 = vmatmul.mubr.msk.bf16.vlgmr.msra.gmra.mxu0 %vm1493_vm0, %v2909_v29 }
 0x7fe   : > { %8332 = vmatpush3.bf16.msra.mxu0 %v3291_v27  ;;  %8311 = vmatprep.mubr.msk.bf16.mxu0 %vm1493_vm0, %v2911_v16 }
 0x7ff   : > { %8333 = vmatprep.subr.bf16.mxu0 %v3289_v55  ;;  %8322 = vmatpush3.bf16.msra.mxu1 %v3196_v10 }
 0x800   : > { %8483 = vmatprep.subr.msk.bf16.mxu1 %vm1493_vm0, %v11034_v20 }
 0x802   : > { %8334 = vmatpush3.bf16.msra.mxu0 %v3289_v55  ;;  %v11116_v55 = vpop.permute.xlu0 %3494 }
 0x803   : > { %8335 = vmatprep.subr.bf16.mxu0 %v3287_v8 }
 0x805   : > { %8312 = vmatmul.mubr.msk.bf16.gmra.mxu0 %vm1493_vm0, %v2913_v42 }
 0x806   : > { %8336 = vmatpush3.bf16.msra.mxu0 %v3287_v8 }
 0x807   : > { %8337 = vmatprep.subr.bf16.mxu0 %v3285_v33 }
 0x80a   : > { %8338 = vmatpush3.bf16.msra.mxu0 %v3285_v33 }
 0x81c   : > { %v11042_v47 = vpop.f32.mrf.mxu1 }
 0x81e   : > { %v11044_v32 = vpop.f32.mrf.mxu1 }
 0x820   : > { %v11046_v25 = vpop.f32.mrf.mxu1 }
 0x822   : > { %v11048_v35 = vpop.f32.mrf.mxu1 }
 0x83b   : > { %v11050_v56 = vpop.f32.mrf.mxu1 }
 0x83d   : > { %v11052_v5 = vpop.f32.mrf.mxu1 }
 0x83f   : > { %v11054_v4 = vpop.f32.mrf.mxu1 }
 0x841   : > { %v11056_v60 = vpop.f32.mrf.mxu1 }
 0x843   : > { %v8293_v41 = vpop.f32.mrf.mxu1 }
 0x844   : > { %v3017_v34 = vsel %vm1672_vm1, %v8293_v41, -inf }
 0x845   : > { %3018 = vmax.xlane.f32.xlu0 %v3017_v34  ;;  %v2875_v48 = vpop.f32.mrf.mxu1 }
 0x846   : > { %v3011_v17 = vsel %vm1672_vm1, %v2875_v48, -inf }
 0x847   : > { %v11059_v26 = vpop.f32.mrf.mxu1 }
 0x848   : > { %v3020_v42 = vsel %vm1672_vm1, %v11059_v26, -inf }
 0x849   : > { %3012 = vmax.xlane.f32.xlu0 %v3011_v17  ;;  %v11062_v29 = vpop.f32.mrf.mxu1 }
 0x84a   : > { %v3014_v61 = vsel %vm1672_vm1, %v11062_v29, -inf }
 0x84b   : > { %3015 = vmax.xlane.f32.xlu1 %v3014_v61 }
 0x84d   : > { %3021 = vmax.xlane.f32.xlu0 %v3020_v42 }
 0x878   : > { %v11070_v63 = vpop.f32.mrf.mxu0 }
 0x87a   : > { %v11078_v0 = vpop.f32.mrf.mxu0 }
 0x87c   : > { %v11086_v14 = vpop.f32.mrf.mxu0 }
 0x87e   : > { %v11090_v7 = vpop.f32.mrf.mxu0 }
 0x8a6   : > { %v11068_v50 = vpop.f32.mrf.mxu1 }
 0x8a7   : > { %v3029_v39 = vsel %vm1672_vm1, %v11068_v50, -inf }
 0x8a8   : > { %3030 = vmax.xlane.f32.xlu0 %v3029_v39  ;;  %v11074_v51 = vpop.f32.mrf.mxu1 }
 0x8a9   : > { %v3023_v10 = vsel %vm1672_vm1, %v11074_v51, -inf }
 0x8aa   : > { %v11076_v11 = vpop.f32.mrf.mxu1 }
 0x8ab   : > { %v3032_v31 = vsel %vm1672_vm1, %v11076_v11, -inf }
 0x8ac   : > { %3024 = vmax.xlane.f32.xlu0 %v3023_v10  ;;  %3033 = vmax.xlane.f32.xlu1 %v3032_v31  ;;  %v11084_v2 = vpop.f32.mrf.mxu1 }
 0x8ad   : > { %v3026_v16 = vsel %vm1672_vm1, %v11084_v2, -inf }
 0x8b0   : > { %3027 = vmax.xlane.f32.xlu1 %v3026_v16 }
 0x8b5   : > { %v11092_v9 = vpop.f32.mrf.mxu0 }
 0x8b7   : > { %v11094_v53 = vpop.f32.mrf.mxu0 }
 0x8b9   : > { %v11096_v13 = vpop.f32.mrf.mxu0 }
 0x8ba   : > { %14137 = vst [vmem:[#allocation27_spill] sm:$0xff] %v11096_v13 }
 0x8bb   : > { %v11098_v36 = vpop.f32.mrf.mxu0 }
 0x8bd   : > { %v11100_v52 = vpop.f32.mrf.mxu0 }
 0x8be   : > { %v3041_v40 = vsel %vm1672_vm1, %v11100_v52, -inf }
 0x8bf   : > { %3042 = vmax.xlane.f32.xlu0 %v3041_v40  ;;  %v11104_v18 = vpop.f32.mrf.mxu0 }
 0x8c0   : > { %v3035_v6 = vsel %vm1672_vm1, %v11104_v18, -inf }
 0x8c1   : > { %3488 = vrot.lane.b32.xlu1 %v10440_v57, %s9656_s10  ;;  %v11114_v27 = vpop.f32.mrf.mxu0 }
 0x8c2   : > { %v3044_v61 = vsel %vm1672_vm1, %v11114_v27, -inf }
 0x8c3   : > { %3036 = vmax.xlane.f32.xlu0 %v3035_v6  ;;  %v11118_v8 = vpop.f32.mrf.mxu0 }
 0x8c5   : > { %3605 = vrot.lane.b32.xlu1 %v10442_v19, %s9656_s10  ;;  %v11120_v34 = vpop.f32.mrf.mxu0 }
 0x8c7   : > { %v11124_v42 = vpop.f32.mrf.mxu0 }
 0x8c8   : > { %v3047_v6 = vsel %vm1672_vm1, %v11124_v42, -inf }
 0x8c9   : > { %v11128_v10 = vpop.f32.mrf.mxu0 }
 0x8cb   : > { %v11132_v16 = vpop.f32.mrf.mxu0 }
 0x8cc   : > { %v3050_v40 = vsel %vm1672_vm1, %v11132_v16, -inf }
 0x8ce   : > { %v3019_v33 = vpop.xlane.xlu0 %3018 }
 0x8cf   : > { %v3061_v57 = vsub.f32 %v8293_v41, %v3019_v33  ;;  %v3056_v41 = vsel %vm1672_vm1, %v11128_v10, -inf }
 0x8d1   : > { %v3079_v19 = vmul.f32 1.442695, %v3061_v57 }
 0x8d2   : > { %v3013_v17 = vpop.xlane.xlu0 %3012 }
 0x8d3   : > { %v3059_v39 = vsub.f32 %v2875_v48, %v3013_v17  ;;  %8925 = vpow2.f32 %v3079_v19  ;;  %v3053_v48 = vsel %vm1672_vm1, %v11120_v34, -inf }
 0x8d5   : > { %v3075_v31 = vmul.f32 1.442695, %v3059_v39 }
 0x8d6   : > { %v3022_v19 = vpop.xlane.xlu0 %3021 }
 0x8d7   : > { %8927 = vpow2.f32 %v3075_v31  ;;  %v3062_v39 = vsub.f32 %v11059_v26, %v3022_v19 }
 0x8d9   : > { %3486 = vrot.lane.b32.xlu0 %v10434_v38, %s9656_s10  ;;  %v3038_v38 = vsel %vm1672_vm1, %v11118_v8, -inf }
 0x8e0   : > { %v11140_v33 = vpop.eup %8925 }
 0x8e1   : > { %v3113_v57 = vsel %vm1672_vm1, %v11140_v33, 0.0 }
 0x8e4   : > { %v11144_v17 = vpop.eup %8927 }
 0x8e9   : > { %3045 = vmax.xlane.f32.xlu1 %v3044_v61  ;;  %v3107_v61 = vsel %vm1672_vm1, %v11144_v17, 0.0 }
 0x8ed   : > { %3039 = vmax.xlane.f32.xlu1 %v3038_v38  ;;  %v3016_v38 = vpop.xlane.xlu1 %3015 }
 0x8ee   : > { %v3060_v31 = vsub.f32 %v11062_v29, %v3016_v38 }
 0x8f1   : > { %3057 = vmax.xlane.f32.xlu1 %v3056_v41  ;;  %v3081_v41 = vmul.f32 1.442695, %v3062_v39 }
 0x8f3   : > { %8929 = vpow2.f32 %v3081_v41 }
 0x8f5   : > { %3051 = vmax.xlane.f32.xlu1 %v3050_v40  ;;  %v3077_v40 = vmul.f32 1.442695, %v3060_v31 }
 0x8f7   : > { %8931 = vpow2.f32 %v3077_v40 }
 0x8f8   : > { %3054 = vmax.xlane.f32.xlu0 %v3053_v48 }
 0x8fc   : > { %3048 = vmax.xlane.f32.xlu0 %v3047_v6 }
 0x900   : > { %3114 = vadd.xlane.f32.xlu0 %v3113_v57  ;;  %v11152_v48 = vpop.eup %8929 }
 0x901   : > { %v3116_v6 = vsel %vm1672_vm1, %v11152_v48, 0.0 }
 0x904   : > { %3108 = vadd.xlane.f32.xlu0 %v3107_v61  ;;  %v11156_v57 = vpop.eup %8931 }
 0x906   : > { %3603 = vrot.lane.b32.xlu1 %v10444_v1, %s9656_s10  ;;  %v3110_v1 = vsel %vm1672_vm1, %v11156_v57, 0.0 }
 0x92a   : > { %3117 = vadd.xlane.f32.xlu1 %v3116_v6 }
 0x92e   : > { %3111 = vadd.xlane.f32.xlu1 %v3110_v1 }
 0x931   : > { %v3031_v26 = vpop.xlane.xlu0 %3030 }
 0x932   : > { %v3065_v61 = vsub.f32 %v11068_v50, %v3031_v26 }
 0x934   : > { %v3087_v29 = vmul.f32 1.442695, %v3065_v61 }
 0x935   : > { %v3034_v19 = vpop.xlane.xlu1 %3033  ;;  %v3025_v39 = vpop.xlane.xlu0 %3024 }
 0x936   : > { %8933 = vpow2.f32 %v3087_v29  ;;  %v3066_v38 = vsub.f32 %v11076_v11, %v3034_v19  ;;  %v3063_v31 = vsub.f32 %v11074_v51, %v3025_v39 }
 0x938   : > { %v3089_v41 = vmul.f32 1.442695, %v3066_v38  ;;  %v3083_v40 = vmul.f32 1.442695, %v3063_v31 }
 0x939   : > { %v3028_v46 = vpop.xlane.xlu1 %3027 }
 0x93a   : > { %8935 = vpow2.f32 %v3089_v41  ;;  %v3064_v6 = vsub.f32 %v11084_v2, %v3028_v46 }
 0x93b   : > { %8937 = vpow2.f32 %v3083_v40 }
 0x93c   : > { %v3085_v13 = vmul.f32 1.442695, %v3064_v6 }
 0x93d   : > { %v11164_v1 = vpop.permute.xlu1 %3488 }
 0x93e   : > { %8939 = vpow2.f32 %v3085_v13 }
 0x941   : > { %v11166_v50 = vpop.permute.xlu1 %3605 }
 0x942   : > { %8487 = vmatprep.subr.msk.bf16.mxu0 %vm1493_vm0, %v11166_v50 }
 0x943   : > { %v11170_v26 = vpop.eup %8933 }
 0x944   : > { %v3125_v51 = vsel %vm1672_vm1, %v11170_v26, 0.0 }
 0x945   : > { %3126 = vadd.xlane.f32.xlu0 %v3125_v51 }
 0x947   : > { %v11174_v11 = vpop.eup %8935 }
 0x948   : > { %v11176_v61 = vpop.eup %8937  ;;  %v3043_v46 = vpop.xlane.xlu0 %3042  ;;  %v3128_v2 = vsel %vm1672_vm1, %v11174_v11, 0.0 }
 0x949   : > { %v3069_v13 = vsub.f32 %v11100_v52, %v3043_v46  ;;  %3129 = vadd.xlane.f32.xlu0 %v3128_v2  ;;  %v3119_v29 = vsel %vm1672_vm1, %v11176_v61, 0.0 }
 0x94a   : > { %3120 = vadd.xlane.f32.xlu1 %v3119_v29 }
 0x94b   : > { %v11183_v19 = vpop.eup %8939  ;;  %v3095_v39 = vmul.f32 1.442695, %v3069_v13 }
 0x94c   : > { %v3037_v38 = vpop.xlane.xlu0 %3036  ;;  %v3122_v31 = vsel %vm1672_vm1, %v11183_v19, 0.0 }
 0x94d   : > { %8941 = vpow2.f32 %v3095_v39  ;;  %v3067_v41 = vsub.f32 %v11104_v18, %v3037_v38  ;;  %3123 = vadd.xlane.f32.xlu0 %v3122_v31 }
 0x94f   : > { %v3091_v40 = vmul.f32 1.442695, %v3067_v41 }
 0x950   : > { %v11200_v31 = vpop.permute.xlu0 %3486 }
 0x951   : > { %8943 = vpow2.f32 %v3091_v40 }
 0x95a   : > { %v11188_v6 = vpop.eup %8941 }
 0x95b   : > { %v3137_v52 = vsel %vm1672_vm1, %v11188_v6, 0.0 }
 0x95c   : > { %3138 = vadd.xlane.f32.xlu1 %v3137_v52 }
 0x95e   : > { %v11192_v51 = vpop.eup %8943 }
 0x95f   : > { %v3131_v46 = vsel %vm1672_vm1, %v11192_v51, 0.0 }
 0x960   : > { %3132 = vadd.xlane.f32.xlu1 %v3131_v46 }
 0x971   : > { %3492 = vrot.lane.b32.xlu1 %v10458_v54, %s9656_s10 }
 0x972   : > { %v3046_v2 = vpop.xlane.xlu1 %3045 }
 0x973   : > { %v3070_v18 = vsub.f32 %v11114_v27, %v3046_v2 }
 0x975   : > { %v3097_v13 = vmul.f32 1.442695, %v3070_v18 }
 0x976   : > { %v3040_v29 = vpop.xlane.xlu1 %3039 }
 0x977   : > { %8945 = vpow2.f32 %v3097_v13  ;;  %v3068_v39 = vsub.f32 %v11118_v8, %v3040_v29 }
 0x979   : > { %v3093_v38 = vmul.f32 1.442695, %v3068_v39 }
 0x97a   : > { %v3058_v29 = vpop.xlane.xlu1 %3057 }
 0x97b   : > { %8947 = vpow2.f32 %v3093_v38  ;;  %v3074_v38 = vsub.f32 %v11128_v10, %v3058_v29 }
 0x97e   : > { %v3052_v39 = vpop.xlane.xlu1 %3051 }
 0x981   : > { %v3055_v41 = vpop.xlane.xlu0 %3054 }
 0x984   : > { %v11202_v40 = vpop.eup %8945 }
 0x985   : > { %v3049_v52 = vpop.xlane.xlu0 %3048  ;;  %v3140_v46 = vsel %vm1672_vm1, %v11202_v40, 0.0 }
 0x986   : > { %v3071_v54 = vsub.f32 %v11124_v42, %v3049_v52  ;;  %3141 = vadd.xlane.f32.xlu0 %v3140_v46  ;;  %v3073_v42 = vsub.f32 %v11120_v34, %v3055_v41  ;;  %v3072_v46 = vsub.f32 %v11132_v16, %v3052_v39 }
 0x988   : > { %v11207_v27 = vpop.eup %8947  ;;  %v3099_v2 = vmul.f32 1.442695, %v3071_v54  ;;  %v3103_v52 = vmul.f32 1.442695, %v3073_v42 }
 0x989   : > { %v3134_v8 = vsel %vm1672_vm1, %v11207_v27, 0.0  ;;  %v3115_v54 = vpop.xlane.xlu0 %3114 }
 0x98a   : > { %8949 = vpow2.f32 %v3099_v2  ;;  %3135 = vadd.xlane.f32.xlu0 %v3134_v8  ;;  %v3105_v2 = vmul.f32 1.442695, %v3074_v38  ;;  %v11224_v8 = vpop.permute.xlu1 %3603 }
 0x98b   : > { %8951 = vpow2.f32 %v3103_v52 }
 0x98c   : > { %8953 = vpow2.f32 %v3105_v2 }
 0x98d   : > { %v3109_v34 = vpop.xlane.xlu0 %3108 }
 0x997   : > { %v11211_v18 = vpop.eup %8949 }
 0x998   : > { %v3143_v13 = vsel %vm1672_vm1, %v11211_v18, 0.0  ;;  %v11228_v16 = vpop.eup %8951 }
 0x999   : > { %3144 = vadd.xlane.f32.xlu1 %v3143_v13  ;;  %v11232_v41 = vpop.eup %8953 }
 0x9a0   : > { %3490 = vrot.lane.b32.xlu0 %v10452_v62, %s9656_s10  ;;  %v3101_v62 = vmul.f32 1.442695, %v3072_v46 }
 0x9a2   : > { %8955 = vpow2.f32 %v3101_v62 }
 0x9aa   : > { %3599 = vrot.lane.b32.xlu1 %v10469_v12, %s9656_s10 }
 0x9ae   : > { %3593 = vrot.lane.b32.xlu1 %v10490_v45, %s9656_s10  ;;  %v3149_v45 = vsel %vm1672_vm1, %v11228_v16, 0.0 }
 0x9af   : > { %v11234_v13 = vpop.eup %8955 }
 0x9b0   : > { %v3146_v46 = vsel %vm1672_vm1, %v11234_v13, 0.0 }
 0x9b2   : > { %3597 = vrot.lane.b32.xlu1 %v10515_v43, %s9656_s10  ;;  %v3152_v43 = vsel %vm1672_vm1, %v11232_v41, 0.0 }
 0x9b3   : > { %v3118_v10 = vpop.xlane.xlu1 %3117 }
 0x9b4   : > { %8957 = vrcp.f32 %v3118_v10 }
 0x9b5   : > { %8959 = vrcp.f32 %v3109_v34 }
 0x9b6   : > { %8961 = vrcp.f32 %v3115_v54 }
 0x9b7   : > { %v3112_v12 = vpop.xlane.xlu1 %3111 }
 0x9b8   : > { %8963 = vrcp.f32 %v3112_v12  ;;  %v3524_v12 = vsel %vm1493_vm0, %v11034_v20, 0  ;;  %v3518_v20 = vsel %vm1493_vm0, %v11030_v28, 0 }
 0x9bf   : > { %3150 = vadd.xlane.f32.xlu0 %v3149_v45 }
 0x9c1   : > { %v8958_v29 = vpop.eup %8957 }
 0x9c2   : > { %v8960_v42 = vpop.eup %8959  ;;  %v3174_v52 = vmul.f32 %v8958_v29, %v11152_v48 }
 0x9c3   : > { %3153 = vadd.xlane.f32.xlu0 %v3152_v43  ;;  %v8962_v39 = vpop.eup %8961  ;;  %v3171_v54 = vmul.f32 %v8960_v42, %v11144_v17  ;;  %v3515_v42 = vsel %vm1493_vm0, %v11116_v55, 0 }
 0x9c4   : > { %v3173_v62 = vmul.f32 %v8962_v39, %v11140_v33  ;;  %v3521_v33 = vsel %vm1493_vm0, %v11024_v44, 0 }
 0x9c5   : > { %v8964_v38 = vpop.eup %8963 }
 0x9c6   : > { %v3172_v2 = vmul.f32 %v8964_v38, %v11156_v57  ;;  %v3188_v10 = vpack.c.bf16 %v3174_v52, %v3173_v62 }
 0x9c7   : > { %3147 = vadd.xlane.f32.xlu0 %v3146_v46 }
 0x9c8   : > { %v3187_v34 = vpack.c.bf16 %v3172_v2, %v3171_v54 }
 0x9ca   : > { %8323 = vmatprep.mubr.msk.bf16.mxu1 %vm1672_vm1, %v3187_v34 }
 0x9cb   : > { %8324 = vmatmul.mubr.msk.bf16.vlgmr.msra.gmra.mxu1 %vm1672_vm1, %v3188_v10 }
 0x9cc   : > { %8348 = vmatpush3.bf16.xpose.msra.mxu1 %v3524_v12 }
 0x9cd   : > { %8484 = vmatprep.subr.msk.bf16.mxu1 %vm1493_vm0, %v11024_v44 }
 0x9ce   : > { %v3127_v48 = vpop.xlane.xlu0 %3126 }
 0x9d2   : > { %v3130_v17 = vpop.xlane.xlu0 %3129 }
 0x9d3   : > { %v3121_v45 = vpop.xlane.xlu1 %3120  ;;  %8965 = vrcp.f32 %v3130_v17  ;;  %v3629_v17 = vsel %vm1493_vm0, %v11166_v50, 0 }
 0x9d4   : > { %8350 = vmatpush3.bf16.xpose.msra.mxu1 %v3521_v33  ;;  %8967 = vrcp.f32 %v3121_v45 }
 0x9d5   : > { %8485 = vmatprep.subr.msk.bf16.mxu1 %vm1493_vm0, %v11030_v28  ;;  %8969 = vrcp.f32 %v3127_v48 }
 0x9d6   : > { %v3124_v57 = vpop.xlane.xlu0 %3123 }
 0x9d7   : > { %8971 = vrcp.f32 %v3124_v57 }
 0x9dc   : > { %8352 = vmatpush3.bf16.xpose.msra.mxu1 %v3518_v20 }
 0x9dd   : > { %8486 = vmatprep.subr.msk.bf16.mxu1 %vm1493_vm0, %v11116_v55  ;;  %3601 = vrot.lane.b32.xlu0 %v10460_v37, %s9656_s10 }
 0x9e0   : > { %v8966_v44 = vpop.eup %8965 }
 0x9e1   : > { %3591 = vrot.lane.b32.xlu0 %v10488_v24, %s9656_s10  ;;  %v8968_v29 = vpop.eup %8967  ;;  %v3178_v28 = vmul.f32 %v8966_v44, %v11174_v11 }
 0x9e2   : > { %v8970_v43 = vpop.eup %8969  ;;  %v3175_v38 = vmul.f32 %v8968_v29, %v11176_v61 }
 0x9e3   : > { %v3177_v52 = vmul.f32 %v8970_v43, %v11170_v26 }
 0x9e4   : > { %v8972_v39 = vpop.eup %8971  ;;  %8354 = vmatpush3.bf16.xpose.msra.mxu1 %v3515_v42 }
 0x9e5   : > { %3595 = vrot.lane.b32.xlu0 %v10513_v15, %s9656_s10  ;;  %v3176_v37 = vmul.f32 %v8972_v39, %v11183_v19  ;;  %v3190_v24 = vpack.c.bf16 %v3178_v28, %v3177_v52  ;;  %v3139_v15 = vpop.xlane.xlu1 %3138 }
 0x9e7   : > { %v3189_v46 = vpack.c.bf16 %v3176_v37, %v3175_v38 }
 0x9e9   : > { %3886 = vrot.lane.b32.xlu0 %v10392_v3, %s9656_s10  ;;  %8327 = vmatprep.mubr.msk.bf16.mxu1 %vm1672_vm1, %v3189_v46  ;;  %v3133_v55 = vpop.xlane.xlu1 %3132 }
 0x9ea   : > { %8328 = vmatmul.mubr.msk.bf16.gmra.mxu1 %vm1672_vm1, %v3190_v24 }
 0x9eb   : > { %8355 = vmatprep.mubr.msk.bf16.mxu1 %vm1493_vm0, %v11200_v31 }
 0x9ed   : > { %v3493_v3 = vpop.permute.xlu1 %3492 }
 0x9f2   : > { %8356 = vmatmul.mubr.msk.bf16.vlgmr.msra.gmra.mxu1 %vm1493_vm0, %v11164_v1 }
 0xa0f   : > { %v3142_v11 = vpop.xlane.xlu0 %3141 }
 0xa10   : > { %8973 = vrcp.f32 %v3142_v11 }
 0xa11   : > { %8975 = vrcp.f32 %v3133_v55 }
 0xa12   : > { %8977 = vrcp.f32 %v3139_v15 }
 0xa13   : > { %v3136_v26 = vpop.xlane.xlu0 %3135 }
 0xa14   : > { %8979 = vrcp.f32 %v3136_v26 }
 0xa17   : > { %v3491_v61 = vpop.permute.xlu0 %3490 }
 0xa18   : > { %8359 = vmatprep.mubr.msk.bf16.mxu1 %vm1493_vm0, %v3491_v61 }
 0xa19   : > { %8360 = vmatmul.mubr.msk.bf16.gmra.mxu1 %vm1493_vm0, %v3493_v3 }
 0xa1d   : > { %v8974_v19 = vpop.eup %8973 }
 0xa1e   : > { %v8976_v54 = vpop.eup %8975  ;;  %v3182_v1 = vmul.f32 %v8974_v19, %v11202_v40 }
 0xa1f   : > { %v8978_v31 = vpop.eup %8977  ;;  %v3179_v62 = vmul.f32 %v8976_v54, %v11192_v51  ;;  %v3626_v51 = vsel %vm1493_vm0, %v11224_v8, 0 }
 0xa20   : > { %v3181_v10 = vmul.f32 %v8978_v31, %v11188_v6 }
 0xa21   : > { %v8980_v2 = vpop.eup %8979 }
 0xa22   : > { %v3180_v34 = vmul.f32 %v8980_v2, %v11207_v27  ;;  %v3192_v48 = vpack.c.bf16 %v3182_v1, %v3181_v10  ;;  %v3145_v27 = vpop.xlane.xlu1 %3144 }
 0xa24   : > { %v3191_v12 = vpack.c.bf16 %v3180_v34, %v3179_v62 }
 0xa26   : > { %8339 = vmatprep.mubr.msk.bf16.mxu0 %vm1672_vm1, %v3191_v12  ;;  %v3600_v57 = vpop.permute.xlu1 %3599 }
 0xa27   : > { %8340 = vmatmul.mubr.msk.bf16.vlgmr.msra.gmra.mxu0 %vm1672_vm1, %v3192_v48  ;;  %v3620_v42 = vsel %vm1493_vm0, %v3600_v57, 0 }
 0xa28   : > { %8364 = vmatpush3.bf16.xpose.msra.mxu0 %v3629_v17 }
 0xa29   : > { %8488 = vmatprep.subr.msk.bf16.mxu0 %vm1493_vm0, %v11224_v8 }
 0xa2a   : > { %v3594_v55 = vpop.permute.xlu1 %3593 }
 0xa30   : > { %8366 = vmatpush3.bf16.xpose.msra.mxu0 %v3626_v51 }
 0xa48   : > { %v3151_v40 = vpop.xlane.xlu0 %3150 }
 0xa4c   : > { %v3154_v6 = vpop.xlane.xlu0 %3153 }
 0xa4d   : > { %8981 = vrcp.f32 %v3154_v6 }
 0xa4e   : > { %8983 = vrcp.f32 %v3145_v27 }
 0xa4f   : > { %8985 = vrcp.f32 %v3151_v40 }
 0xa50   : > { %v3148_v45 = vpop.xlane.xlu0 %3147 }
 0xa51   : > { %8987 = vrcp.f32 %v3148_v45 }
 0xa54   : > { %v3602_v33 = vpop.permute.xlu0 %3601 }
 0xa55   : > { %8489 = vmatprep.subr.msk.bf16.mxu0 %vm1493_vm0, %v3602_v33  ;;  %v3623_v50 = vsel %vm1493_vm0, %v3602_v33, 0 }
 0xa56   : > { %8368 = vmatpush3.bf16.xpose.msra.mxu0 %v3623_v50 }
 0xa57   : > { %8490 = vmatprep.subr.msk.bf16.mxu0 %vm1493_vm0, %v3600_v57 }
 0xa58   : > { %v3592_v20 = vpop.permute.xlu0 %3591 }
 0xa5a   : > { %v8982_v8 = vpop.eup %8981 }
 0xa5b   : > { %v8984_v44 = vpop.eup %8983  ;;  %v3186_v28 = vmul.f32 %v8982_v8, %v11232_v41 }
 0xa5c   : > { %v3596_v29 = vpop.permute.xlu0 %3595  ;;  %v8986_v43 = vpop.eup %8985  ;;  %v3183_v38 = vmul.f32 %v8984_v44, %v11211_v18 }
 0xa5d   : > { %v3185_v46 = vmul.f32 %v8986_v43, %v11228_v16  ;;  %v3598_v18 = vpop.permute.xlu1 %3597 }
 0xa5e   : > { %v8988_v39 = vpop.eup %8987  ;;  %8370 = vmatpush3.bf16.xpose.msra.mxu0 %v3620_v42 }
 0xa5f   : > { %v3184_v37 = vmul.f32 %v8988_v39, %v11234_v13  ;;  %v3194_v15 = vpack.c.bf16 %v3186_v28, %v3185_v46 }
 0xa60   : > { %v3887_v52 = vpop.permute.xlu0 %3886 }
 0xa61   : > { %8379 = vmatprep.subr.bf16.mxu1 %v3887_v52  ;;  %v3193_v24 = vpack.c.bf16 %v3184_v37, %v3183_v38 }
 0xa62   : > { %8380 = vmatpush3.bf16.msra.mxu1 %v3887_v52 }
 0xa63   : > { %8343 = vmatprep.mubr.msk.bf16.mxu0 %vm1672_vm1, %v3193_v24 }
 0xa64   : > { %8344 = vmatmul.mubr.msk.bf16.gmra.mxu0 %vm1672_vm1, %v3194_v15 }
 0xa65   : > { %8371 = vmatprep.mubr.msk.bf16.mxu0 %vm1493_vm0, %v3592_v20 }
 0xa6c   : > { %8372 = vmatmul.mubr.msk.bf16.vlgmr.msra.gmra.mxu0 %vm1493_vm0, %v3594_v55 }
 0xa6d   : > { %8375 = vmatprep.mubr.msk.bf16.mxu0 %vm1493_vm0, %v3596_v29 }
 0xa74   : > { %8376 = vmatmul.mubr.msk.bf16.gmra.mxu0 %vm1493_vm0, %v3598_v18 }
 0xa8b   : > { %v11306_v41 = vpop.f32.mrf.mxu1 }
 0xa8d   : > { %v11308_v16 = vpop.f32.mrf.mxu1 }
 0xa8f   : > { %v11310_v13 = vpop.f32.mrf.mxu1 }
 0xa91   : > { %v11312_v11 = vpop.f32.mrf.mxu1 }
 0xaaa   : > { %v11314_v26 = vpop.f32.mrf.mxu1 }
 0xaac   : > { %v11316_v61 = vpop.f32.mrf.mxu1 }
 0xaae   : > { %v11318_v3 = vpop.f32.mrf.mxu1 }
 0xab0   : > { %v11320_v19 = vpop.f32.mrf.mxu1 }
 0xab2   : > { %v11322_v54 = vpop.f32.mrf.mxu1 }
 0xab3   : > { %v3702_v31 = vsel %vm1672_vm1, %v11322_v54, -inf }
 0xab4   : > { %3703 = vmax.xlane.f32.xlu0 %v3702_v31  ;;  %v11326_v2 = vpop.f32.mrf.mxu1 }
 0xab5   : > { %v3696_v62 = vsel %vm1672_vm1, %v11326_v2, -inf }
 0xab6   : > { %v11328_v1 = vpop.f32.mrf.mxu1 }
 0xab7   : > { %v3705_v12 = vsel %vm1672_vm1, %v11328_v1, -inf }
 0xab8   : > { %3697 = vmax.xlane.f32.xlu0 %v3696_v62  ;;  %v11332_v34 = vpop.f32.mrf.mxu1 }
 0xab9   : > { %v3699_v10 = vsel %vm1672_vm1, %v11332_v34, -inf }
 0xaba   : > { %3700 = vmax.xlane.f32.xlu1 %v3699_v10 }
 0xabc   : > { %3706 = vmax.xlane.f32.xlu0 %v3705_v12 }
 0xad9   : > { %v11338_v48 = vpop.f32.mrf.mxu1 }
 0xada   : > { %v3714_v17 = vsel %vm1672_vm1, %v11338_v48, -inf }
 0xadb   : > { %3715 = vmax.xlane.f32.xlu0 %v3714_v17  ;;  %v11342_v51 = vpop.f32.mrf.mxu1 }
 0xadc   : > { %v3708_v27 = vsel %vm1672_vm1, %v11342_v51, -inf }
 0xadd   : > { %v11344_v40 = vpop.f32.mrf.mxu1 }
 0xade   : > { %v3717_v6 = vsel %vm1672_vm1, %v11344_v40, -inf }
 0xadf   : > { %3709 = vmax.xlane.f32.xlu0 %v3708_v27  ;;  %3718 = vmax.xlane.f32.xlu1 %v3717_v6  ;;  %v11350_v45 = vpop.f32.mrf.mxu1 }
 0xae0   : > { %v3711_v33 = vsel %vm1672_vm1, %v11350_v45, -inf }
 0xae3   : > { %3712 = vmax.xlane.f32.xlu1 %v3711_v33 }
 0xae7   : > { %v11354_v50 = vpop.f32.mrf.mxu0 }
 0xae9   : > { %v11356_v57 = vpop.f32.mrf.mxu0 }
 0xaeb   : > { %v11358_v20 = vpop.f32.mrf.mxu0 }
 0xaed   : > { %v11360_v8 = vpop.f32.mrf.mxu0 }
 0xb24   : > { %v11362_v44 = vpop.f32.mrf.mxu0 }
 0xb26   : > { %v11364_v29 = vpop.f32.mrf.mxu0 }
 0xb28   : > { %v11366_v43 = vpop.f32.mrf.mxu0 }
 0xb29   : > { %14138 = vst [vmem:[#allocation28_spill] sm:$0xff] %v11366_v43 }
 0xb2a   : > { %v11368_v42 = vpop.f32.mrf.mxu0 }
 0xb2b   : > { %14139 = vst [vmem:[#allocation29_spill] sm:$0xff] %v11368_v42 }
 0xb2c   : > { %v11370_v39 = vpop.f32.mrf.mxu0 }
 0xb2d   : > { %v3726_v28 = vsel %vm1672_vm1, %v11370_v39, -inf }
 0xb2e   : > { %3727 = vmax.xlane.f32.xlu0 %v3726_v28  ;;  %v11374_v38 = vpop.f32.mrf.mxu0 }
 0xb2f   : > { %v3720_v52 = vsel %vm1672_vm1, %v11374_v38, -inf }
 0xb30   : > { %v11376_v37 = vpop.f32.mrf.mxu0 }
 0xb31   : > { %v3729_v46 = vsel %vm1672_vm1, %v11376_v37, -inf }
 0xb32   : > { %3721 = vmax.xlane.f32.xlu0 %v3720_v52  ;;  %3730 = vmax.xlane.f32.xlu1 %v3729_v46  ;;  %v11382_v24 = vpop.f32.mrf.mxu0 }
 0xb33   : > { %v3723_v55 = vsel %vm1672_vm1, %v11382_v24, -inf }
 0xb34   : > { %v11384_v15 = vpop.f32.mrf.mxu0 }
 0xb35   : > { %v3738_v18 = vsel %vm1672_vm1, %v11384_v15, -inf }
 0xb36   : > { %3724 = vmax.xlane.f32.xlu1 %v3723_v55  ;;  %3739 = vmax.xlane.f32.xlu0 %v3738_v18  ;;  %v11390_v31 = vpop.f32.mrf.mxu0 }
 0xb37   : > { %v3732_v10 = vsel %vm1672_vm1, %v11390_v31, -inf }
 0xb38   : > { %v11392_v62 = vpop.f32.mrf.mxu0 }
 0xb39   : > { %v3741_v12 = vsel %vm1672_vm1, %v11392_v62, -inf }
 0xb3a   : > { %3733 = vmax.xlane.f32.xlu0 %v3732_v10  ;;  %3742 = vmax.xlane.f32.xlu1 %v3741_v12  ;;  %v11398_v17 = vpop.f32.mrf.mxu0 }
 0xb3b   : > { %v3735_v27 = vsel %vm1672_vm1, %v11398_v17, -inf }
 0xb3d   : > { %v3704_v6 = vpop.xlane.xlu0 %3703 }
 0xb3e   : > { %3736 = vmax.xlane.f32.xlu1 %v3735_v27  ;;  %v3746_v52 = vsub.f32 %v11322_v54, %v3704_v6 }
 0xb40   : > { %v3764_v18 = vmul.f32 1.442695, %v3746_v52 }
 0xb41   : > { %v3698_v33 = vpop.xlane.xlu0 %3697 }
 0xb42   : > { %v3744_v10 = vsub.f32 %v11326_v2, %v3698_v33  ;;  %8989 = vpow2.f32 %v3764_v18 }
 0xb43   : > { %v3701_v55 = vpop.xlane.xlu1 %3700 }
 0xb44   : > { %v3745_v12 = vsub.f32 %v11332_v34, %v3701_v55 }
 0xb45   : > { %v3707_v28 = vpop.xlane.xlu0 %3706 }
 0xb46   : > { %v3747_v46 = vsub.f32 %v11328_v1, %v3707_v28  ;;  %v3762_v43 = vmul.f32 1.442695, %v3745_v12 }
 0xb48   : > { %v3766_v27 = vmul.f32 1.442695, %v3747_v46 }
 0xb4a   : > { %8991 = vpow2.f32 %v3766_v27 }
 0xb4f   : > { %3884 = vrot.lane.b32.xlu1 %v10402_v21, %s9656_s10  ;;  %v3760_v21 = vmul.f32 1.442695, %v3744_v10  ;;  %v11415_v28 = vpop.eup %8989 }
 0xb50   : > { %3882 = vrot.lane.b32.xlu0 %v10411_v22, %s9656_s10 }
 0xb51   : > { %8993 = vpow2.f32 %v3760_v21 }
 0xb52   : > { %8995 = vpow2.f32 %v3762_v43 }
 0xb54   : > { %3880 = vrot.lane.b32.xlu0 %v10419_v23, %s9656_s10 }
 0xb57   : > { %v11418_v55 = vpop.eup %8991 }
 0xb64   : > { %v3716_v22 = vpop.xlane.xlu0 %3715 }
 0xb65   : > { %v3750_v23 = vsub.f32 %v11338_v48, %v3716_v22  ;;  %v11420_v48 = vpop.eup %8993 }
 0xb67   : > { %v3772_v42 = vmul.f32 1.442695, %v3750_v23 }
 0xb68   : > { %v3719_v54 = vpop.xlane.xlu1 %3718  ;;  %v3710_v6 = vpop.xlane.xlu0 %3709 }
 0xb69   : > { %v3748_v1 = vsub.f32 %v11342_v51, %v3710_v6  ;;  %8997 = vpow2.f32 %v3772_v42  ;;  %v3751_v2 = vsub.f32 %v11344_v40, %v3719_v54  ;;  %v3798_v51 = vsel %vm1672_vm1, %v11415_v28, 0.0  ;;  %v11426_v42 = vpop.eup %8995 }
 0xb6a   : > { %v3801_v40 = vsel %vm1672_vm1, %v11418_v55, 0.0  ;;  %v3795_v18 = vsel %vm1672_vm1, %v11426_v42, 0.0 }
 0xb6b   : > { %v3768_v33 = vmul.f32 1.442695, %v3748_v1  ;;  %v3774_v52 = vmul.f32 1.442695, %v3751_v2 }
 0xb6c   : > { %v3713_v34 = vpop.xlane.xlu1 %3712 }
 0xb6d   : > { %8999 = vpow2.f32 %v3768_v33  ;;  %v3749_v46 = vsub.f32 %v11350_v45, %v3713_v34  ;;  %v3792_v45 = vsel %vm1672_vm1, %v11420_v48, 0.0 }
 0xb6e   : > { %9001 = vpow2.f32 %v3774_v52 }
 0xb6f   : > { %v3770_v43 = vmul.f32 1.442695, %v3749_v46 }
 0xb71   : > { %9003 = vpow2.f32 %v3770_v43 }
 0xb73   : > { %3799 = vadd.xlane.f32.xlu0 %v3798_v51  ;;  %3802 = vadd.xlane.f32.xlu1 %v3801_v40 }
 0xb76   : > { %v11432_v10 = vpop.eup %8997 }
 0xb77   : > { %3793 = vadd.xlane.f32.xlu0 %v3792_v45  ;;  %3796 = vadd.xlane.f32.xlu1 %v3795_v18  ;;  %v3810_v12 = vsel %vm1672_vm1, %v11432_v10, 0.0 }
 0xb7a   : > { %v11436_v27 = vpop.eup %8999 }
 0xb7b   : > { %3811 = vadd.xlane.f32.xlu1 %v3810_v12  ;;  %v3804_v21 = vsel %vm1672_vm1, %v11436_v27, 0.0  ;;  %v11440_v22 = vpop.eup %9001 }
 0xb7c   : > { %v3813_v23 = vsel %vm1672_vm1, %v11440_v22, 0.0 }
 0xb7e   : > { %v11444_v54 = vpop.eup %9003 }
 0xb7f   : > { %3805 = vadd.xlane.f32.xlu1 %v3804_v21  ;;  %v3807_v6 = vsel %vm1672_vm1, %v11444_v54, 0.0 }
 0xb83   : > { %3814 = vadd.xlane.f32.xlu1 %v3813_v23 }
 0xb87   : > { %3808 = vadd.xlane.f32.xlu1 %v3807_v6 }
 0xb8d   : > { %3975 = vrot.lane.b32.xlu0 %v10475_v59, %s9656_s10 }
 0xbb7   : > { %v3728_v1 = vpop.xlane.xlu0 %3727 }
 0xbb8   : > { %v3754_v2 = vsub.f32 %v11370_v39, %v3728_v1 }
 0xbba   : > { %v3780_v33 = vmul.f32 1.442695, %v3754_v2 }
 0xbbb   : > { %v3731_v34 = vpop.xlane.xlu1 %3730  ;;  %v3722_v52 = vpop.xlane.xlu0 %3721 }
 0xbbc   : > { %9005 = vpow2.f32 %v3780_v33  ;;  %v3755_v46 = vsub.f32 %v11376_v37, %v3731_v34  ;;  %v3752_v43 = vsub.f32 %v11374_v38, %v3722_v52 }
 0xbbe   : > { %v3776_v51 = vmul.f32 1.442695, %v3752_v43  ;;  %v3782_v40 = vmul.f32 1.442695, %v3755_v46 }
 0xbbf   : > { %v3725_v45 = vpop.xlane.xlu1 %3724  ;;  %v3740_v18 = vpop.xlane.xlu0 %3739 }
 0xbc0   : > { %v3753_v12 = vsub.f32 %v11382_v24, %v3725_v45  ;;  %v3758_v21 = vsub.f32 %v11384_v15, %v3740_v18  ;;  %9007 = vpow2.f32 %v3776_v51 }
 0xbc1   : > { %9009 = vpow2.f32 %v3782_v40 }
 0xbc2   : > { %v3778_v59 = vmul.f32 1.442695, %v3753_v12  ;;  %v3788_v23 = vmul.f32 1.442695, %v3758_v21 }
 0xbc3   : > { %v3743_v39 = vpop.xlane.xlu1 %3742  ;;  %v3734_v6 = vpop.xlane.xlu0 %3733 }
 0xbc4   : > { %9011 = vpow2.f32 %v3778_v59  ;;  %v3756_v1 = vsub.f32 %v11390_v31, %v3734_v6  ;;  %v3759_v38 = vsub.f32 %v11392_v62, %v3743_v39 }
 0xbc5   : > { %9013 = vpow2.f32 %v3788_v23 }
 0xbc6   : > { %v3784_v37 = vmul.f32 1.442695, %v3756_v1  ;;  %v3790_v34 = vmul.f32 1.442695, %v3759_v38 }
 0xbc7   : > { %v3737_v2 = vpop.xlane.xlu1 %3736  ;;  %v3883_v52 = vpop.permute.xlu0 %3882 }
 0xbc8   : > { %9015 = vpow2.f32 %v3784_v37  ;;  %v3757_v24 = vsub.f32 %v11398_v17, %v3737_v2  ;;  %v7785_v37 = vpack.c.bf16 %v11044_v32, %v11044_v32  ;;  %v7787_v2 = vpack.c.bf16 %v11042_v47, %v11042_v47 }
 0xbc9   : > { %v11457_v33 = vpop.eup %9005  ;;  %9017 = vpow2.f32 %v3790_v34  ;;  %v7786_v34 = vpack.c.bf16 %v11048_v35, %v11048_v35  ;;  %v7803_v47 = vpack.c.bf16 %v11306_v41, %v11306_v41  ;;  %v7802_v35 = vpack.c.bf16 %v11312_v11, %v11312_v11 }
 0xbca   : > { %v3822_v15 = vsel %vm1672_vm1, %v11457_v33, 0.0  ;;  %v3786_v62 = vmul.f32 1.442695, %v3757_v24  ;;  %v7804_v41 = vpack.c.bf16 %v11310_v13, %v11310_v13  ;;  %v7791_v11 = vpack.c.bf16 %v11050_v56, %v11050_v56 }
 0xbcb   : > { %v3885_v46 = vpop.permute.xlu1 %3884  ;;  %3823 = vadd.xlane.f32.xlu0 %v3822_v15  ;;  %v3881_v40 = vpop.permute.xlu0 %3880  ;;  %v7805_v13 = vpack.c.bf16 %v11316_v61, %v11316_v61  ;;  %v7792_v56 = vpack.c.bf16 %v11054_v4, %v11054_v4  ;;  %v7806_v61 = vpack.c.bf16 %v11320_v19, %v11320_v19 }
 0xbcc   : > { %8381 = vmatprep.subr.bf16.mxu1 %v3885_v46  ;;  %9019 = vpow2.f32 %v3786_v62 }
 0xbcd   : > { %8382 = vmatpush3.bf16.msra.mxu1 %v3885_v46  ;;  %v11462_v31 = vpop.eup %9007 }
 0xbce   : > { %8383 = vmatprep.subr.bf16.mxu1 %v3883_v52  ;;  %v3816_v43 = vsel %vm1672_vm1, %v11462_v31, 0.0  ;;  %v11466_v51 = vpop.eup %9009 }
 0xbcf   : > { %3817 = vadd.xlane.f32.xlu0 %v3816_v43  ;;  %v3825_v12 = vsel %vm1672_vm1, %v11466_v51, 0.0 }
 0xbd1   : > { %v11468_v17 = vpop.eup %9011  ;;  %8384 = vmatpush3.bf16.msra.mxu1 %v3883_v52 }
 0xbd2   : > { %8385 = vmatprep.subr.bf16.mxu1 %v3881_v40  ;;  %v3819_v45 = vsel %vm1672_vm1, %v11468_v17, 0.0  ;;  %v11472_v18 = vpop.eup %9013 }
 0xbd3   : > { %3820 = vadd.xlane.f32.xlu1 %v3819_v45  ;;  %3826 = vadd.xlane.f32.xlu0 %v3825_v12  ;;  %v3834_v21 = vsel %vm1672_vm1, %v11472_v18, 0.0 }
 0xbd5   : > { %8386 = vmatpush3.bf16.msra.mxu1 %v3881_v40  ;;  %v11478_v59 = vpop.eup %9015  ;;  %v7807_v40 = vpack.c.bf16 %v11314_v26, %v11314_v26  ;;  %v7793_v26 = vpack.c.bf16 %v11078_v0, %v11078_v0  ;;  %v7794_v0 = vpack.c.bf16 %v11090_v7, %v11090_v7 }
 0xbd6   : > { %v3828_v23 = vsel %vm1672_vm1, %v11478_v59, 0.0  ;;  %v11482_v39 = vpop.eup %9017 }
 0xbd7   : > { %3835 = vadd.xlane.f32.xlu1 %v3834_v21  ;;  %v3837_v6 = vsel %vm1672_vm1, %v11482_v39, 0.0 }
 0xbd9   : > { %v11486_v1 = vpop.eup %9019 }
 0xbda   : > { %v3831_v38 = vsel %vm1672_vm1, %v11486_v1, 0.0 }
 0xbdb   : > { %3829 = vadd.xlane.f32.xlu1 %v3828_v23 }
 0xbdf   : > { %3838 = vadd.xlane.f32.xlu1 %v3837_v6 }
 0xbe3   : > { %3832 = vadd.xlane.f32.xlu1 %v3831_v38  ;;  %v7808_v38 = vpack.c.bf16 %v11318_v3, %v11318_v3 }
 0xbe9   : > { %3971 = vrot.lane.b32.xlu0 %v10502_v58, %s9656_s10  ;;  %v7801_v58 = vpack.c.bf16 %v11308_v16, %v11308_v16  ;;  %v7789_v16 = vpack.c.bf16 %v11052_v5, %v11052_v5  ;;  %v7790_v5 = vpack.c.bf16 %v11056_v60, %v11056_v60 }
 0xbed   : > { %3969 = vrot.lane.b32.xlu0 %v10508_v49, %s9656_s10  ;;  %v7788_v49 = vpack.c.bf16 %v11046_v25, %v11046_v25 }
 0xbf1   : > { %2736 = vrot.lane.b32.xlu0 %v7785_v37, %s9656_s10 }
 0xbf4   : > { %3973 = vrot.lane.b32.xlu1 %v10494_v30, %s9656_s10 }
 0xbf5   : > { %2740 = vrot.lane.b32.xlu0 %v7787_v2, %s9656_s10 }
 0xbf8   : > { %2738 = vrot.lane.b32.xlu1 %v7786_v34, %s9656_s10 }
 0xbf9   : > { %3421 = vrot.lane.b32.xlu0 %v7801_v58, %s9655_s6 }
 0xbfc   : > { %v3803_v32 = vpop.xlane.xlu1 %3802  ;;  %2742 = vrot.lane.b32.xlu1 %v7788_v49, %s9656_s10  ;;  %v3800_v30 = vpop.xlane.xlu0 %3799 }
 0xbfd   : > { %9021 = vrcp.f32 %v3803_v32  ;;  %3425 = vrot.lane.b32.xlu0 %v7803_v47, %s9655_s6 }
 0xbfe   : > { %9023 = vrcp.f32 %v3800_v30 }
 0xc00   : > { %v3797_v25 = vpop.xlane.xlu1 %3796  ;;  %3423 = vrot.lane.b32.xlu1 %v7802_v35, %s9655_s6  ;;  %v3794_v24 = vpop.xlane.xlu0 %3793 }
 0xc01   : > { %9025 = vrcp.f32 %v3797_v25  ;;  %2744 = vrot.lane.b32.xlu0 %v7789_v16, %s9656_s10 }
 0xc02   : > { %9027 = vrcp.f32 %v3794_v24 }
 0xc04   : > { %v3812_v15 = vpop.xlane.xlu1 %3811  ;;  %3427 = vrot.lane.b32.xlu1 %v7804_v41, %s9655_s6  ;;  %v3976_v52 = vpop.permute.xlu0 %3975 }
 0xc05   : > { %8395 = vmatprep.subr.bf16.mxu0 %v3976_v52  ;;  %2748 = vrot.lane.b32.xlu0 %v7791_v11, %s9656_s10 }
 0xc06   : > { %8396 = vmatpush3.bf16.msra.mxu0 %v3976_v52 }
 0xc08   : > { %v3806_v46 = vpop.xlane.xlu1 %3805  ;;  %2746 = vrot.lane.b32.xlu1 %v7790_v5, %s9656_s10 }
 0xc09   : > { %3429 = vrot.lane.b32.xlu0 %v7805_v13, %s9655_s6 }
 0xc0a   : > { %v9022_v62 = vpop.eup %9021 }
 0xc0b   : > { %v9024_v43 = vpop.eup %9023  ;;  %v3859_v4 = vmul.f32 %v9022_v62, %v11418_v55 }
 0xc0c   : > { %v3815_v60 = vpop.xlane.xlu1 %3814  ;;  %2750 = vrot.lane.b32.xlu1 %v7792_v56, %s9656_s10  ;;  %v3858_v21 = vmul.f32 %v9024_v43, %v11415_v28 }
 0xc0d   : > { %9029 = vrcp.f32 %v3815_v60  ;;  %3433 = vrot.lane.b32.xlu0 %v7807_v40, %s9655_s6 }
 0xc0e   : > { %v9026_v45 = vpop.eup %9025  ;;  %9031 = vrcp.f32 %v3806_v46  ;;  %v3873_v28 = vpack.c.bf16 %v3859_v4, %v3858_v21 }
 0xc0f   : > { %v9028_v12 = vpop.eup %9027  ;;  %v3857_v23 = vmul.f32 %v9026_v45, %v11426_v42  ;;  %9033 = vrcp.f32 %v3812_v15 }
 0xc10   : > { %v3809_v6 = vpop.xlane.xlu1 %3808  ;;  %3431 = vrot.lane.b32.xlu1 %v7806_v61, %s9655_s6  ;;  %v3856_v19 = vmul.f32 %v9028_v12, %v11420_v48 }
 0xc11   : > { %9035 = vrcp.f32 %v3809_v6  ;;  %2752 = vrot.lane.b32.xlu0 %v7793_v26, %s9656_s10 }
 0xc12   : > { %v3872_v55 = vpack.c.bf16 %v3857_v23, %v3856_v19 }
 0xc14   : > { %8387 = vmatprep.mubr.msk.bf16.mxu1 %vm1672_vm1, %v3872_v55  ;;  %3435 = vrot.lane.b32.xlu1 %v7808_v38, %s9655_s6 }
 0xc15   : > { %8388 = vmatmul.mubr.msk.bf16.vlgmr.msra.gmra.mxu1 %vm1672_vm1, %v3873_v28 }
 0xc18   : > { %2754 = vrot.lane.b32.xlu1 %v7794_v0, %s9656_s10 }
 0xc1a   : > { %v9030_v48 = vpop.eup %9029 }
 0xc1b   : > { %v9032_v42 = vpop.eup %9031  ;;  %v3863_v3 = vmul.f32 %v9030_v48, %v11440_v22 }
 0xc1c   : > { %v9034_v37 = vpop.eup %9033  ;;  %v3860_v34 = vmul.f32 %v9032_v42, %v11436_v27 }
 0xc1d   : > { %v3862_v49 = vmul.f32 %v9034_v37, %v11432_v10 }
 0xc1e   : > { %v9036_v2 = vpop.eup %9035 }
 0xc1f   : > { %v3861_v58 = vmul.f32 %v9036_v2, %v11444_v54  ;;  %v3875_v32 = vpack.c.bf16 %v3863_v3, %v3862_v49  ;;  %v14140_v2 = vmov 0   ;;  %v8637_v49 = vld [vmem:[#allocation11 + $0x38] sm:$0xff]  }
 0xc20   : > { %8411 = vmatprep.subr.bf16.mxu1 %v8637_v49 }
 0xc21   : > { %v3874_v47 = vpack.c.bf16 %v3861_v58, %v3860_v34  ;;  %8412 = vmatpush3.bf16.msra.mxu1 %v8637_v49 }
 0xc23   : > { %8391 = vmatprep.mubr.msk.bf16.mxu1 %vm1672_vm1, %v3874_v47  ;;  %v8638_v47 = vld [vmem:[#allocation11 + $0x30] sm:$0xff]  }
 0xc24   : > { %8392 = vmatmul.mubr.msk.bf16.gmra.mxu1 %vm1672_vm1, %v3875_v32  ;;  %8413 = vmatprep.subr.bf16.mxu1 %v8638_v47  ;;  %v8639_v32 = vld [vmem:[#allocation11 + $0x28] sm:$0xff]  }
 0xc25   : > { %8414 = vmatpush3.bf16.msra.mxu1 %v8638_v47 }
 0xc26   : > { %8415 = vmatprep.subr.bf16.mxu1 %v8639_v32 }
 0xc29   : > { %8416 = vmatpush3.bf16.msra.mxu1 %v8639_v32 }
 0xc54   : > { %v3824_v7 = vpop.xlane.xlu0 %3823 }
 0xc58   : > { %v3818_v30 = vpop.xlane.xlu0 %3817 }
 0xc59   : > { %9037 = vrcp.f32 %v3818_v30  ;;  %v8641_v30 = vld [vmem:[#allocation11 + $0x18] sm:$0xff]  }
 0xc5c   : > { %v3821_v35 = vpop.xlane.xlu1 %3820  ;;  %v3827_v16 = vpop.xlane.xlu0 %3826 }
 0xc5d   : > { %9039 = vrcp.f32 %v3821_v35  ;;  %v8642_v35 = vld [vmem:[#allocation11 + $0x10] sm:$0xff]  }
 0xc5e   : > { %9041 = vrcp.f32 %v3827_v16  ;;  %v8643_v16 = vld [vmem:[#allocation11 + $0x8] sm:$0xff]  }
 0xc5f   : > { %9043 = vrcp.f32 %v3824_v7  ;;  %v8640_v7 = vld [vmem:[#allocation11 + $0x20] sm:$0xff]  }
 0xc60   : > { %v3836_v25 = vpop.xlane.xlu1 %3835  ;;  %v3972_v22 = vpop.permute.xlu0 %3971  ;;  %8417 = vmatprep.subr.bf16.mxu1 %v8640_v7 }
 0xc61   : > { %8418 = vmatpush3.bf16.msra.mxu1 %v8640_v7 }
 0xc62   : > { %8419 = vmatprep.subr.bf16.mxu1 %v8641_v30 }
 0xc64   : > { %v3830_v24 = vpop.xlane.xlu1 %3829  ;;  %v3970_v27 = vpop.permute.xlu0 %3969 }
 0xc65   : > { %9045 = vrcp.f32 %v3830_v24  ;;  %8420 = vmatpush3.bf16.msra.mxu1 %v8641_v30 }
 0xc66   : > { %v9038_v54 = vpop.eup %9037  ;;  %8421 = vmatprep.subr.bf16.mxu1 %v8642_v35 }
 0xc67   : > { %v3864_v15 = vmul.f32 %v9038_v54, %v11462_v31 }
 0xc68   : > { %v3839_v10 = vpop.xlane.xlu1 %3838  ;;  %v2737_v41 = vpop.permute.xlu0 %2736 }
 0xc69   : > { %2785 = vst.msk [vmem:[#allocation2] sm:$0xf] %vm2784_vm3, %v2737_v41  ;;  %8422 = vmatpush3.bf16.msra.mxu1 %v8642_v35 }
 0xc6a   : > { %v9040_v11 = vpop.eup %9039  ;;  %8423 = vmatprep.subr.bf16.mxu1 %v8643_v16 }
 0xc6b   : > { %v3865_v52 = vmul.f32 %v9040_v11, %v11468_v17  ;;  %v9042_v31 = vpop.eup %9041 }
 0xc6c   : > { %v3833_v5 = vpop.xlane.xlu1 %3832  ;;  %v2741_v13 = vpop.permute.xlu0 %2740  ;;  %v3867_v60 = vmul.f32 %v9042_v31, %v11466_v51 }
 0xc6d   : > { %9047 = vrcp.f32 %v3833_v5  ;;  %v3876_v46 = vpack.c.bf16 %v3865_v52, %v3864_v15  ;;  %2787 = vst.msk [vmem:[#allocation2 + $0x8] sm:$0xf] %vm2784_vm3, %v2741_v13  ;;  %v9044_v40 = vpop.eup %9043  ;;  %8424 = vmatpush3.bf16.msra.mxu1 %v8643_v16  ;;  %v7795_v15 = vpack.c.bf16 %v11070_v63, %v11070_v63  ;;  %v7796_v5 = vpack.c.bf16 %v11086_v14, %v11086_v14 }
 0xc6e   : > { %9049 = vrcp.f32 %v3839_v10  ;;  %v3866_v12 = vmul.f32 %v9044_v40, %v11457_v33  ;;  %v7809_v13 = vpack.c.bf16 %v11356_v57, %v11356_v57  ;;  %v7810_v63 = vpack.c.bf16 %v11360_v8, %v11360_v8 }
 0xc6f   : > { %8403 = vmatprep.mubr.msk.bf16.mxu0 %vm1672_vm1, %v3876_v46  ;;  %9051 = vrcp.f32 %v3836_v25  ;;  %v7811_v57 = vpack.c.bf16 %v11354_v50, %v11354_v50  ;;  %v7797_v8 = vpack.c.bf16 %v11094_v53, %v11094_v53 }
 0xc70   : > { %v3974_v56 = vpop.permute.xlu1 %3973  ;;  %v3422_v62 = vpop.permute.xlu0 %3421  ;;  %v3877_v23 = vpack.c.bf16 %v3867_v60, %v3866_v12  ;;  %v7812_v60 = vpack.c.bf16 %v11358_v20, %v11358_v20  ;;  %v7799_v20 = vpack.c.bf16 %v11092_v9, %v11092_v9  ;;  %v7815_v9 = vpack.c.bf16 %v11362_v44, %v11362_v44 }
 0xc71   : > { %8397 = vmatprep.subr.bf16.mxu0 %v3974_v56  ;;  %3470 = vst.msk [vmem:[#allocation2] sm:$0xf] %vm3469_vm4, %v3422_v62 }
 0xc72   : > { %8398 = vmatpush3.bf16.msra.mxu0 %v3974_v56  ;;  %v9046_v45 = vpop.eup %9045 }
 0xc73   : > { %8399 = vmatprep.subr.bf16.mxu0 %v3972_v22  ;;  %v3868_v26 = vmul.f32 %v9046_v45, %v11478_v59  ;;  %v7798_v45 = vpack.c.bf16 %v11098_v36, %v11098_v36 }
 0xc74   : > { %v2739_v17 = vpop.permute.xlu1 %2738  ;;  %v3426_v43 = vpop.permute.xlu0 %3425 }
 0xc75   : > { %2786 = vst.msk [vmem:[#allocation2 + $0x4] sm:$0xf] %vm2784_vm3, %v2739_v17 }
 0xc76   : > { %3472 = vst.msk [vmem:[#allocation2 + $0x8] sm:$0xf] %vm3469_vm4, %v3426_v43  ;;  %8400 = vmatpush3.bf16.msra.mxu0 %v3972_v22 }
 0xc77   : > { %8401 = vmatprep.subr.bf16.mxu0 %v3970_v27 }
 0xc78   : > { %v2743_v61 = vpop.permute.xlu1 %2742  ;;  %v2745_v4 = vpop.permute.xlu0 %2744 }
 0xc79   : > { %2788 = vst.msk [vmem:[#allocation2 + $0xc] sm:$0xf] %vm2784_vm3, %v2743_v61  ;;  %2789 = vst.msk [vmem:[#allocation2 + $0x10] sm:$0xf] %vm2784_vm3, %v2745_v4 }
 0xc7a   : > { %v9048_v21 = vpop.eup %9047  ;;  %8402 = vmatpush3.bf16.msra.mxu0 %v3970_v27  ;;  %v8644_v27 = vld [vmem:[#allocation11] sm:$0xff]  }
 0xc7b   : > { %v3869_v6 = vmul.f32 %v9048_v21, %v11486_v1  ;;  %v9050_v19 = vpop.eup %9049  ;;  %8425 = vmatprep.subr.bf16.mxu1 %v8644_v27 }
 0xc7c   : > { %v3424_v38 = vpop.permute.xlu1 %3423  ;;  %v2749_v51 = vpop.permute.xlu0 %2748  ;;  %v3871_v28 = vmul.f32 %v9050_v19, %v11482_v39  ;;  %8426 = vmatpush3.bf16.msra.mxu1 %v8644_v27 }
 0xc7d   : > { %3471 = vst.msk [vmem:[#allocation2 + $0x4] sm:$0xf] %vm3469_vm4, %v3424_v38  ;;  %8404 = vmatmul.mubr.msk.bf16.vlgmr.msra.gmra.mxu0 %vm1672_vm1, %v3877_v23  ;;  %v3878_v33 = vpack.c.bf16 %v3869_v6, %v3868_v26  ;;  %v9052_v55 = vpop.eup %9051  ;;  %v14141_v6 = vld [vmem:[#allocation27_spill] sm:$0xff]  ;;  %v7813_v38 = vpack.c.bf16 %v11364_v29, %v11364_v29  ;;  %v14143_v29 = vld [vmem:[#allocation28_spill] sm:$0xff] }
 0xc7e   : > { %2791 = vst.msk [vmem:[#allocation2 + $0x18] sm:$0xf] %vm2784_vm3, %v2749_v51  ;;  %v3870_v1 = vmul.f32 %v9052_v55, %v11472_v18  ;;  %v7800_v19 = vpack.c.bf16 %v14141_v6, %v14141_v6  ;;  %v14142_v55 = vld [vmem:[#allocation29_spill] sm:$0xff] }
 0xc7f   : > { %8407 = vmatprep.mubr.msk.bf16.mxu0 %vm1672_vm1, %v3878_v33  ;;  %v9342_v6 = vld [vmem:[%s9958_s5 + $0x10] sm:$0xff] }
 0xc80   : > { %v3428_v0 = vpop.permute.xlu1 %3427  ;;  %v3430_v59 = vpop.permute.xlu0 %3429  ;;  %v3879_v48 = vpack.c.bf16 %v3871_v28, %v3870_v1  ;;  %v7814_v28 = vpack.c.bf16 %v14142_v55, %v14142_v55 }
 0xc81   : > { %3473 = vst.msk [vmem:[#allocation2 + $0xc] sm:$0xf] %vm3469_vm4, %v3428_v0  ;;  %3474 = vst.msk [vmem:[#allocation2 + $0x10] sm:$0xf] %vm3469_vm4, %v3430_v59 }
 0xc84   : > { %v2747_v42 = vpop.permute.xlu1 %2746  ;;  %v3434_v37 = vpop.permute.xlu0 %3433 }
 0xc85   : > { %2790 = vst.msk [vmem:[#allocation2 + $0x14] sm:$0xf] %vm2784_vm3, %v2747_v42  ;;  %8408 = vmatmul.mubr.msk.bf16.gmra.mxu0 %vm1672_vm1, %v3879_v48  ;;  %v7816_v48 = vpack.c.bf16 %v14143_v29, %v14143_v29 }
 0xc86   : > { %3476 = vst.msk [vmem:[#allocation2 + $0x18] sm:$0xf] %vm3469_vm4, %v3434_v37  ;;  %4895 = vmatprep.mubr.bf16.mxu0 %v14140_v2 }
 0xc88   : > { %v2751_v39 = vpop.permute.xlu1 %2750  ;;  %v2753_v3 = vpop.permute.xlu0 %2752 }
 0xc89   : > { %2792 = vst.msk [vmem:[#allocation2 + $0x1c] sm:$0xf] %vm2784_vm3, %v2751_v39  ;;  %2793 = vst.msk [vmem:[#allocation2 + $0x20] sm:$0xf] %vm2784_vm3, %v2753_v3 }
 0xc8c   : > { %v3432_v18 = vpop.permute.xlu1 %3431 }
 0xc8d   : > { %3475 = vst.msk [vmem:[#allocation2 + $0x14] sm:$0xf] %vm3469_vm4, %v3432_v18 }
 0xc90   : > { %v3436_v34 = vpop.permute.xlu1 %3435 }
 0xc91   : > { %3477 = vst.msk [vmem:[#allocation2 + $0x1c] sm:$0xf] %vm3469_vm4, %v3436_v34 }
 0xc94   : > { %v2755_v58 = vpop.permute.xlu1 %2754 }
 0xc95   : > { %2794 = vst.msk [vmem:[#allocation2 + $0x24] sm:$0xf] %vm2784_vm3, %v2755_v58 }
 0xcd5   : > { %v8389_v25 = vpop.f32.mrf.mxu1 }
 0xcd6   : > { %v7819_v22 = vpack.c.bf16 %v8389_v25, %v8389_v25 }
 0xcd7   : > { %v3938_v24 = vpop.f32.mrf.mxu1 }
 0xcd8   : > { %4110 = vrot.lane.b32.xlu0 %v7819_v22, %s9654_s18  ;;  %v7817_v10 = vpack.c.bf16 %v3938_v24, %v3938_v24 }
 0xcd9   : > { %v8390_v54 = vpop.f32.mrf.mxu1 }
 0xcda   : > { %v7820_v41 = vpack.c.bf16 %v8390_v54, %v8390_v54 }
 0xcdb   : > { %v3941_v11 = vpop.f32.mrf.mxu1 }
 0xcdc   : > { %4106 = vrot.lane.b32.xlu0 %v7817_v10, %s9654_s18  ;;  %4112 = vrot.lane.b32.xlu1 %v7820_v41, %s9654_s18  ;;  %v7818_v52 = vpack.c.bf16 %v3941_v11, %v3941_v11 }
 0xce0   : > { %2756 = vrot.lane.b32.xlu0 %v7795_v15, %s9656_s10  ;;  %4108 = vrot.lane.b32.xlu1 %v7818_v52, %s9654_s18 }
 0xce4   : > { %3437 = vrot.lane.b32.xlu0 %v7809_v13, %s9655_s6  ;;  %2758 = vrot.lane.b32.xlu1 %v7796_v5, %s9656_s10  ;;  %v8393_v46 = vpop.f32.mrf.mxu1 }
 0xce5   : > { %v7823_v56 = vpack.c.bf16 %v8393_v46, %v8393_v46 }
 0xce6   : > { %v3954_v62 = vpop.f32.mrf.mxu1 }
 0xce7   : > { %v7821_v14 = vpack.c.bf16 %v3954_v62, %v3954_v62 }
 0xce8   : > { %3439 = vrot.lane.b32.xlu1 %v7810_v63, %s9655_s6  ;;  %4118 = vrot.lane.b32.xlu0 %v7823_v56, %s9654_s18  ;;  %v8394_v31 = vpop.f32.mrf.mxu1 }
 0xce9   : > { %v7824_v17 = vpack.c.bf16 %v8394_v31, %v8394_v31 }
 0xcea   : > { %v3957_v43 = vpop.f32.mrf.mxu1 }
 0xceb   : > { %v7822_v40 = vpack.c.bf16 %v3957_v43, %v3957_v43 }
 0xcec   : > { %4114 = vrot.lane.b32.xlu0 %v7821_v14, %s9654_s18  ;;  %4120 = vrot.lane.b32.xlu1 %v7824_v17, %s9654_s18 }
 0xcf0   : > { %3441 = vrot.lane.b32.xlu0 %v7811_v57, %s9655_s6  ;;  %4116 = vrot.lane.b32.xlu1 %v7822_v40, %s9654_s18 }
 0xcf4   : > { %2760 = vrot.lane.b32.xlu0 %v7797_v8, %s9656_s10  ;;  %3443 = vrot.lane.b32.xlu1 %v7812_v60, %s9655_s6 }
 0xcf8   : > { %2762 = vrot.lane.b32.xlu1 %v7798_v45, %s9656_s10 }
 0xd3d   : > { %v8405_v50 = vpop.f32.mrf.mxu0 }
 0xd3e   : > { %v7827_v61 = vpack.c.bf16 %v8405_v50, %v8405_v50 }
 0xd3f   : > { %v4027_v12 = vpop.f32.mrf.mxu0 }
 0xd40   : > { %4126 = vrot.lane.b32.xlu0 %v7827_v61, %s9654_s18  ;;  %v7825_v21 = vpack.c.bf16 %v4027_v12, %v4027_v12  ;;  %v11685_v61 = vld [vmem:[%s13994_s7] ss:$0 sm:$0xff] }
 0xd41   : > { %v8406_v4 = vpop.f32.mrf.mxu0 }
 0xd42   : > { %v7828_v53 = vpack.c.bf16 %v8406_v4, %v8406_v4 }
 0xd43   : > { %v4030_v23 = vpop.f32.mrf.mxu0 }
 0xd44   : > { %4122 = vrot.lane.b32.xlu0 %v7825_v21, %s9654_s18  ;;  %4128 = vrot.lane.b32.xlu1 %v7828_v53, %s9654_s18  ;;  %v7826_v26 = vpack.c.bf16 %v4030_v23, %v4030_v23  ;;  %v9341_v23 = vld [vmem:[%s9958_s5] sm:$0xff] }
 0xd45   : > { %v8409_v36 = vpop.f32.mrf.mxu0 }
 0xd46   : > { %v7831_v3 = vpack.c.bf16 %v8409_v36, %v8409_v36 }
 0xd47   : > { %v4043_v33 = vpop.f32.mrf.mxu0 }
 0xd48   : > { %2764 = vrot.lane.b32.xlu0 %v7799_v20, %s9656_s10  ;;  %4124 = vrot.lane.b32.xlu1 %v7826_v26, %s9654_s18  ;;  %v7829_v42 = vpack.c.bf16 %v4043_v33, %v4043_v33 }
 0xd49   : > { %v8410_v1 = vpop.f32.mrf.mxu0 }
 0xd4a   : > { %v4111_v51 = vpop.permute.xlu0 %4110  ;;  %v7832_v49 = vpack.c.bf16 %v8410_v1, %v8410_v1 }
 0xd4b   : > { %4157 = vst.msk [vmem:[#allocation2 + $0x8] sm:$0xf] %vm4154_vm5, %v4111_v51  ;;  %v4046_v39 = vpop.f32.mrf.mxu0  ;;  %v9343_v51 = vld [vmem:[%s9958_s5 + $0x8] sm:$0xff] }
 0xd4c   : > { %3445 = vrot.lane.b32.xlu0 %v7813_v38, %s9655_s6  ;;  %2766 = vrot.lane.b32.xlu1 %v7800_v19, %s9656_s10  ;;  %v7830_v18 = vpack.c.bf16 %v4046_v39, %v4046_v39  ;;  %v9346_v39 = vld [vmem:[%s9958_s5 + $0x30] sm:$0xff]  ;;  %s7339_s10 = scalar_lea.sflag [#allocation5], %s9951_s0 }
 0xd4e   : > { %v4113_v0 = vpop.permute.xlu1 %4112  ;;  %v4107_v59 = vpop.permute.xlu0 %4106 }
 0xd4f   : > { %4158 = vst.msk [vmem:[#allocation2 + $0xc] sm:$0xf] %vm4154_vm5, %v4113_v0  ;;  %4155 = vst.msk [vmem:[#allocation2] sm:$0xf] %vm4154_vm5, %v4107_v59 }
 0xd50   : > { %3449 = vrot.lane.b32.xlu0 %v7815_v9, %s9655_s6  ;;  %3447 = vrot.lane.b32.xlu1 %v7814_v28, %s9655_s6  ;;  %v9344_v9 = vld [vmem:[%s9958_s5 + $0x18] sm:$0xff] }
 0xd52   : > { %v4109_v37 = vpop.permute.xlu1 %4108  ;;  %v2757_v44 = vpop.permute.xlu0 %2756 }
 0xd53   : > { %4156 = vst.msk [vmem:[#allocation2 + $0x4] sm:$0xf] %vm4154_vm5, %v4109_v37 }
 0xd54   : > { %2795 = vst.msk [vmem:[#allocation2 + $0x28] sm:$0xf] %vm2784_vm3, %v2757_v44  ;;  %3451 = vrot.lane.b32.xlu1 %v7816_v48, %s9655_s6  ;;  %4130 = vrot.lane.b32.xlu0 %v7829_v42, %s9654_s18  ;;  %v9345_v48 = vld [vmem:[%s9958_s5 + $0x20] sm:$0xff] }
 0xd56   : > { %v2759_v34 = vpop.permute.xlu1 %2758  ;;  %v3438_v58 = vpop.permute.xlu0 %3437  ;;  %v8646_v30 = vld [vmem:[#allocation2 + $0x8] sm:$0xff]  }
 0xd57   : > { %2796 = vst.msk [vmem:[#allocation2 + $0x2c] sm:$0xf] %vm2784_vm3, %v2759_v34  ;;  %v9347_v34 = vld [vmem:[%s9958_s5 + $0x28] sm:$0xff] }
 0xd58   : > { %3478 = vst.msk [vmem:[#allocation2 + $0x20] sm:$0xf] %vm3469_vm4, %v3438_v58  ;;  %4134 = vrot.lane.b32.xlu0 %v7831_v3, %s9654_s18  ;;  %4132 = vrot.lane.b32.xlu1 %v7830_v18, %s9654_s18 }
 0xd5a   : > { %v3440_v47 = vpop.permute.xlu1 %3439  ;;  %v4119_v32 = vpop.permute.xlu0 %4118  ;;  %v8645_v7 = vld [vmem:[#allocation2] sm:$0xff]  }
 0xd5b   : > { %3479 = vst.msk [vmem:[#allocation2 + $0x24] sm:$0xf] %vm3469_vm4, %v3440_v47  ;;  %8427 = vmatprep.mubr.bf16.mxu1 %v8645_v7 }
 0xd5c   : > { %4161 = vst.msk [vmem:[#allocation2 + $0x18] sm:$0xf] %vm4154_vm5, %v4119_v32  ;;  %4136 = vrot.lane.b32.xlu1 %v7832_v49, %s9654_s18  ;;  %8428 = vmatmul.mubr.bf16.vlgmr.msra.gmra.mxu1 %v8646_v30  ;;  %v9348_v49 = vld [vmem:[%s9958_s5 + $0x38] sm:$0xff]  ;;  %s14294_s18 = sld [smem:[#allocation74_spill]] }
 0xd5e   : > { %v4121_v35 = vpop.permute.xlu1 %4120  ;;  %v4115_v16 = vpop.permute.xlu0 %4114 }
 0xd5f   : > { %4162 = vst.msk [vmem:[#allocation2 + $0x1c] sm:$0xf] %vm4154_vm5, %v4121_v35  ;;  %4159 = vst.msk [vmem:[#allocation2 + $0x10] sm:$0xf] %vm4154_vm5, %v4115_v16 }
 0xd62   : > { %v4117_v25 = vpop.permute.xlu1 %4116  ;;  %v3442_v22 = vpop.permute.xlu0 %3441  ;;  %s13940_s6 = scalar_lea.hbm %s14294_s18, %s7834_s29 }
 0xd63   : > { %4160 = vst.msk [vmem:[#allocation2 + $0x14] sm:$0xf] %vm4154_vm5, %v4117_v25  ;;  %v9349_v25 = vld [vmem:[%s9958_s5 + $0x40] sm:$0xff] }
 0xd64   : > { %3480 = vst.msk [vmem:[#allocation2 + $0x28] sm:$0xf] %vm3469_vm4, %v3442_v22 }
 0xd66   : > { %v3444_v24 = vpop.permute.xlu1 %3443  ;;  %v2761_v27 = vpop.permute.xlu0 %2760  ;;  %v8648_v41 = vld [vmem:[#allocation2 + $0x18] sm:$0xff]  }
 0xd67   : > { %3481 = vst.msk [vmem:[#allocation2 + $0x2c] sm:$0xf] %vm3469_vm4, %v3444_v24 }
 0xd68   : > { %2797 = vst.msk [vmem:[#allocation2 + $0x30] sm:$0xf] %vm2784_vm3, %v2761_v27 }
 0xd6a   : > { %v2763_v54 = vpop.permute.xlu1 %2762  ;;  %v8647_v10 = vld [vmem:[#allocation2 + $0x10] sm:$0xff]  }
 0xd6b   : > { %2798 = vst.msk [vmem:[#allocation2 + $0x34] sm:$0xf] %vm2784_vm3, %v2763_v54  ;;  %8431 = vmatprep.mubr.bf16.mxu1 %v8647_v10  ;;  %v9350_v54 = vld [vmem:[%s9958_s5 + $0x50] sm:$0xff] }
 0xd6c   : > { %8432 = vmatmul.mubr.bf16.gmra.mxu1 %v8648_v41 }
 0xdb2   : > { %v4127_v11 = vpop.permute.xlu0 %4126 }
 0xdb3   : > { %4165 = vst.msk [vmem:[#allocation2 + $0x28] sm:$0xf] %vm4154_vm5, %v4127_v11  ;;  %v9351_v11 = vld [vmem:[%s9958_s5 + $0x48] sm:$0xff] }
 0xdb6   : > { %v4129_v15 = vpop.permute.xlu1 %4128  ;;  %v4123_v52 = vpop.permute.xlu0 %4122 }
 0xdb7   : > { %4166 = vst.msk [vmem:[#allocation2 + $0x2c] sm:$0xf] %vm4154_vm5, %v4129_v15  ;;  %4163 = vst.msk [vmem:[#allocation2 + $0x20] sm:$0xf] %vm4154_vm5, %v4123_v52  ;;  %v9352_v52 = vld [vmem:[%s9958_s5 + $0x58] sm:$0xff] }
 0xdba   : > { %v4125_v5 = vpop.permute.xlu1 %4124  ;;  %v2765_v13 = vpop.permute.xlu0 %2764 }
 0xdbb   : > { %4164 = vst.msk [vmem:[#allocation2 + $0x24] sm:$0xf] %vm4154_vm5, %v4125_v5 }
 0xdbc   : > { %2799 = vst.msk [vmem:[#allocation2 + $0x38] sm:$0xf] %vm2784_vm3, %v2765_v13 }
 0xdbe   : > { %v2767_v46 = vpop.permute.xlu1 %2766  ;;  %v3446_v56 = vpop.permute.xlu0 %3445  ;;  %v8650_v17 = vld [vmem:[#allocation2 + $0x28] sm:$0xff]  }
 0xdbf   : > { %2800 = vst.msk [vmem:[#allocation2 + $0x3c] sm:$0xf] %vm2784_vm3, %v2767_v46 }
 0xdc0   : > { %3482 = vst.msk [vmem:[#allocation2 + $0x30] sm:$0xf] %vm3469_vm4, %v3446_v56 }
 0xdc2   : > { %v3448_v63 = vpop.permute.xlu1 %3447  ;;  %v3450_v62 = vpop.permute.xlu0 %3449  ;;  %v8649_v31 = vld [vmem:[#allocation2 + $0x20] sm:$0xff]  }
 0xdc3   : > { %3483 = vst.msk [vmem:[#allocation2 + $0x34] sm:$0xf] %vm3469_vm4, %v3448_v63  ;;  %3484 = vst.msk [vmem:[#allocation2 + $0x38] sm:$0xf] %vm3469_vm4, %v3450_v62  ;;  %8435 = vmatprep.mubr.bf16.mxu1 %v8649_v31  ;;  %v9353_v31 = vld [vmem:[%s9958_s5 + $0x60] sm:$0xff] }
 0xdc4   : > { %8436 = vmatmul.mubr.bf16.gmra.mxu1 %v8650_v17 }
 0xdc6   : > { %v3452_v14 = vpop.permute.xlu1 %3451  ;;  %v4131_v43 = vpop.permute.xlu0 %4130 }
 0xdc7   : > { %3485 = vst.msk [vmem:[#allocation2 + $0x3c] sm:$0xf] %vm3469_vm4, %v3452_v14 }
 0xdc8   : > { %4167 = vst.msk [vmem:[#allocation2 + $0x30] sm:$0xf] %vm4154_vm5, %v4131_v43 }
 0xdca   : > { %v4133_v57 = vpop.permute.xlu1 %4132  ;;  %v4135_v40 = vpop.permute.xlu0 %4134 }
 0xdcb   : > { %4168 = vst.msk [vmem:[#allocation2 + $0x34] sm:$0xf] %vm4154_vm5, %v4133_v57  ;;  %4169 = vst.msk [vmem:[#allocation2 + $0x38] sm:$0xf] %vm4154_vm5, %v4135_v40  ;;  %v9354_v57 = vld [vmem:[%s9958_s5 + $0x70] sm:$0xff] }
 0xdce   : > { %v4137_v8 = vpop.permute.xlu1 %4136 }
 0xdcf   : > { %4170 = vst.msk [vmem:[#allocation2 + $0x3c] sm:$0xf] %vm4154_vm5, %v4137_v8 }
 0xdd2   : > { %v8651_v60 = vld [vmem:[#allocation2 + $0x30] sm:$0xff]  }
 0xdd3   : > { %8439 = vmatprep.mubr.bf16.mxu1 %v8651_v60  ;;  %v9355_v60 = vld [vmem:[%s9958_s5 + $0x68] sm:$0xff] }
 0xdd6   : > { %v8652_v45 = vld [vmem:[#allocation2 + $0x38] sm:$0xff]  }
 0xdd7   : > { %8440 = vmatmul.mubr.bf16.gmra.mxu1 %v8652_v45 }
 0xdd8   : > { %5008 = vmatprep.mubr.bf16.mxu1 %v14140_v2 }
 0xe1c   : > { %v8429_v50 = vpop.f32.mrf.mxu1 }
 0xe1d   : > { %v4349_v53 = vadd.f32 %v8429_v50, %v11685_v61  ;;  %v9356_v50 = vld [vmem:[%s9958_s5 + $0x78] sm:$0xff] }
 0xe1e   : > { %v4340_v12 = vpop.f32.mrf.mxu1 }
 0xe1f   : > { %v4341_v4 = vadd.f32 %v11685_v61, %v4340_v12  ;;  %v11695_v19 = vadd.f32 %v9342_v6, %v4349_v53 }
 0xe20   : > { %v8430_v21 = vpop.f32.mrf.mxu1 }
 0xe21   : > { %v11690_v20 = vadd.f32 %v9341_v23, %v4341_v4  ;;  %14145 = vst [vmem:[#allocation29_spill] sm:$0xff] %v11695_v19  ;;  %v4352_v38 = vadd.f32 %v8430_v21, %v11685_v61 }
 0xe22   : > { %v4343_v26 = vpop.f32.mrf.mxu1 }
 0xe23   : > { %14144 = vst [vmem:[#allocation27_spill] sm:$0xff] %v11690_v20  ;;  %v4344_v36 = vadd.f32 %v11685_v61, %v4343_v26  ;;  %4421 = vadd.xlane.f32.xlu0 %v11690_v20  ;;  %v11704_v55 = vadd.f32 %v9344_v9, %v4352_v38 }
 0xe25   : > { %v11699_v33 = vadd.f32 %v9343_v51, %v4344_v36  ;;  %14147 = vst [vmem:[#allocation30_spill] sm:$0xff] %v11704_v55 }
 0xe27   : > { %14146 = vst [vmem:[#allocation28_spill] sm:$0xff] %v11699_v33  ;;  %4423 = vadd.xlane.f32.xlu1 %v11699_v33  ;;  %4425 = vadd.xlane.f32.xlu0 %v11695_v19 }
 0xe2b   : > { %4427 = vadd.xlane.f32.xlu0 %v11704_v55 }
 0xe2c   : > { %v8433_v28 = vpop.f32.mrf.mxu1 }
 0xe2d   : > { %v4365_v29 = vadd.f32 %v8433_v28, %v11685_v61 }
 0xe2e   : > { %v4356_v0 = vpop.f32.mrf.mxu1 }
 0xe2f   : > { %v4357_v59 = vadd.f32 %v11685_v61, %v4356_v0  ;;  %v11715_v3 = vadd.f32 %v9346_v39, %v4365_v29  ;;  %v8655_v29 = vld [vmem:[#allocation12 + $0xe4] ss:$16 sps:$4 sm:$0xff]  }
 0xe30   : > { %v8434_v1 = vpop.f32.mrf.mxu1  ;;  %4863 = vmatprep.subr.bf16.mxu0 %v8655_v29  ;;  %v8692_v29 = vld [vmem:[#allocation12 + $0x28] ss:$16 sps:$4 sm:$0xff]  }
 0xe31   : > { %v11710_v42 = vadd.f32 %v9345_v48, %v4357_v59  ;;  %14149 = vst [vmem:[#allocation32_spill] sm:$0xff] %v11715_v3  ;;  %v4368_v18 = vadd.f32 %v8434_v1, %v11685_v61  ;;  %v8653_v1 = vld [vmem:[#allocation12 + $0xe0] ss:$16 sps:$4 sm:$0xff]   ;;  %v8656_v48 = vld [vmem:[#allocation12 + $0xe8] ss:$16 sps:$4 sm:$0xff]  }
 0xe32   : > { %v4359_v37 = vpop.f32.mrf.mxu1  ;;  %4864 = vmatpush1.bf16.msra.mxu0 %v8653_v1  ;;  %v8689_v1 = vld [vmem:[#allocation12 + $0x20] ss:$16 sps:$4 sm:$0xff]  }
 0xe33   : > { %14148 = vst [vmem:[#allocation31_spill] sm:$0xff] %v11710_v42  ;;  %v4360_v44 = vadd.f32 %v11685_v61, %v4359_v37  ;;  %4429 = vadd.xlane.f32.xlu0 %v11710_v42  ;;  %v11724_v47 = vadd.f32 %v9348_v49, %v4368_v18  ;;  %v8661_v49 = vld [vmem:[#allocation12 + $0xc4] ss:$16 sps:$4 sm:$0xff]  }
 0xe34   : > { %4865 = vmatprep.subr.bf16.mxu0 %v8661_v49 }
 0xe35   : > { %v11719_v58 = vadd.f32 %v9347_v34, %v4360_v44  ;;  %14151 = vst [vmem:[#allocation34_spill] sm:$0xff] %v11724_v47  ;;  %v8658_v44 = vld [vmem:[#allocation12 + $0xec] ss:$16 sps:$4 sm:$0xff]  }
 0xe36   : > { %4976 = vmatprep.subr.bf16.mxu1 %v8658_v44  ;;  %v8700_v44 = vld [vmem:[#allocation12 + $0xc] ss:$16 sps:$4 sm:$0xff]  }
 0xe37   : > { %14150 = vst [vmem:[#allocation33_spill] sm:$0xff] %v11719_v58  ;;  %4431 = vadd.xlane.f32.xlu1 %v11719_v58  ;;  %4433 = vadd.xlane.f32.xlu0 %v11715_v3 }
 0xe38   : > { %4977 = vmatpush1.bf16.msra.mxu1 %v8656_v48  ;;  %v8697_v48 = vld [vmem:[#allocation12 + $0x4] ss:$16 sps:$4 sm:$0xff]  }
 0xe3b   : > { %4435 = vadd.xlane.f32.xlu1 %v11724_v47 }
 0xe84   : > { %v8437_v32 = vpop.f32.mrf.mxu1 }
 0xe85   : > { %v4381_v16 = vadd.f32 %v8437_v32, %v11685_v61  ;;  %v8664_v32 = vld [vmem:[#allocation12 + $0xcc] ss:$16 sps:$4 sm:$0xff]  }
 0xe86   : > { %v4372_v7 = vpop.f32.mrf.mxu1  ;;  %4978 = vmatprep.subr.bf16.mxu1 %v8664_v32 }
 0xe87   : > { %v4373_v30 = vadd.f32 %v11685_v61, %v4372_v7  ;;  %v11735_v10 = vadd.f32 %v9350_v54, %v4381_v16 }
 0xe88   : > { %v8438_v35 = vpop.f32.mrf.mxu1 }
 0xe89   : > { %v11730_v22 = vadd.f32 %v9349_v25, %v4373_v30  ;;  %14153 = vst [vmem:[#allocation36_spill] sm:$0xff] %v11735_v10  ;;  %v4384_v41 = vadd.f32 %v8438_v35, %v11685_v61  ;;  %v8659_v30 = vld [vmem:[#allocation12 + $0xc0] ss:$16 sps:$4 sm:$0xff]   ;;  %v8662_v35 = vld [vmem:[#allocation12 + $0xc8] ss:$16 sps:$4 sm:$0xff]  }
 0xe8a   : > { %v4375_v24 = vpop.f32.mrf.mxu1  ;;  %4866 = vmatpush1.bf16.msra.mxu0 %v8659_v30  ;;  %4979 = vmatpush1.bf16.msra.mxu1 %v8662_v35 }
 0xe8b   : > { %14152 = vst [vmem:[#allocation35_spill] sm:$0xff] %v11730_v22  ;;  %v4376_v27 = vadd.f32 %v11685_v61, %v4375_v24  ;;  %4437 = vadd.xlane.f32.xlu0 %v11730_v22  ;;  %v11744_v5 = vadd.f32 %v9352_v52, %v4384_v41  ;;  %v8667_v41 = vld [vmem:[#allocation12 + $0xa4] ss:$16 sps:$4 sm:$0xff]  }
 0xe8c   : > { %4867 = vmatprep.subr.bf16.mxu0 %v8667_v41 }
 0xe8d   : > { %v11739_v15 = vadd.f32 %v9351_v11, %v4376_v27  ;;  %14155 = vst [vmem:[#allocation38_spill] sm:$0xff] %v11744_v5  ;;  %v8670_v11 = vld [vmem:[#allocation12 + $0xac] ss:$16 sps:$4 sm:$0xff]  }
 0xe8e   : > { %4980 = vmatprep.subr.bf16.mxu1 %v8670_v11 }
 0xe8f   : > { %14154 = vst [vmem:[#allocation37_spill] sm:$0xff] %v11739_v15  ;;  %4439 = vadd.xlane.f32.xlu1 %v11739_v15  ;;  %4441 = vadd.xlane.f32.xlu0 %v11735_v10 }
 0xe93   : > { %4443 = vadd.xlane.f32.xlu1 %v11744_v5 }
 0xe97   : > { %v8441_v13 = vpop.f32.mrf.mxu1 }
 0xe98   : > { %v4397_v62 = vadd.f32 %v8441_v13, %v11685_v61 }
 0xe99   : > { %v4388_v46 = vpop.f32.mrf.mxu1 }
 0xe9a   : > { %v4389_v56 = vadd.f32 %v11685_v61, %v4388_v46  ;;  %v11755_v40 = vadd.f32 %v9354_v57, %v4397_v62  ;;  %v8665_v46 = vld [vmem:[#allocation12 + $0xa0] ss:$16 sps:$4 sm:$0xff]   ;;  %v8676_v57 = vld [vmem:[#allocation12 + $0x8c] ss:$16 sps:$4 sm:$0xff]  }
 0xe9b   : > { %v8442_v63 = vpop.f32.mrf.mxu1  ;;  %4868 = vmatpush1.bf16.msra.mxu0 %v8665_v46 }
 0xe9c   : > { %v11750_v17 = vadd.f32 %v9353_v31, %v4389_v56  ;;  %14157 = vst [vmem:[#allocation40_spill] sm:$0xff] %v11755_v40  ;;  %v4400_v8 = vadd.f32 %v8442_v63, %v11685_v61  ;;  %v8668_v56 = vld [vmem:[#allocation12 + $0xa8] ss:$16 sps:$4 sm:$0xff]  }
 0xe9d   : > { %v4391_v14 = vpop.f32.mrf.mxu1  ;;  %4981 = vmatpush1.bf16.msra.mxu1 %v8668_v56 }
 0xe9e   : > { %14156 = vst [vmem:[#allocation39_spill] sm:$0xff] %v11750_v17  ;;  %v4392_v43 = vadd.f32 %v11685_v61, %v4391_v14  ;;  %4445 = vadd.xlane.f32.xlu0 %v11750_v17  ;;  %v11764_v12 = vadd.f32 %v9356_v50, %v4400_v8  ;;  %v8674_v50 = vld [vmem:[#allocation12 + $0x88] ss:$16 sps:$4 sm:$0xff]   ;;  %4982 = vmatprep.subr.bf16.mxu1 %v8676_v57 }
 0xea0   : > { %v11759_v45 = vadd.f32 %v9355_v60, %v4392_v43  ;;  %14159 = vst [vmem:[#allocation42_spill] sm:$0xff] %v11764_v12  ;;  %v8673_v43 = vld [vmem:[#allocation12 + $0x84] ss:$16 sps:$4 sm:$0xff]   ;;  %v8671_v60 = vld [vmem:[#allocation12 + $0x80] ss:$16 sps:$4 sm:$0xff]  }
 0xea1   : > { %4869 = vmatprep.subr.bf16.mxu0 %v8673_v43  ;;  %4983 = vmatpush1.bf16.msra.mxu1 %v8674_v50 }
 0xea2   : > { %14158 = vst [vmem:[#allocation41_spill] sm:$0xff] %v11759_v45  ;;  %4447 = vadd.xlane.f32.xlu1 %v11759_v45  ;;  %4449 = vadd.xlane.f32.xlu0 %v11755_v40 }
 0xea3   : > { %4870 = vmatpush1.bf16.msra.mxu0 %v8671_v60 }
 0xea6   : > { %4451 = vadd.xlane.f32.xlu1 %v11764_v12 }
 0xeac   : > { %v4422_v4 = vpop.xlane.xlu0 %4421 }
 0xead   : > { %v4453_v21 = vmul.f32 0.0078125, %v4422_v4 }
 0xeaf   : > { %v11768_v53 = vsub.f32 %v11690_v20, %v4453_v21  ;;  %v8679_v21 = vld [vmem:[#allocation12 + $0x64] ss:$16 sps:$4 sm:$0xff]  }
 0xeb0   : > { %v4424_v23 = vpop.xlane.xlu1 %4423  ;;  %v4426_v26 = vpop.xlane.xlu0 %4425  ;;  %4871 = vmatprep.subr.bf16.mxu0 %v8679_v21 }
 0xeb1   : > { %v4454_v61 = vmul.f32 0.0078125, %v4424_v23  ;;  %v4455_v36 = vmul.f32 0.0078125, %v4426_v26  ;;  %v4485_v6 = vmul.f32 %v11768_v53, %v11768_v53  ;;  %v8682_v23 = vld [vmem:[#allocation12 + $0x6c] ss:$16 sps:$4 sm:$0xff]   ;;  %v8677_v26 = vld [vmem:[#allocation12 + $0x60] ss:$16 sps:$4 sm:$0xff]  }
 0xeb2   : > { %4984 = vmatprep.subr.bf16.mxu1 %v8682_v23  ;;  %4872 = vmatpush1.bf16.msra.mxu0 %v8677_v26 }
 0xeb3   : > { %v11773_v38 = vsub.f32 %v11699_v33, %v4454_v61  ;;  %v11776_v51 = vsub.f32 %v11695_v19, %v4455_v36  ;;  %4501 = vadd.xlane.f32.xlu0 %v4485_v6  ;;  %v8680_v61 = vld [vmem:[#allocation12 + $0x68] ss:$16 sps:$4 sm:$0xff]   ;;  %v8685_v36 = vld [vmem:[#allocation12 + $0x44] ss:$16 sps:$4 sm:$0xff]   ;;  %v8688_v6 = vld [vmem:[#allocation12 + $0x4c] ss:$16 sps:$4 sm:$0xff]  }
 0xeb4   : > { %v4428_v9 = vpop.xlane.xlu0 %4427  ;;  %4985 = vmatpush1.bf16.msra.mxu1 %v8680_v61  ;;  %4873 = vmatprep.subr.bf16.mxu0 %v8685_v36 }
 0xeb5   : > { %v4456_v28 = vmul.f32 0.0078125, %v4428_v9  ;;  %v4486_v0 = vmul.f32 %v11773_v38, %v11773_v38  ;;  %v4487_v59 = vmul.f32 %v11776_v51, %v11776_v51  ;;  %v8683_v9 = vld [vmem:[#allocation12 + $0x40] ss:$16 sps:$4 sm:$0xff]   ;;  %4986 = vmatprep.subr.bf16.mxu1 %v8688_v6 }
 0xeb6   : > { %4874 = vmatpush1.bf16.msra.mxu0 %v8683_v9 }
 0xeb7   : > { %v11783_v37 = vsub.f32 %v11704_v55, %v4456_v28  ;;  %4503 = vadd.xlane.f32.xlu1 %v4486_v0  ;;  %4505 = vadd.xlane.f32.xlu0 %v4487_v59  ;;  %v8686_v28 = vld [vmem:[#allocation12 + $0x48] ss:$16 sps:$4 sm:$0xff]   ;;  %v8691_v0 = vld [vmem:[#allocation12 + $0x24] ss:$16 sps:$4 sm:$0xff]   ;;  %v8694_v59 = vld [vmem:[#allocation12 + $0x2c] ss:$16 sps:$4 sm:$0xff]  }
 0xeb8   : > { %4987 = vmatpush1.bf16.msra.mxu1 %v8686_v28  ;;  %4875 = vmatprep.subr.bf16.mxu0 %v8691_v0 }
 0xeb9   : > { %v4488_v39 = vmul.f32 %v11783_v37, %v11783_v37  ;;  %4988 = vmatprep.subr.bf16.mxu1 %v8694_v59 }
 0xeba   : > { %4876 = vmatpush1.bf16.msra.mxu0 %v8689_v1 }
 0xebb   : > { %4507 = vadd.xlane.f32.xlu1 %v4488_v39  ;;  %v8695_v39 = vld [vmem:[#allocation12] ss:$16 sps:$4 sm:$0xff]   ;;  %4877 = vmatprep.subr.bf16.mxu0 %v8697_v48 }
 0xebc   : > { %v4430_v18 = vpop.xlane.xlu0 %4429  ;;  %4989 = vmatpush1.bf16.msra.mxu1 %v8692_v29 }
 0xebd   : > { %v4457_v34 = vmul.f32 0.0078125, %v4430_v18  ;;  %v8698_v18 = vld [vmem:[#allocation12 + $0x8] ss:$16 sps:$4 sm:$0xff]   ;;  %4990 = vmatprep.subr.bf16.mxu1 %v8700_v44 }
 0xebe   : > { %4878 = vmatpush1.bf16.msra.mxu0 %v8695_v39 }
 0xebf   : > { %v11788_v7 = vsub.f32 %v11710_v42, %v4457_v34 }
 0xec0   : > { %v4432_v16 = vpop.xlane.xlu1 %4431  ;;  %v4434_v25 = vpop.xlane.xlu0 %4433  ;;  %4991 = vmatpush1.bf16.msra.mxu1 %v8698_v18 }
 0xec1   : > { %v4458_v24 = vmul.f32 0.0078125, %v4432_v16  ;;  %v4459_v27 = vmul.f32 0.0078125, %v4434_v25  ;;  %v4489_v54 = vmul.f32 %v11788_v7, %v11788_v7 }
 0xec3   : > { %v11793_v52 = vsub.f32 %v11719_v58, %v4458_v24  ;;  %v11796_v13 = vsub.f32 %v11715_v3, %v4459_v27  ;;  %4509 = vadd.xlane.f32.xlu0 %v4489_v54 }
 0xec4   : > { %v4436_v63 = vpop.xlane.xlu1 %4435 }
 0xec5   : > { %v4460_v62 = vmul.f32 0.0078125, %v4436_v63  ;;  %v4490_v31 = vmul.f32 %v11793_v52, %v11793_v52  ;;  %v4491_v14 = vmul.f32 %v11796_v13, %v11796_v13 }
 0xec7   : > { %v11803_v8 = vsub.f32 %v11724_v47, %v4460_v62  ;;  %4511 = vadd.xlane.f32.xlu1 %v4490_v31  ;;  %4513 = vadd.xlane.f32.xlu0 %v4491_v14 }
 0xec9   : > { %v4492_v4 = vmul.f32 %v11803_v8, %v11803_v8 }
 0xecb   : > { %4515 = vadd.xlane.f32.xlu1 %v4492_v4 }
 0xf14   : > { %v4438_v34 = vpop.xlane.xlu0 %4437 }
 0xf15   : > { %v4461_v49 = vmul.f32 0.0078125, %v4438_v34 }
 0xf17   : > { %v11808_v32 = vsub.f32 %v11730_v22, %v4461_v49 }
 0xf18   : > { %v4440_v30 = vpop.xlane.xlu1 %4439  ;;  %v4442_v35 = vpop.xlane.xlu0 %4441 }
 0xf19   : > { %v4462_v16 = vmul.f32 0.0078125, %v4440_v30  ;;  %v4463_v25 = vmul.f32 0.0078125, %v4442_v35  ;;  %v4493_v24 = vmul.f32 %v11808_v32, %v11808_v32 }
 0xf1b   : > { %v11813_v27 = vsub.f32 %v11739_v15, %v4462_v16  ;;  %v11816_v54 = vsub.f32 %v11735_v10, %v4463_v25  ;;  %4517 = vadd.xlane.f32.xlu0 %v4493_v24 }
 0xf1c   : > { %v4444_v41 = vpop.xlane.xlu1 %4443 }
 0xf1d   : > { %v4464_v11 = vmul.f32 0.0078125, %v4444_v41  ;;  %v4494_v46 = vmul.f32 %v11813_v27, %v11813_v27  ;;  %v4495_v56 = vmul.f32 %v11816_v54, %v11816_v54 }
 0xf1f   : > { %v11823_v63 = vsub.f32 %v11744_v5, %v4464_v11  ;;  %4519 = vadd.xlane.f32.xlu1 %v4494_v46  ;;  %4521 = vadd.xlane.f32.xlu0 %v4495_v56  ;;  %v11851_v56 = vld [vmem:[%s13995_s8] ss:$0 sm:$0xff] }
 0xf21   : > { %v4496_v62 = vmul.f32 %v11823_v63, %v11823_v63 }
 0xf23   : > { %4523 = vadd.xlane.f32.xlu1 %v4496_v62 }
 0xf27   : > { %v4446_v31 = vpop.xlane.xlu0 %4445 }
 0xf28   : > { %v4465_v14 = vmul.f32 0.0078125, %v4446_v31 }
 0xf2a   : > { %v11828_v43 = vsub.f32 %v11750_v17, %v4465_v14 }
 0xf2b   : > { %v4448_v57 = vpop.xlane.xlu1 %4447  ;;  %v4450_v60 = vpop.xlane.xlu0 %4449 }
 0xf2c   : > { %v4466_v50 = vmul.f32 0.0078125, %v4448_v57  ;;  %v4467_v4 = vmul.f32 0.0078125, %v4450_v60  ;;  %v4497_v21 = vmul.f32 %v11828_v43, %v11828_v43 }
 0xf2e   : > { %v11833_v23 = vsub.f32 %v11759_v45, %v4466_v50  ;;  %v11836_v26 = vsub.f32 %v11755_v40, %v4467_v4  ;;  %4525 = vadd.xlane.f32.xlu0 %v4497_v21 }
 0xf2f   : > { %v4452_v61 = vpop.xlane.xlu1 %4451 }
 0xf30   : > { %v4468_v36 = vmul.f32 0.0078125, %v4452_v61  ;;  %v4498_v6 = vmul.f32 %v11833_v23, %v11833_v23  ;;  %v4499_v9 = vmul.f32 %v11836_v26, %v11836_v26 }
 0xf32   : > { %v11843_v28 = vsub.f32 %v11764_v12, %v4468_v36  ;;  %4527 = vadd.xlane.f32.xlu1 %v4498_v6  ;;  %4529 = vadd.xlane.f32.xlu0 %v4499_v9 }
 0xf34   : > { %v4500_v0 = vmul.f32 %v11843_v28, %v11843_v28 }
 0xf36   : > { %4531 = vadd.xlane.f32.xlu1 %v4500_v0 }
 0xf3c   : > { %v4502_v59 = vpop.xlane.xlu0 %4501 }
 0xf3d   : > { %v4533_v1 = vmul.f32 0.0078125, %v4502_v59 }
 0xf3f   : > { %v4549_v29 = vadd.f32 1e-05, %v4533_v1 }
 0xf40   : > { %v4504_v48 = vpop.xlane.xlu1 %4503  ;;  %v4506_v44 = vpop.xlane.xlu0 %4505 }
 0xf41   : > { %9053 = vrsqrt.f32 %v4549_v29  ;;  %v4534_v39 = vmul.f32 0.0078125, %v4504_v48  ;;  %v4535_v18 = vmul.f32 0.0078125, %v4506_v44 }
 0xf43   : > { %v4550_v34 = vadd.f32 1e-05, %v4534_v39  ;;  %v4551_v49 = vadd.f32 1e-05, %v4535_v18 }
 0xf44   : > { %v4508_v30 = vpop.xlane.xlu1 %4507 }
 0xf45   : > { %9055 = vrsqrt.f32 %v4550_v34  ;;  %v4536_v35 = vmul.f32 0.0078125, %v4508_v30 }
 0xf46   : > { %9057 = vrsqrt.f32 %v4551_v49 }
 0xf47   : > { %v4552_v16 = vadd.f32 1e-05, %v4536_v35 }
 0xf49   : > { %9059 = vrsqrt.f32 %v4552_v16 }
 0xf4c   : > { %v4510_v25 = vpop.xlane.xlu0 %4509 }
 0xf4d   : > { %v4537_v24 = vmul.f32 0.0078125, %v4510_v25 }
 0xf4e   : > { %v9054_v41 = vpop.eup %9053 }
 0xf4f   : > { %v4581_v11 = vmul.f32 %v9054_v41, %v11768_v53  ;;  %v4553_v46 = vadd.f32 1e-05, %v4537_v24  ;;  %v11858_v53 = vld [vmem:[%s13996_s9] ss:$0 sm:$0xff] }
 0xf50   : > { %v4512_v62 = vpop.xlane.xlu1 %4511  ;;  %v4514_v31 = vpop.xlane.xlu0 %4513 }
 0xf51   : > { %9061 = vrsqrt.f32 %v4553_v46  ;;  %v4538_v14 = vmul.f32 0.0078125, %v4512_v62  ;;  %v4539_v57 = vmul.f32 0.0078125, %v4514_v31  ;;  %v4603_v50 = vmul.f32 %v11851_v56, %v4581_v11 }
 0xf52   : > { %v9056_v60 = vpop.eup %9055 }
 0xf53   : > { %v9058_v4 = vpop.eup %9057  ;;  %v4582_v21 = vmul.f32 %v9056_v60, %v11773_v38  ;;  %v4554_v61 = vadd.f32 1e-05, %v4538_v14  ;;  %v4555_v36 = vadd.f32 1e-05, %v4539_v57  ;;  %v4625_v1 = vadd.f32 %v11858_v53, %v4603_v50 }
 0xf54   : > { %v4516_v6 = vpop.xlane.xlu1 %4515  ;;  %v4583_v29 = vmul.f32 %v9058_v4, %v11776_v51 }
 0xf55   : > { %9063 = vrsqrt.f32 %v4554_v61  ;;  %v4540_v9 = vmul.f32 0.0078125, %v4516_v6  ;;  %v4604_v0 = vmul.f32 %v11851_v56, %v4582_v21 }
 0xf56   : > { %v9060_v59 = vpop.eup %9059  ;;  %9065 = vrsqrt.f32 %v4555_v36  ;;  %v4605_v34 = vmul.f32 %v11851_v56, %v4583_v29 }
 0xf57   : > { %v4556_v48 = vadd.f32 1e-05, %v4540_v9  ;;  %v4626_v38 = vadd.f32 %v11858_v53, %v4604_v0  ;;  %v4584_v44 = vmul.f32 %v9060_v59, %v11783_v37 }
 0xf58   : > { %v4627_v30 = vadd.f32 %v11858_v53, %v4605_v34 }
 0xf59   : > { %9067 = vrsqrt.f32 %v4556_v48  ;;  %v4641_v39 = vpack.c.bf16 %v4626_v38, %v4625_v1  ;;  %v4606_v18 = vmul.f32 %v11851_v56, %v4584_v44 }
 0xf5b   : > { %4896 = vmatmul.mubr.bf16.vlgmr.msra.gmra.mxu0 %v4641_v39  ;;  %5009 = vmatmul.mubr.bf16.vlgmr.msra.gmra.mxu1 %v4641_v39  ;;  %v4628_v51 = vadd.f32 %v11858_v53, %v4606_v18 }
 0xf5c   : > { %4905 = vmatprep.mubr.bf16.mxu0 %v14140_v2  ;;  %5018 = vmatprep.mubr.bf16.mxu1 %v14140_v2 }
 0xf5d   : > { %v4642_v37 = vpack.c.bf16 %v4628_v51, %v4627_v30 }
 0xf5e   : > { %v9062_v49 = vpop.eup %9061 }
 0xf5f   : > { %v4585_v35 = vmul.f32 %v9062_v49, %v11788_v7 }
 0xf61   : > { %v4607_v24 = vmul.f32 %v11851_v56, %v4585_v35 }
 0xf62   : > { %v9064_v16 = vpop.eup %9063 }
 0xf63   : > { %4906 = vmatmul.mubr.bf16.gmra.mxu0 %v4642_v37  ;;  %5019 = vmatmul.mubr.bf16.gmra.mxu1 %v4642_v37  ;;  %v4586_v25 = vmul.f32 %v9064_v16, %v11793_v52  ;;  %v9066_v41 = vpop.eup %9065  ;;  %v4629_v62 = vadd.f32 %v11858_v53, %v4607_v24 }
 0xf64   : > { %4915 = vmatprep.mubr.bf16.mxu0 %v14140_v2  ;;  %5028 = vmatprep.mubr.bf16.mxu1 %v14140_v2  ;;  %v4587_v31 = vmul.f32 %v9066_v41, %v11796_v13 }
 0xf65   : > { %v4608_v11 = vmul.f32 %v11851_v56, %v4586_v25 }
 0xf66   : > { %v9068_v46 = vpop.eup %9067  ;;  %v4609_v60 = vmul.f32 %v11851_v56, %v4587_v31 }
 0xf67   : > { %v4630_v7 = vadd.f32 %v11858_v53, %v4608_v11  ;;  %v4588_v14 = vmul.f32 %v9068_v46, %v11803_v8 }
 0xf68   : > { %v4631_v4 = vadd.f32 %v11858_v53, %v4609_v60 }
 0xf69   : > { %v4643_v57 = vpack.c.bf16 %v4630_v7, %v4629_v62  ;;  %v4610_v52 = vmul.f32 %v11851_v56, %v4588_v14 }
 0xf6b   : > { %4916 = vmatmul.mubr.bf16.gmra.mxu0 %v4643_v57  ;;  %5029 = vmatmul.mubr.bf16.gmra.mxu1 %v4643_v57  ;;  %v4632_v50 = vadd.f32 %v11858_v53, %v4610_v52 }
 0xf6c   : > { %4925 = vmatprep.mubr.bf16.mxu0 %v14140_v2  ;;  %5038 = vmatprep.mubr.bf16.mxu1 %v14140_v2 }
 0xf6d   : > { %v4644_v21 = vpack.c.bf16 %v4632_v50, %v4631_v4 }
 0xf73   : > { %4926 = vmatmul.mubr.bf16.gmra.mxu0 %v4644_v21  ;;  %5039 = vmatmul.mubr.bf16.gmra.mxu1 %v4644_v21 }
 0xf74   : > { %4935 = vmatprep.mubr.bf16.mxu0 %v14140_v2  ;;  %5048 = vmatprep.mubr.bf16.mxu1 %v14140_v2 }
 0xfa4   : > { %v4518_v13 = vpop.xlane.xlu0 %4517 }
 0xfa5   : > { %v4541_v8 = vmul.f32 0.0078125, %v4518_v13 }
 0xfa7   : > { %v4557_v61 = vadd.f32 1e-05, %v4541_v8 }
 0xfa8   : > { %v4520_v36 = vpop.xlane.xlu1 %4519  ;;  %v4522_v6 = vpop.xlane.xlu0 %4521 }
 0xfa9   : > { %9069 = vrsqrt.f32 %v4557_v61  ;;  %v4542_v9 = vmul.f32 0.0078125, %v4520_v36  ;;  %v4543_v0 = vmul.f32 0.0078125, %v4522_v6 }
 0xfab   : > { %v4558_v59 = vadd.f32 1e-05, %v4542_v9  ;;  %v4559_v1 = vadd.f32 1e-05, %v4543_v0 }
 0xfac   : > { %v4524_v29 = vpop.xlane.xlu1 %4523 }
 0xfad   : > { %9071 = vrsqrt.f32 %v4558_v59  ;;  %v4544_v48 = vmul.f32 0.0078125, %v4524_v29 }
 0xfae   : > { %9073 = vrsqrt.f32 %v4559_v1 }
 0xfaf   : > { %v4560_v38 = vadd.f32 1e-05, %v4544_v48 }
 0xfb1   : > { %9075 = vrsqrt.f32 %v4560_v38 }
 0xfb6   : > { %v9070_v44 = vpop.eup %9069 }
 0xfb7   : > { %v4526_v39 = vpop.xlane.xlu0 %4525  ;;  %v4589_v18 = vmul.f32 %v9070_v44, %v11808_v32 }
 0xfb8   : > { %v4545_v34 = vmul.f32 0.0078125, %v4526_v39 }
 0xfb9   : > { %v4611_v16 = vmul.f32 %v11851_v56, %v4589_v18 }
 0xfba   : > { %v9072_v51 = vpop.eup %9071  ;;  %v4561_v49 = vadd.f32 1e-05, %v4545_v34 }
 0xfbb   : > { %v4528_v30 = vpop.xlane.xlu1 %4527  ;;  %v4530_v35 = vpop.xlane.xlu0 %4529  ;;  %v4590_v37 = vmul.f32 %v9072_v51, %v11813_v27  ;;  %v4633_v32 = vadd.f32 %v11858_v53, %v4611_v16 }
 0xfbc   : > { %v9074_v25 = vpop.eup %9073  ;;  %9077 = vrsqrt.f32 %v4561_v49  ;;  %v4546_v24 = vmul.f32 0.0078125, %v4528_v30  ;;  %v4547_v41 = vmul.f32 0.0078125, %v4530_v35  ;;  %v4681_v35 = vld [vmem:[%s13998_s11] sm:$0xf] }
 0xfbd   : > { %v4612_v11 = vmul.f32 %v11851_v56, %v4590_v37  ;;  %v4591_v57 = vmul.f32 %v9074_v25, %v11816_v54 }
 0xfbe   : > { %v9076_v46 = vpop.eup %9075  ;;  %v4562_v62 = vadd.f32 1e-05, %v4546_v24  ;;  %v4563_v7 = vadd.f32 1e-05, %v4547_v41 }
 0xfbf   : > { %v4532_v31 = vpop.xlane.xlu1 %4531  ;;  %v4634_v14 = vadd.f32 %v11858_v53, %v4612_v11  ;;  %v4592_v27 = vmul.f32 %v9076_v46, %v11823_v63  ;;  %v4613_v21 = vmul.f32 %v11851_v56, %v4591_v57 }
 0xfc0   : > { %9079 = vrsqrt.f32 %v4562_v62  ;;  %v4548_v52 = vmul.f32 0.0078125, %v4532_v31 }
 0xfc1   : > { %v4645_v60 = vpack.c.bf16 %v4634_v14, %v4633_v32  ;;  %v4614_v50 = vmul.f32 %v11851_v56, %v4592_v27  ;;  %9081 = vrsqrt.f32 %v4563_v7  ;;  %v4635_v63 = vadd.f32 %v11858_v53, %v4613_v21 }
 0xfc2   : > { %v4564_v4 = vadd.f32 1e-05, %v4548_v52 }
 0xfc3   : > { %4936 = vmatmul.mubr.bf16.gmra.mxu0 %v4645_v60  ;;  %5049 = vmatmul.mubr.bf16.gmra.mxu1 %v4645_v60  ;;  %v4636_v54 = vadd.f32 %v11858_v53, %v4614_v50 }
 0xfc4   : > { %9083 = vrsqrt.f32 %v4564_v4  ;;  %4945 = vmatprep.mubr.bf16.mxu0 %v14140_v2  ;;  %5058 = vmatprep.mubr.bf16.mxu1 %v14140_v2 }
 0xfc5   : > { %v4646_v8 = vpack.c.bf16 %v4636_v54, %v4635_v63 }
 0xfc9   : > { %v9078_v13 = vpop.eup %9077 }
 0xfca   : > { %v4593_v61 = vmul.f32 %v9078_v13, %v11828_v43 }
 0xfcb   : > { %4946 = vmatmul.mubr.bf16.gmra.mxu0 %v4646_v8  ;;  %5059 = vmatmul.mubr.bf16.gmra.mxu1 %v4646_v8 }
 0xfcc   : > { %4955 = vmatprep.mubr.bf16.mxu0 %v14140_v2  ;;  %5068 = vmatprep.mubr.bf16.mxu1 %v14140_v2  ;;  %v4615_v9 = vmul.f32 %v11851_v56, %v4593_v61 }
 0xfcd   : > { %v9080_v36 = vpop.eup %9079 }
 0xfce   : > { %v4594_v6 = vmul.f32 %v9080_v36, %v11833_v23  ;;  %v9082_v0 = vpop.eup %9081  ;;  %v4637_v29 = vadd.f32 %v11858_v53, %v4615_v9 }
 0xfcf   : > { %v4595_v43 = vmul.f32 %v9082_v0, %v11836_v26  ;;  %v4683_v26 = vlaneseq }
 0xfd0   : > { %v4616_v59 = vmul.f32 %v11851_v56, %v4594_v6 }
 0xfd1   : > { %v9084_v1 = vpop.eup %9083  ;;  %v4617_v23 = vmul.f32 %v11851_v56, %v4595_v43 }
 0xfd2   : > { %v4638_v48 = vadd.f32 %v11858_v53, %v4616_v59  ;;  %v4596_v38 = vmul.f32 %v9084_v1, %v11843_v28  ;;  %v4684_v28 = vshrl.u32 %v4683_v26, 7 }
 0xfd3   : > { %v4639_v34 = vadd.f32 %v11858_v53, %v4617_v23 }
 0xfd4   : > { %v4647_v44 = vpack.c.bf16 %v4638_v48, %v4637_v29  ;;  %v4618_v39 = vmul.f32 %v11851_v56, %v4596_v38  ;;  %v4685_v49 = vsub.s32 0, %v4684_v28  ;;  %v4693_v30 = vsub.s32 2, %v4684_v28 }
 0xfd5   : > { %v4689_v56 = vsub.s32 1, %v4684_v28 }
 0xfd6   : > { %4956 = vmatmul.mubr.bf16.gmra.mxu0 %v4647_v44  ;;  %5069 = vmatmul.mubr.bf16.gmra.mxu1 %v4647_v44  ;;  %v4640_v18 = vadd.f32 %v11858_v53, %v4618_v39  ;;  %v11922_v37 = vrot.slane %v4681_v35, %v4685_v49  ;;  %v11924_v16 = vrot.slane %v4681_v35, %v4693_v30  ;;  %v4697_v53 = vsub.s32 3, %v4684_v28 }
 0xfd7   : > { %4965 = vmatprep.mubr.bf16.mxu0 %v14140_v2  ;;  %5078 = vmatprep.mubr.bf16.mxu1 %v14140_v2  ;;  %v11926_v24 = vrot.slane %v4681_v35, %v4689_v56 }
 0xfd8   : > { %v4648_v51 = vpack.c.bf16 %v4640_v18, %v4639_v34  ;;  %14160 = vst [vmem:[#allocation43_spill] sm:$0xff] %v11922_v37  ;;  %14161 = vst [vmem:[#allocation44_spill] sm:$0xff] %v11924_v16  ;;  %v11943_v32 = vrot.slane %v4681_v35, %v4697_v53 }
 0xfd9   : > { %14162 = vst [vmem:[#allocation45_spill] sm:$0xff] %v11926_v24 }
 0xfde   : > { %4966 = vmatmul.mubr.bf16.gmra.mxu0 %v4648_v51  ;;  %5079 = vmatmul.mubr.bf16.gmra.mxu1 %v4648_v51 }
0x101b   : > { %v4897_v2 = vpop.f32.mrf.mxu0  ;;  %v5010_v25 = vpop.f32.mrf.mxu1 }
0x101c   : > { %v11929_v41 = vadd.f32 %v4897_v2, %v11922_v37  ;;  %v11932_v11 = vadd.f32 %v5010_v25, %v11924_v16 }
0x101d   : > { %v4899_v46 = vpop.f32.mrf.mxu0  ;;  %v5012_v27 = vpop.f32.mrf.mxu1 }
0x101e   : > { %v11935_v62 = vmul.f32 0.70710677, %v11929_v41  ;;  %v11938_v7 = vmul.f32 0.70710677, %v11932_v11  ;;  %v11941_v31 = vadd.f32 %v4899_v46, %v11926_v24  ;;  %v11957_v54 = vadd.f32 %v5012_v27, %v11943_v32 }
0x101f   : > { %v4901_v4 = vpop.f32.mrf.mxu0  ;;  %v5014_v36 = vpop.f32.mrf.mxu1 }
0x1020   : > { %v11946_v14 = vand.u32 2147483647, %v11935_v62  ;;  %v5219_v57 = vand.u32 2147483647, %v11938_v7  ;;  %v11950_v52 = vmul.f32 0.70710677, %v11941_v31  ;;  %v11961_v61 = vadd.f32 %v4901_v4, %v11922_v37 }
0x1021   : > { %14163 = vst [vmem:[#allocation46_spill] sm:$0xff] %v11957_v54  ;;  %v4903_v6 = vpop.f32.mrf.mxu0  ;;  %v11964_v9 = vmul.f32 0.70710677, %v11957_v54  ;;  %v11970_v59 = vadd.f32 %v5014_v36, %v11924_v16  ;;  %v5016_v49 = vpop.f32.mrf.mxu1  ;;  %vm6499_vm6 = vcmp.lt.f32.partialorder %v11938_v7, 0.0  ;;  %vm6497_vm8 = vcmp.lt.f32.partialorder %v11935_v62, 0.0  ;;  %v8715_v62 = vld [vmem:[#allocation14 + $0x18] sm:$0xff]  }
0x1022   : > { %v5281_v60 = vmul.f32 0.3275911, %v11946_v14  ;;  %v5283_v50 = vmul.f32 0.3275911, %v5219_v57  ;;  %v11954_v21 = vand.u32 2147483647, %v11950_v52  ;;  %v11973_v1 = vadd.f32 %v4903_v6, %v11926_v24 }
0x1023   : > { %14164 = vst [vmem:[#allocation47_spill] sm:$0xff] %v11964_v9  ;;  %v11967_v0 = vmul.f32 0.70710677, %v11961_v61  ;;  %v11976_v48 = vand.u32 2147483647, %v11964_v9  ;;  %v6115_v23 = vsub.f32 0.0, %v5219_v57  ;;  %v4907_v25 = vpop.f32.mrf.mxu0  ;;  %v5020_v27 = vpop.f32.mrf.mxu1  ;;  %v12003_v6 = vadd.f32 %v5016_v49, %v11943_v32 }
0x1024   : > { %v5347_v63 = vadd.f32 1.0, %v5283_v50  ;;  %v5345_v13 = vadd.f32 1.0, %v5281_v60  ;;  %v5282_v8 = vmul.f32 0.3275911, %v11954_v21  ;;  %v11979_v43 = vmul.f32 0.70710677, %v11970_v59 }
0x1025   : > { %v11982_v38 = vand.u32 2147483647, %v11967_v0  ;;  %v11986_v39 = vmul.f32 0.70710677, %v11973_v1  ;;  %v5284_v18 = vmul.f32 0.3275911, %v11976_v48  ;;  %v6179_v30 = vmul.f32 %v6115_v23, %v5219_v57 }
0x1026   : > { %9085 = vrcp.f32 %v5347_v63  ;;  %v5346_v29 = vadd.f32 1.0, %v5282_v8  ;;  %v5223_v44 = vand.u32 2147483647, %v11979_v43  ;;  %v11997_v63 = vadd.f32 %v4907_v25, %v11922_v37  ;;  %14165 = vst [vmem:[#allocation48_spill] sm:$0xff] %v12003_v6 }
0x1027   : > { %9087 = vrcp.f32 %v5345_v13  ;;  %v5285_v51 = vmul.f32 0.3275911, %v11982_v38  ;;  %v11991_v28 = vand.u32 2147483647, %v11986_v39  ;;  %v5348_v35 = vadd.f32 1.0, %v5284_v18 }
0x1028   : > { %9089 = vrcp.f32 %v5346_v29  ;;  %v5287_v34 = vmul.f32 0.3275911, %v5223_v44  ;;  %v6245_v4 = vmul.f32 1.442695, %v6179_v30  ;;  %v12000_v57 = vadd.f32 %v5020_v27, %v11924_v16 }
0x1029   : > { %v5349_v2 = vadd.f32 1.0, %v5285_v51  ;;  %v5286_v46 = vmul.f32 0.3275911, %v11991_v28  ;;  %v6119_v8 = vsub.f32 0.0, %v5223_v44  ;;  %v6114_v15 = vsub.f32 0.0, %v11954_v21 }
0x102a   : > { %v5351_v26 = vadd.f32 1.0, %v5287_v34  ;;  %v12009_v34 = vmul.f32 0.70710677, %v11997_v63  ;;  %v12012_v51 = vmul.f32 0.70710677, %v12000_v57  ;;  %v6117_v42 = vsub.f32 0.0, %v11982_v38 }
0x102b   : > { %v5350_v36 = vadd.f32 1.0, %v5286_v46  ;;  %v6183_v30 = vmul.f32 %v6119_v8, %v5223_v44  ;;  %vm6503_vm7 = vcmp.lt.f32.partialorder %v11979_v43, 0.0  ;;  %vm6498_vm9 = vcmp.lt.f32.partialorder %v11950_v52, 0.0 }
0x102c   : > { %9091 = vrcp.f32 %v5351_v26  ;;  %v12022_v27 = vand.u32 2147483647, %v12012_v51  ;;  %vm6501_vm10 = vcmp.lt.f32.partialorder %v11967_v0, 0.0  ;;  %vm6502_vm11 = vcmp.lt.f32.partialorder %v11986_v39, 0.0 }
0x102d   : > { %9093 = vrcp.f32 %v5348_v35  ;;  %v12015_v35 = vmul.f32 0.70710677, %v12003_v6  ;;  %vm6505_vm12 = vcmp.lt.f32.partialorder %v12009_v34, 0.0  ;;  %vm6507_vm13 = vcmp.lt.f32.partialorder %v12012_v51, 0.0 }
0x102e   : > { %9095 = vrcp.f32 %v5349_v2  ;;  %v5291_v12 = vmul.f32 0.3275911, %v12022_v27 }
0x102f   : > { %9097 = vpow2.f32 %v6245_v4  ;;  %14166 = vst [vmem:[#allocation49_spill] sm:$0xff] %v12015_v35  ;;  %v12025_v44 = vand.u32 2147483647, %v12015_v35  ;;  %v8708_v35 = vld [vmem:[#allocation14 + $0xb8] sm:$0xff]  }
0x1030   : > { %9099 = vrcp.f32 %v5350_v36  ;;  %v6113_v36 = vsub.f32 0.0, %v11946_v14  ;;  %v5355_v47 = vadd.f32 1.0, %v5291_v12 }
0x1031   : > { %v5288_v45 = vmul.f32 0.3275911, %v12025_v44 }
0x1033   : > { %v9086_v56 = vpop.eup %9085 }
0x1034   : > { %v5539_v53 = vmul.f32 1.0614054, %v9086_v56  ;;  %v11994_v60 = vpop.eup %9087 }
0x1035   : > { %v5537_v29 = vmul.f32 1.0614054, %v11994_v60  ;;  %v12006_v23 = vpop.eup %9089 }
0x1036   : > { %v5603_v50 = vadd.f32 -1.4531521, %v5539_v53  ;;  %v5538_v2 = vmul.f32 1.0614054, %v12006_v23  ;;  %v12019_v53 = vand.u32 2147483647, %v12009_v34 }
0x1037   : > { %v5601_v49 = vadd.f32 -1.4531521, %v5537_v29 }
0x1038   : > { %v5667_v13 = vmul.f32 %v9086_v56, %v5603_v50  ;;  %v5602_v29 = vadd.f32 -1.4531521, %v5538_v2  ;;  %v5289_v33 = vmul.f32 0.3275911, %v12019_v53  ;;  %v6177_v2 = vmul.f32 %v6113_v36, %v11946_v14 }
0x1039   : > { %v9092_v46 = vpop.eup %9091  ;;  %v5665_v8 = vmul.f32 %v11994_v60, %v5601_v49  ;;  %v6116_v14 = vsub.f32 0.0, %v11976_v48 }
0x103a   : > { %v5731_v18 = vadd.f32 1.4214138, %v5667_v13  ;;  %v5543_v4 = vmul.f32 1.0614054, %v9092_v46  ;;  %v6253_v13 = vmul.f32 1.442695, %v6183_v30  ;;  %v12030_v20 = vpop.eup %9093  ;;  %v5666_v49 = vmul.f32 %v12006_v23, %v5602_v29 }
0x103b   : > { %v12033_v40 = vpop.eup %9095  ;;  %v5729_v17 = vadd.f32 1.4214138, %v5665_v8  ;;  %v5353_v5 = vadd.f32 1.0, %v5289_v33  ;;  %v6241_v36 = vmul.f32 1.442695, %v6177_v2  ;;  %v6178_v33 = vmul.f32 %v6114_v15, %v11954_v21 }
0x103c   : > { %v5795_v26 = vmul.f32 %v9086_v56, %v5731_v18  ;;  %9101 = vpow2.f32 %v6253_v13  ;;  %v9098_v10 = vpop.eup %9097  ;;  %v5541_v22 = vmul.f32 1.0614054, %v12033_v40  ;;  %v5352_v13 = vadd.f32 1.0, %v5288_v45 }
0x103d   : > { %v5793_v8 = vmul.f32 %v11994_v60, %v5729_v17  ;;  %v5730_v29 = vadd.f32 1.4214138, %v5666_v49  ;;  %9103 = vrcp.f32 %v5353_v5  ;;  %v12049_v17 = vmul.f32 0.5, %v11929_v41 }
0x103e   : > { %v5859_v25 = vadd.f32 -0.28449672, %v5795_v26  ;;  %v5607_v26 = vadd.f32 -1.4531521, %v5543_v4  ;;  %v5605_v58 = vadd.f32 -1.4531521, %v5541_v22  ;;  %9105 = vrcp.f32 %v5355_v47 }
0x103f   : > { %9107 = vrcp.f32 %v5352_v13  ;;  %v5794_v49 = vmul.f32 %v12006_v23, %v5730_v29  ;;  %v5091_v2 = vmul.f32 0.5, %v11932_v11  ;;  %v6180_v22 = vmul.f32 %v6116_v14, %v11976_v48  ;;  %v4909_v13 = vpop.f32.mrf.mxu0 }
0x1040   : > { %v5923_v50 = vmul.f32 %v9086_v56, %v5859_v25  ;;  %v5671_v30 = vmul.f32 %v9092_v46, %v5607_v26  ;;  %v12041_v26 = vpop.eup %9099  ;;  %9109 = vpow2.f32 %v6241_v36  ;;  %v6243_v47 = vmul.f32 1.442695, %v6178_v33 }
0x1041   : > { %v5542_v45 = vmul.f32 1.0614054, %v12041_v26  ;;  %v5669_v21 = vmul.f32 %v12033_v40, %v5605_v58  ;;  %v5858_v48 = vadd.f32 -0.28449672, %v5794_v49  ;;  %v6247_v14 = vmul.f32 1.442695, %v6180_v22 }
0x1042   : > { %v5987_v18 = vadd.f32 0.2548296, %v5923_v50  ;;  %v5540_v50 = vmul.f32 1.0614054, %v12030_v20  ;;  %v5735_v4 = vadd.f32 1.4214138, %v5671_v30  ;;  %9111 = vpow2.f32 %v6243_v47  ;;  %v5022_v47 = vpop.f32.mrf.mxu1 }
0x1043   : > { %v5606_v41 = vadd.f32 -1.4531521, %v5542_v45  ;;  %v12064_v58 = vmul.f32 0.5, %v11961_v61  ;;  %v12067_v36 = vadd.f32 %v4909_v13, %v11926_v24  ;;  %v5922_v45 = vmul.f32 %v12006_v23, %v5858_v48 }
0x1044   : > { %v6051_v25 = vmul.f32 %v9086_v56, %v5987_v18  ;;  %v5799_v18 = vmul.f32 %v9092_v46, %v5735_v4  ;;  %v5604_v3 = vadd.f32 -1.4531521, %v5540_v50  ;;  %v6181_v50 = vmul.f32 %v6117_v42, %v11982_v38 }
0x1045   : > { %v5733_v38 = vadd.f32 1.4214138, %v5669_v21  ;;  %v5670_v7 = vmul.f32 %v12041_v26, %v5606_v41  ;;  %v12074_v61 = vmul.f32 0.5, %v11973_v1  ;;  %9113 = vpow2.f32 %v6247_v14 }
0x1046   : > { %v6371_v56 = vmul.f32 %v9098_v10, %v6051_v25  ;;  %v5863_v30 = vadd.f32 -0.28449672, %v5799_v18  ;;  %v5857_v25 = vadd.f32 -0.28449672, %v5793_v8  ;;  %v5668_v5 = vmul.f32 %v12030_v20, %v5604_v3 }
0x1047   : > { %v6118_v18 = vsub.f32 0.0, %v11991_v28  ;;  %v12061_v3 = vmul.f32 0.5, %v11941_v31  ;;  %v5734_v21 = vadd.f32 1.4214138, %v5670_v7  ;;  %v5986_v41 = vadd.f32 0.2548296, %v5922_v45 }
0x1048   : > { %v6435_v10 = vsub.f32 1.0, %v6371_v56  ;;  %v5927_v12 = vmul.f32 %v9092_v46, %v5863_v30  ;;  %v5921_v11 = vmul.f32 %v11994_v60, %v5857_v25  ;;  %v5732_v29 = vadd.f32 1.4214138, %v5668_v5 }
0x1049   : > { %v9102_v8 = vpop.eup %9101  ;;  %v6182_v31 = vmul.f32 %v6118_v18, %v11991_v28  ;;  %v5095_v25 = vmul.f32 0.5, %v11970_v59  ;;  %v12082_v28 = vmul.f32 0.70710677, %v12067_v36  ;;  %v6121_v13 = vsub.f32 0.0, %v12019_v53 }
0x104a   : > { %v5991_v15 = vadd.f32 0.2548296, %v5927_v12  ;;  %v6563_v4 = vsub.f32 0.0, %v6435_v10  ;;  %v5985_v12 = vadd.f32 0.2548296, %v5921_v11  ;;  %v5796_v49 = vmul.f32 %v12030_v20, %v5732_v29 }
0x104b   : > { %v12093_v48 = vand.u32 2147483647, %v12082_v28  ;;  %v12096_v29 = vadd.f32 %v5022_v47, %v11943_v32  ;;  %vm6506_vm15 = vcmp.lt.f32.partialorder %v12082_v28, 0.0 }
0x104c   : > { %v6055_v56 = vmul.f32 %v9092_v46, %v5991_v15  ;;  %v6249_v46 = vmul.f32 1.442695, %v6181_v50  ;;  %v6627_v30 = vsel %vm6499_vm6, %v6563_v4, %v6435_v10  ;;  %v12078_v10 = vpop.eup %9103  ;;  %v5797_v15 = vmul.f32 %v12033_v40, %v5733_v38 }
0x104d   : > { %v6691_v22 = vadd.f32 1.0, %v6627_v30  ;;  %v12084_v59 = vpop.eup %9105  ;;  %v6251_v50 = vmul.f32 1.442695, %v6182_v31  ;;  %v6120_v4 = vsub.f32 0.0, %v12025_v44  ;;  %v6049_v43 = vmul.f32 %v11994_v60, %v5985_v12  ;;  %v4911_v12 = vpop.f32.mrf.mxu0 }
0x104e   : > { %v6375_v42 = vmul.f32 %v9102_v8, %v6055_v56  ;;  %9115 = vpow2.f32 %v6249_v46  ;;  %v12087_v56 = vpop.eup %9107  ;;  %v5860_v8 = vadd.f32 -0.28449672, %v5796_v49  ;;  %v5545_v11 = vmul.f32 1.0614054, %v12078_v10 }
0x104f   : > { %v12098_v14 = vmul.f32 %v6691_v22, %v5091_v2  ;;  %v5547_v60 = vmul.f32 1.0614054, %v12084_v59  ;;  %v9110_v46 = vpop.eup %9109  ;;  %v5798_v30 = vmul.f32 %v12041_v26, %v5734_v21  ;;  %v6184_v7 = vmul.f32 %v6120_v4, %v12025_v44 }
0x1050   : > { %v6439_v33 = vsub.f32 1.0, %v6375_v42  ;;  %v5861_v42 = vadd.f32 -0.28449672, %v5797_v15  ;;  %v5290_v31 = vmul.f32 0.3275911, %v12093_v48  ;;  %v12107_v45 = vmul.f32 %v9110_v46, %v6049_v43  ;;  %v4913_v46 = vpop.f32.mrf.mxu0 }
0x1051   : > { %14167 = vst [vmem:[#allocation50_spill] sm:$0xff] %v12098_v14  ;;  %v6050_v2 = vmul.f32 %v12006_v23, %v5986_v41  ;;  %v6185_v49 = vmul.f32 %v6121_v13, %v12019_v53  ;;  %v5924_v22 = vmul.f32 %v12030_v20, %v5860_v8  ;;  %v12115_v15 = vmul.f32 0.5, %v11997_v63  ;;  %v9112_v53 = vpop.eup %9111  ;;  %v5024_v63 = vpop.f32.mrf.mxu1  ;;  %v8705_v14 = vld [vmem:[#allocation14 + $0x68] sm:$0xff]  }
0x1052   : > { %v6567_v5 = vsub.f32 0.0, %v6439_v33  ;;  %v5609_v47 = vadd.f32 -1.4531521, %v5545_v11  ;;  %v5354_v44 = vadd.f32 1.0, %v5290_v31  ;;  %v5925_v21 = vmul.f32 %v12033_v40, %v5861_v42  ;;  %v8703_v31 = vld [vmem:[#allocation14 + $0x70] sm:$0xff]  }
0x1053   : > { %v5611_v4 = vadd.f32 -1.4531521, %v5547_v60  ;;  %v12119_v43 = vmul.f32 0.70710677, %v12096_v29  ;;  %v12122_v23 = vadd.f32 %v4911_v12, %v11922_v37  ;;  %v5862_v41 = vadd.f32 -0.28449672, %v5798_v30 }
0x1054   : > { %v6631_v1 = vsel %vm6503_vm7, %v6567_v5, %v6439_v33  ;;  %v5544_v33 = vmul.f32 1.0614054, %v12087_v56  ;;  %v8701_v5 = vld [vmem:[#allocation14 + $0x78] sm:$0xff]   ;;  %v6255_v13 = vmul.f32 1.442695, %v6184_v7  ;;  %9117 = vrcp.f32 %v5354_v44  ;;  %v8704_v7 = vld [vmem:[#allocation14 + $0x30] sm:$0xff]  }
0x1055   : > { %v6695_v18 = vadd.f32 1.0, %v6631_v1  ;;  %v8702_v1 = vld [vmem:[#allocation14 + $0x38] sm:$0xff]   ;;  %7995 = vmatprep.subr.bf16.mxu0 %v8701_v5  ;;  %v14038_v8 = vsub.f32 1.0, %v12107_v45  ;;  %v12125_v11 = vmul.f32 %v9112_v53, %v6050_v2  ;;  %v12127_v42 = vmul.f32 1.442695, %v6185_v49  ;;  %v12136_v5 = vpop.eup %9113 }
0x1056   : > { %7996 = vmatpush3.bf16.msra.mxu0 %v8702_v1  ;;  %v12130_v60 = vand.u32 2147483647, %v12119_v43  ;;  %v5988_v12 = vadd.f32 0.2548296, %v5924_v22  ;;  %9119 = vpow2.f32 %v6251_v50  ;;  %v5673_v30 = vmul.f32 %v12078_v10, %v5609_v47 }
0x1057   : > { %v12100_v38 = vmul.f32 %v6695_v18, %v5095_v25  ;;  %v5608_v18 = vadd.f32 -1.4531521, %v5544_v33  ;;  %v12134_v33 = vmul.f32 0.70710677, %v12122_v23  ;;  %v5989_v44 = vadd.f32 0.2548296, %v5925_v21  ;;  %7997 = vmatprep.subr.bf16.mxu0 %v8703_v31 }
0x1058   : > { %v5675_v2 = vmul.f32 %v12084_v59, %v5611_v4  ;;  %v5292_v49 = vmul.f32 0.3275911, %v12130_v60  ;;  %v12141_v1 = vadd.f32 %v5024_v63, %v11924_v16  ;;  %v5926_v50 = vmul.f32 %v12041_v26, %v5862_v41  ;;  %v5026_v63 = vpop.f32.mrf.mxu1 }
0x1059   : > { %14168 = vst [vmem:[#allocation51_spill] sm:$0xff] %v12100_v38  ;;  %v5672_v22 = vmul.f32 %v12087_v56, %v5608_v18  ;;  %v12147_v47 = vand.u32 2147483647, %v12134_v33  ;;  %v12150_v21 = vadd.f32 %v4913_v46, %v11926_v24  ;;  %v6561_v4 = vsub.f32 0.0, %v14038_v8  ;;  %v12156_v38 = vld [vmem:[#allocation14 + $0xf8] sm:$0xff]  }
0x105a   : > { %7998 = vmatpush3.bf16.msra.mxu0 %v8704_v7  ;;  %v6123_v31 = vsub.f32 0.0, %v12022_v27  ;;  %v5356_v25 = vadd.f32 1.0, %v5292_v49  ;;  %v5737_v41 = vadd.f32 1.4214138, %v5673_v30  ;;  %v12161_v46 = vmul.f32 0.70710677, %v12141_v1  ;;  %8443 = vmatprep.subr.bf16.mxu1 %v12156_v38 }
0x105b   : > { %v9116_v53 = vpop.eup %9115  ;;  %v5293_v18 = vmul.f32 0.3275911, %v12147_v47  ;;  %v6053_v7 = vmul.f32 %v12033_v40, %v5989_v44  ;;  %v5739_v55 = vadd.f32 1.4214138, %v5675_v2  ;;  %v12165_v8 = vmul.f32 0.70710677, %v12150_v21  ;;  %7999 = vmatprep.subr.bf16.mxu0 %v8705_v14  ;;  %8451 = vmatpush3.bf16.msra.mxu1 %v8708_v35 }
0x105c   : > { %14169 = vst [vmem:[#allocation52_spill] sm:$0xff] %v12161_v46  ;;  %9121 = vrcp.f32 %v5356_v25  ;;  %v8707_v49 = vld [vmem:[#allocation14 + $0x28] sm:$0xff]   ;;  %v5990_v19 = vadd.f32 0.2548296, %v5926_v50  ;;  %v12169_v6 = vand.u32 2147483647, %v12161_v46  ;;  %v6052_v54 = vmul.f32 %v12030_v20, %v5988_v12 }
0x105d   : > { %14170 = vst [vmem:[#allocation53_spill] sm:$0xff] %v12165_v8  ;;  %9123 = vpow2.f32 %v6255_v13  ;;  %v5357_v30 = vadd.f32 1.0, %v5293_v18  ;;  %v5736_v40 = vadd.f32 1.4214138, %v5672_v22  ;;  %v6187_v25 = vmul.f32 %v6123_v31, %v12022_v27  ;;  %v8709_v14 = vld [vmem:[#allocation14 + $0x60] sm:$0xff]   ;;  %v8710_v2 = vld [vmem:[#allocation14 + $0xf0] sm:$0xff]  }
0x105e   : > { %v12174_v44 = vand.u32 2147483647, %v12165_v8  ;;  %8000 = vmatpush3.bf16.msra.mxu0 %v8707_v49  ;;  %v14171_v9 = vsub.f32 1.0, %v12125_v11  ;;  %v5801_v13 = vmul.f32 %v12078_v10, %v5737_v41  ;;  %v12180_v18 = vadd.f32 %v5026_v63, %v11943_v32  ;;  %v8711_v20 = vld [vmem:[#allocation14 + $0x20] sm:$0xff]   ;;  %v8712_v12 = vld [vmem:[#allocation14 + $0xb0] sm:$0xff]   ;;  %8444 = vmatprep.subr.bf16.mxu1 %v8710_v2 }
0x105f   : > { %9125 = vrcp.f32 %v5357_v30  ;;  %v12182_v22 = vmul.f32 %v9116_v53, %v6053_v7  ;;  %v5803_v27 = vmul.f32 %v12084_v59, %v5739_v55  ;;  %v5295_v31 = vmul.f32 0.3275911, %v12169_v6  ;;  %8001 = vmatprep.subr.bf16.mxu0 %v8709_v14  ;;  %8452 = vmatpush3.bf16.msra.mxu1 %v8712_v12 }
0x1060   : > { %v6562_v50 = vsub.f32 0.0, %v14171_v9  ;;  %v5294_v49 = vmul.f32 0.3275911, %v12174_v44  ;;  %v6054_v9 = vmul.f32 %v12041_v26, %v5990_v19  ;;  %9127 = vpow2.f32 %v12127_v42  ;;  %v8713_v19 = vld [vmem:[#allocation14 + $0x58] sm:$0xff]   ;;  %v8714_v26 = vld [vmem:[#allocation14 + $0xe8] sm:$0xff]  }
0x1061   : > { %v12190_v63 = vmul.f32 0.5, %v12000_v57  ;;  %v12193_v35 = vmul.f32 0.5, %v12067_v36  ;;  %v12195_v53 = vpop.eup %9117  ;;  %v14173_v55 = vsub.f32 1.0, %v12107_v45  ;;  %v6261_v7 = vmul.f32 1.442695, %v6187_v25  ;;  %v5030_v45 = vpop.f32.mrf.mxu1  ;;  %8445 = vmatprep.subr.bf16.mxu1 %v8714_v26 }
0x1062   : > { %v5359_v30 = vadd.f32 1.0, %v5295_v31  ;;  %v5358_v14 = vadd.f32 1.0, %v5294_v49  ;;  %8002 = vmatpush3.bf16.msra.mxu0 %v8711_v20  ;;  %v12202_v42 = vmul.f32 %v12136_v5, %v6052_v54  ;;  %v5800_v57 = vmul.f32 %v12087_v56, %v5736_v40  ;;  %v8716_v5 = vld [vmem:[#allocation14 + $0xa8] sm:$0xff]   ;;  %v8718_v49 = vld [vmem:[#allocation14 + $0xe0] sm:$0xff]  }
0x1063   : > { %14172 = vst [vmem:[#allocation54_spill] sm:$0xff] %v12193_v35  ;;  %v6625_v41 = vsel %vm6497_vm8, %v6561_v4, %v14173_v55  ;;  %v5865_v36 = vadd.f32 -0.28449672, %v5801_v13  ;;  %v12206_v2 = vmul.f32 0.70710677, %v12180_v18  ;;  %v4917_v35 = vpop.f32.mrf.mxu0  ;;  %v9120_v4 = vpop.eup %9119  ;;  %v14176_v25 = vsub.f32 1.0, %v12125_v11  ;;  %8003 = vmatprep.subr.bf16.mxu0 %v8713_v19  ;;  %8453 = vmatpush3.bf16.msra.mxu1 %v8716_v5 }
0x1064   : > { %14174 = vst [vmem:[#allocation55_spill] sm:$0xff] %v12202_v42  ;;  %v14046_v31 = vsub.f32 1.0, %v12182_v22  ;;  %v5867_v54 = vadd.f32 -0.28449672, %v5803_v27  ;;  %9129 = vrcp.f32 %v5359_v30  ;;  %v12214_v40 = vmul.f32 %v9120_v4, %v6054_v9  ;;  %v8717_v27 = vld [vmem:[#allocation14 + $0x50] sm:$0xff]   ;;  %8446 = vmatprep.subr.bf16.mxu1 %v8718_v49 }
0x1065   : > { %14175 = vst [vmem:[#allocation56_spill] sm:$0xff] %v12206_v2  ;;  %v6626_v20 = vsel %vm6498_vm9, %v6562_v50, %v14176_v25  ;;  %v5546_v13 = vmul.f32 1.0614054, %v12195_v53  ;;  %9131 = vrcp.f32 %v5358_v14  ;;  %v12218_v12 = vand.u32 2147483647, %v12206_v2  ;;  %v8719_v19 = vld [vmem:[#allocation14 + $0x10] sm:$0xff]  }
0x1066   : > { %v6689_v11 = vadd.f32 1.0, %v6625_v41  ;;  %9133 = vpow2.f32 %v6261_v7  ;;  %v12221_v52 = vadd.f32 %v4917_v35, %v11922_v37  ;;  %v12224_v50 = vadd.f32 %v5030_v45, %v11924_v16  ;;  %8004 = vmatpush3.bf16.msra.mxu0 %v8715_v62  ;;  %v8720_v41 = vld [vmem:[#allocation14 + $0xa0] sm:$0xff]   ;;  %v4919_v62 = vpop.f32.mrf.mxu0  ;;  %v8722_v25 = vld [vmem:[#allocation14 + $0xd8] sm:$0xff]  }
0x1067   : > { %v6690_v55 = vadd.f32 1.0, %v6626_v20  ;;  %v5929_v30 = vmul.f32 %v12078_v10, %v5865_v36  ;;  %v5296_v14 = vmul.f32 0.3275911, %v12218_v12  ;;  %v5864_v7 = vadd.f32 -0.28449672, %v5800_v57  ;;  %8005 = vmatprep.subr.bf16.mxu0 %v8717_v27  ;;  %8454 = vmatpush3.bf16.msra.mxu1 %v8720_v41 }
0x1068   : > { %v5931_v35 = vmul.f32 %v12084_v59, %v5867_v54  ;;  %v12231_v26 = vmul.f32 0.70710677, %v12221_v52  ;;  %v12234_v45 = vmul.f32 0.70710677, %v12224_v50  ;;  %v6565_v36 = vsub.f32 0.0, %v14046_v31  ;;  %8447 = vmatprep.subr.bf16.mxu1 %v8722_v25 }
0x1069   : > { %v12236_v4 = vpop.eup %9121  ;;  %v5610_v20 = vadd.f32 -1.4531521, %v5546_v13  ;;  %v5360_v57 = vadd.f32 1.0, %v5296_v14  ;;  %v6122_v54 = vsub.f32 0.0, %v12093_v48  ;;  %v6125_v42 = vsub.f32 0.0, %v12147_v47  ;;  %v8721_v14 = vld [vmem:[#allocation14 + $0x48] sm:$0xff]  }
0x106a   : > { %14177 = vst [vmem:[#allocation57_spill] sm:$0xff] %v12231_v26  ;;  %14178 = vst [vmem:[#allocation58_spill] sm:$0xff] %v12234_v45  ;;  %v12241_v5 = vpop.eup %9123  ;;  %v5548_v9 = vmul.f32 1.0614054, %v12236_v4  ;;  %v12247_v27 = vand.u32 2147483647, %v12231_v26  ;;  %8006 = vmatpush3.bf16.msra.mxu0 %v8719_v19  ;;  %v12253_v13 = vadd.f32 %v4919_v62, %v11926_v24  ;;  %v5928_v2 = vmul.f32 %v12087_v56, %v5864_v7 }
0x106b   : > { %14179 = vst [vmem:[#allocation59_spill] sm:$0xff] %v12241_v5  ;;  %v5993_v49 = vadd.f32 0.2548296, %v5929_v30  ;;  %9135 = vrcp.f32 %v5360_v57  ;;  %v12250_v31 = vand.u32 2147483647, %v12234_v45  ;;  %v12260_v30 = vmul.f32 %v6689_v11, %v12049_v17  ;;  %8007 = vmatprep.subr.bf16.mxu0 %v8721_v14  ;;  %v8728_v24 = vld [vmem:[#allocation14 + $0x90] sm:$0xff]  }
0x106c   : > { %14180 = vst [vmem:[#allocation60_spill] sm:$0xff] %v12253_v13  ;;  %v12255_v5 = vpop.eup %9125  ;;  %v5995_v8 = vadd.f32 0.2548296, %v5931_v35  ;;  %v5612_v46 = vadd.f32 -1.4531521, %v5548_v9  ;;  %v12263_v19 = vmul.f32 %v6690_v55, %v12061_v3  ;;  %v5674_v41 = vmul.f32 %v12195_v53, %v5610_v20  ;;  %v8723_v55 = vld [vmem:[#allocation14 + $0x8] sm:$0xff]  }
0x106d   : > { %v5297_v26 = vmul.f32 0.3275911, %v12247_v27  ;;  %14181 = vst [vmem:[#allocation61_spill] sm:$0xff] %v12260_v30  ;;  %v5549_v62 = vmul.f32 1.0614054, %v12255_v5  ;;  %v9128_v57 = vpop.eup %9127  ;;  %v14183_v7 = vsub.f32 1.0, %v12182_v22  ;;  %v6189_v17 = vmul.f32 %v6125_v42, %v12147_v47 }
0x106e   : > { %14182 = vst [vmem:[#allocation62_spill] sm:$0xff] %v12263_v19  ;;  %v5299_v3 = vmul.f32 0.3275911, %v12250_v31  ;;  %v8724_v35 = vld [vmem:[#allocation14 + $0x98] sm:$0xff]   ;;  %v8725_v19 = vld [vmem:[#allocation14 + $0x40] sm:$0xff]   ;;  %v6057_v20 = vmul.f32 %v12078_v10, %v5993_v49  ;;  %v5676_v45 = vmul.f32 %v12236_v4, %v5612_v46  ;;  %v8726_v22 = vld [vmem:[#allocation14 + $0xd0] sm:$0xff]   ;;  %v6059_v47 = vmul.f32 %v12084_v59, %v5995_v8  ;;  %8008 = vmatpush3.bf16.msra.mxu0 %v8723_v55 }
0x106f   : > { %v6629_v9 = vsel %vm6501_vm10, %v6565_v36, %v14183_v7  ;;  %v5361_v11 = vadd.f32 1.0, %v5297_v26  ;;  %v5613_v14 = vadd.f32 -1.4531521, %v5549_v62  ;;  %v12277_v25 = vmul.f32 0.70710677, %v12253_v13  ;;  %8455 = vmatpush3.bf16.msra.mxu1 %v8724_v35  ;;  %v8727_v26 = vld [vmem:[#allocation14] sm:$0xff]   ;;  %8009 = vmatprep.subr.bf16.mxu0 %v8725_v19 }
0x1070   : > { %v14185_v0 = vsub.f32 1.0, %v12214_v40  ;;  %v5992_v7 = vadd.f32 0.2548296, %v5928_v2  ;;  %v6186_v42 = vmul.f32 %v6122_v54, %v12093_v48  ;;  %v5738_v46 = vadd.f32 1.4214138, %v5674_v41  ;;  %8448 = vmatprep.subr.bf16.mxu1 %v8726_v22  ;;  %v8729_v54 = vld [vmem:[#allocation14 + $0xc8] sm:$0xff]  }
0x1071   : > { %14184 = vst [vmem:[#allocation63_spill] sm:$0xff] %v12277_v25  ;;  %v12283_v10 = vpop.eup %9129  ;;  %v6124_v49 = vsub.f32 0.0, %v12130_v60  ;;  %v5677_v62 = vmul.f32 %v12255_v5, %v5613_v14  ;;  %v12288_v13 = vand.u32 2147483647, %v12277_v25  ;;  %v6265_v59 = vmul.f32 1.442695, %v6189_v17 }
0x1072   : > { %v6566_v36 = vsub.f32 0.0, %v14185_v0  ;;  %v12290_v2 = vpop.eup %9131  ;;  %v5551_v48 = vmul.f32 1.0614054, %v12283_v10  ;;  %9137 = vrcp.f32 %v5361_v11  ;;  %v5363_v8 = vadd.f32 1.0, %v5299_v3  ;;  %8010 = vmatpush3.bf16.msra.mxu0 %v8727_v26  ;;  %v8730_v17 = vld [vmem:[#allocation14 + $0x88] sm:$0xff]  }
0x1073   : > { %v9134_v55 = vpop.eup %9133  ;;  %v12293_v35 = vmul.f32 %v9128_v57, %v6057_v20  ;;  %v5740_v41 = vadd.f32 1.4214138, %v5676_v45  ;;  %v5741_v0 = vadd.f32 1.4214138, %v5677_v62  ;;  %v5550_v14 = vmul.f32 1.0614054, %v12290_v2  ;;  %8456 = vmatpush3.bf16.msra.mxu1 %v8728_v24  ;;  %8059 = vmatprep.subr.bf16.mxu0 %v12156_v38 }
0x1074   : > { %v6693_v16 = vadd.f32 1.0, %v6629_v9  ;;  %v12296_v25 = vmul.f32 %v9134_v55, %v6059_v47  ;;  %v5615_v19 = vadd.f32 -1.4531521, %v5551_v48  ;;  %v5298_v22 = vmul.f32 0.3275911, %v12288_v13  ;;  %8449 = vmatprep.subr.bf16.mxu1 %v8729_v54 }
0x1075   : > { %v12300_v11 = vmul.f32 %v12087_v56, %v5992_v7  ;;  %v5802_v3 = vmul.f32 %v12195_v53, %v5738_v46  ;;  %v5805_v57 = vmul.f32 %v12255_v5, %v5741_v0  ;;  %v5614_v45 = vadd.f32 -1.4531521, %v5550_v14  ;;  %v8731_v56 = vld [vmem:[#allocation14 + $0xc0] sm:$0xff]  }
0x1076   : > { %v14187_v9 = vsub.f32 1.0, %v12214_v40  ;;  %v6259_v47 = vmul.f32 1.442695, %v6186_v42  ;;  %v6188_v24 = vmul.f32 %v6124_v49, %v12130_v60  ;;  %v5679_v26 = vmul.f32 %v12283_v10, %v5615_v19  ;;  %v5032_v40 = vpop.f32.mrf.mxu1  ;;  %v8732_v42 = vld [vmem:[#allocation14 + $0x80] sm:$0xff]  }
0x1077   : > { %14186 = vst [vmem:[#allocation64_spill] sm:$0xff] %v12300_v11  ;;  %v6441_v7 = vsub.f32 1.0, %v12293_v35  ;;  %v5869_v46 = vadd.f32 -0.28449672, %v5805_v57  ;;  %v6127_v38 = vsub.f32 0.0, %v12169_v6  ;;  %9139 = vrcp.f32 %v5363_v8  ;;  %8457 = vmatpush3.bf16.msra.mxu1 %v8730_v17 }
0x1078   : > { %v6630_v20 = vsel %vm6502_vm11, %v6566_v36, %v14187_v9  ;;  %v12315_v62 = vpop.eup %9135  ;;  %v6443_v39 = vsub.f32 1.0, %v12296_v25  ;;  %v5804_v60 = vmul.f32 %v12236_v4, %v5740_v41  ;;  %9141 = vpow2.f32 %v6265_v59  ;;  %8450 = vmatprep.subr.bf16.mxu1 %v8731_v56 }
0x1079   : > { %v5362_v36 = vadd.f32 1.0, %v5298_v22  ;;  %v5866_v49 = vadd.f32 -0.28449672, %v5802_v3  ;;  %v5743_v48 = vadd.f32 1.4214138, %v5679_v26  ;;  %v5678_v54 = vmul.f32 %v12290_v2, %v5614_v45 }
0x107a   : > { %v6126_v55 = vsub.f32 0.0, %v12174_v44  ;;  %v6263_v35 = vmul.f32 1.442695, %v6188_v24  ;;  %v5933_v8 = vmul.f32 %v12255_v5, %v5869_v46  ;;  %v5552_v0 = vmul.f32 1.0614054, %v12315_v62 }
0x107b   : > { %v12324_v25 = vadd.f32 %v5032_v40, %v11943_v32  ;;  %v12327_v59 = vmul.f32 %v6693_v16, %v12064_v58  ;;  %v6694_v41 = vadd.f32 1.0, %v6630_v20  ;;  %9143 = vpow2.f32 %v6259_v47  ;;  %8458 = vmatpush3.bf16.msra.mxu1 %v8732_v42 }
0x107c   : > { %v6191_v14 = vmul.f32 %v6127_v38, %v12169_v6  ;;  %v6569_v19 = vsub.f32 0.0, %v6441_v7  ;;  %v6571_v22 = vsub.f32 0.0, %v6443_v39  ;;  %v5868_v17 = vadd.f32 -0.28449672, %v5804_v60 }
0x107d   : > { %14188 = vst [vmem:[#allocation65_spill] sm:$0xff] %v12327_v59  ;;  %9145 = vrcp.f32 %v5362_v36  ;;  %v5930_v3 = vmul.f32 %v12195_v53, %v5866_v49  ;;  %v5807_v57 = vmul.f32 %v12283_v10, %v5743_v48  ;;  %v5742_v45 = vadd.f32 1.4214138, %v5678_v54 }
0x107e   : > { %v6190_v9 = vmul.f32 %v6126_v55, %v12174_v44  ;;  %9147 = vpow2.f32 %v6263_v35  ;;  %v5997_v24 = vadd.f32 0.2548296, %v5933_v8  ;;  %v5616_v16 = vadd.f32 -1.4531521, %v5552_v0 }
0x107f   : > { %v12334_v58 = vmul.f32 0.70710677, %v12324_v25  ;;  %v12336_v20 = vpop.eup %9137  ;;  %v12341_v47 = vmul.f32 %v6694_v41, %v12074_v61  ;;  %v12344_v26 = vmul.f32 0.5, %v12096_v29  ;;  %v6269_v56 = vmul.f32 1.442695, %v6191_v14 }
0x1080   : > { %v6633_v44 = vsel %vm6505_vm12, %v6569_v19, %v6441_v7  ;;  %v6635_v46 = vsel %vm6507_vm13, %v6571_v22, %v6443_v39  ;;  %v5932_v38 = vmul.f32 %v12236_v4, %v5868_v17  ;;  %v12352_v40 = vmul.f32 0.5, %v12122_v23 }
0x1081   : > { %v5994_v60 = vadd.f32 0.2548296, %v5930_v3  ;;  %v5871_v36 = vadd.f32 -0.28449672, %v5807_v57  ;;  %v5806_v61 = vmul.f32 %v12290_v2, %v5742_v45  ;;  %v6267_v42 = vmul.f32 1.442695, %v6190_v9 }
0x1082   : > { %v6061_v29 = vmul.f32 %v12255_v5, %v5997_v24  ;;  %v5680_v49 = vmul.f32 %v12315_v62, %v5616_v16  ;;  %v5553_v34 = vmul.f32 1.0614054, %v12336_v20  ;;  %v12359_v7 = vand.u32 2147483647, %v12334_v58 }
0x1083   : > { %v12362_v51 = vmul.f32 0.5, %v12141_v1  ;;  %9149 = vpow2.f32 %v6269_v56  ;;  %v12365_v23 = vmul.f32 0.5, %v12150_v21  ;;  %v6128_v39 = vsub.f32 0.0, %v12218_v12 }
0x1084   : > { %v12368_v48 = vpop.eup %9139  ;;  %v6697_v54 = vadd.f32 1.0, %v6633_v44  ;;  %v6699_v5 = vadd.f32 1.0, %v6635_v46  ;;  %v5996_v55 = vadd.f32 0.2548296, %v5932_v38  ;;  %v5300_v35 = vmul.f32 0.3275911, %v12359_v7  ;;  %v4921_v44 = vpop.f32.mrf.mxu0 }
0x1085   : > { %v9142_v8 = vpop.eup %9141  ;;  %v5935_v0 = vmul.f32 %v12283_v10, %v5871_v36  ;;  %v5870_v41 = vadd.f32 -0.28449672, %v5806_v61  ;;  %9151 = vpow2.f32 %v6267_v42  ;;  %v6129_v1 = vsub.f32 0.0, %v12247_v27 }
0x1086   : > { %v6058_v14 = vmul.f32 %v12195_v53, %v5994_v60  ;;  %v6381_v21 = vmul.f32 %v9142_v8, %v6061_v29  ;;  %v5744_v19 = vadd.f32 1.4214138, %v5680_v49  ;;  %v5617_v22 = vadd.f32 -1.4531521, %v5553_v34 }
0x1087   : > { %v6192_v17 = vmul.f32 %v6128_v39, %v12218_v12  ;;  %v5555_v3 = vmul.f32 1.0614054, %v12368_v48  ;;  %v6131_v57 = vsub.f32 0.0, %v12250_v31  ;;  %v5364_v45 = vadd.f32 1.0, %v5300_v35 }
0x1088   : > { %v9144_v9 = vpop.eup %9143  ;;  %v12378_v24 = vmul.f32 %v6697_v54, %v12115_v15  ;;  %v12381_v16 = vmul.f32 %v6699_v5, %v12190_v63  ;;  %v6060_v56 = vmul.f32 %v12236_v4, %v5996_v55  ;;  %v12385_v53 = vmul.f32 0.5, %v12180_v18 }
0x1089   : > { %vm6509_vm14 = vcmp.lt.f32.partialorder %v12134_v33, 0.0  ;;  %v5999_v12 = vadd.f32 0.2548296, %v5935_v0  ;;  %v5934_v38 = vmul.f32 %v12290_v2, %v5870_v41  ;;  %v6193_v60 = vmul.f32 %v6129_v1, %v12247_v27  ;;  %v4923_v33 = vpop.f32.mrf.mxu0 }
0x108a   : > { %14189 = vst [vmem:[#allocation66_spill] sm:$0xff] %v12378_v24  ;;  %v12387_v46 = vpop.eup %9145  ;;  %9153 = vrcp.f32 %v5364_v45  ;;  %v6378_v15 = vmul.f32 %v9144_v9, %v6058_v14  ;;  %v6445_v36 = vsub.f32 1.0, %v6381_v21  ;;  %v5808_v63 = vmul.f32 %v12315_v62, %v5744_v19 }
0x108b   : > { %v5681_v4 = vmul.f32 %v12336_v20, %v5617_v22  ;;  %v9148_v61 = vpop.eup %9147  ;;  %v6271_v18 = vmul.f32 1.442695, %v6192_v17  ;;  %v5619_v42 = vadd.f32 -1.4531521, %v5555_v3  ;;  %v6195_v29 = vmul.f32 %v6131_v57, %v12250_v31  ;;  %v5034_v31 = vpop.f32.mrf.mxu1  ;;  %v14190_v3 = vld [vmem:[#allocation44_spill] sm:$0xff] }
0x108c   : > { %v12396_v49 = vadd.f32 %v4921_v44, %v11922_v37  ;;  %v6380_v34 = vmul.f32 %v9148_v61, %v6060_v56  ;;  %v12399_v39 = vmul.f32 0.5, %v12221_v52  ;;  %v5554_v27 = vmul.f32 1.0614054, %v12387_v46 }
0x108d   : > { %v6130_v54 = vsub.f32 0.0, %v12288_v13  ;;  %v6063_v5 = vmul.f32 %v12283_v10, %v5999_v12  ;;  %v5998_v55 = vadd.f32 0.2548296, %v5934_v38  ;;  %v6273_v35 = vmul.f32 1.442695, %v6193_v60 }
0x108e   : > { %v12406_v8 = vmul.f32 0.5, %v12224_v50  ;;  %v6442_v0 = vsub.f32 1.0, %v6378_v15  ;;  %v6573_v41 = vsub.f32 0.0, %v6445_v36  ;;  %v5872_v1 = vadd.f32 -0.28449672, %v5808_v63  ;;  %v14191_v63 = vld [vmem:[#allocation60_spill] sm:$0xff] }
0x108f   : > { %v5745_v14 = vadd.f32 1.4214138, %v5681_v4  ;;  %vm6508_vm0 = vcmp.lt.f32.partialorder %v12119_v43, 0.0  ;;  %9155 = vpow2.f32 %v6271_v18  ;;  %v5683_v52 = vmul.f32 %v12368_v48, %v5619_v42 }
0x1090   : > { %v6277_v21 = vmul.f32 1.442695, %v6195_v29  ;;  %v12411_v19 = vmul.f32 0.70710677, %v12396_v49  ;;  %v9150_v10 = vpop.eup %9149  ;;  %v6444_v22 = vsub.f32 1.0, %v6380_v34  ;;  %v6194_v50 = vmul.f32 %v6130_v54, %v12288_v13 }
0x1091   : > { %v5618_v17 = vadd.f32 -1.4531521, %v5554_v27  ;;  %v12415_v57 = vadd.f32 %v5034_v31, %v14190_v3  ;;  %v12417_v45 = vmul.f32 %v9150_v10, %v6063_v5  ;;  %v6062_v9 = vmul.f32 %v12290_v2, %v5998_v55  ;;  %v14192_v27 = vld [vmem:[#allocation52_spill] sm:$0xff] }
0x1092   : > { %9157 = vpow2.f32 %v6273_v35  ;;  %v12421_v56 = vand.u32 2147483647, %v12411_v19  ;;  %v9152_v44 = vpop.eup %9151  ;;  %v6570_v12 = vsub.f32 0.0, %v6442_v0  ;;  %v6637_v38 = vsel %vm6509_vm14, %v6573_v41, %v6445_v36 }
0x1093   : > { %v5936_v60 = vmul.f32 %v12315_v62, %v5872_v1  ;;  %v5809_v13 = vmul.f32 %v12336_v20, %v5745_v14  ;;  %v5747_v15 = vadd.f32 1.4214138, %v5683_v52  ;;  %9159 = vpow2.f32 %v6277_v21  ;;  %v14193_v21 = vld [vmem:[#allocation45_spill] sm:$0xff] }
0x1094   : > { %v12428_v4 = vmul.f32 0.5, %v14191_v63  ;;  %v5301_v2 = vmul.f32 0.3275911, %v12421_v56  ;;  %v6572_v61 = vsub.f32 0.0, %v6444_v22  ;;  %v5682_v18 = vmul.f32 %v12387_v46, %v5618_v17 }
0x1095   : > { %v6275_v42 = vmul.f32 1.442695, %v6194_v50  ;;  %v12433_v29 = vmul.f32 0.70710677, %v12415_v57  ;;  %v6701_v36 = vadd.f32 1.0, %v6637_v38  ;;  %v6447_v34 = vsub.f32 1.0, %v12417_v45  ;;  %v5036_v38 = vpop.f32.mrf.mxu1 }
0x1096   : > { %vm6511_vm1 = vcmp.lt.f32.partialorder %v14192_v27, 0.0  ;;  %v6382_v54 = vmul.f32 %v9152_v44, %v6062_v9  ;;  %v5365_v5 = vadd.f32 1.0, %v5301_v2  ;;  %v6634_v35 = vsel %vm6506_vm15, %v6570_v12, %v6442_v0  ;;  %v14194_v50 = vld [vmem:[#allocation53_spill] sm:$0xff] }
0x1097   : > { %v12437_v55 = vpop.eup %9153  ;;  %v6000_v31 = vadd.f32 0.2548296, %v5936_v60  ;;  %v5873_v41 = vadd.f32 -0.28449672, %v5809_v13  ;;  %v12442_v1 = vand.u32 2147483647, %v12433_v29  ;;  %v5811_v14 = vmul.f32 %v12368_v48, %v5747_v15  ;;  %v4927_v60 = vpop.f32.mrf.mxu0 }
0x1098   : > { %v5556_v52 = vmul.f32 1.0614054, %v12437_v55  ;;  %9161 = vrcp.f32 %v5365_v5  ;;  %v12447_v10 = vadd.f32 %v4923_v33, %v14193_v21  ;;  %v6636_v17 = vsel %vm6508_vm0, %v6572_v61, %v6444_v22 }
0x1099   : > { %vm6510_vm2 = vcmp.lt.f32.partialorder %v14194_v50, 0.0  ;;  %v5746_v28 = vadd.f32 1.4214138, %v5682_v18  ;;  %9163 = vpow2.f32 %v6275_v42  ;;  %v5303_v0 = vmul.f32 0.3275911, %v12442_v1 }
0x109a   : > { %v6698_v45 = vadd.f32 1.0, %v6634_v35  ;;  %v6446_v9 = vsub.f32 1.0, %v6382_v54  ;;  %v12454_v44 = vmul.f32 0.5, %v12324_v25  ;;  %v5620_v12 = vadd.f32 -1.4531521, %v5556_v52  ;;  %v14196_v54 = vld [vmem:[#allocation54_spill] sm:$0xff] }
0x109b   : > { %v6575_v13 = vsub.f32 0.0, %v6447_v34  ;;  %v6064_v15 = vmul.f32 %v12315_v62, %v6000_v31  ;;  %v5937_v43 = vmul.f32 %v12336_v20, %v5873_v41  ;;  %v5367_v22 = vadd.f32 1.0, %v5303_v0 }
0x109c   : > { %v6700_v63 = vadd.f32 1.0, %v6636_v17  ;;  %v12459_v2 = vmul.f32 %v6701_v36, %v12352_v40  ;;  %v5875_v61 = vadd.f32 -0.28449672, %v5811_v14  ;;  %v12462_v18 = vmul.f32 0.70710677, %v12447_v10  ;;  %v9156_v42 = vpop.eup %9155 }
0x109d   : > { %v5810_v25 = vmul.f32 %v12387_v46, %v5746_v28  ;;  %9165 = vrcp.f32 %v5367_v22  ;;  %v12466_v33 = vadd.f32 %v5036_v38, %v11943_v32  ;;  %v12469_v62 = vadd.f32 %v4927_v60, %v11922_v37 }
0x109e   : > { %14195 = vst [vmem:[#allocation44_spill] sm:$0xff] %v12459_v2  ;;  %v12472_v5 = vmul.f32 %v6698_v45, %v14196_v54  ;;  %v6574_v35 = vsub.f32 0.0, %v6446_v9  ;;  %v5684_v40 = vmul.f32 %v12437_v55, %v5620_v12  ;;  %v12476_v36 = vand.u32 2147483647, %v12462_v18 }
0x109f   : > { %v9158_v31 = vpop.eup %9157  ;;  %v6639_v41 = vsel %vm6511_vm1, %v6575_v13, %v6447_v34  ;;  %v12480_v14 = vmul.f32 %v9156_v42, %v6064_v15  ;;  %v6001_v52 = vadd.f32 0.2548296, %v5937_v43  ;;  %v12483_v17 = vmul.f32 0.70710677, %v12466_v33  ;;  %v5040_v15 = vpop.f32.mrf.mxu1 }
0x10a0   : > { %v12486_v28 = vmul.f32 %v6700_v63, %v12344_v26  ;;  %v5939_v0 = vmul.f32 %v12368_v48, %v5875_v61  ;;  %v6132_v45 = vsub.f32 0.0, %v12359_v7  ;;  %v5302_v12 = vmul.f32 0.3275911, %v12476_v36  ;;  %v9160_v38 = vpop.eup %9159 }
0x10a1   : > { %v5874_v34 = vadd.f32 -0.28449672, %v5810_v25  ;;  %v12494_v60 = vand.u32 2147483647, %v12483_v17  ;;  %v12497_v13 = vmul.f32 0.70710677, %v12469_v62  ;;  %v6638_v43 = vsel %vm6510_vm2, %v6574_v35, %v6446_v9 }
0x10a2   : > { %14197 = vst [vmem:[#allocation60_spill] sm:$0xff] %v12486_v28  ;;  %v6703_v26 = vadd.f32 1.0, %v6639_v41  ;;  %v5748_v22 = vadd.f32 1.4214138, %v5684_v40  ;;  %v5366_v63 = vadd.f32 1.0, %v5302_v12  ;;  %v6448_v61 = vsub.f32 1.0, %v12480_v14  ;;  %v4929_v12 = vpop.f32.mrf.mxu0 }
0x10a3   : > { %14198 = vst [vmem:[#allocation52_spill] sm:$0xff] %v12497_v13  ;;  %v6065_v42 = vmul.f32 %v12336_v20, %v6001_v52  ;;  %v5304_v54 = vmul.f32 0.3275911, %v12494_v60  ;;  %v12505_v25 = vand.u32 2147483647, %v12497_v13  ;;  %v6196_v6 = vmul.f32 %v6132_v45, %v12359_v7 }
0x10a4   : > { %v6003_v27 = vadd.f32 0.2548296, %v5939_v0  ;;  %9167 = vrcp.f32 %v5366_v63  ;;  %v12509_v41 = vadd.f32 %v5040_v15, %v14190_v3  ;;  %v6702_v9 = vadd.f32 1.0, %v6638_v43  ;;  %v14199_v15 = vld [vmem:[#allocation56_spill] sm:$0xff] }
0x10a5   : > { %v12511_v50 = vpop.eup %9161  ;;  %v5938_v35 = vmul.f32 %v12387_v46, %v5874_v34  ;;  %v5368_v40 = vadd.f32 1.0, %v5304_v54  ;;  %v5305_v20 = vmul.f32 0.3275911, %v12505_v25  ;;  %v12516_v52 = vmul.f32 %v6703_v26, %v12362_v51  ;;  %v5042_v26 = vpop.f32.mrf.mxu1 }
0x10a6   : > { %v9164_v14 = vpop.eup %9163  ;;  %v5812_v0 = vmul.f32 %v12437_v55, %v5748_v22  ;;  %v12520_v7 = vmul.f32 0.5, %v12396_v49  ;;  %v5557_v45 = vmul.f32 1.0614054, %v12511_v50  ;;  %vm6512_vm3 = vcmp.lt.f32.partialorder %v14199_v15, 0.0  ;;  %v4931_v15 = vpop.f32.mrf.mxu0 }
0x10a7   : > { %v6576_v43 = vsub.f32 0.0, %v6448_v61  ;;  %v6385_v63 = vmul.f32 %v9158_v31, %v6065_v42  ;;  %9169 = vrcp.f32 %v5368_v40  ;;  %v5369_v34 = vadd.f32 1.0, %v5305_v20 }
0x10a8   : > { %v6067_v54 = vmul.f32 %v12368_v48, %v6003_v27  ;;  %v6279_v11 = vmul.f32 1.442695, %v6196_v6  ;;  %v5621_v24 = vadd.f32 -1.4531521, %v5557_v45  ;;  %v12526_v51 = vmul.f32 0.70710677, %v12509_v41 }
0x10a9   : > { %v6002_v22 = vadd.f32 0.2548296, %v5938_v35  ;;  %v6133_v49 = vsub.f32 0.0, %v12421_v56  ;;  %v6135_v2 = vsub.f32 0.0, %v12442_v1  ;;  %v12531_v13 = vadd.f32 %v4929_v12, %v14193_v21  ;;  %v14201_v27 = vld [vmem:[#allocation57_spill] sm:$0xff] }
0x10aa   : > { %14200 = vst [vmem:[#allocation45_spill] sm:$0xff] %v12526_v51  ;;  %v12533_v28 = vpop.eup %9165  ;;  %v5876_v31 = vadd.f32 -0.28449672, %v5812_v0  ;;  %v5685_v42 = vmul.f32 %v12511_v50, %v5621_v24  ;;  %9171 = vrcp.f32 %v5369_v34  ;;  %v12537_v6 = vand.u32 2147483647, %v12526_v51 }
0x10ab   : > { %v6449_v48 = vsub.f32 1.0, %v6385_v63  ;;  %vm6513_vm4 = vcmp.lt.f32.partialorder %v14201_v27, 0.0  ;;  %v5559_v35 = vmul.f32 1.0614054, %v12533_v28  ;;  %v6136_v40 = vsub.f32 0.0, %v12494_v60 }
0x10ac   : > { %v12543_v20 = vadd.f32 %v5042_v26, %v11943_v32  ;;  %v12545_v45 = vmul.f32 %v9160_v38, %v6067_v54  ;;  %9173 = vpow2.f32 %v6279_v11  ;;  %v5749_v0 = vadd.f32 1.4214138, %v5685_v42 }
0x10ad   : > { %v5307_v24 = vmul.f32 0.3275911, %v12537_v6  ;;  %v6066_v12 = vmul.f32 %v12387_v46, %v6002_v22  ;;  %v6197_v34 = vmul.f32 %v6133_v49, %v12421_v56  ;;  %v5623_v63 = vadd.f32 -1.4531521, %v5559_v35 }
0x10ae   : > { %v12551_v51 = vmul.f32 0.70710677, %v12531_v13  ;;  %v5940_v30 = vmul.f32 %v12437_v55, %v5876_v31  ;;  %v6199_v59 = vmul.f32 %v6135_v2, %v12442_v1  ;;  %v6134_v26 = vsub.f32 0.0, %v12476_v36  ;;  %v14205_v31 = vld [vmem:[#allocation58_spill] sm:$0xff] }
0x10af   : > { %v5371_v38 = vadd.f32 1.0, %v5307_v24  ;;  %v5687_v11 = vmul.f32 %v12533_v28, %v5623_v63  ;;  %v6200_v54 = vmul.f32 %v6136_v40, %v12494_v60  ;;  %v12562_v46 = vmul.f32 0.70710677, %v12543_v20 }
0x10b0   : > { %14202 = vst [vmem:[#allocation53_spill] sm:$0xff] %v12551_v51  ;;  %v12559_v42 = vand.u32 2147483647, %v12551_v51  ;;  %v12565_v56 = vmul.f32 %v6702_v9, %v12365_v23  ;;  %v12569_v22 = vsel %vm6512_vm3, %v6576_v43, %v6448_v61  ;;  %v6577_v1 = vsub.f32 0.0, %v6449_v48 }
0x10b1   : > { %14203 = vst [vmem:[#allocation54_spill] sm:$0xff] %v12562_v46  ;;  %v5813_v2 = vmul.f32 %v12511_v50, %v5749_v0  ;;  %v12572_v49 = vpop.eup %9167  ;;  %v6451_v60 = vsub.f32 1.0, %v12545_v45  ;;  %vm6515_vm5 = vcmp.lt.f32.partialorder %v14205_v31, 0.0  ;;  %v12576_v35 = vmul.f32 %v9164_v14, %v6066_v12 }
0x10b2   : > { %14204 = vst [vmem:[#allocation56_spill] sm:$0xff] %v12565_v56  ;;  %v6281_v40 = vmul.f32 1.442695, %v6197_v34  ;;  %v5751_v24 = vadd.f32 1.4214138, %v5687_v11  ;;  %9175 = vrcp.f32 %v5371_v38  ;;  %v6198_v63 = vmul.f32 %v6134_v26, %v12476_v36 }
0x10b3   : > { %v5558_v23 = vmul.f32 1.0614054, %v12572_v49  ;;  %v5306_v9 = vmul.f32 0.3275911, %v12559_v42  ;;  %v12581_v61 = vand.u32 2147483647, %v12562_v46  ;;  %v6641_v14 = vsel %vm6513_vm4, %v6577_v1, %v6449_v48 }
0x10b4   : > { %v6004_v43 = vadd.f32 0.2548296, %v5940_v30  ;;  %v6285_v0 = vmul.f32 1.442695, %v6199_v59  ;;  %v6287_v45 = vmul.f32 1.442695, %v6200_v54  ;;  %v12584_v51 = vpop.eup %9169  ;;  %v5815_v56 = vmul.f32 %v12533_v28, %v5751_v24 }
0x10b5   : > { %v5877_v12 = vadd.f32 -0.28449672, %v5813_v2  ;;  %v5622_v34 = vadd.f32 -1.4531521, %v5558_v23  ;;  %v5308_v38 = vmul.f32 0.3275911, %v12581_v61  ;;  %v12592_v30 = vadd.f32 %v4931_v15, %v11922_v37 }
0x10b6   : > { %v6579_v11 = vsub.f32 0.0, %v6451_v60  ;;  %v5560_v46 = vmul.f32 1.0614054, %v12584_v51  ;;  %v6450_v59 = vsub.f32 1.0, %v12576_v35  ;;  %9177 = vpow2.f32 %v6281_v40  ;;  %v14206_v48 = vld [vmem:[#allocation63_spill] sm:$0xff] }
0x10b7   : > { %v5686_v36 = vmul.f32 %v12572_v49, %v5622_v34  ;;  %v5370_v26 = vadd.f32 1.0, %v5306_v9  ;;  %v12596_v27 = vpop.eup %9171  ;;  %vm6514_vm6 = vcmp.lt.f32.partialorder %v14206_v48, 0.0  ;;  %9179 = vpow2.f32 %v6285_v0 }
0x10b8   : > { %v6283_v54 = vmul.f32 1.442695, %v6198_v63  ;;  %v5624_v1 = vadd.f32 -1.4531521, %v5560_v46  ;;  %v5372_v2 = vadd.f32 1.0, %v5308_v38  ;;  %v6068_v24 = vmul.f32 %v12437_v55, %v6004_v43 }
0x10b9   : > { %v5941_v23 = vmul.f32 %v12511_v50, %v5877_v12  ;;  %v5750_v15 = vadd.f32 1.4214138, %v5686_v36  ;;  %9181 = vpow2.f32 %v6287_v45  ;;  %v9174_v37 = vpop.eup %9173  ;;  %v5879_v35 = vadd.f32 -0.28449672, %v5815_v56 }
0x10ba   : > { %v5688_v40 = vmul.f32 %v12584_v51, %v5624_v1  ;;  %v5561_v9 = vmul.f32 1.0614054, %v12596_v27  ;;  %v12604_v34 = vmul.f32 0.70710677, %v12592_v30  ;;  %v6643_v0 = vsel %vm6515_vm5, %v6579_v11, %v6451_v60 }
0x10bb   : > { %v6578_v46 = vsub.f32 0.0, %v6450_v59  ;;  %v5814_v63 = vmul.f32 %v12572_v49, %v5750_v15  ;;  %9183 = vrcp.f32 %v5370_v26  ;;  %v6137_v43 = vsub.f32 0.0, %v12505_v25 }
0x10bc   : > { %v5752_v55 = vadd.f32 1.4214138, %v5688_v40  ;;  %9185 = vrcp.f32 %v5372_v2  ;;  %v12611_v56 = vand.u32 2147483647, %v12604_v34  ;;  %v12613_v45 = vmul.f32 %v9174_v37, %v6068_v24  ;;  %v5044_v40 = vpop.f32.mrf.mxu1 }
0x10bd   : > { %v6005_v12 = vadd.f32 0.2548296, %v5941_v23  ;;  %v5878_v38 = vadd.f32 -0.28449672, %v5814_v63  ;;  %9187 = vpow2.f32 %v6283_v54  ;;  %v5943_v36 = vmul.f32 %v12533_v28, %v5879_v35 }
0x10be   : > { %v5816_v60 = vmul.f32 %v12584_v51, %v5752_v55  ;;  %v5625_v31 = vadd.f32 -1.4531521, %v5561_v9  ;;  %v5309_v11 = vmul.f32 0.3275911, %v12611_v56  ;;  %v6823_v26 = vpack.c.bf16 %v12516_v52, %v12381_v16  ;;  %v9360_v52 = vld [vmem:[#allocation14 + $0xe8] sm:$0xff]  }
0x10bf   : > { %v6704_v1 = vadd.f32 1.0, %v12569_v22  ;;  %v6705_v2 = vadd.f32 1.0, %v6641_v14  ;;  %v12622_v15 = vmul.f32 0.5, %v12415_v57  ;;  %v12624_v37 = vpop.eup %9175  ;;  %v6707_v24 = vadd.f32 1.0, %v6643_v0 }
0x10c0   : > { %v5942_v54 = vmul.f32 %v12572_v49, %v5878_v38  ;;  %v5880_v23 = vadd.f32 -0.28449672, %v5816_v60  ;;  %v5373_v35 = vadd.f32 1.0, %v5309_v11  ;;  %v6642_v9 = vsel %vm6514_vm6, %v6578_v46, %v6450_v59 }
0x10c1   : > { %v6452_v63 = vsub.f32 1.0, %v12613_v45  ;;  %vm6516_vm7 = vcmp.lt.f32.partialorder %v12334_v58, 0.0  ;;  %v6069_v22 = vmul.f32 %v12511_v50, %v6005_v12  ;;  %v6201_v57 = vmul.f32 %v6137_v43, %v12505_v25 }
0x10c2   : > { %v6007_v14 = vadd.f32 0.2548296, %v5943_v36  ;;  %v5944_v55 = vmul.f32 %v12584_v51, %v5880_v23  ;;  %v5689_v0 = vmul.f32 %v12596_v27, %v5625_v31  ;;  %9189 = vrcp.f32 %v5373_v35 }
0x10c3   : > { %v12636_v38 = vmul.f32 %v6704_v1, %v12385_v53  ;;  %v5563_v48 = vmul.f32 1.0614054, %v12624_v37  ;;  %v6139_v59 = vsub.f32 0.0, %v12537_v6  ;;  %v12641_v46 = vadd.f32 %v5044_v40, %v14190_v3  ;;  %v9178_v45 = vpop.eup %9177 }
0x10c4   : > { %v12644_v50 = vmul.f32 %v6705_v2, %v12399_v39  ;;  %v6706_v25 = vadd.f32 1.0, %v6642_v9  ;;  %v6006_v43 = vadd.f32 0.2548296, %v5942_v54  ;;  %v6008_v12 = vadd.f32 0.2548296, %v5944_v55  ;;  %v9180_v36 = vpop.eup %9179 }
0x10c5   : > { %v12647_v60 = vmul.f32 %v6707_v24, %v12406_v8  ;;  %v6389_v53 = vmul.f32 %v9178_v45, %v6069_v22  ;;  %v12650_v31 = vmul.f32 0.5, %v12447_v10  ;;  %v6289_v11 = vmul.f32 1.442695, %v6201_v57 }
0x10c6   : > { %v9182_v1 = vpop.eup %9181  ;;  %v6580_v23 = vsub.f32 0.0, %v6452_v63  ;;  %v6071_v35 = vmul.f32 %v12533_v28, %v6007_v14  ;;  %v6072_v40 = vmul.f32 %v12584_v51, %v6008_v12  ;;  %v5753_v39 = vadd.f32 1.4214138, %v5689_v0 }
0x10c7   : > { %v12655_v2 = vmul.f32 0.5, %v12466_v33  ;;  %v5627_v54 = vadd.f32 -1.4531521, %v5563_v48  ;;  %v6203_v9 = vmul.f32 %v6139_v59, %v12537_v6  ;;  %v12659_v8 = vmul.f32 0.70710677, %v12641_v46 }
0x10c8   : > { %v12661_v24 = vpop.eup %9183  ;;  %v12664_v10 = vmul.f32 %v6706_v25, %v12428_v4  ;;  %vm6517_vm8 = vcmp.lt.f32.partialorder %v12411_v19, 0.0  ;;  %v6070_v28 = vmul.f32 %v12572_v49, %v6006_v43  ;;  %v12669_v51 = vmul.f32 0.5, %v12469_v62 }
0x10c9   : > { %v12672_v33 = vmul.f32 0.5, %v12509_v41  ;;  %v12674_v22 = vpop.eup %9185  ;;  %v6453_v6 = vsub.f32 1.0, %v6389_v53  ;;  %9191 = vpow2.f32 %v6289_v11  ;;  %v12677_v57 = vmul.f32 0.5, %v12531_v13 }
0x10ca   : > { %v6138_v4 = vsub.f32 0.0, %v12559_v42  ;;  %v9188_v14 = vpop.eup %9187  ;;  %v6644_v55 = vsel %vm6516_vm7, %v6580_v23, %v6452_v63  ;;  %v6391_v49 = vmul.f32 %v9180_v36, %v6071_v35  ;;  %v6392_v0 = vmul.f32 %v9182_v1, %v6072_v40 }
0x10cb   : > { %v5817_v62 = vmul.f32 %v12596_v27, %v5753_v39  ;;  %v5691_v41 = vmul.f32 %v12624_v37, %v5627_v54  ;;  %v6293_v48 = vmul.f32 1.442695, %v6203_v9  ;;  %v5562_v59 = vmul.f32 1.0614054, %v12661_v24 }
0x10cc   : > { %v12686_v45 = vand.u32 2147483647, %v12659_v8  ;;  %v6390_v13 = vmul.f32 %v9188_v14, %v6070_v28  ;;  %v12689_v25 = vmul.f32 0.5, %v12543_v20  ;;  %v5564_v43 = vmul.f32 1.0614054, %v12674_v22  ;;  %v5046_v14 = vpop.f32.mrf.mxu1 }
0x10cd   : > { %v6140_v58 = vsub.f32 0.0, %v12581_v61  ;;  %v6581_v63 = vsub.f32 0.0, %v6453_v6  ;;  %vm6520_vm9 = vcmp.lt.f32.partialorder %v12483_v17, 0.0  ;;  %v6202_v12 = vmul.f32 %v6138_v4, %v12559_v42  ;;  %v4933_v42 = vpop.f32.mrf.mxu0 }
0x10ce   : > { %v12696_v36 = vmul.f32 0.5, %v12592_v30  ;;  %v5311_v53 = vmul.f32 0.3275911, %v12686_v45  ;;  %v6708_v11 = vadd.f32 1.0, %v6644_v55  ;;  %v6455_v1 = vsub.f32 1.0, %v6391_v49 }
0x10cf   : > { %vm6519_vm10 = vcmp.lt.f32.partialorder %v12433_v29, 0.0  ;;  %v6456_v20 = vsub.f32 1.0, %v6392_v0  ;;  %v5881_v23 = vadd.f32 -0.28449672, %v5817_v62  ;;  %v12700_v35 = vpop.eup %9189  ;;  %vm6518_vm11 = vcmp.lt.f32.partialorder %v12462_v18, 0.0 }
0x10d0   : > { %v5755_v40 = vadd.f32 1.4214138, %v5691_v41  ;;  %9193 = vpow2.f32 %v6293_v48  ;;  %v5626_v39 = vadd.f32 -1.4531521, %v5562_v59  ;;  %v5375_v54 = vadd.f32 1.0, %v5311_v53 }
0x10d1   : > { %v6454_v9 = vsub.f32 1.0, %v6390_v13  ;;  %v5628_v30 = vadd.f32 -1.4531521, %v5564_v43  ;;  %v6204_v28 = vmul.f32 %v6140_v58, %v12581_v61  ;;  %v5565_v4 = vmul.f32 1.0614054, %v12700_v35 }
0x10d2   : > { %v6645_v55 = vsel %vm6517_vm8, %v6581_v63, %v6453_v6  ;;  %v6291_v49 = vmul.f32 1.442695, %v6202_v12  ;;  %v6141_v0 = vsub.f32 0.0, %v12611_v56  ;;  %9195 = vrcp.f32 %v5375_v54 }
0x10d3   : > { %v6583_v62 = vsub.f32 0.0, %v6455_v1  ;;  %v6584_v41 = vsub.f32 0.0, %v6456_v20  ;;  %v5945_v48 = vmul.f32 %v12596_v27, %v5881_v23  ;;  %v12710_v59 = vadd.f32 %v4933_v42, %v14193_v21 }
0x10d4   : > { %v5819_v13 = vmul.f32 %v12624_v37, %v5755_v40  ;;  %v5690_v61 = vmul.f32 %v12661_v24, %v5626_v39  ;;  %v5629_v43 = vadd.f32 -1.4531521, %v5565_v4  ;;  %v12715_v58 = vadd.f32 %v5046_v14, %v11943_v32 }
0x10d5   : > { %v12718_v19 = vmul.f32 %v6708_v11, %v12454_v44  ;;  %v6582_v6 = vsub.f32 0.0, %v6454_v9  ;;  %v5692_v63 = vmul.f32 %v12674_v22, %v5628_v30  ;;  %v6295_v12 = vmul.f32 1.442695, %v6204_v28 }
0x10d6   : > { %v6709_v53 = vadd.f32 1.0, %v6645_v55  ;;  %9197 = vpow2.f32 %v6291_v49  ;;  %v5693_v23 = vmul.f32 %v12700_v35, %v5629_v43  ;;  %v12723_v54 = vmul.f32 0.70710677, %v12710_v59  ;;  %v9192_v40 = vpop.eup %9191  ;;  %v4937_v43 = vpop.f32.mrf.mxu0 }
0x10d7   : > { %v6648_v39 = vsel %vm6520_vm9, %v6584_v41, %v6456_v20  ;;  %v6009_v42 = vadd.f32 0.2548296, %v5945_v48  ;;  %v6205_v4 = vmul.f32 %v6141_v0, %v12611_v56  ;;  %v12729_v44 = vmul.f32 0.70710677, %v12715_v58 }
0x10d8   : > { %v6647_v11 = vsel %vm6519_vm10, %v6583_v62, %v6455_v1  ;;  %v5883_v30 = vadd.f32 -0.28449672, %v5819_v13  ;;  %v5754_v28 = vadd.f32 1.4214138, %v5690_v61  ;;  %v12734_v14 = vand.u32 2147483647, %v12723_v54 }
0x10d9   : > { %v6646_v55 = vsel %vm6518_vm11, %v6582_v6, %v6454_v9  ;;  %v5756_v49 = vadd.f32 1.4214138, %v5692_v63  ;;  %9199 = vpow2.f32 %v6295_v12  ;;  %v12739_v17 = vand.u32 2147483647, %v12729_v44 }
0x10da   : > { %v6712_v56 = vadd.f32 1.0, %v6648_v39  ;;  %v5757_v20 = vadd.f32 1.4214138, %v5693_v23  ;;  %v6143_v0 = vsub.f32 0.0, %v12686_v45  ;;  %v5310_v29 = vmul.f32 0.3275911, %v12734_v14 }
0x10db   : > { %v12744_v1 = vmul.f32 %v6709_v53, %v12520_v7  ;;  %v6711_v62 = vadd.f32 1.0, %v6647_v11  ;;  %v6297_v41 = vmul.f32 1.442695, %v6205_v4  ;;  %v5312_v48 = vmul.f32 0.3275911, %v12739_v17  ;;  %v14207_v7 = vld [vmem:[#allocation62_spill] sm:$0xff] }
0x10dc   : > { %v6073_v18 = vmul.f32 %v12596_v27, %v6009_v42  ;;  %v5947_v9 = vmul.f32 %v12624_v37, %v5883_v30  ;;  %v5818_v13 = vmul.f32 %v12661_v24, %v5754_v28  ;;  %v5374_v61 = vadd.f32 1.0, %v5310_v29  ;;  %v14208_v28 = vld [vmem:[#allocation56_spill] sm:$0xff]  ;;  %v4939_v29 = vpop.f32.mrf.mxu0 }
0x10dd   : > { %v12750_v6 = vpop.eup %9193  ;;  %v6710_v63 = vadd.f32 1.0, %v6646_v55  ;;  %v5820_v12 = vmul.f32 %v12674_v22, %v5756_v49  ;;  %v5376_v23 = vadd.f32 1.0, %v5312_v48  ;;  %v6818_v53 = vpack.c.bf16 %v12341_v47, %v14207_v7  ;;  %v14209_v49 = vld [vmem:[#allocation65_spill] sm:$0xff] }
0x10de   : > { %v6776_v39 = vmul.f32 %v6712_v56, %v12655_v2  ;;  %v5821_v4 = vmul.f32 %v12700_v35, %v5757_v20  ;;  %v6207_v27 = vmul.f32 %v6143_v0, %v12686_v45  ;;  %9201 = vrcp.f32 %v5374_v61  ;;  %v14210_v56 = vld [vmem:[#allocation61_spill] sm:$0xff]  ;;  %v5050_v0 = vpop.f32.mrf.mxu1  ;;  %v14212_v61 = vld [vmem:[#allocation60_spill] sm:$0xff] }
0x10df   : > { %v12758_v42 = vpop.eup %9195  ;;  %v6825_v11 = vpack.c.bf16 %v12744_v1, %v12644_v50  ;;  %v12763_v30 = vmul.f32 %v6711_v62, %v12622_v15  ;;  %9203 = vrcp.f32 %v5376_v23  ;;  %7144 = vmatprep.mubr.bf16.mxu0 %v6818_v53  ;;  %v6822_v47 = vpack.c.bf16 %v14208_v28, %v12472_v5  ;;  %v9358_v7 = vld [vmem:[#allocation14 + $0xf0] sm:$0xff]  }
0x10e0   : > { %v12767_v55 = vmul.f32 %v9192_v40, %v6073_v18  ;;  %v5882_v2 = vadd.f32 -0.28449672, %v5818_v13  ;;  %9205 = vpow2.f32 %v6297_v41  ;;  %v5567_v45 = vmul.f32 1.0614054, %v12758_v42  ;;  %v9357_v40 = vld [vmem:[#allocation14 + $0xb8] sm:$0xff]  }
0x10e1   : > { %v14211_v20 = vpack.c.bf16 %v14209_v49, %v14210_v56  ;;  %v6774_v15 = vmul.f32 %v6710_v63, %v12650_v31  ;;  %v6011_v62 = vadd.f32 0.2548296, %v5947_v9  ;;  %v5884_v48 = vadd.f32 -0.28449672, %v5820_v12  ;;  %v14213_v31 = vld [vmem:[#allocation43_spill] sm:$0xff] }
0x10e2   : > { %v6824_v5 = vpack.c.bf16 %v12636_v38, %v14212_v61  ;;  %v5885_v18 = vadd.f32 -0.28449672, %v5821_v4  ;;  %v5631_v41 = vadd.f32 -1.4531521, %v5567_v45  ;;  %v6301_v13 = vmul.f32 1.442695, %v6207_v27 }
0x10e3   : > { %7145 = vmatmul.mubr.bf16.vlgmr.msra.gmra.mxu0 %v14211_v20  ;;  %v6828_v23 = vpack.c.bf16 %v6776_v39, %v12718_v19  ;;  %v12777_v53 = vpop.eup %9197  ;;  %v6142_v28 = vsub.f32 0.0, %v12734_v14  ;;  %v12781_v9 = vadd.f32 %v4937_v43, %v14213_v31  ;;  %v12784_v63 = vadd.f32 %v5050_v0, %v14190_v3 }
0x10e4   : > { %7152 = vmatprep.mubr.bf16.mxu0 %v6822_v47  ;;  %8060 = vmatpush3.bf16.msra.mxu0 %v9357_v40  ;;  %v12787_v38 = vadd.f32 %v4939_v29, %v14193_v21  ;;  %v6457_v12 = vsub.f32 1.0, %v12767_v55  ;;  %v5946_v19 = vmul.f32 %v12661_v24, %v5882_v2  ;;  %v5695_v39 = vmul.f32 %v12758_v42, %v5631_v41  ;;  %v9359_v2 = vld [vmem:[#allocation14 + $0xb0] sm:$0xff]   ;;  %v14214_v29 = vld [vmem:[#allocation52_spill] sm:$0xff]  ;;  %v14216_v40 = vld [vmem:[#allocation66_spill] sm:$0xff] }
0x10e5   : > { %8061 = vmatprep.subr.bf16.mxu0 %v9358_v7  ;;  %7249 = vmatprep.mubr.bf16.mxu1 %v6824_v5  ;;  %v6144_v4 = vsub.f32 0.0, %v12739_v17  ;;  %v6075_v43 = vmul.f32 %v12624_v37, %v6011_v62  ;;  %v6826_v27 = vpack.c.bf16 %v6774_v15, %v12664_v10  ;;  %v12799_v47 = vmul.f32 0.70710677, %v12781_v9  ;;  %v14215_v5 = vld [vmem:[#allocation44_spill] sm:$0xff]  ;;  %v9366_v55 = vld [vmem:[#allocation14 + $0xd0] sm:$0xff]  }
0x10e6   : > { %7250 = vmatmul.mubr.bf16.vlgmr.msra.gmra.mxu1 %v6823_v26  ;;  %v12802_v45 = vmul.f32 0.70710677, %v12784_v63  ;;  %v12804_v49 = vpop.eup %9199  ;;  %v5949_v56 = vmul.f32 %v12700_v35, %v5885_v18  ;;  %v5759_v20 = vadd.f32 1.4214138, %v5695_v39  ;;  %9207 = vpow2.f32 %v6301_v13  ;;  %v9361_v7 = vld [vmem:[#allocation14 + $0xa8] sm:$0xff]  }
0x10e7   : > { %7257 = vmatprep.mubr.bf16.mxu1 %v6828_v23  ;;  %v12808_v16 = vmul.f32 0.70710677, %v12787_v38  ;;  %v5948_v26 = vmul.f32 %v12674_v22, %v5884_v48  ;;  %v6206_v37 = vmul.f32 %v6142_v28, %v12734_v14  ;;  %v12813_v10 = vand.u32 2147483647, %v12799_v47 }
0x10e8   : > { %8062 = vmatpush3.bf16.msra.mxu0 %v9359_v2  ;;  %v12816_v0 = vand.u32 2147483647, %v12802_v45  ;;  %vm6521_vm12 = vcmp.lt.f32.partialorder %v14214_v29, 0.0  ;;  %v6010_v15 = vadd.f32 0.2548296, %v5946_v19  ;;  %v5823_v62 = vmul.f32 %v12758_v42, %v5759_v20  ;;  %v9362_v2 = vld [vmem:[#allocation14 + $0xe0] sm:$0xff]  }
0x10e9   : > { %8063 = vmatprep.subr.bf16.mxu0 %v9360_v52  ;;  %v6208_v61 = vmul.f32 %v6144_v4, %v12739_v17  ;;  %v14217_v18 = vpack.c.bf16 %v14215_v5, %v14216_v40  ;;  %v12825_v48 = vand.u32 2147483647, %v12808_v16  ;;  %v6827_v14 = vpack.c.bf16 %v12763_v30, %v12647_v60  ;;  %v5052_v4 = vpop.f32.mrf.mxu1  ;;  %v14219_v29 = vld [vmem:[#allocation53_spill] sm:$0xff] }
0x10ea   : > { %v6585_v41 = vsub.f32 0.0, %v6457_v12  ;;  %v5313_v13 = vmul.f32 0.3275911, %v12813_v10  ;;  %v5315_v23 = vmul.f32 0.3275911, %v12816_v0  ;;  %v12834_v17 = vmul.f32 %v12750_v6, %v6075_v43 }
0x10eb   : > { %7153 = vmatmul.mubr.bf16.gmra.mxu0 %v14217_v18  ;;  %v6013_v28 = vadd.f32 0.2548296, %v5949_v56  ;;  %v5887_v19 = vadd.f32 -0.28449672, %v5823_v62  ;;  %v5314_v39 = vmul.f32 0.3275911, %v12825_v48  ;;  %v12837_v60 = vpop.eup %9201  ;;  %v6074_v40 = vmul.f32 %v12661_v24, %v6010_v15 }
0x10ec   : > { %7160 = vmatprep.mubr.bf16.mxu0 %v6826_v27  ;;  %8064 = vmatpush3.bf16.msra.mxu0 %v9361_v7  ;;  %v6012_v30 = vadd.f32 0.2548296, %v5948_v26  ;;  %v6299_v27 = vmul.f32 1.442695, %v6206_v37  ;;  %v5377_v20 = vadd.f32 1.0, %v5313_v13  ;;  %v5379_v52 = vadd.f32 1.0, %v5315_v23  ;;  %v12839_v5 = vpop.eup %9203 }
0x10ed   : > { %8065 = vmatprep.subr.bf16.mxu0 %v9362_v2  ;;  %v5951_v6 = vmul.f32 %v12758_v42, %v5887_v19  ;;  %v5566_v43 = vmul.f32 1.0614054, %v12837_v60  ;;  %v6303_v56 = vmul.f32 1.442695, %v6208_v61  ;;  %v9206_v62 = vpop.eup %9205  ;;  %v5568_v18 = vmul.f32 1.0614054, %v12839_v5 }
0x10ee   : > { %7258 = vmatmul.mubr.bf16.gmra.mxu1 %v6827_v14  ;;  %9209 = vrcp.f32 %v5377_v20  ;;  %v5378_v7 = vadd.f32 1.0, %v5314_v39  ;;  %v12846_v26 = vadd.f32 %v5052_v4, %v11943_v32  ;;  %v9363_v37 = vld [vmem:[#allocation14 + $0xa0] sm:$0xff]   ;;  %v6077_v13 = vmul.f32 %v12700_v35, %v6013_v28  ;;  %v9364_v15 = vld [vmem:[#allocation14 + $0xd8] sm:$0xff]   ;;  %v4941_v39 = vpop.f32.mrf.mxu0  ;;  %v5054_v28 = vpop.f32.mrf.mxu1 }
0x10ef   : > { %v6015_v23 = vadd.f32 0.2548296, %v5951_v6  ;;  %v5630_v24 = vadd.f32 -1.4531521, %v5566_v43  ;;  %9211 = vrcp.f32 %v5379_v52  ;;  %v6076_v61 = vmul.f32 %v12674_v22, %v6012_v30 }
0x10f0   : > { %8066 = vmatpush3.bf16.msra.mxu0 %v9363_v37  ;;  %v12851_v14 = vmul.f32 0.5, %v12641_v46  ;;  %9213 = vpow2.f32 %v6299_v27  ;;  %v5632_v19 = vadd.f32 -1.4531521, %v5568_v18  ;;  %v12854_v4 = vmul.f32 %v12777_v53, %v6074_v40  ;;  %v14218_v27 = vld [vmem:[#allocation45_spill] sm:$0xff] }
0x10f1   : > { %8067 = vmatprep.subr.bf16.mxu0 %v9364_v15  ;;  %v6079_v2 = vmul.f32 %v12758_v42, %v6015_v23  ;;  %v5694_v35 = vmul.f32 %v12837_v60, %v5630_v24  ;;  %9215 = vpow2.f32 %v6303_v56  ;;  %v6649_v46 = vsel %vm6521_vm12, %v6585_v41, %v6457_v12  ;;  %v9365_v42 = vld [vmem:[#allocation14 + $0x98] sm:$0xff]  }
0x10f2   : > { %v5696_v22 = vmul.f32 %v12839_v5, %v5632_v19  ;;  %9217 = vrcp.f32 %v5378_v7  ;;  %v12867_v53 = vmul.f32 0.70710677, %v12846_v26  ;;  %v6459_v30 = vsub.f32 1.0, %v12834_v17  ;;  %v9367_v7 = vld [vmem:[#allocation14 + $0x90] sm:$0xff]  }
0x10f3   : > { %7161 = vmatmul.mubr.bf16.gmra.mxu0 %v6825_v11  ;;  %vm6523_vm13 = vcmp.lt.f32.partialorder %v14218_v27, 0.0  ;;  %v12871_v50 = vmul.f32 %v9206_v62, %v6077_v13  ;;  %v5758_v1 = vadd.f32 1.4214138, %v5694_v35  ;;  %v12874_v11 = vadd.f32 %v4941_v39, %v14213_v31  ;;  %v9208_v12 = vpop.eup %9207  ;;  %v14220_v13 = vld [vmem:[#allocation54_spill] sm:$0xff] }
0x10f4   : > { %8068 = vmatpush3.bf16.msra.mxu0 %v9365_v42  ;;  %vm6522_vm14 = vcmp.lt.f32.partialorder %v14219_v29, 0.0  ;;  %v12878_v41 = vmul.f32 %v12804_v49, %v6076_v61  ;;  %v5760_v20 = vadd.f32 1.4214138, %v5696_v22  ;;  %v12881_v52 = vand.u32 2147483647, %v12867_v53  ;;  %v9368_v61 = vld [vmem:[#allocation14 + $0xc8] sm:$0xff]  }
0x10f5   : > { %8069 = vmatprep.subr.bf16.mxu0 %v9366_v55  ;;  %v12884_v17 = vadd.f32 %v5054_v28, %v14190_v3  ;;  %v6458_v40 = vsub.f32 1.0, %v12854_v4  ;;  %v12887_v6 = vmul.f32 %v9208_v12, %v6079_v2  ;;  %v5822_v43 = vmul.f32 %v12837_v60, %v5758_v1  ;;  %v9369_v1 = vld [vmem:[#allocation14 + $0x88] sm:$0xff]  }
0x10f6   : > { %v12891_v56 = vmul.f32 0.70710677, %v12874_v11  ;;  %v6713_v62 = vadd.f32 1.0, %v6649_v46  ;;  %vm6525_vm15 = vcmp.lt.f32.partialorder %v12604_v34, 0.0  ;;  %v5824_v49 = vmul.f32 %v12839_v5, %v5760_v20 }
0x10f7   : > { %v5316_v18 = vmul.f32 0.3275911, %v12881_v52  ;;  %v6587_v37 = vsub.f32 0.0, %v6459_v30  ;;  %vm6524_vm0 = vcmp.lt.f32.partialorder %v14220_v13, 0.0  ;;  %v6461_v23 = vsub.f32 1.0, %v12871_v50 }
0x10f8   : > { %8070 = vmatpush3.bf16.msra.mxu0 %v9367_v7  ;;  %v5886_v24 = vadd.f32 -0.28449672, %v5822_v43  ;;  %v12899_v15 = vand.u32 2147483647, %v12891_v56  ;;  %v6460_v19 = vsub.f32 1.0, %v12878_v41  ;;  %v6586_v35 = vsub.f32 0.0, %v6458_v40 }
0x10f9   : > { %8071 = vmatprep.subr.bf16.mxu0 %v9368_v61  ;;  %v5888_v39 = vadd.f32 -0.28449672, %v5824_v49  ;;  %v5380_v4 = vadd.f32 1.0, %v5316_v18  ;;  %v12903_v2 = vmul.f32 0.70710677, %v12884_v17  ;;  %v6463_v28 = vsub.f32 1.0, %v12887_v6 }
0x10fa   : > { %v5950_v46 = vmul.f32 %v12837_v60, %v5886_v24  ;;  %v5317_v22 = vmul.f32 0.3275911, %v12899_v15  ;;  %v12909_v42 = vmul.f32 %v6713_v62, %v12669_v51  ;;  %vm6527_vm1 = vcmp.lt.f32.partialorder %v12659_v8, 0.0  ;;  %v9370_v43 = vld [vmem:[#allocation14 + $0xc0] sm:$0xff]  }
0x10fb   : > { %14221 = vst [vmem:[#allocation57_spill] sm:$0xff] %v12903_v2  ;;  %v5952_v50 = vmul.f32 %v12839_v5, %v5888_v39  ;;  %9219 = vrcp.f32 %v5380_v4  ;;  %v12913_v55 = vpop.eup %9209  ;;  %v6589_v12 = vsub.f32 0.0, %v6461_v23  ;;  %v12916_v6 = vand.u32 2147483647, %v12903_v2 }
0x10fc   : > { %8072 = vmatpush3.bf16.msra.mxu0 %v9369_v1  ;;  %v6014_v41 = vadd.f32 0.2548296, %v5950_v46  ;;  %v5381_v20 = vadd.f32 1.0, %v5317_v22  ;;  %v12918_v49 = vpop.eup %9211  ;;  %v6651_v51 = vsel %vm6523_vm13, %v6587_v37, %v6459_v30  ;;  %v6588_v62 = vsub.f32 0.0, %v6460_v19  ;;  %v9371_v37 = vld [vmem:[#allocation14 + $0x80] sm:$0xff]  }
0x10fd   : > { %8073 = vmatprep.subr.bf16.mxu0 %v9370_v43  ;;  %v6016_v18 = vadd.f32 0.2548296, %v5952_v50  ;;  %v5569_v7 = vmul.f32 1.0614054, %v12913_v55  ;;  %v9214_v24 = vpop.eup %9213  ;;  %v6650_v61 = vsel %vm6522_vm14, %v6586_v35, %v6458_v40  ;;  %v6591_v39 = vsub.f32 0.0, %v6463_v28 }
0x10fe   : > { %v6078_v4 = vmul.f32 %v12837_v60, %v6014_v41  ;;  %9221 = vrcp.f32 %v5381_v20  ;;  %v9216_v46 = vpop.eup %9215  ;;  %v5118_v22 = vmul.f32 0.5, %v12710_v59  ;;  %v5120_v1 = vmul.f32 0.5, %v12715_v58 }
0x10ff   : > { %v6080_v27 = vmul.f32 %v12839_v5, %v6016_v18  ;;  %v5319_v30 = vmul.f32 0.3275911, %v12916_v6  ;;  %v12930_v50 = vpop.eup %9217  ;;  %v6715_v43 = vadd.f32 1.0, %v6651_v51  ;;  %v6653_v29 = vsel %vm6525_vm15, %v6589_v12, %v6461_v23  ;;  %v4943_v5 = vpop.f32.mrf.mxu0 }
0x1100   : > { %8074 = vmatpush3.bf16.msra.mxu0 %v9371_v37  ;;  %v6398_v40 = vmul.f32 %v9214_v24, %v6078_v4  ;;  %v5571_v60 = vmul.f32 1.0614054, %v12918_v49  ;;  %v6714_v35 = vadd.f32 1.0, %v6650_v61  ;;  %v6652_v59 = vsel %vm6524_vm0, %v6588_v62, %v6460_v19 }
0x1101   : > { %v6400_v58 = vmul.f32 %v9216_v46, %v6080_v27  ;;  %v5633_v41 = vadd.f32 -1.4531521, %v5569_v7  ;;  %v6655_v20 = vsel %vm6527_vm1, %v6591_v39, %v6463_v28  ;;  %v5570_v37 = vmul.f32 1.0614054, %v12930_v50 }
0x1102   : > { %v6462_v18 = vsub.f32 1.0, %v6398_v40  ;;  %v5383_v51 = vadd.f32 1.0, %v5319_v30  ;;  %v6717_v2 = vadd.f32 1.0, %v6653_v29  ;;  %vm6526_vm2 = vcmp.lt.f32.partialorder %v12723_v54, 0.0 }
0x1103   : > { %v6464_v34 = vsub.f32 1.0, %v6400_v58  ;;  %vm6528_vm3 = vcmp.lt.f32.partialorder %v12729_v44, 0.0  ;;  %v6716_v23 = vadd.f32 1.0, %v6652_v59  ;;  %v5635_v13 = vadd.f32 -1.4531521, %v5571_v60 }
0x1104   : > { %v6590_v12 = vsub.f32 0.0, %v6462_v18  ;;  %v12943_v19 = vadd.f32 %v4943_v5, %v14193_v21  ;;  %v6779_v62 = vmul.f32 %v6715_v43, %v12672_v33  ;;  %v6719_v8 = vadd.f32 1.0, %v6655_v20 }
0x1105   : > { %v6592_v28 = vsub.f32 0.0, %v6464_v34  ;;  %v5697_v7 = vmul.f32 %v12913_v55, %v5633_v41  ;;  %v6778_v24 = vmul.f32 %v6714_v35, %v12677_v57  ;;  %v5634_v39 = vadd.f32 -1.4531521, %v5570_v37 }
0x1106   : > { %v6654_v61 = vsel %vm6526_vm2, %v6590_v12, %v6462_v18  ;;  %9223 = vrcp.f32 %v5383_v51  ;;  %v6781_v54 = vmul.f32 %v6717_v2, %v12696_v36  ;;  %v6145_v46 = vsub.f32 0.0, %v12813_v10  ;;  %v5056_v2 = vpop.f32.mrf.mxu1 }
0x1107   : > { %v6718_v44 = vadd.f32 1.0, %v6654_v61  ;;  %v6656_v4 = vsel %vm6528_vm3, %v6592_v28, %v6464_v34  ;;  %v6780_v30 = vmul.f32 %v6716_v23, %v12689_v25  ;;  %v5699_v43 = vmul.f32 %v12918_v49, %v5635_v13  ;;  %v14222_v34 = vld [vmem:[#allocation64_spill] sm:$0xff]  ;;  %v14223_v23 = vld [vmem:[#allocation59_spill] sm:$0xff] }
0x1108   : > { %v12950_v27 = vpop.eup %9219  ;;  %v6720_v33 = vadd.f32 1.0, %v6656_v4  ;;  %v12955_v29 = vmul.f32 0.70710677, %v12943_v19  ;;  %v6783_v57 = vmul.f32 %v6719_v8, %v12851_v14  ;;  %v5761_v60 = vadd.f32 1.4214138, %v5697_v7  ;;  %v14224_v61 = vld [vmem:[#allocation55_spill] sm:$0xff] }
0x1109   : > { %v6782_v40 = vmul.f32 %v6718_v44, %v5118_v22  ;;  %v5572_v36 = vmul.f32 1.0614054, %v12950_v27  ;;  %v6147_v59 = vsub.f32 0.0, %v12816_v0  ;;  %v5698_v58 = vmul.f32 %v12930_v50, %v5634_v39 }
0x110a   : > { %v6784_v35 = vmul.f32 %v6720_v33, %v5120_v1  ;;  %v12962_v25 = vand.u32 2147483647, %v12955_v29  ;;  %v6829_v5 = vpack.c.bf16 %v6781_v54, %v12909_v42  ;;  %v6209_v14 = vmul.f32 %v6145_v46, %v12813_v10 }
0x110b   : > { %v12964_v41 = vpop.eup %9221  ;;  %v6830_v20 = vpack.c.bf16 %v6782_v40, %v6778_v24  ;;  %v6146_v22 = vsub.f32 0.0, %v12825_v48  ;;  %v5763_v37 = vadd.f32 1.4214138, %v5699_v43  ;;  %v12971_v51 = vadd.f32 %v5056_v2, %v11943_v32 }
0x110c   : > { %v6832_v18 = vpack.c.bf16 %v6784_v35, %v6780_v30  ;;  %v5318_v1 = vmul.f32 0.3275911, %v12962_v25  ;;  %v6376_v12 = vmul.f32 %v14223_v23, %v14222_v34  ;;  %v6831_v13 = vpack.c.bf16 %v6783_v57, %v6779_v62 }
0x110d   : > { %7168 = vmatprep.mubr.bf16.mxu0 %v6830_v20  ;;  %v5825_v8 = vmul.f32 %v12913_v55, %v5761_v60  ;;  %v5636_v42 = vadd.f32 -1.4531521, %v5572_v36  ;;  %v6211_v10 = vmul.f32 %v6147_v59, %v12816_v0  ;;  %v5762_v28 = vadd.f32 1.4214138, %v5698_v58  ;;  %v14226_v36 = vld [vmem:[#allocation47_spill] sm:$0xff] }
0x110e   : > { %7265 = vmatprep.mubr.bf16.mxu1 %v6832_v18  ;;  %7169 = vmatmul.mubr.bf16.gmra.mxu0 %v6829_v5  ;;  %v5573_v7 = vmul.f32 1.0614054, %v12964_v41  ;;  %v5382_v24 = vadd.f32 1.0, %v5318_v1  ;;  %v14225_v39 = vsub.f32 1.0, %v14224_v61  ;;  %v6305_v44 = vmul.f32 1.442695, %v6209_v14 }
0x110f   : > { %7266 = vmatmul.mubr.bf16.gmra.mxu1 %v6831_v13  ;;  %v5827_v4 = vmul.f32 %v12918_v49, %v5763_v37  ;;  %v6210_v62 = vmul.f32 %v6146_v22, %v12825_v48  ;;  %v12983_v46 = vmul.f32 0.70710677, %v12971_v51  ;;  %v6440_v30 = vsub.f32 1.0, %v6376_v12 }
0x1110   : > { %v6564_v54 = vsub.f32 0.0, %v14225_v39  ;;  %9225 = vrcp.f32 %v5382_v24  ;;  %v5889_v33 = vadd.f32 -0.28449672, %v5825_v8  ;;  %v5700_v0 = vmul.f32 %v12950_v27, %v5636_v42  ;;  %v4947_v42 = vpop.f32.mrf.mxu0  ;;  %v14229_v24 = vld [vmem:[#allocation49_spill] sm:$0xff] }
0x1111   : > { %v6309_v43 = vmul.f32 1.442695, %v6211_v10  ;;  %v5826_v57 = vmul.f32 %v12930_v50, %v5762_v28  ;;  %v5637_v40 = vadd.f32 -1.4531521, %v5573_v7  ;;  %vm6500_vm4 = vcmp.lt.f32.partialorder %v14226_v36, 0.0  ;;  %v5060_v10 = vpop.f32.mrf.mxu1  ;;  %v14228_v28 = vld [vmem:[#allocation46_spill] sm:$0xff] }
0x1112   : > { %9227 = vpow2.f32 %v6305_v44  ;;  %v6148_v2 = vsub.f32 0.0, %v12881_v52  ;;  %v14227_v48 = vmov %v14225_v39  ;;  %v5891_v59 = vadd.f32 -0.28449672, %v5827_v4 }
0x1113   : > { %v12987_v60 = vpop.eup %9223  ;;  %v6628_v35 = vsel %vm6500_vm4, %v6564_v54, %v14227_v48  ;;  %v6307_v58 = vmul.f32 1.442695, %v6210_v62  ;;  %v12994_v5 = vand.u32 2147483647, %v12983_v46  ;;  %v6568_v20 = vsub.f32 0.0, %v6440_v30  ;;  %v14230_v62 = vld [vmem:[#allocation48_spill] sm:$0xff] }
0x1114   : > { %v5953_v14 = vmul.f32 %v12913_v55, %v5889_v33  ;;  %v5764_v22 = vadd.f32 1.4214138, %v5700_v0  ;;  %9229 = vpow2.f32 %v6309_v43  ;;  %v5890_v18 = vadd.f32 -0.28449672, %v5826_v57 }
0x1115   : > { %v5701_v37 = vmul.f32 %v12964_v41, %v5637_v40  ;;  %v5575_v1 = vmul.f32 1.0614054, %v12987_v60  ;;  %v6692_v34 = vadd.f32 1.0, %v6628_v35  ;;  %v6212_v23 = vmul.f32 %v6148_v2, %v12881_v52 }
0x1116   : > { %v5955_v12 = vmul.f32 %v12918_v49, %v5891_v59  ;;  %9231 = vpow2.f32 %v6307_v58  ;;  %v6149_v13 = vsub.f32 0.0, %v12899_v15  ;;  %v5320_v8 = vmul.f32 0.3275911, %v12994_v5 }
0x1117   : > { %v5092_v7 = vmul.f32 0.5, %v14228_v28  ;;  %vm6504_vm5 = vcmp.lt.f32.partialorder %v14229_v24, 0.0  ;;  %v6017_v61 = vadd.f32 0.2548296, %v5953_v14  ;;  %v5828_v39 = vmul.f32 %v12950_v27, %v5764_v22 }
0x1118   : > { %v6632_v54 = vsel %vm6504_vm5, %v6568_v20, %v6440_v30  ;;  %v5954_v44 = vmul.f32 %v12930_v50, %v5890_v18  ;;  %v5765_v52 = vadd.f32 1.4214138, %v5701_v37  ;;  %v5639_v4 = vadd.f32 -1.4531521, %v5575_v1 }
0x1119   : > { %v13008_v33 = vmul.f32 0.5, %v14230_v62  ;;  %v6311_v0 = vmul.f32 1.442695, %v6212_v23  ;;  %v13011_v43 = vadd.f32 %v4947_v42, %v14213_v31  ;;  %v13014_v57 = vadd.f32 %v5060_v10, %v14190_v3 }
0x111a   : > { %v13016_v40 = vmul.f32 %v6692_v34, %v5092_v7  ;;  %v6019_v36 = vadd.f32 0.2548296, %v5955_v12  ;;  %v6213_v2 = vmul.f32 %v6149_v13, %v12899_v15  ;;  %v5384_v30 = vadd.f32 1.0, %v5320_v8 }
0x111b   : > { %v13021_v35 = vadd.f32 1.0, %v6632_v54  ;;  %v6081_v59 = vmul.f32 %v12913_v55, %v6017_v61  ;;  %v5892_v58 = vadd.f32 -0.28449672, %v5828_v39  ;;  %v13025_v20 = vmul.f32 0.70710677, %v13011_v43 }
0x111c   : > { %14231 = vst [vmem:[#allocation58_spill] sm:$0xff] %v13016_v40  ;;  %v6018_v14 = vadd.f32 0.2548296, %v5954_v44  ;;  %v5829_v22 = vmul.f32 %v12964_v41, %v5765_v52  ;;  %v5703_v18 = vmul.f32 %v12987_v60, %v5639_v4  ;;  %v13030_v37 = vmul.f32 0.70710677, %v13014_v57 }
0x111d   : > { %v13019_v48 = vpop.eup %9225  ;;  %9233 = vpow2.f32 %v6311_v0  ;;  %v6151_v15 = vsub.f32 0.0, %v12916_v6  ;;  %v13035_v34 = vand.u32 2147483647, %v13025_v20  ;;  %v6083_v23 = vmul.f32 %v12918_v49, %v6019_v36  ;;  %v4949_v49 = vpop.f32.mrf.mxu0 }
0x111e   : > { %v5574_v1 = vmul.f32 1.0614054, %v13019_v48  ;;  %v6313_v12 = vmul.f32 1.442695, %v6213_v2  ;;  %9235 = vrcp.f32 %v5384_v30  ;;  %v13039_v13 = vand.u32 2147483647, %v13030_v37 }
0x111f   : > { %v9228_v55 = vpop.eup %9227  ;;  %v13042_v8 = vmul.f32 0.5, %v12781_v9  ;;  %v5956_v10 = vmul.f32 %v12950_v27, %v5892_v58  ;;  %v5321_v28 = vmul.f32 0.3275911, %v13035_v34  ;;  %v6082_v7 = vmul.f32 %v12930_v50, %v6018_v14 }
0x1120   : > { %v6401_v42 = vmul.f32 %v9228_v55, %v6081_v59  ;;  %v5893_v24 = vadd.f32 -0.28449672, %v5829_v22  ;;  %v5767_v61 = vadd.f32 1.4214138, %v5703_v18  ;;  %v5323_v39 = vmul.f32 0.3275911, %v13039_v13 }
0x1121   : > { %v9230_v54 = vpop.eup %9229  ;;  %v13049_v44 = vmul.f32 0.5, %v12784_v63  ;;  %v6215_v52 = vmul.f32 %v6151_v15, %v12916_v6  ;;  %v5638_v9 = vadd.f32 -1.4531521, %v5574_v1  ;;  %v5385_v4 = vadd.f32 1.0, %v5321_v28  ;;  %v5062_v63 = vpop.f32.mrf.mxu1 }
0x1122   : > { %v13052_v62 = vmul.f32 %v9230_v54, %v6083_v23  ;;  %v13055_v0 = vmul.f32 0.5, %v12787_v38  ;;  %9237 = vpow2.f32 %v6313_v12  ;;  %v5387_v50 = vadd.f32 1.0, %v5323_v39  ;;  %v4951_v15 = vpop.f32.mrf.mxu0 }
0x1123   : > { %v9232_v36 = vpop.eup %9231  ;;  %v6465_v2 = vsub.f32 1.0, %v6401_v42  ;;  %v6020_v30 = vadd.f32 0.2548296, %v5956_v10  ;;  %9239 = vrcp.f32 %v5385_v4  ;;  %v13058_v59 = vadd.f32 %v4949_v49, %v14193_v21 }
0x1124   : > { %v13060_v58 = vmul.f32 %v9232_v36, %v6082_v7  ;;  %v5957_v6 = vmul.f32 %v12964_v41, %v5893_v24  ;;  %v5831_v14 = vmul.f32 %v12987_v60, %v5767_v61  ;;  %9241 = vrcp.f32 %v5387_v50 }
0x1125   : > { %vm6529_vm6 = vcmp.lt.f32.partialorder %v12799_v47, 0.0  ;;  %v13066_v38 = vmul.f32 0.5, %v12846_v26  ;;  %v6317_v22 = vmul.f32 1.442695, %v6215_v52  ;;  %v5702_v18 = vmul.f32 %v13019_v48, %v5638_v9 }
0x1126   : > { %v13070_v1 = vmul.f32 0.5, %v12874_v11  ;;  %v13073_v55 = vmul.f32 0.5, %v12884_v17  ;;  %v6150_v23 = vsub.f32 0.0, %v12962_v25  ;;  %v13077_v12 = vadd.f32 %v5062_v63, %v11943_v32 }
0x1127   : > { %v6593_v42 = vsub.f32 0.0, %v6465_v2  ;;  %v6467_v10 = vsub.f32 1.0, %v13052_v62  ;;  %vm6531_vm7 = vcmp.lt.f32.partialorder %v12802_v45, 0.0  ;;  %v6084_v26 = vmul.f32 %v12950_v27, %v6020_v30 }
0x1128   : > { %v13083_v28 = vmul.f32 0.70710677, %v13058_v59  ;;  %v6466_v11 = vsub.f32 1.0, %v13060_v58  ;;  %vm6530_vm8 = vcmp.lt.f32.partialorder %v12808_v16, 0.0  ;;  %v6021_v17 = vadd.f32 0.2548296, %v5957_v6  ;;  %v4953_v16 = vpop.f32.mrf.mxu0 }
0x1129   : > { %v5895_v7 = vadd.f32 -0.28449672, %v5831_v14  ;;  %v13088_v24 = vadd.f32 %v4951_v15, %v14213_v31  ;;  %9243 = vpow2.f32 %v6317_v22  ;;  %v5766_v61 = vadd.f32 1.4214138, %v5702_v18 }
0x112a   : > { %v13091_v39 = vand.u32 2147483647, %v13083_v28  ;;  %v13094_v49 = vmul.f32 0.70710677, %v13077_v12  ;;  %v9234_v27 = vpop.eup %9233  ;;  %v13097_v54 = vmul.f32 0.5, %v12943_v19  ;;  %v6214_v52 = vmul.f32 %v6150_v23, %v12962_v25 }
0x112b   : > { %v13101_v9 = vmul.f32 0.5, %v12971_v51  ;;  %v6152_v4 = vsub.f32 0.0, %v12994_v5  ;;  %v13104_v62 = vpop.eup %9235  ;;  %v6595_v50 = vsub.f32 0.0, %v6467_v10  ;;  %v6404_v36 = vmul.f32 %v9234_v27, %v6084_v26 }
0x112c   : > { %v5322_v30 = vmul.f32 0.3275911, %v13091_v39  ;;  %v13108_v63 = vand.u32 2147483647, %v13094_v49  ;;  %v6657_v19 = vsel %vm6529_vm6, %v6593_v42, %v6465_v2  ;;  %v6085_v58 = vmul.f32 %v12964_v41, %v6021_v17 }
0x112d   : > { %v5959_v25 = vmul.f32 %v12987_v60, %v5895_v7  ;;  %v13115_v51 = vmul.f32 0.70710677, %v13088_v24  ;;  %v6594_v6 = vsub.f32 0.0, %v6466_v11  ;;  %v5830_v14 = vmul.f32 %v13019_v48, %v5766_v61  ;;  %v5064_v7 = vpop.f32.mrf.mxu1 }
0x112e   : > { %v5386_v22 = vadd.f32 1.0, %v5322_v30  ;;  %v5324_v18 = vmul.f32 0.3275911, %v13108_v63  ;;  %v13121_v15 = vmul.f32 %v13021_v35, %v13008_v33  ;;  %vm6532_vm9 = vcmp.lt.f32.partialorder %v12867_v53, 0.0 }
0x112f   : > { %v6315_v47 = vmul.f32 1.442695, %v6214_v52  ;;  %v5576_v41 = vmul.f32 1.0614054, %v13104_v62  ;;  %v13126_v2 = vand.u32 2147483647, %v13115_v51  ;;  %v9238_v23 = vpop.eup %9237  ;;  %v6659_v33 = vsel %vm6531_vm7, %v6595_v50, %v6467_v10 }
0x1130   : > { %14232 = vst [vmem:[#allocation63_spill] sm:$0xff] %v13121_v15  ;;  %v6721_v42 = vadd.f32 1.0, %v6657_v19  ;;  %v6468_v26 = vsub.f32 1.0, %v6404_v36  ;;  %9245 = vrcp.f32 %v5386_v22  ;;  %v5388_v17 = vadd.f32 1.0, %v5324_v18  ;;  %v13128_v61 = vpop.eup %9239 }
0x1131   : > { %v6405_v35 = vmul.f32 %v9238_v23, %v6085_v58  ;;  %v6023_v27 = vadd.f32 0.2548296, %v5959_v25  ;;  %v5325_v52 = vmul.f32 0.3275911, %v13126_v2  ;;  %v13133_v30 = vpop.eup %9241  ;;  %v6658_v15 = vsel %vm6530_vm8, %v6594_v6, %v6466_v11 }
0x1132   : > { %v5894_v40 = vadd.f32 -0.28449672, %v5830_v14  ;;  %v6216_v36 = vmul.f32 %v6152_v4, %v12994_v5  ;;  %v5577_v19 = vmul.f32 1.0614054, %v13128_v61  ;;  %v5640_v22 = vadd.f32 -1.4531521, %v5576_v41 }
0x1133   : > { %v5579_v18 = vmul.f32 1.0614054, %v13133_v30  ;;  %9247 = vrcp.f32 %v5388_v17  ;;  %v13141_v45 = vadd.f32 %v5064_v7, %v14190_v3  ;;  %v6723_v10 = vadd.f32 1.0, %v6659_v33 }
0x1134   : > { %v6596_v50 = vsub.f32 0.0, %v6468_v26  ;;  %vm6533_vm10 = vcmp.lt.f32.partialorder %v12891_v56, 0.0  ;;  %v5641_v58 = vadd.f32 -1.4531521, %v5577_v19  ;;  %v5389_v25 = vadd.f32 1.0, %v5325_v52 }
0x1135   : > { %v13145_v11 = vmul.f32 %v6721_v42, %v13042_v8  ;;  %v6469_v5 = vsub.f32 1.0, %v6405_v35  ;;  %v6087_v4 = vmul.f32 %v12987_v60, %v6023_v27  ;;  %9249 = vpow2.f32 %v6315_v47 }
0x1136   : > { %v6722_v6 = vadd.f32 1.0, %v6658_v15  ;;  %v6319_v14 = vmul.f32 1.442695, %v6216_v36  ;;  %v5643_v41 = vadd.f32 -1.4531521, %v5579_v18  ;;  %9251 = vrcp.f32 %v5389_v25  ;;  %v9244_v23 = vpop.eup %9243 }
0x1137   : > { %14233 = vst [vmem:[#allocation62_spill] sm:$0xff] %v13145_v11  ;;  %v5958_v17 = vmul.f32 %v13019_v48, %v5894_v40  ;;  %v5704_v7 = vmul.f32 %v13104_v62, %v5640_v22  ;;  %v13151_v33 = vmul.f32 0.70710677, %v13141_v45  ;;  %v13154_v52 = vadd.f32 %v4953_v16, %v14193_v21 }
0x1138   : > { %v13157_v8 = vmul.f32 %v6723_v10, %v13049_v44  ;;  %v6660_v60 = vsel %vm6532_vm9, %v6596_v50, %v6468_v26  ;;  %v5705_v15 = vmul.f32 %v13128_v61, %v5641_v58  ;;  %v6153_v47 = vsub.f32 0.0, %v13035_v34  ;;  %v5066_v10 = vpop.f32.mrf.mxu1 }
0x1139   : > { %v6597_v42 = vsub.f32 0.0, %v6469_v5  ;;  %v6407_v40 = vmul.f32 %v9244_v23, %v6087_v4  ;;  %v6155_v35 = vsub.f32 0.0, %v13039_v13  ;;  %v13165_v27 = vand.u32 2147483647, %v13151_v33 }
0x113a   : > { %14234 = vst [vmem:[#allocation56_spill] sm:$0xff] %v13157_v8  ;;  %v13168_v36 = vmul.f32 %v6722_v6, %v13055_v0  ;;  %v13171_v44 = vmul.f32 0.5, %v13011_v43  ;;  %v5707_v53 = vmul.f32 %v13133_v30, %v5643_v41  ;;  %v13175_v26 = vmul.f32 0.70710677, %v13154_v52  ;;  %v14236_v6 = vld [vmem:[#allocation57_spill] sm:$0xff] }
0x113b   : > { %v6022_v19 = vadd.f32 0.2548296, %v5958_v17  ;;  %v5768_v22 = vadd.f32 1.4214138, %v5704_v7  ;;  %9253 = vpow2.f32 %v6319_v14  ;;  %v5327_v18 = vmul.f32 0.3275911, %v13165_v27 }
0x113c   : > { %14235 = vst [vmem:[#allocation65_spill] sm:$0xff] %v13168_v36  ;;  %v6724_v50 = vadd.f32 1.0, %v6660_v60  ;;  %v5769_v58 = vadd.f32 1.4214138, %v5705_v15  ;;  %v6217_v25 = vmul.f32 %v6153_v47, %v13035_v34  ;;  %v13180_v0 = vand.u32 2147483647, %v13175_v26 }
0x113d   : > { %v13182_v43 = vpop.eup %9245  ;;  %v6661_v16 = vsel %vm6533_vm10, %v6597_v42, %v6469_v5  ;;  %v6471_v4 = vsub.f32 1.0, %v6407_v40  ;;  %vm6535_vm11 = vcmp.lt.f32.partialorder %v14236_v6, 0.0  ;;  %v6219_v14 = vmul.f32 %v6155_v35, %v13039_v13 }
0x113e   : > { %v5391_v41 = vadd.f32 1.0, %v5327_v18  ;;  %v5771_v23 = vadd.f32 1.4214138, %v5707_v53  ;;  %v5578_v17 = vmul.f32 1.0614054, %v13182_v43  ;;  %v13191_v34 = vadd.f32 %v5066_v10, %v11943_v32 }
0x113f   : > { %v5326_v7 = vmul.f32 0.3275911, %v13180_v0  ;;  %v6086_v60 = vmul.f32 %v13019_v48, %v6022_v19  ;;  %v5832_v15 = vmul.f32 %v13104_v62, %v5768_v22  ;;  %v13196_v56 = vmul.f32 0.5, %v13014_v57 }
0x1140   : > { %9255 = vrcp.f32 %v5391_v41  ;;  %v13198_v5 = vpop.eup %9247  ;;  %v13201_v13 = vmul.f32 %v6724_v50, %v13066_v38  ;;  %v5833_v47 = vmul.f32 %v13128_v61, %v5769_v58  ;;  %v5642_v42 = vadd.f32 -1.4531521, %v5578_v17  ;;  %v4957_v41 = vpop.f32.mrf.mxu0 }
0x1141   : > { %v5390_v40 = vadd.f32 1.0, %v5326_v7  ;;  %v6725_v35 = vadd.f32 1.0, %v6661_v16  ;;  %v6599_v53 = vsub.f32 0.0, %v6471_v4  ;;  %v6321_v18 = vmul.f32 1.442695, %v6217_v25 }
0x1142   : > { %14237 = vst [vmem:[#allocation61_spill] sm:$0xff] %v13201_v13  ;;  %v5580_v48 = vmul.f32 1.0614054, %v13198_v5  ;;  %v9250_v19 = vpop.eup %9249  ;;  %v5835_v22 = vmul.f32 %v13133_v30, %v5771_v23  ;;  %v6325_v57 = vmul.f32 1.442695, %v6219_v14  ;;  %v6154_v17 = vsub.f32 0.0, %v13091_v39 }
0x1143   : > { %9257 = vrcp.f32 %v5390_v40  ;;  %v13207_v10 = vmul.f32 0.70710677, %v13191_v34  ;;  %v13209_v38 = vpop.eup %9251  ;;  %v6406_v50 = vmul.f32 %v9250_v19, %v6086_v60  ;;  %v5896_v58 = vadd.f32 -0.28449672, %v5832_v15 }
0x1144   : > { %v5644_v16 = vadd.f32 -1.4531521, %v5580_v48  ;;  %v5897_v7 = vadd.f32 -0.28449672, %v5833_v47  ;;  %v5706_v25 = vmul.f32 %v13182_v43, %v5642_v42  ;;  %v5581_v13 = vmul.f32 1.0614054, %v13209_v38 }
0x1145   : > { %14238 = vst [vmem:[#allocation60_spill] sm:$0xff] %v13207_v10  ;;  %v13215_v23 = vand.u32 2147483647, %v13207_v10  ;;  %9259 = vpow2.f32 %v6321_v18  ;;  %v6156_v40 = vsub.f32 0.0, %v13108_v63  ;;  %v13220_v36 = vadd.f32 %v4957_v41, %v14213_v31 }
0x1146   : > { %v5708_v14 = vmul.f32 %v13198_v5, %v5644_v16  ;;  %v6663_v60 = vsel %vm6535_vm11, %v6599_v53, %v6471_v4  ;;  %vm6534_vm12 = vcmp.lt.f32.partialorder %v12955_v29, 0.0  ;;  %v5899_v15 = vadd.f32 -0.28449672, %v5835_v22 }
0x1147   : > { %v5645_v47 = vadd.f32 -1.4531521, %v5581_v13  ;;  %v5328_v42 = vmul.f32 0.3275911, %v13215_v23  ;;  %v13227_v48 = vmul.f32 %v6725_v35, %v13070_v1  ;;  %v6470_v18 = vsub.f32 1.0, %v6406_v50 }
0x1148   : > { %v5960_v19 = vmul.f32 %v13104_v62, %v5896_v58  ;;  %9261 = vpow2.f32 %v6325_v57  ;;  %v9254_v16 = vpop.eup %9253  ;;  %v5961_v41 = vmul.f32 %v13128_v61, %v5897_v7  ;;  %v5770_v10 = vadd.f32 1.4214138, %v5706_v25 }
0x1149   : > { %14239 = vst [vmem:[#allocation43_spill] sm:$0xff] %v13227_v48  ;;  %v6218_v6 = vmul.f32 %v6154_v17, %v13091_v39  ;;  %v5772_v4 = vadd.f32 1.4214138, %v5708_v14  ;;  %v6727_v53 = vadd.f32 1.0, %v6663_v60  ;;  %v13233_v22 = vmul.f32 0.5, %v13058_v59 }
0x114a   : > { %v5709_v13 = vmul.f32 %v13209_v38, %v5645_v47  ;;  %v13237_v1 = vmul.f32 0.70710677, %v13220_v36  ;;  %v5963_v35 = vmul.f32 %v13133_v30, %v5899_v15  ;;  %v6220_v57 = vmul.f32 %v6156_v40, %v13108_v63 }
0x114b   : > { %v6157_v50 = vsub.f32 0.0, %v13126_v2  ;;  %v5392_v58 = vadd.f32 1.0, %v5328_v42  ;;  %v6598_v17 = vsub.f32 0.0, %v6470_v18  ;;  %v6024_v7 = vadd.f32 0.2548296, %v5960_v19 }
0x114c   : > { %14240 = vst [vmem:[#allocation52_spill] sm:$0xff] %v13237_v1  ;;  %v13245_v59 = vmul.f32 0.5, %v13077_v12  ;;  %v6025_v14 = vadd.f32 0.2548296, %v5961_v41  ;;  %v5834_v60 = vmul.f32 %v13182_v43, %v5770_v10  ;;  %v6323_v47 = vmul.f32 1.442695, %v6218_v6  ;;  %v5070_v41 = vpop.f32.mrf.mxu1 }
0x114d   : > { %v13247_v25 = vpop.eup %9255  ;;  %v5836_v15 = vmul.f32 %v13198_v5, %v5772_v4  ;;  %v13252_v63 = vmul.f32 %v6727_v53, %v13073_v55  ;;  %v5773_v40 = vadd.f32 1.4214138, %v5709_v13  ;;  %v13256_v39 = vand.u32 2147483647, %v13237_v1 }
0x114e   : > { %v5583_v42 = vmul.f32 1.0614054, %v13247_v25  ;;  %v6027_v19 = vadd.f32 0.2548296, %v5963_v35  ;;  %v6327_v12 = vmul.f32 1.442695, %v6220_v57  ;;  %v6221_v11 = vmul.f32 %v6157_v50, %v13126_v2 }
0x114f   : > { %14241 = vst [vmem:[#allocation44_spill] sm:$0xff] %v13252_v63  ;;  %9263 = vrcp.f32 %v5392_v58  ;;  %v6662_v10 = vsel %vm6534_vm12, %v6598_v17, %v6470_v18  ;;  %v6088_v55 = vmul.f32 %v13104_v62, %v6024_v7  ;;  %v6159_v4 = vsub.f32 0.0, %v13165_v27 }
0x1150   : > { %v13259_v48 = vpop.eup %9257  ;;  %v5647_v6 = vadd.f32 -1.4531521, %v5583_v42  ;;  %v6089_v53 = vmul.f32 %v13128_v61, %v6025_v14  ;;  %v5898_v13 = vadd.f32 -0.28449672, %v5834_v60  ;;  %v5900_v1 = vadd.f32 -0.28449672, %v5836_v15 }
0x1151   : > { %v5582_v35 = vmul.f32 1.0614054, %v13259_v48  ;;  %v5837_v2 = vmul.f32 %v13209_v38, %v5773_v40  ;;  %v5329_v50 = vmul.f32 0.3275911, %v13256_v39  ;;  %v13271_v29 = vadd.f32 %v5070_v41, %v14190_v3 }
0x1152   : > { %v5711_v57 = vmul.f32 %v13247_v25, %v5647_v6  ;;  %v9260_v18 = vpop.eup %9259  ;;  %v6091_v62 = vmul.f32 %v13133_v30, %v6027_v19  ;;  %9265 = vpow2.f32 %v6323_v47  ;;  %v6329_v58 = vmul.f32 1.442695, %v6221_v11  ;;  %v4959_v6 = vpop.f32.mrf.mxu0 }
0x1153   : > { %v5646_v17 = vadd.f32 -1.4531521, %v5582_v35  ;;  %v6408_v61 = vmul.f32 %v9254_v16, %v6088_v55  ;;  %9267 = vpow2.f32 %v6327_v12  ;;  %v6223_v14 = vmul.f32 %v6159_v4, %v13165_v27 }
0x1154   : > { %v5775_v7 = vadd.f32 1.4214138, %v5711_v57  ;;  %v6726_v15 = vadd.f32 1.0, %v6662_v10  ;;  %v5962_v40 = vmul.f32 %v13182_v43, %v5898_v13  ;;  %v13277_v42 = vmul.f32 0.5, %v13088_v24 }
0x1155   : > { %v9262_v60 = vpop.eup %9261  ;;  %v13280_v41 = vmul.f32 0.70710677, %v13271_v29  ;;  %v6409_v30 = vmul.f32 %v9260_v18, %v6089_v53  ;;  %v5964_v11 = vmul.f32 %v13198_v5, %v5900_v1  ;;  %v5901_v47 = vadd.f32 -0.28449672, %v5837_v2 }
0x1156   : > { %v5393_v16 = vadd.f32 1.0, %v5329_v50  ;;  %vm6536_vm13 = vcmp.lt.f32.partialorder %v12983_v46, 0.0  ;;  %v6411_v19 = vmul.f32 %v9262_v60, %v6091_v62  ;;  %9269 = vpow2.f32 %v6329_v58 }
0x1157   : > { %v5710_v27 = vmul.f32 %v13259_v48, %v5646_v17  ;;  %v13286_v12 = vand.u32 2147483647, %v13280_v41  ;;  %v6472_v24 = vsub.f32 1.0, %v6408_v61  ;;  %v5839_v10 = vmul.f32 %v13247_v25, %v5775_v7 }
0x1158   : > { %v6333_v55 = vmul.f32 1.442695, %v6223_v14  ;;  %v13290_v4 = vadd.f32 %v4959_v6, %v14193_v21  ;;  %vm6537_vm14 = vcmp.lt.f32.partialorder %v13025_v20, 0.0  ;;  %v6026_v53 = vadd.f32 0.2548296, %v5962_v40 }
0x1159   : > { %v6158_v13 = vsub.f32 0.0, %v13180_v0  ;;  %v5331_v35 = vmul.f32 0.3275911, %v13286_v12  ;;  %v6473_v2 = vsub.f32 1.0, %v6409_v30  ;;  %vm6539_vm15 = vcmp.lt.f32.partialorder %v13030_v37, 0.0 }
0x115a   : > { %v6028_v57 = vadd.f32 0.2548296, %v5964_v11  ;;  %v5965_v50 = vmul.f32 %v13209_v38, %v5901_v47  ;;  %9271 = vrcp.f32 %v5393_v16  ;;  %v13300_v18 = vmul.f32 %v6726_v15, %v13097_v54  ;;  %v5072_v15 = vpop.f32.mrf.mxu1 }
0x115b   : > { %v6475_v62 = vsub.f32 1.0, %v6411_v19  ;;  %v13303_v58 = vmul.f32 0.5, %v13141_v45  ;;  %v5774_v17 = vadd.f32 1.4214138, %v5710_v27  ;;  %v6600_v7 = vsub.f32 0.0, %v6472_v24 }
0x115c   : > { %v13305_v61 = vpop.eup %9263  ;;  %v5903_v14 = vadd.f32 -0.28449672, %v5839_v10  ;;  %v5395_v60 = vadd.f32 1.0, %v5331_v35  ;;  %v13308_v40 = vmul.f32 0.70710677, %v13290_v4  ;;  %v6090_v6 = vmul.f32 %v13182_v43, %v6026_v53 }
0x115d   : > { %9273 = vpow2.f32 %v6333_v55  ;;  %v6222_v30 = vmul.f32 %v6158_v13, %v13180_v0  ;;  %v6160_v54 = vsub.f32 0.0, %v13215_v23  ;;  %v6601_v11 = vsub.f32 0.0, %v6473_v2 }
0x115e   : > { %v6092_v45 = vmul.f32 %v13198_v5, %v6028_v57  ;;  %v6029_v47 = vadd.f32 0.2548296, %v5965_v50  ;;  %9275 = vrcp.f32 %v5395_v60  ;;  %v6603_v16 = vsub.f32 0.0, %v6475_v62 }
0x115f   : > { %v13315_v19 = vmul.f32 0.5, %v13154_v52  ;;  %v5838_v27 = vmul.f32 %v13259_v48, %v5774_v17  ;;  %v5584_v10 = vmul.f32 1.0614054, %v13305_v61  ;;  %v9266_v43 = vpop.eup %9265  ;;  %v6664_v0 = vsel %vm6536_vm13, %v6600_v7, %v6472_v24 }
0x1160   : > { %v5967_v55 = vmul.f32 %v13247_v25, %v5903_v14  ;;  %v13323_v53 = vand.u32 2147483647, %v13308_v40  ;;  %v13326_v5 = vadd.f32 %v5072_v15, %v11943_v32  ;;  %v9268_v13 = vpop.eup %9267  ;;  %v6410_v35 = vmul.f32 %v9266_v43, %v6090_v6 }
0x1161   : > { %v6331_v52 = vmul.f32 1.442695, %v6222_v30  ;;  %v13329_v57 = vmul.f32 0.5, %v13191_v34  ;;  %v6224_v50 = vmul.f32 %v6160_v54, %v13215_v23  ;;  %v6665_v46 = vsel %vm6537_vm14, %v6601_v11, %v6473_v2  ;;  %v4961_v2 = vpop.f32.mrf.mxu0 }
0x1162   : > { %v6412_v24 = vmul.f32 %v9268_v13, %v6092_v45  ;;  %v6093_v17 = vmul.f32 %v13209_v38, %v6029_v47  ;;  %v5330_v7 = vmul.f32 0.3275911, %v13323_v53  ;;  %v6728_v14 = vadd.f32 1.0, %v6664_v0 }
0x1163   : > { %v6667_v60 = vsel %vm6539_vm15, %v6603_v16, %v6475_v62  ;;  %v5902_v15 = vadd.f32 -0.28449672, %v5838_v27  ;;  %v5648_v6 = vadd.f32 -1.4531521, %v5584_v10  ;;  %v9270_v30 = vpop.eup %9269  ;;  %vm6538_vm0 = vcmp.lt.f32.partialorder %v13083_v28, 0.0 }
0x1164   : > { %v6031_v34 = vadd.f32 0.2548296, %v5967_v55  ;;  %v6161_v23 = vsub.f32 0.0, %v13256_v39  ;;  %v5394_v54 = vadd.f32 1.0, %v5330_v7  ;;  %v13341_v20 = vmul.f32 0.70710677, %v13326_v5 }
0x1165   : > { %v6729_v38 = vadd.f32 1.0, %v6665_v46  ;;  %v6474_v11 = vsub.f32 1.0, %v6410_v35  ;;  %vm6540_vm1 = vcmp.lt.f32.partialorder %v13094_v49, 0.0  ;;  %9277 = vpow2.f32 %v6331_v52 }
0x1166   : > { %v6335_v37 = vmul.f32 1.442695, %v6224_v50  ;;  %v6476_v62 = vsub.f32 1.0, %v6412_v24  ;;  %v6413_v45 = vmul.f32 %v9270_v30, %v6093_v17  ;;  %9279 = vrcp.f32 %v5394_v54  ;;  %v5074_v30 = vpop.f32.mrf.mxu1  ;;  %v4963_v54 = vpop.f32.mrf.mxu0 }
0x1167   : > { %v13345_v47 = vand.u32 2147483647, %v13341_v20  ;;  %v13347_v16 = vpop.eup %9271  ;;  %v6731_v27 = vadd.f32 1.0, %v6667_v60  ;;  %v5966_v10 = vmul.f32 %v13259_v48, %v5902_v15  ;;  %v5712_v43 = vmul.f32 %v13305_v61, %v5648_v6 }
0x1168   : > { %v13352_v0 = vadd.f32 %v4961_v2, %v14213_v31  ;;  %v13355_v55 = vmul.f32 %v6728_v14, %v13101_v9  ;;  %v6095_v13 = vmul.f32 %v13247_v25, %v6031_v34  ;;  %v6225_v35 = vmul.f32 %v6161_v23, %v13256_v39 }
0x1169   : > { %v5332_v52 = vmul.f32 0.3275911, %v13345_v47  ;;  %v13361_v50 = vmul.f32 %v6729_v38, %v13171_v44  ;;  %v6602_v46 = vsub.f32 0.0, %v6474_v11  ;;  %vm6541_vm2 = vcmp.lt.f32.partialorder %v13115_v51, 0.0 }
0x116a   : > { %9281 = vpow2.f32 %v6335_v37  ;;  %v13365_v24 = vmul.f32 0.5, %v13220_v36  ;;  %v9274_v17 = vpop.eup %9273  ;;  %v6604_v7 = vsub.f32 0.0, %v6476_v62  ;;  %v6477_v9 = vsub.f32 1.0, %v6413_v45 }
0x116b   : > { %14242 = vst [vmem:[#allocation66_spill] sm:$0xff] %v13361_v50  ;;  %v5585_v14 = vmul.f32 1.0614054, %v13347_v16  ;;  %v5396_v25 = vadd.f32 1.0, %v5332_v52  ;;  %v13368_v60 = vpop.eup %9275  ;;  %v13371_v39 = vmul.f32 %v6731_v27, %v13196_v56  ;;  %v6030_v44 = vadd.f32 0.2548296, %v5966_v10 }
0x116c   : > { %v5776_v15 = vadd.f32 1.4214138, %v5712_v43  ;;  %v13374_v6 = vmul.f32 0.70710677, %v13352_v0  ;;  %v6415_v34 = vmul.f32 %v9274_v17, %v6095_v13  ;;  %v6337_v36 = vmul.f32 1.442695, %v6225_v35 }
0x116d   : > { %14243 = vst [vmem:[#allocation45_spill] sm:$0xff] %v13371_v39  ;;  %v5587_v23 = vmul.f32 1.0614054, %v13368_v60  ;;  %9283 = vrcp.f32 %v5396_v25  ;;  %v6666_v2 = vsel %vm6538_vm0, %v6602_v46, %v6474_v11  ;;  %v13380_v38 = vmul.f32 0.5, %v13271_v29 }
0x116e   : > { %v6163_v56 = vsub.f32 0.0, %v13286_v12  ;;  %v13384_v37 = vand.u32 2147483647, %v13374_v6  ;;  %v6668_v45 = vsel %vm6540_vm1, %v6604_v7, %v6476_v62  ;;  %v6605_v27 = vsub.f32 0.0, %v6477_v9 }
0x116f   : > { %v5649_v10 = vadd.f32 -1.4531521, %v5585_v14  ;;  %v13389_v43 = vadd.f32 %v5074_v30, %v14190_v3  ;;  %vm6543_vm3 = vcmp.lt.f32.partialorder %v13151_v33, 0.0  ;;  %v6094_v28 = vmul.f32 %v13259_v48, %v6030_v44 }
0x1170   : > { %v5840_v29 = vmul.f32 %v13305_v61, %v5776_v15  ;;  %v5333_v11 = vmul.f32 0.3275911, %v13384_v37  ;;  %v13396_v13 = vadd.f32 %v4963_v54, %v14193_v21  ;;  %v6479_v35 = vsub.f32 1.0, %v6415_v34 }
0x1171   : > { %9285 = vpow2.f32 %v6337_v36  ;;  %v5651_v49 = vadd.f32 -1.4531521, %v5587_v23  ;;  %v13399_v62 = vmul.f32 0.70710677, %v13389_v43  ;;  %v6730_v52 = vadd.f32 1.0, %v6666_v2 }
0x1172   : > { %v6732_v46 = vadd.f32 1.0, %v6668_v45  ;;  %v6227_v17 = vmul.f32 %v6163_v56, %v13286_v12  ;;  %v5397_v7 = vadd.f32 1.0, %v5333_v11  ;;  %v9278_v14 = vpop.eup %9277  ;;  %v6669_v48 = vsel %vm6541_vm2, %v6605_v27, %v6477_v9 }
0x1173   : > { %v5713_v25 = vmul.f32 %v13347_v16, %v5649_v10  ;;  %v6162_v44 = vsub.f32 0.0, %v13323_v53  ;;  %v13407_v15 = vand.u32 2147483647, %v13399_v62  ;;  %v13409_v30 = vpop.eup %9279  ;;  %v6414_v34 = vmul.f32 %v9278_v14, %v6094_v28 }
0x1174   : > { %v5904_v36 = vadd.f32 -0.28449672, %v5840_v29  ;;  %9287 = vrcp.f32 %v5397_v7  ;;  %v13412_v23 = vmul.f32 0.70710677, %v13396_v13  ;;  %v6607_v12 = vsub.f32 0.0, %v6479_v35  ;;  %v5076_v7 = vpop.f32.mrf.mxu1 }
0x1175   : > { %v5715_v54 = vmul.f32 %v13368_v60, %v5651_v49  ;;  %v5586_v51 = vmul.f32 1.0614054, %v13409_v30  ;;  %v5335_v9 = vmul.f32 0.3275911, %v13407_v15  ;;  %v6733_v2 = vadd.f32 1.0, %v6669_v48 }
0x1176   : > { %v6341_v56 = vmul.f32 1.442695, %v6227_v17  ;;  %v13418_v45 = vmul.f32 0.5, %v13290_v4  ;;  %v13421_v27 = vand.u32 2147483647, %v13412_v23  ;;  %vm6542_vm4 = vcmp.lt.f32.partialorder %v13175_v26, 0.0 }
0x1177   : > { %v13423_v10 = vpop.eup %9281  ;;  %v5777_v28 = vadd.f32 1.4214138, %v5713_v25  ;;  %v5650_v29 = vadd.f32 -1.4531521, %v5586_v51  ;;  %v6226_v11 = vmul.f32 %v6162_v44, %v13323_v53  ;;  %v5399_v49 = vadd.f32 1.0, %v5335_v9 }
0x1178   : > { %v13428_v14 = vmul.f32 %v6730_v52, %v13233_v22  ;;  %v6478_v17 = vsub.f32 1.0, %v6414_v34  ;;  %v5968_v4 = vmul.f32 %v13305_v61, %v5904_v36  ;;  %v5334_v48 = vmul.f32 0.3275911, %v13421_v27 }
0x1179   : > { %v13433_v1 = vmul.f32 %v6732_v46, %v13245_v59  ;;  %v6671_v8 = vsel %vm6543_vm3, %v6607_v12, %v6479_v35  ;;  %v5779_v25 = vadd.f32 1.4214138, %v5715_v54  ;;  %9289 = vrcp.f32 %v5399_v49  ;;  %v4967_v35 = vpop.f32.mrf.mxu0 }
0x117a   : > { %v13437_v51 = vpop.eup %9283  ;;  %v13440_v53 = vmul.f32 %v6733_v2, %v13277_v42  ;;  %v5714_v22 = vmul.f32 %v13409_v30, %v5650_v29  ;;  %v5398_v52 = vadd.f32 1.0, %v5334_v48  ;;  %v13444_v44 = vadd.f32 %v5076_v7, %v11943_v32 }
0x117b   : > { %v5841_v34 = vmul.f32 %v13347_v16, %v5777_v28  ;;  %9291 = vpow2.f32 %v6341_v56  ;;  %v6339_v59 = vmul.f32 1.442695, %v6226_v11  ;;  %v5588_v33 = vmul.f32 1.0614054, %v13437_v51 }
0x117c   : > { %14244 = vst [vmem:[#allocation53_spill] sm:$0xff] %v13440_v53  ;;  %v6735_v46 = vadd.f32 1.0, %v6671_v8  ;;  %v6606_v36 = vsub.f32 0.0, %v6478_v17  ;;  %v6032_v12 = vadd.f32 0.2548296, %v5968_v4  ;;  %v5843_v42 = vmul.f32 %v13368_v60, %v5779_v25 }
0x117d   : > { %v13449_v54 = vmul.f32 0.70710677, %v13444_v44  ;;  %v5652_v9 = vadd.f32 -1.4531521, %v5588_v33  ;;  %v6164_v2 = vsub.f32 0.0, %v13345_v47  ;;  %9293 = vrcp.f32 %v5398_v52 }
0x117e   : > { %v13453_v29 = vpop.eup %9285  ;;  %v5778_v28 = vadd.f32 1.4214138, %v5714_v22  ;;  %v13461_v8 = vadd.f32 %v4967_v35, %v14213_v31  ;;  %v5905_v49 = vadd.f32 -0.28449672, %v5841_v34  ;;  %9295 = vpow2.f32 %v6339_v59 }
0x117f   : > { %v13458_v11 = vand.u32 2147483647, %v13449_v54  ;;  %v13464_v7 = vmul.f32 0.5, %v13326_v5  ;;  %v5716_v4 = vmul.f32 %v13437_v51, %v5652_v9  ;;  %v13468_v48 = vmul.f32 %v6735_v46, %v13303_v58 }
0x1180   : > { %14245 = vst [vmem:[#allocation54_spill] sm:$0xff] %v13461_v8  ;;  %v6670_v25 = vsel %vm6542_vm4, %v6606_v36, %v6478_v17  ;;  %v13474_v52 = vmul.f32 0.70710677, %v13461_v8  ;;  %v6096_v34 = vmul.f32 %v13305_v61, %v6032_v12  ;;  %v5907_v59 = vadd.f32 -0.28449672, %v5843_v42  ;;  %v5080_v36 = vpop.f32.mrf.mxu1 }
0x1181   : > { %14246 = vst [vmem:[#allocation64_spill] sm:$0xff] %v13468_v48  ;;  %v5336_v22 = vmul.f32 0.3275911, %v13458_v11  ;;  %v13476_v33 = vpop.eup %9287  ;;  %v6228_v5 = vmul.f32 %v6164_v2, %v13345_v47  ;;  %v6165_v35 = vsub.f32 0.0, %v13384_v37  ;;  %v5842_v58 = vmul.f32 %v13409_v30, %v5778_v28 }
0x1182   : > { %14247 = vst [vmem:[#allocation59_spill] sm:$0xff] %v13474_v52  ;;  %v5589_v46 = vmul.f32 1.0614054, %v13476_v33  ;;  %v13484_v17 = vand.u32 2147483647, %v13474_v52  ;;  %v13486_v9 = vadd.f32 1.0, %v6670_v25  ;;  %v5969_v56 = vmul.f32 %v13347_v16, %v5905_v49 }
0x1183   : > { %v5400_v26 = vadd.f32 1.0, %v5336_v22  ;;  %v5780_v8 = vadd.f32 1.4214138, %v5716_v4  ;;  %v6167_v61 = vsub.f32 0.0, %v13407_v15  ;;  %v6166_v47 = vsub.f32 0.0, %v13421_v27 }
0x1184   : > { %v5653_v12 = vadd.f32 -1.4531521, %v5589_v46  ;;  %v5337_v42 = vmul.f32 0.3275911, %v13484_v17  ;;  %v5971_v28 = vmul.f32 %v13368_v60, %v5907_v59  ;;  %v13496_v22 = vmul.f32 0.5, %v13352_v0 }
0x1185   : > { %9297 = vrcp.f32 %v5400_v26  ;;  %v13499_v25 = vadd.f32 %v5080_v36, %v14190_v3  ;;  %v5906_v4 = vadd.f32 -0.28449672, %v5842_v58  ;;  %v6343_v46 = vmul.f32 1.442695, %v6228_v5 }
0x1186   : > { %v13501_v49 = vpop.eup %9289  ;;  %v5717_v52 = vmul.f32 %v13476_v33, %v5653_v12  ;;  %v6229_v26 = vmul.f32 %v6165_v35, %v13384_v37  ;;  %v6033_v50 = vadd.f32 0.2548296, %v5969_v56  ;;  %v5844_v53 = vmul.f32 %v13437_v51, %v5780_v8 }
0x1187   : > { %14248 = vst [vmem:[#allocation55_spill] sm:$0xff] %v13499_v25  ;;  %v5591_v2 = vmul.f32 1.0614054, %v13501_v49  ;;  %v6231_v59 = vmul.f32 %v6167_v61, %v13407_v15  ;;  %v6230_v36 = vmul.f32 %v6166_v47, %v13421_v27  ;;  %v6168_v48 = vsub.f32 0.0, %v13458_v11 }
0x1188   : > { %v9292_v0 = vpop.eup %9291  ;;  %v5781_v39 = vadd.f32 1.4214138, %v5717_v52  ;;  %v5401_v63 = vadd.f32 1.0, %v5337_v42  ;;  %v13511_v5 = vmul.f32 %v13423_v10, %v6096_v34  ;;  %v6035_v58 = vadd.f32 0.2548296, %v5971_v28  ;;  %v4969_v34 = vpop.f32.mrf.mxu0 }
0x1189   : > { %v5655_v12 = vadd.f32 -1.4531521, %v5591_v2  ;;  %v13514_v37 = vmul.f32 0.70710677, %v13499_v25  ;;  %v5970_v8 = vmul.f32 %v13409_v30, %v5906_v4  ;;  %9299 = vpow2.f32 %v6343_v46 }
0x118a   : > { %v13516_v56 = vpop.eup %9293  ;;  %v5845_v15 = vmul.f32 %v13476_v33, %v5781_v39  ;;  %v6345_v52 = vmul.f32 1.442695, %v6229_v26  ;;  %v5908_v27 = vadd.f32 -0.28449672, %v5844_v53  ;;  %v6349_v61 = vmul.f32 1.442695, %v6231_v59 }
0x118b   : > { %v5719_v35 = vmul.f32 %v13501_v49, %v5655_v12  ;;  %v5590_v10 = vmul.f32 1.0614054, %v13516_v56  ;;  %v9296_v47 = vpop.eup %9295  ;;  %v6097_v42 = vmul.f32 %v13347_v16, %v6033_v50  ;;  %v6347_v2 = vmul.f32 1.442695, %v6230_v36  ;;  %v14249_v12 = vld [vmem:[#allocation60_spill] sm:$0xff] }
0x118c   : > { %v6232_v28 = vmul.f32 %v6168_v48, %v13458_v11  ;;  %9301 = vrcp.f32 %v5401_v63  ;;  %v6099_v4 = vmul.f32 %v13368_v60, %v6035_v58  ;;  %v13526_v39 = vand.u32 2147483647, %v13514_v37 }
0x118d   : > { %v5783_v46 = vadd.f32 1.4214138, %v5719_v35  ;;  %v5654_v25 = vadd.f32 -1.4531521, %v5590_v10  ;;  %v6034_v53 = vadd.f32 0.2548296, %v5970_v8  ;;  %9303 = vpow2.f32 %v6345_v52 }
0x118e   : > { %v5909_v26 = vadd.f32 -0.28449672, %v5845_v15  ;;  %v13529_v59 = vadd.f32 %v4969_v34, %v14193_v21  ;;  %vm6544_vm5 = vcmp.lt.f32.partialorder %v14249_v12, 0.0  ;;  %v5972_v16 = vmul.f32 %v13437_v51, %v5908_v27  ;;  %v5082_v34 = vpop.f32.mrf.mxu1 }
0x118f   : > { %v5847_v50 = vmul.f32 %v13501_v49, %v5783_v46  ;;  %9305 = vpow2.f32 %v6349_v61  ;;  %v5718_v63 = vmul.f32 %v13516_v56, %v5654_v25  ;;  %v6480_v60 = vsub.f32 1.0, %v13511_v5 }
0x1190   : > { %v13537_v11 = vmul.f32 %v13453_v29, %v6097_v42  ;;  %9307 = vpow2.f32 %v6347_v2  ;;  %v6351_v48 = vmul.f32 1.442695, %v6232_v28  ;;  %v6419_v58 = vmul.f32 %v9292_v0, %v6099_v4  ;;  %v14250_v2 = vld [vmem:[#allocation52_spill] sm:$0xff] }
0x1191   : > { %v5911_v8 = vadd.f32 -0.28449672, %v5847_v50  ;;  %v5782_v15 = vadd.f32 1.4214138, %v5718_v63  ;;  %v5339_v52 = vmul.f32 0.3275911, %v13526_v39  ;;  %v6098_v27 = vmul.f32 %v13409_v30, %v6034_v53 }
0x1192   : > { %v13539_v36 = vpop.eup %9297  ;;  %v5973_v35 = vmul.f32 %v13476_v33, %v5909_v26  ;;  %v13546_v5 = vmul.f32 0.70710677, %v13529_v59  ;;  %v13550_v29 = vmul.f32 %v13486_v9, %v13315_v19  ;;  %v6036_v61 = vadd.f32 0.2548296, %v5972_v16 }
0x1193   : > { %v5592_v25 = vmul.f32 1.0614054, %v13539_v36  ;;  %v5975_v0 = vmul.f32 %v13501_v49, %v5911_v8  ;;  %v5846_v10 = vmul.f32 %v13516_v56, %v5782_v15  ;;  %v6608_v42 = vsub.f32 0.0, %v6480_v60 }
0x1194   : > { %v6481_v30 = vsub.f32 1.0, %v13537_v11  ;;  %vm6545_vm6 = vcmp.lt.f32.partialorder %v14250_v2, 0.0  ;;  %vm6547_vm7 = vcmp.lt.f32.partialorder %v13280_v41, 0.0  ;;  %v13558_v4 = vand.u32 2147483647, %v13546_v5 }
0x1195   : > { %v5656_v28 = vadd.f32 -1.4531521, %v5592_v25  ;;  %v6483_v46 = vsub.f32 1.0, %v6419_v58  ;;  %v5910_v19 = vadd.f32 -0.28449672, %v5846_v10  ;;  %9309 = vpow2.f32 %v6351_v48 }
0x1196   : > { %v5403_v9 = vadd.f32 1.0, %v5339_v52  ;;  %v6418_v53 = vmul.f32 %v9296_v47, %v6098_v27  ;;  %v6037_v26 = vadd.f32 0.2548296, %v5973_v35  ;;  %v13562_v50 = vadd.f32 %v5082_v34, %v11943_v32  ;;  %v9300_v63 = vpop.eup %9299 }
0x1197   : > { %v5720_v16 = vmul.f32 %v13539_v36, %v5656_v28  ;;  %v6100_v11 = vmul.f32 %v13437_v51, %v6036_v61  ;;  %v6039_v8 = vadd.f32 0.2548296, %v5975_v0  ;;  %v5974_v15 = vmul.f32 %v13516_v56, %v5910_v19 }
0x1198   : > { %14251 = vst [vmem:[#allocation47_spill] sm:$0xff] %v13562_v50  ;;  %v5338_v25 = vmul.f32 0.3275911, %v13558_v4  ;;  %v6672_v58 = vsel %vm6544_vm5, %v6608_v42, %v6480_v60  ;;  %v6609_v48 = vsub.f32 0.0, %v6481_v30  ;;  %v13570_v47 = vmul.f32 0.5, %v13389_v43 }
0x1199   : > { %v5784_v52 = vadd.f32 1.4214138, %v5720_v16  ;;  %v13572_v27 = vpop.eup %9301  ;;  %v6611_v35 = vsub.f32 0.0, %v6483_v46  ;;  %vm6546_vm8 = vcmp.lt.f32.partialorder %v13308_v40, 0.0  ;;  %v6038_v10 = vadd.f32 0.2548296, %v5974_v15 }
0x119a   : > { %9311 = vrcp.f32 %v5403_v9  ;;  %v5402_v51 = vadd.f32 1.0, %v5338_v25  ;;  %v6482_v61 = vsub.f32 1.0, %v6418_v53  ;;  %v6101_v0 = vmul.f32 %v13476_v33, %v6037_v26  ;;  %v9304_v60 = vpop.eup %9303  ;;  %v4971_v26 = vpop.f32.mrf.mxu0 }
0x119b   : > { %v5848_v34 = vmul.f32 %v13539_v36, %v5784_v52  ;;  %v13578_v12 = vmul.f32 0.70710677, %v13562_v50  ;;  %v13580_v43 = vmul.f32 %v9300_v63, %v6100_v11  ;;  %v6103_v42 = vmul.f32 %v13501_v49, %v6039_v8 }
0x119c   : > { %v13584_v28 = vmul.f32 0.5, %v13396_v13  ;;  %9313 = vrcp.f32 %v5402_v51  ;;  %v9306_v19 = vpop.eup %9305  ;;  %v6736_v9 = vadd.f32 1.0, %v6672_v58  ;;  %v6102_v53 = vmul.f32 %v13516_v56, %v6038_v10 }
0x119d   : > { %v5912_v16 = vadd.f32 -0.28449672, %v5848_v34  ;;  %v5593_v33 = vmul.f32 1.0614054, %v13572_v27  ;;  %v9308_v15 = vpop.eup %9307  ;;  %v6673_v25 = vsel %vm6545_vm6, %v6609_v48, %v6481_v30  ;;  %v6675_v63 = vsel %vm6547_vm7, %v6611_v35, %v6483_v46 }
0x119e   : > { %v6169_v49 = vsub.f32 0.0, %v13484_v17  ;;  %v13594_v13 = vand.u32 2147483647, %v13578_v12  ;;  %v6610_v11 = vsub.f32 0.0, %v6482_v61  ;;  %vm6548_vm9 = vcmp.lt.f32.partialorder %v13341_v20, 0.0 }
0x119f   : > { %v13597_v56 = vmul.f32 %v9304_v60, %v6101_v0  ;;  %v5976_v8 = vmul.f32 %v13539_v36, %v5912_v16  ;;  %v6171_v58 = vsub.f32 0.0, %v13526_v39  ;;  %v6484_v2 = vsub.f32 1.0, %v13580_v43  ;;  %v5084_v43 = vpop.f32.mrf.mxu1 }
0x11a0   : > { %v13602_v30 = vmul.f32 %v9306_v19, %v6103_v42  ;;  %v5340_v41 = vmul.f32 0.3275911, %v13594_v13  ;;  %v13606_v46 = vadd.f32 %v4971_v26, %v14213_v31  ;;  %v13609_v48 = vmul.f32 %v6736_v9, %v13329_v57  ;;  %v4973_v42 = vpop.f32.mrf.mxu0 }
0x11a1   : > { %v13611_v52 = vmul.f32 %v9308_v15, %v6102_v53  ;;  %v6040_v35 = vadd.f32 0.2548296, %v5976_v8  ;;  %v5657_v10 = vadd.f32 -1.4531521, %v5593_v33  ;;  %v6737_v51 = vadd.f32 1.0, %v6673_v25 }
0x11a2   : > { %v6739_v0 = vadd.f32 1.0, %v6675_v63  ;;  %vm6549_vm10 = vcmp.lt.f32.partialorder %v13374_v6, 0.0  ;;  %v6233_v34 = vmul.f32 %v6169_v49, %v13484_v17  ;;  %v5404_v60 = vadd.f32 1.0, %v5340_v41  ;;  %v9310_v19 = vpop.eup %9309 }
0x11a3   : > { %v6674_v31 = vsel %vm6546_vm8, %v6610_v11, %v6482_v61  ;;  %v6485_v57 = vsub.f32 1.0, %v13597_v56  ;;  %vm6551_vm11 = vcmp.lt.f32.partialorder %v13399_v62, 0.0  ;;  %v6104_v9 = vmul.f32 %v13539_v36, %v6040_v35  ;;  %v13626_v26 = vpop.f32.mrf.mxu0 }
0x11a4   : > { %v6235_v53 = vmul.f32 %v6171_v58, %v13526_v39  ;;  %v6612_v16 = vsub.f32 0.0, %v6484_v2  ;;  %v6487_v33 = vsub.f32 1.0, %v13602_v30  ;;  %vm6550_vm12 = vcmp.lt.f32.partialorder %v13412_v23, 0.0 }
0x11a5   : > { %9315 = vrcp.f32 %v5404_v60  ;;  %v13624_v17 = vmul.f32 0.70710677, %v13606_v46  ;;  %v6486_v40 = vsub.f32 1.0, %v13611_v52  ;;  %v6424_v61 = vmul.f32 %v9310_v19, %v6104_v9  ;;  %v13642_v11 = vpop.f32.mrf.mxu0 }
0x11a6   : > { %v5721_v15 = vmul.f32 %v13572_v27, %v5657_v10  ;;  %v13631_v36 = vadd.f32 %v5084_v43, %v14190_v3  ;;  %v13634_v39 = vmul.f32 %v6737_v51, %v13365_v24  ;;  %v13637_v25 = vmul.f32 0.5, %v13444_v44  ;;  %v5086_v24 = vpop.f32.mrf.mxu1 }
0x11a7   : > { %v6353_v63 = vmul.f32 1.442695, %v6233_v34  ;;  %v13640_v49 = vand.u32 2147483647, %v13624_v17  ;;  %v13644_v56 = vpop.eup %9311  ;;  %v13647_v8 = vmul.f32 %v6739_v0, %v13380_v38  ;;  %v6738_v58 = vadd.f32 1.0, %v6674_v31  ;;  %v13654_v10 = vpop.f32.mrf.mxu0 }
0x11a8   : > { %v6613_v3 = vsub.f32 0.0, %v6485_v57  ;;  %v6170_v30 = vsub.f32 0.0, %v13558_v4  ;;  %v6676_v44 = vsel %vm6548_vm9, %v6612_v16, %v6484_v2  ;;  %v6615_v41 = vsub.f32 0.0, %v6487_v33  ;;  %v13661_v43 = vpop.f32.mrf.mxu1 }
0x11a9   : > { %vm6552_vm13 = vcmp.lt.f32.partialorder %v13449_v54, 0.0  ;;  %v6357_v52 = vmul.f32 1.442695, %v6235_v53  ;;  %v5341_v35 = vmul.f32 0.3275911, %v13640_v49  ;;  %v13656_v51 = vpop.eup %9313  ;;  %v6614_v38 = vsub.f32 0.0, %v6486_v40  ;;  %v13665_v31 = vpop.f32.mrf.mxu0 }
0x11aa   : > { %v6488_v0 = vsub.f32 1.0, %v6424_v61  ;;  %v5785_v34 = vadd.f32 1.4214138, %v5721_v15  ;;  %v13659_v60 = vmul.f32 0.70710677, %v13631_v36  ;;  %9317 = vpow2.f32 %v6353_v63 }
0x11ab   : > { %v5595_v20 = vmul.f32 1.0614054, %v13644_v56  ;;  %v5594_v2 = vmul.f32 1.0614054, %v13656_v51  ;;  %v5405_v19 = vadd.f32 1.0, %v5341_v35  ;;  %v6740_v9 = vadd.f32 1.0, %v6676_v44  ;;  %v13678_v35 = vpop.f32.mrf.mxu0 }
0x11ac   : > { %v6677_v53 = vsel %vm6549_vm10, %v6613_v3, %v6485_v57  ;;  %v6234_v16 = vmul.f32 %v6170_v30, %v13558_v4  ;;  %v13671_v61 = vand.u32 2147483647, %v13659_v60  ;;  %v6679_v15 = vsel %vm6551_vm11, %v6615_v41, %v6487_v33  ;;  %v13686_v3 = vpop.f32.mrf.mxu1 }
0x11ad   : > { %v5658_v63 = vadd.f32 -1.4531521, %v5594_v2  ;;  %9319 = vrcp.f32 %v5405_v19  ;;  %v13676_v50 = vadd.f32 %v4973_v42, %v14193_v21  ;;  %v13681_v44 = vmul.f32 %v6738_v58, %v13418_v45  ;;  %v13689_v21 = vpop.f32.mrf.mxu0 }
0x11ae   : > { %v6678_v6 = vsel %vm6550_vm12, %v6614_v38, %v6486_v40  ;;  %v6616_v4 = vsub.f32 0.0, %v6488_v0  ;;  %v5343_v57 = vmul.f32 0.3275911, %v13671_v61  ;;  %v6741_v62 = vadd.f32 1.0, %v6677_v53  ;;  %v13710_v53 = vpop.f32.mrf.mxu1 }
0x11af   : > { %v5849_v33 = vmul.f32 %v13572_v27, %v5785_v34  ;;  %v5659_v30 = vadd.f32 -1.4531521, %v5595_v20  ;;  %9321 = vpow2.f32 %v6357_v52  ;;  %v13692_v42 = vmul.f32 %v6740_v9, %v13464_v7  ;;  %v13699_v19 = vpop.f32.mrf.mxu0  ;;  %v14253_v20 = vld [vmem:[#allocation65_spill] sm:$0xff] }
0x11b0   : > { %v6743_v45 = vadd.f32 1.0, %v6679_v15  ;;  %v6172_v58 = vsub.f32 0.0, %v13594_v13  ;;  %v5407_v23 = vadd.f32 1.0, %v5343_v57  ;;  %v6742_v40 = vadd.f32 1.0, %v6678_v6 }
0x11b1   : > { %v5722_v41 = vmul.f32 %v13656_v51, %v5658_v63  ;;  %v6355_v38 = vmul.f32 1.442695, %v6234_v16  ;;  %v13697_v2 = vmul.f32 0.70710677, %v13676_v50  ;;  %v6680_v52 = vsel %vm6552_vm13, %v6616_v4, %v6488_v0 }
0x11b2   : > { %v13701_v34 = vpop.eup %9315  ;;  %9323 = vrcp.f32 %v5407_v23  ;;  %v13706_v7 = vadd.f32 %v5086_v24, %v11943_v32  ;;  %v6834_v9 = vpack.c.bf16 %v13300_v18, %v14253_v20  ;;  %v13713_v16 = vmul.f32 %v6741_v62, %v13496_v22  ;;  %v13725_v18 = vpop.f32.mrf.mxu0  ;;  %v14254_v62 = vld [vmem:[#allocation61_spill] sm:$0xff]  ;;  %v14256_v23 = vld [vmem:[#allocation62_spill] sm:$0xff] }
0x11b3   : > { %v5913_v15 = vadd.f32 -0.28449672, %v5849_v33  ;;  %v5723_v63 = vmul.f32 %v13644_v56, %v5659_v30  ;;  %v5596_v6 = vmul.f32 1.0614054, %v13701_v34  ;;  %v13718_v54 = vmul.f32 %v6743_v45, %v13570_v47  ;;  %v14255_v30 = vld [vmem:[#allocation43_spill] sm:$0xff] }
0x11b4   : > { %14252 = vst [vmem:[#allocation46_spill] sm:$0xff] %v13706_v7  ;;  %v6236_v0 = vmul.f32 %v6172_v58, %v13594_v13  ;;  %v6173_v32 = vsub.f32 0.0, %v13640_v49  ;;  %v13723_v24 = vand.u32 2147483647, %v13697_v2  ;;  %7176 = vmatprep.mubr.bf16.mxu0 %v6834_v9  ;;  %v6744_v22 = vadd.f32 1.0, %v6680_v52  ;;  %v13739_v52 = vpop.f32.mrf.mxu1 }
0x11b5   : > { %v5786_v4 = vadd.f32 1.4214138, %v5722_v41  ;;  %v5660_v57 = vadd.f32 -1.4531521, %v5596_v6  ;;  %v6836_v33 = vpack.c.bf16 %v13355_v55, %v14254_v62  ;;  %v14257_v47 = vpack.c.bf16 %v14255_v30, %v14256_v23 }
0x11b6   : > { %v6806_v13 = vmul.f32 %v6742_v40, %v13584_v28  ;;  %v5342_v45 = vmul.f32 0.3275911, %v13723_v24  ;;  %v13735_v58 = vmul.f32 0.70710677, %v13706_v7  ;;  %v6838_v20 = vpack.c.bf16 %v13550_v29, %v13428_v14  ;;  %v14258_v14 = vld [vmem:[#allocation44_spill] sm:$0xff] }
0x11b7   : > { %7177 = vmatmul.mubr.bf16.gmra.mxu0 %v14257_v47  ;;  %v5787_v41 = vadd.f32 1.4214138, %v5723_v63  ;;  %v5724_v9 = vmul.f32 %v13701_v34, %v5660_v57  ;;  %v6175_v55 = vsub.f32 0.0, %v13671_v61  ;;  %7273 = vmatprep.mubr.bf16.mxu1 %v6836_v33  ;;  %v6840_v6 = vpack.c.bf16 %v13609_v48, %v13433_v1  ;;  %v13745_v28 = vpop.eup %9317  ;;  %v14259_v29 = vld [vmem:[#allocation56_spill] sm:$0xff]  ;;  %v13754_v57 = vpop.f32.mrf.mxu0 }
0x11b8   : > { %v6359_v40 = vmul.f32 1.442695, %v6236_v0  ;;  %v6237_v62 = vmul.f32 %v6173_v32, %v13640_v49  ;;  %v5406_v30 = vadd.f32 1.0, %v5342_v45  ;;  %v13749_v23 = vand.u32 2147483647, %v13735_v58  ;;  %7184 = vmatprep.mubr.bf16.mxu0 %v6838_v20  ;;  %v13765_v45 = vpop.f32.mrf.mxu1 }
0x11b9   : > { %v14260_v63 = vpack.c.bf16 %v14258_v14, %v14259_v29  ;;  %v6808_v1 = vmul.f32 %v6744_v22, %v13637_v25  ;;  %v5850_v48 = vmul.f32 %v13656_v51, %v5786_v4  ;;  %9325 = vpow2.f32 %v6355_v38 }
0x11ba   : > { %v13760_v49 = vpop.eup %9319  ;;  %v5977_v0 = vmul.f32 %v13572_v27, %v5913_v15  ;;  %9327 = vrcp.f32 %v5406_v30  ;;  %v5344_v32 = vmul.f32 0.3275911, %v13749_v23  ;;  %v6842_v47 = vpack.c.bf16 %v6806_v13, %v13681_v44  ;;  %v8024_v30 = vpop.f32.mrf.mxu0 }
0x11bb   : > { %7274 = vmatmul.mubr.bf16.gmra.mxu1 %v14260_v63  ;;  %v5851_v20 = vmul.f32 %v13644_v56, %v5787_v41  ;;  %v5788_v14 = vadd.f32 1.4214138, %v5724_v9  ;;  %v5597_v25 = vmul.f32 1.0614054, %v13760_v49  ;;  %v6239_v22 = vmul.f32 %v6175_v55, %v13671_v61  ;;  %v14261_v63 = vld [vmem:[#allocation53_spill] sm:$0xff]  ;;  %v14262_v41 = vld [vmem:[#allocation66_spill] sm:$0xff] }
0x11bc   : > { %7281 = vmatprep.mubr.bf16.mxu1 %v6840_v6  ;;  %v13770_v38 = vpop.eup %9321  ;;  %v6843_v4 = vpack.c.bf16 %v13718_v54, %v13647_v8  ;;  %9329 = vpow2.f32 %v6359_v40  ;;  %v6361_v15 = vmul.f32 1.442695, %v6237_v62  ;;  %v5408_v6 = vadd.f32 1.0, %v5344_v32  ;;  %v14264_v61 = vld [vmem:[#allocation58_spill] sm:$0xff]  ;;  %v14265_v55 = vld [vmem:[#allocation63_spill] sm:$0xff] }
0x11bd   : > { %v5914_v29 = vadd.f32 -0.28449672, %v5850_v48  ;;  %v5661_v44 = vadd.f32 -1.4531521, %v5597_v25  ;;  %v6174_v13 = vsub.f32 0.0, %v13723_v24  ;;  %v14263_v9 = vpack.c.bf16 %v14261_v63, %v14262_v41  ;;  %v8088_v48 = vpop.f32.mrf.mxu1 }
0x11be   : > { %v6844_v33 = vpack.c.bf16 %v6808_v1, %v13692_v42  ;;  %9331 = vrcp.f32 %v5408_v6  ;;  %v6820_v7 = vpack.c.bf16 %v14265_v55, %v14264_v61  ;;  %v13783_v40 = vadd.f32 %v13642_v11, %v13626_v26  ;;  %v14266_v26 = vld [vmem:[#allocation64_spill] sm:$0xff]  ;;  %v14267_v11 = vld [vmem:[#allocation45_spill] sm:$0xff] }
0x11bf   : > { %7185 = vmatmul.mubr.bf16.gmra.mxu0 %v14263_v9  ;;  %v13787_v62 = vadd.f32 %v13665_v31, %v13654_v10  ;;  %v13789_v32 = vpop.eup %9323  ;;  %v5915_v25 = vadd.f32 -0.28449672, %v5851_v20  ;;  %v5852_v63 = vmul.f32 %v13701_v34, %v5788_v14  ;;  %v5725_v42 = vmul.f32 %v13760_v49, %v5661_v44  ;;  %v8026_v31 = vpop.f32.mrf.mxu0 }
0x11c0   : > { %7192 = vmatprep.mubr.bf16.mxu0 %v6842_v47  ;;  %v6365_v1 = vmul.f32 1.442695, %v6239_v22  ;;  %v13793_v47 = vadd.f32 0.2548296, %v5977_v0  ;;  %9333 = vpow2.f32 %v6361_v15  ;;  %v5599_v6 = vmul.f32 1.0614054, %v13789_v32 }
0x11c1   : > { %v14268_v41 = vpack.c.bf16 %v14266_v26, %v14267_v11  ;;  %v8019_v10 = vadd.f32 %v13689_v21, %v13678_v35  ;;  %v5978_v20 = vmul.f32 %v13656_v51, %v5914_v29  ;;  %v5789_v9 = vadd.f32 1.4214138, %v5725_v42  ;;  %v13807_v0 = vld [vmem:[%s14269_s15] ss:$0 sm:$0xff]  ;;  %v8090_v29 = vpop.f32.mrf.mxu1 }
0x11c2   : > { %v6238_v14 = vmul.f32 %v6174_v13, %v13723_v24  ;;  %v6176_v22 = vsub.f32 0.0, %v13749_v23  ;;  %v5663_v15 = vadd.f32 -1.4531521, %v5599_v6  ;;  %v8083_v35 = vadd.f32 %v13686_v3, %v13661_v43 }
0x11c3   : > { %7282 = vmatmul.mubr.bf16.gmra.mxu1 %v14268_v41  ;;  %v7155_v44 = vadd.f32 %v8019_v10, %v13807_v0  ;;  %v8022_v21 = vadd.f32 %v13725_v18, %v13699_v19  ;;  %v5979_v24 = vmul.f32 %v13644_v56, %v5915_v25  ;;  %v5916_v13 = vadd.f32 -0.28449672, %v5852_v63  ;;  %v8027_v41 = vpop.f32.mrf.mxu0 }
0x11c4   : > { %7289 = vmatprep.mubr.bf16.mxu1 %v6844_v33  ;;  %v5853_v33 = vmul.f32 %v13760_v49, %v5789_v9  ;;  %9335 = vpow2.f32 %v6365_v1  ;;  %v5727_v42 = vmul.f32 %v13789_v32, %v5663_v15  ;;  %v8086_v11 = vadd.f32 %v13739_v52, %v13710_v53  ;;  %v14271_v9 = vld [vmem:[#allocation29_spill] sm:$0xff] }
0x11c5   : > { %v7252_v26 = vadd.f32 %v8083_v35, %v7155_v44  ;;  %v7158_v6 = vadd.f32 %v8022_v21, %v13807_v0  ;;  %v6042_v43 = vadd.f32 0.2548296, %v5978_v20  ;;  %v6363_v10 = vmul.f32 1.442695, %v6238_v14  ;;  %v8091_v35 = vpop.f32.mrf.mxu1 }
0x11c6   : > { %v5917_v3 = vadd.f32 -0.28449672, %v5853_v33  ;;  %v14270_v19 = vpack.c.bf16 %v13713_v16, %v13634_v39  ;;  %v8025_v18 = vadd.f32 %v8024_v30, %v13754_v57  ;;  %v9326_v25 = vpop.eup %9325  ;;  %v5791_v63 = vadd.f32 1.4214138, %v5727_v42 }
0x11c7   : > { %v6240_v1 = vmul.f32 %v6176_v22, %v13749_v23  ;;  %v7308_v15 = vadd.f32 %v7252_v26, %v14271_v9  ;;  %v7255_v44 = vadd.f32 %v8086_v11, %v7158_v6  ;;  %v13826_v53 = vpop.eup %9327  ;;  %v8089_v39 = vadd.f32 %v8088_v48, %v13765_v45  ;;  %v14272_v23 = vld [vmem:[#allocation30_spill] sm:$0xff]  ;;  %v14273_v6 = vld [vmem:[#allocation31_spill] sm:$0xff] }
0x11c8   : > { %7193 = vmatmul.mubr.bf16.gmra.mxu0 %v14270_v19  ;;  %v5981_v52 = vmul.f32 %v13760_v49, %v5917_v3  ;;  %v7163_v20 = vadd.f32 %v8025_v18, %v13807_v0  ;;  %v8028_v16 = vadd.f32 %v8027_v41, %v8026_v31  ;;  %v5980_v57 = vmul.f32 %v13701_v34, %v5916_v13 }
0x11c9   : > { %v5855_v30 = vmul.f32 %v13789_v32, %v5791_v63  ;;  %v5598_v14 = vmul.f32 1.0614054, %v13826_v53  ;;  %7324 = vst [vmem:[%s13838_s25 + $0x10] sm:$0xff] %v7308_v15  ;;  %v7309_v22 = vadd.f32 %v7255_v44, %v14272_v23  ;;  %v9330_v21 = vpop.eup %9329  ;;  %v8092_v13 = vadd.f32 %v8091_v35, %v8090_v29  ;;  %v14274_v63 = vld [vmem:[#allocation33_spill] sm:$0xff] }
0x11ca   : > { %v6045_v45 = vadd.f32 0.2548296, %v5981_v52  ;;  %v7260_v48 = vadd.f32 %v8089_v39, %v7163_v20  ;;  %v7166_v31 = vadd.f32 %v8028_v16, %v13807_v0  ;;  %v6106_v33 = vmul.f32 %v13656_v51, %v6042_v43 }
0x11cb   : > { %7290 = vmatmul.mubr.bf16.gmra.mxu1 %v6843_v4  ;;  %v5919_v42 = vadd.f32 -0.28449672, %v5855_v30  ;;  %v5662_v26 = vadd.f32 -1.4531521, %v5598_v14  ;;  %9337 = vpow2.f32 %v6363_v10  ;;  %7325 = vst [vmem:[%s13838_s25 + $0x18] sm:$0xff] %v7309_v22  ;;  %v13845_v8 = vpop.eup %9331  ;;  %v6105_v10 = vmul.f32 %v13572_v27, %v13793_v47 }
0x11cc   : > { %v6109_v54 = vmul.f32 %v13760_v49, %v6045_v45  ;;  %v6367_v4 = vmul.f32 1.442695, %v6240_v1  ;;  %v7310_v11 = vadd.f32 %v7260_v48, %v14273_v6  ;;  %v7263_v41 = vadd.f32 %v8092_v13, %v7166_v31 }
0x11cd   : > { %v6044_v3 = vadd.f32 0.2548296, %v5980_v57  ;;  %v5983_v19 = vmul.f32 %v13789_v32, %v5919_v42  ;;  %v5726_v29 = vmul.f32 %v13826_v53, %v5662_v26  ;;  %v5600_v51 = vmul.f32 1.0614054, %v13845_v8  ;;  %v9334_v43 = vpop.eup %9333  ;;  %v14275_v42 = vld [vmem:[#allocation59_spill] sm:$0xff] }
0x11ce   : > { %v6043_v18 = vadd.f32 0.2548296, %v5979_v24  ;;  %7326 = vst [vmem:[%s13838_s25 + $0x20] sm:$0xff] %v7310_v11  ;;  %v7311_v49 = vadd.f32 %v7263_v41, %v14274_v63  ;;  %v6429_v1 = vmul.f32 %v9334_v43, %v6109_v54  ;;  %v6426_v35 = vmul.f32 %v9326_v25, %v6106_v33  ;;  %v8029_v57 = vpop.f32.mrf.mxu0 }
0x11cf   : > { %v6047_v9 = vadd.f32 0.2548296, %v5983_v19  ;;  %v5790_v15 = vadd.f32 1.4214138, %v5726_v29  ;;  %v5664_v44 = vadd.f32 -1.4531521, %v5600_v51  ;;  %9339 = vpow2.f32 %v6367_v4  ;;  %v8093_v25 = vpop.f32.mrf.mxu1 }
0x11d0   : > { %7327 = vst [vmem:[%s13838_s25 + $0x28] sm:$0xff] %v7311_v49  ;;  %v6108_v20 = vmul.f32 %v13701_v34, %v6044_v3  ;;  %v6425_v47 = vmul.f32 %v13745_v28, %v6105_v10  ;;  %v6107_v24 = vmul.f32 %v13644_v56, %v6043_v18  ;;  %v6493_v30 = vsub.f32 1.0, %v6429_v1  ;;  %v8030_v45 = vpop.f32.mrf.mxu0 }
0x11d1   : > { %v9336_v52 = vpop.eup %9335  ;;  %v6111_v39 = vmul.f32 %v13789_v32, %v6047_v9  ;;  %v5854_v16 = vmul.f32 %v13826_v53, %v5790_v15  ;;  %v5728_v27 = vmul.f32 %v13845_v8, %v5664_v44  ;;  %v6490_v48 = vsub.f32 1.0, %v6426_v35  ;;  %v8094_v13 = vpop.f32.mrf.mxu1 }
0x11d2   : > { %v6428_v31 = vmul.f32 %v9330_v21, %v6108_v20  ;;  %v6489_v33 = vsub.f32 1.0, %v6425_v47  ;;  %vm6553_vm14 = vcmp.lt.f32.partialorder %v14275_v42, 0.0  ;;  %v6427_v28 = vmul.f32 %v13770_v38, %v6107_v24  ;;  %v8032_v26 = vpop.f32.mrf.mxu0 }
0x11d3   : > { %v5918_v14 = vadd.f32 -0.28449672, %v5854_v16  ;;  %v5792_v23 = vadd.f32 1.4214138, %v5728_v27  ;;  %v6431_v22 = vmul.f32 %v9336_v52, %v6111_v39  ;;  %v8031_v56 = vadd.f32 %v8030_v45, %v8029_v57  ;;  %v8096_v11 = vpop.f32.mrf.mxu1  ;;  %v14276_v39 = vld [vmem:[#allocation32_spill] sm:$0xff] }
0x11d4   : > { %vm6554_vm15 = vcmp.lt.f32.partialorder %v13546_v5, 0.0  ;;  %v6621_v54 = vsub.f32 0.0, %v6493_v30  ;;  %vm6557_vm0 = vcmp.lt.f32.partialorder %v13624_v17, 0.0  ;;  %v8095_v19 = vadd.f32 %v8094_v13, %v8093_v25  ;;  %v8033_v29 = vpop.f32.mrf.mxu0 }
0x11d5   : > { %v5982_v34 = vmul.f32 %v13826_v53, %v5918_v14  ;;  %v5856_v32 = vmul.f32 %v13845_v8, %v5792_v23  ;;  %v6495_v21 = vsub.f32 1.0, %v6431_v22  ;;  %v7171_v3 = vadd.f32 %v8031_v56, %v13807_v0  ;;  %v8097_v18 = vpop.f32.mrf.mxu1  ;;  %v14278_v56 = vld [vmem:[#allocation54_spill] sm:$0xff] }
0x11d6   : > { %vm6555_vm1 = vcmp.lt.f32.partialorder %v13514_v37, 0.0  ;;  %v6618_v51 = vsub.f32 0.0, %v6490_v48  ;;  %v6492_v38 = vsub.f32 1.0, %v6428_v31  ;;  %v6617_v63 = vsub.f32 0.0, %v6489_v33  ;;  %v14277_v31 = vld [vmem:[#allocation34_spill] sm:$0xff] }
0x11d7   : > { %v6046_v4 = vadd.f32 0.2548296, %v5982_v34  ;;  %v5920_v6 = vadd.f32 -0.28449672, %v5856_v32  ;;  %v6491_v49 = vsub.f32 1.0, %v6427_v28  ;;  %v7268_v1 = vadd.f32 %v8095_v19, %v7171_v3 }
0x11d8   : > { %v9338_v41 = vpop.eup %9337  ;;  %v8034_v9 = vadd.f32 %v8033_v29, %v8032_v26  ;;  %v5149_v15 = vmul.f32 0.5, %v13606_v46  ;;  %v6685_v44 = vsel %vm6557_vm0, %v6621_v54, %v6493_v30  ;;  %v6623_v20 = vsub.f32 0.0, %v6495_v21 }
0x11d9   : > { %v6110_v43 = vmul.f32 %v13826_v53, %v6046_v4  ;;  %v5984_v10 = vmul.f32 %v13845_v8, %v5920_v6  ;;  %v7312_v16 = vadd.f32 %v7268_v1, %v14276_v39  ;;  %v8098_v27 = vadd.f32 %v8097_v18, %v8096_v11 }
0x11da   : > { %v7174_v53 = vadd.f32 %v8034_v9, %v13807_v0  ;;  %v6682_v24 = vsel %vm6554_vm15, %v6618_v51, %v6490_v48  ;;  %v6620_v57 = vsub.f32 0.0, %v6492_v38  ;;  %v6681_v17 = vsel %vm6553_vm14, %v6617_v63, %v6489_v33 }
0x11db   : > { %v6430_v35 = vmul.f32 %v9338_v41, %v6110_v43  ;;  %v6048_v52 = vadd.f32 0.2548296, %v5984_v10  ;;  %v6619_v30 = vsub.f32 0.0, %v6491_v49  ;;  %vm6556_vm2 = vcmp.lt.f32.partialorder %v13578_v12, 0.0  ;;  %7328 = vst [vmem:[%s13838_s25 + $0x30] sm:$0xff] %v7312_v16  ;;  %v14281_v10 = vld [vmem:[#allocation55_spill] sm:$0xff] }
0x11dc   : > { %v9340_v47 = vpop.eup %9339  ;;  %v7271_v23 = vadd.f32 %v8098_v27, %v7174_v53  ;;  %v6749_v25 = vadd.f32 1.0, %v6685_v44  ;;  %vm6559_vm3 = vcmp.lt.f32.partialorder %v13659_v60, 0.0  ;;  %v6746_v5 = vadd.f32 1.0, %v6682_v24  ;;  %v14282_v44 = vld [vmem:[#allocation51_spill] sm:$0xff] }
0x11dd   : > { %v6494_v14 = vsub.f32 1.0, %v6430_v35  ;;  %v6112_v46 = vmul.f32 %v13845_v8, %v6048_v52  ;;  %v6687_v48 = vsel %vm6559_vm3, %v6623_v20, %v6495_v21  ;;  %vm6558_vm4 = vcmp.lt.f32.partialorder %v13697_v2, 0.0  ;;  %v14283_v35 = vld [vmem:[#allocation50_spill] sm:$0xff] }
0x11de   : > { %v7313_v8 = vadd.f32 %v7271_v23, %v14277_v31  ;;  %v6745_v34 = vadd.f32 1.0, %v6681_v17  ;;  %v6684_v32 = vsel %vm6556_vm2, %v6620_v57, %v6492_v38  ;;  %v6683_v12 = vsel %vm6555_vm1, %v6619_v30, %v6491_v49  ;;  %v14285_v23 = vld [vmem:[#allocation35_spill] sm:$0xff] }
0x11df   : > { %v6622_v22 = vsub.f32 0.0, %v6494_v14  ;;  %v6432_v45 = vmul.f32 %v9340_v47, %v6112_v46  ;;  %v5146_v42 = vmul.f32 0.5, %v13529_v59  ;;  %v5150_v28 = vmul.f32 0.5, %v13676_v50  ;;  %v14279_v59 = vld [vmem:[#allocation47_spill] sm:$0xff]  ;;  %v14280_v50 = vld [vmem:[#allocation46_spill] sm:$0xff] }
0x11e0   : > { %7329 = vst [vmem:[%s13838_s25 + $0x38] sm:$0xff] %v7313_v8  ;;  %v5145_v26 = vmul.f32 0.5, %v14278_v56  ;;  %v6813_v54 = vmul.f32 %v6749_v25, %v5149_v15  ;;  %v6751_v4 = vadd.f32 1.0, %v6687_v48  ;;  %v6748_v11 = vadd.f32 1.0, %v6684_v32 }
0x11e1   : > { %v6686_v13 = vsel %vm6558_vm4, %v6622_v22, %v6494_v14  ;;  %v6496_v33 = vsub.f32 1.0, %v6432_v45  ;;  %v6810_v6 = vmul.f32 %v6746_v5, %v5146_v42  ;;  %vm6560_vm5 = vcmp.lt.f32.partialorder %v13735_v58, 0.0 }
0x11e2   : > { %v6750_v60 = vadd.f32 1.0, %v6686_v13  ;;  %v6809_v21 = vmul.f32 %v6745_v34, %v5145_v26  ;;  %v6747_v3 = vadd.f32 1.0, %v6683_v12  ;;  %v5151_v37 = vmul.f32 0.5, %v13631_v36  ;;  %v14286_v13 = vld [vmem:[#allocation37_spill] sm:$0xff] }
0x11e3   : > { %v6624_v2 = vsub.f32 0.0, %v6496_v33  ;;  %v5148_v29 = vmul.f32 0.5, %v14279_v59  ;;  %v5152_v51 = vmul.f32 0.5, %v14280_v50  ;;  %v5147_v18 = vmul.f32 0.5, %v14281_v10  ;;  %v14288_v50 = vld [vmem:[#allocation38_spill] sm:$0xff] }
0x11e4   : > { %v6814_v41 = vmul.f32 %v6750_v60, %v5150_v28  ;;  %v6845_v63 = vpack.c.bf16 %v6813_v54, %v6809_v21  ;;  %v6815_v49 = vmul.f32 %v6751_v4, %v5151_v37  ;;  %v14284_v52 = vpack.c.bf16 %v14282_v44, %v14283_v35  ;;  %v14290_v44 = vld [vmem:[#allocation41_spill] sm:$0xff] }
0x11e5   : > { %v6688_v19 = vsel %vm6560_vm5, %v6624_v2, %v6496_v33  ;;  %v6812_v1 = vmul.f32 %v6748_v11, %v5148_v29  ;;  %v6811_v15 = vmul.f32 %v6747_v3, %v5147_v18  ;;  %v14287_v2 = vld [vmem:[#allocation36_spill] sm:$0xff] }
0x11e6   : > { %v6752_v38 = vadd.f32 1.0, %v6688_v19  ;;  %v6846_v43 = vpack.c.bf16 %v6814_v41, %v6810_v6 }
0x11e7   : > { %v6847_v36 = vpack.c.bf16 %v6815_v49, %v6811_v15 }
0x11e8   : > { %v6816_v9 = vmul.f32 %v6752_v38, %v5152_v51  ;;  %7200 = vmatprep.mubr.bf16.mxu0 %v6846_v43 }
0x11e9   : > { %7201 = vmatmul.mubr.bf16.gmra.mxu0 %v6845_v63 }
0x11ea   : > { %v6848_v58 = vpack.c.bf16 %v6816_v9, %v6812_v1  ;;  %7241 = vmatprep.mubr.bf16.mxu0 %v6820_v7  ;;  %v14289_v9 = vld [vmem:[#allocation39_spill] sm:$0xff] }
0x11ec   : > { %7297 = vmatprep.mubr.bf16.mxu1 %v6848_v58 }
0x11ed   : > { %7298 = vmatmul.mubr.bf16.gmra.mxu1 %v6847_v36 }
0x11f1   : > { %7242 = vmatmul.mubr.bf16.vlgmr.msra.gmra.mxu0 %v14284_v52 }
0x1277   : > { %v8035_v20 = vpop.f32.mrf.mxu0 }
0x1279   : > { %v8036_v39 = vpop.f32.mrf.mxu0 }
0x127a   : > { %v8037_v53 = vadd.f32 %v8036_v39, %v8035_v20 }
0x127b   : > { %v8099_v16 = vpop.f32.mrf.mxu1  ;;  %v8038_v27 = vpop.f32.mrf.mxu0 }
0x127c   : > { %v7179_v47 = vadd.f32 %v8037_v53, %v13807_v0 }
0x127d   : > { %v8100_v24 = vpop.f32.mrf.mxu1  ;;  %v8039_v14 = vpop.f32.mrf.mxu0 }
0x127e   : > { %v8101_v57 = vadd.f32 %v8100_v24, %v8099_v16  ;;  %v8040_v7 = vadd.f32 %v8039_v14, %v8038_v27 }
0x127f   : > { %v8102_v61 = vpop.f32.mrf.mxu1  ;;  %v8041_v46 = vpop.f32.mrf.mxu0 }
0x1280   : > { %v7276_v55 = vadd.f32 %v8101_v57, %v7179_v47  ;;  %v7182_v17 = vadd.f32 %v8040_v7, %v13807_v0 }
0x1281   : > { %v8103_v30 = vpop.f32.mrf.mxu1  ;;  %v8042_v45 = vpop.f32.mrf.mxu0 }
0x1282   : > { %v7314_v25 = vadd.f32 %v7276_v55, %v14285_v23  ;;  %v8104_v22 = vadd.f32 %v8103_v30, %v8102_v61  ;;  %v8043_v48 = vadd.f32 %v8042_v45, %v8041_v46  ;;  %v7147_v23 = vadd.f32 %v13783_v40, %v13807_v0 }
0x1283   : > { %v8105_v5 = vpop.f32.mrf.mxu1  ;;  %v8044_v8 = vpop.f32.mrf.mxu0 }
0x1284   : > { %7330 = vst [vmem:[%s13838_s25 + $0x40] sm:$0xff] %v7314_v25  ;;  %v7279_v31 = vadd.f32 %v8104_v22, %v7182_v17  ;;  %v7187_v34 = vadd.f32 %v8043_v48, %v13807_v0  ;;  %v14291_v25 = vld [vmem:[#allocation40_spill] sm:$0xff] }
0x1285   : > { %v8106_v32 = vpop.f32.mrf.mxu1  ;;  %v8045_v42 = vpop.f32.mrf.mxu0 }
0x1286   : > { %v7315_v33 = vadd.f32 %v7279_v31, %v14286_v13  ;;  %v8107_v12 = vadd.f32 %v8106_v32, %v8105_v5  ;;  %v8046_v60 = vadd.f32 %v8045_v42, %v8044_v8  ;;  %v7150_v32 = vadd.f32 %v13787_v62, %v13807_v0  ;;  %v14292_v13 = vld [vmem:[#allocation42_spill] sm:$0xff] }
0x1287   : > { %v8108_v28 = vpop.f32.mrf.mxu1 }
0x1288   : > { %7331 = vst [vmem:[%s13838_s25 + $0x48] sm:$0xff] %v7315_v33  ;;  %v7284_v56 = vadd.f32 %v8107_v12, %v7187_v34  ;;  %v8047_v26 = vpop.f32.mrf.mxu0  ;;  %v7190_v54 = vadd.f32 %v8046_v60, %v13807_v0  ;;  %v14293_v12 = vld [vmem:[#allocation27_spill] sm:$0xff]  ;;  %v14295_v60 = vld [vmem:[#allocation28_spill] sm:$0xff] }
0x1289   : > { %v8109_v4 = vpop.f32.mrf.mxu1 }
0x128a   : > { %v7316_v6 = vadd.f32 %v7284_v56, %v14287_v2  ;;  %v8110_v11 = vadd.f32 %v8109_v4, %v8108_v28  ;;  %v8048_v41 = vpop.f32.mrf.mxu0 }
0x128b   : > { %v8111_v21 = vpop.f32.mrf.mxu1  ;;  %v8049_v3 = vadd.f32 %v8048_v41, %v8047_v26 }
0x128c   : > { %7332 = vst [vmem:[%s13838_s25 + $0x50] sm:$0xff] %v7316_v6  ;;  %v7287_v37 = vadd.f32 %v8110_v11, %v7190_v54  ;;  %v8050_v19 = vpop.f32.mrf.mxu0 }
0x128d   : > { %v7195_v59 = vadd.f32 %v8049_v3, %v13807_v0  ;;  %v8112_v29 = vpop.f32.mrf.mxu1 }
0x128e   : > { %v7317_v51 = vadd.f32 %v7287_v37, %v14288_v50  ;;  %v8113_v38 = vadd.f32 %v8112_v29, %v8111_v21  ;;  %v8051_v43 = vpop.f32.mrf.mxu0 }
0x128f   : > { %v8114_v10 = vpop.f32.mrf.mxu1  ;;  %v8052_v18 = vadd.f32 %v8051_v43, %v8050_v19 }
0x1290   : > { %7333 = vst [vmem:[%s13838_s25 + $0x58] sm:$0xff] %v7317_v51  ;;  %v7292_v63 = vadd.f32 %v8113_v38, %v7195_v59 }
0x1291   : > { %v7198_v49 = vadd.f32 %v8052_v18, %v13807_v0  ;;  %v8115_v1 = vpop.f32.mrf.mxu1 }
0x1292   : > { %v7318_v15 = vadd.f32 %v7292_v63, %v14289_v9  ;;  %v8116_v58 = vadd.f32 %v8115_v1, %v8114_v10 }
0x1294   : > { %7334 = vst [vmem:[%s13838_s25 + $0x60] sm:$0xff] %v7318_v15  ;;  %v7295_v36 = vadd.f32 %v8116_v58, %v7198_v49 }
0x1296   : > { %v7319_v35 = vadd.f32 %v7295_v36, %v14290_v44 }
0x1298   : > { %7335 = vst [vmem:[%s13838_s25 + $0x68] sm:$0xff] %v7319_v35 }
0x12a9   : > { %v8053_v52 = vpop.f32.mrf.mxu0 }
0x12ab   : > { %v8054_v20 = vpop.f32.mrf.mxu0 }
0x12ac   : > { %v8055_v39 = vadd.f32 %v8054_v20, %v8053_v52 }
0x12ad   : > { %v8117_v16 = vpop.f32.mrf.mxu1  ;;  %v8056_v53 = vpop.f32.mrf.mxu0 }
0x12ae   : > { %v7203_v27 = vadd.f32 %v8055_v39, %v13807_v0 }
0x12af   : > { %v8118_v47 = vpop.f32.mrf.mxu1  ;;  %v8057_v24 = vpop.f32.mrf.mxu0 }
0x12b0   : > { %v8119_v57 = vadd.f32 %v8118_v47, %v8117_v16  ;;  %v8058_v14 = vadd.f32 %v8057_v24, %v8056_v53 }
0x12b1   : > { %v8120_v61 = vpop.f32.mrf.mxu1  ;;  %v8075_v7 = vpop.f32.mrf.mxu0 }
0x12b2   : > { %v7300_v55 = vadd.f32 %v8119_v57, %v7203_v27  ;;  %v7206_v46 = vadd.f32 %v8058_v14, %v13807_v0 }
0x12b3   : > { %v8121_v17 = vpop.f32.mrf.mxu1  ;;  %v8076_v30 = vpop.f32.mrf.mxu0 }
0x12b4   : > { %v7320_v22 = vadd.f32 %v7300_v55, %v14291_v25  ;;  %v8122_v45 = vadd.f32 %v8121_v17, %v8120_v61  ;;  %v8077_v5 = vadd.f32 %v8076_v30, %v8075_v7 }
0x12b5   : > { %v8078_v48 = vpop.f32.mrf.mxu0 }
0x12b6   : > { %7336 = vst [vmem:[%s13838_s25 + $0x70] sm:$0xff] %v7320_v22  ;;  %v7303_v31 = vadd.f32 %v8122_v45, %v7206_v46  ;;  %v7244_v8 = vadd.f32 %v8077_v5, %v7147_v23 }
0x12b7   : > { %v8079_v34 = vpop.f32.mrf.mxu0 }
0x12b8   : > { %v7321_v33 = vadd.f32 %v7303_v31, %v14292_v13  ;;  %v7306_v40 = vadd.f32 %v7244_v8, %v14293_v12  ;;  %v8080_v42 = vadd.f32 %v8079_v34, %v8078_v48 }
0x12ba   : > { %7337 = vst [vmem:[%s13838_s25 + $0x78] sm:$0xff] %v7321_v33  ;;  %7322 = vst [vmem:[%s13838_s25] sm:$0xff] %v7306_v40  ;;  %v7247_v28 = vadd.f32 %v8080_v42, %v7150_v32 }
0x12bc   : > { %v7307_v62 = vadd.f32 %v7247_v28, %v14295_v60 }
0x12be   : > { %7323 = vst [vmem:[%s13838_s25 + $0x8] sm:$0xff] %v7307_v62 }
0x12bf   : > { %9571 = shalt.err (!%p9568_p8)
}
0x12c0   : > { %s9572_s22 = scalar_lea.hbm %s13940_s6, 2048  ;;  %s9576_s4 = scalar_lea.hbm %s14294_s18, 4096 }
0x12c1   : > { %p9573_p3 = scmp.ne.s32.totalorder %s13940_s6, %s9572_s22  ;;  %p9577_p2 = scmp.lt.s32.totalorder %s13940_s6, %s14294_s18 }
0x12c2   : > { %p9578_p10 = scmp.lt.s32.totalorder %s9576_s4, %s9572_s22 }
0x12c3   : > { %p9574_p7 = pnand %p9573_p3, %p14296_p5 }
0x12c4   : > { %p9579_p0 = por %p9578_p10, %p9577_p2 }
0x12c5   : > { %p9575_p12 = pneg %p9574_p7 }
0x12c7   : > { %p9580_p13 = pnand %p9579_p0, %p9575_p12 }
0x12c9   : > { %9583 = shalt.err (!%p9580_p13)
}
0x12ca   : > { %s9658_s20 = smov 128   ;;  %s9659_s15 = smov 8  }
0x12cb   : > { %8515 = dma.vmem_to_hbm [thread:$0]  (%p14296_p5), %s13942_s26, 2048, %s13940_s6, %s7339_s10, %s9658_s20, %s9658_s20, %s9659_s15  }
0x12cc PF: > { %s14297_s25 = sld [smem:[#allocation22_spill]]  ;;  %p14300_p11 = scmp.ge.s32.totalorder %s9638_s16, 2 }
0x12cd   : > { %s14298_s29 = sld [smem:[#allocation26_spill]] }
0x12d2   : > { %s7368_s17 = sand.u32 1, %s14297_s25  }
0x12d3   : > { %p14299_p9 = scmp.ne.s32.totalorder %s14298_s29, 0  ;;  %s7369_s14 = scalar_lea.sflag [#allocation5], %s7368_s17 }
0x12d5   : > { %p8541_p1 = pnand %p14300_p11, %p14299_p9 }
0x12d7   : > { %p8542_p4 = pneg %p8541_p1 }
0x12d9   : > { %9621 = dma.done.wait (%p8542_p4), %s7369_s14, 2048  }
0x12da   : > { %9623 = vsyncadd (%p8542_p4), %s7369_s14, 4294965248  ;;  %s14301_s16 = sld [smem:[#allocation24_spill]]  ;;  %s14304_s29 = smov %s9630_s30 }
0x12db   : > { %s14302_s21 = sld [smem:[#allocation23_spill]] }
0x12dc   : > { %s14303_s15 = sld [smem:[#allocation25_spill]] }
0x12e0   : > { %p32_p6 = scmp.ge.s32.totalorder %s14301_s16, 4  }
0x12e1   : > { %s14305_s30 = smov %s14302_s21 }
0x12e2   :  { %34 = sbr.rel (!%p32_p6) target bundleno = 18 (0x12), region = 154 }
0x12e7   :  { %7374 = vsyncpa [#allocation4], 1 }
0x12e8   :  { %7376 = vsyncpa [#allocation4 + $0x1], 1 }
0x12e9   :  { %7377 = vsyncpa [#allocation7], 1 }
0x12ea   :  { %7379 = vsyncpa [#allocation7 + $0x1], 1 }
0x12eb   :  { %7380 = vsyncpa [#allocation10], 1 }
0x12ec   :  { %7381 = vsyncpa [#allocation13], 1 }
0x12ed   :  { %7382 = vsyncpa [#allocation5], 1 }
0x12ee   :  { %7384 = vsyncpa [#allocation5 + $0x1], 1 }

</bundles_post_ra>
